<compile_context>
chip_gen: v7x
topology: tpu7x:2x2x1
jax: 0.10.0
libtpu: 0.0.40
codegen_flags: <defaults>
</compile_context>

<pallas_src>
import functools

import jax
import jax.numpy as jnp
from jax.experimental import pallas as pl
from jax.experimental.pallas import tpu as pltpu

F32 = jnp.float32
BF16 = jnp.bfloat16

# packed per-block row-vector layout (rows of the (16, out_dim) "vec" array)
_R_FC_BIAS, _R_POST_G, _R_POST_B = 0, 1, 2
_R_INTRA_B, _R_INTER_B, _R_RED_B = 3, 4, 5
_R_NET_G, _R_NET_B = 6, 7
_R_SAG_ROOT, _R_SAG_REL = 8, 9
_R_IA_SRC, _R_IA_DST, _R_EA_SRC, _R_EA_DST = 10, 11, 12, 13
_R_SAG_B = 14


# ------------------------------ in-kernel helpers -----------------------------


def _ln_val(x, g, b, eps=1e-5):
    mu = jnp.mean(x, axis=-1, keepdims=True)
    var = jnp.mean((x - mu) ** 2, axis=-1, keepdims=True)
    return (x - mu) * jax.lax.rsqrt(var + eps) * g + b


def _elu(x):
    return jnp.where(x > 0, x, jnp.exp(x) - 1.0)


def _gat_attend(v_src, v_dst, a_src, a_dst, mask, bias, neg_slope=0.2):
    # single-head dense masked GAT; mask[i, j] = 1 iff edge src_j -> dst_i
    s_src = jax.lax.dot_general(a_src, v_src, (((1,), (1,)), ((), ())),
                                preferred_element_type=jnp.float32)      # (1, M)
    s_dst = jnp.sum(v_dst * a_dst, axis=-1, keepdims=True)               # (M, 1)
    e = s_dst + s_src
    e = jnp.where(e > 0, e, neg_slope * e)                               # LeakyReLU(0.2)
    e = jnp.where(mask > 0, e, -1e9)
    m = jnp.max(e, axis=-1, keepdims=True)
    p = jnp.where(mask > 0, jnp.exp(e - m), 0.0)
    denom = jnp.maximum(jnp.sum(p, axis=-1, keepdims=True), 1e-16)
    attn = p * pl.reciprocal(denom, approx=True)
    # isolated destination rows -> attn == 0 -> output == bias (matches GATConv)
    return jnp.dot(attn, v_src, preferred_element_type=jnp.float32) + bias


# -------------------------- fused per-block kernel -----------------------------


def _block_kernel(*refs, heads, d_head, pre_ln):
    # [optional initial LN] + multi-head GAT + post-LN + ELU         (A)
    # intra GAT + inter (bipartite) GAT + reduce_fc                  (B)
    # SAGPooling(min_score=-1) readout + net LayerNorm + ELU         (C)
    if pre_ln:
        (x_ref, adjs_ref, inter_ref, n2g_ref, pre_ref,
         fcw_ref, asrc_ref, adst_ref, attw_ref, redw_ref, vec_ref,
         pooled_ref, xnext_ref, ii_ref, xe_sc) = refs
    else:
        (x_ref, adjs_ref, inter_ref, n2g_ref,
         fcw_ref, asrc_ref, adst_ref, attw_ref, redw_ref, vec_ref,
         pooled_ref, xnext_ref, ii_ref, xe_sc) = refs
        pre_ref = None

    d_out = heads * d_head
    m_rows = x_ref.shape[0]

    x = x_ref[...]
    if pre_ln:
        x = _ln_val(x, pre_ref[0:1, :], pre_ref[1:2, :])

    # int8 structure masks -> f32 once (HBM traffic stays int8, reused many times)
    adj_self = adjs_ref[...].astype(jnp.float32)     # (M, M) intra adjacency + self loops
    inter_m = inter_ref[...].astype(jnp.float32)     # (M, M) bipartite src->dst mask
    n2g = n2g_ref[...].astype(jnp.float32)           # (M, G) node -> graph one-hot
    vec = vec_ref[...]                               # (16, D) packed row parameters

    # ---- A: GATConv feature conv; all heads' scores in two MXU passes ---------
    wx = jnp.dot(x.astype(BF16), fcw_ref[...],
                 preferred_element_type=jnp.float32)                        # (M, H*D)
    s_dst = jnp.dot(wx, adst_ref[...], preferred_element_type=jnp.float32)  # (M, H)
    s_src_t = jax.lax.dot_general(asrc_ref[...], wx, (((0,), (1,)), ((), ())),
                                  preferred_element_type=jnp.float32)       # (H, M)
    # NOTE: static unroll is fine at these sizes; at large M tile rows via a
    # grid / fori_loop so per-head (M, M) temporaries don't stay live together.
    for h in range(heads):
        e = s_dst[:, h:h + 1] + s_src_t[h:h + 1, :]
        e = jnp.where(e > 0, e, 0.2 * e)
        e = jnp.where(adj_self > 0, e, -1e9)
        mx = jnp.max(e, axis=-1, keepdims=True)
        p = jnp.where(adj_self > 0, jnp.exp(e - mx), 0.0)
        denom = jnp.maximum(jnp.sum(p, axis=-1, keepdims=True), 1e-16)
        attn = p * pl.reciprocal(denom, approx=True)
        xe_sc[:, h * d_head:(h + 1) * d_head] = jnp.dot(
            attn, wx[:, h * d_head:(h + 1) * d_head],
            preferred_element_type=jnp.float32)
    xe = xe_sc[...] + vec[_R_FC_BIAS:_R_FC_BIAS + 1, :]
    xe = _elu(_ln_val(xe, vec[_R_POST_G:_R_POST_G + 1, :],
                      vec[_R_POST_B:_R_POST_B + 1, :]))
    # dropout(p=0.3) = identity in eval; ELU is the intra/inter att input act.

    # ---- B: intra + inter GAT (projections fused in one matmul) + reduce_fc ---
    proj = jnp.dot(xe.astype(BF16), attw_ref[...],
                   preferred_element_type=jnp.float32)                      # (M, 3*D)
    v_i = proj[:, 0:d_out]
    v_s = proj[:, d_out:2 * d_out]
    v_d = proj[:, 2 * d_out:3 * d_out]
    intra = _gat_attend(v_i, v_i, vec[_R_IA_SRC:_R_IA_SRC + 1, :],
                        vec[_R_IA_DST:_R_IA_DST + 1, :], adj_self,
                        vec[_R_INTRA_B:_R_INTRA_B + 1, :])
    inter = _gat_attend(v_s, v_d, vec[_R_EA_SRC:_R_EA_SRC + 1, :],
                        vec[_R_EA_DST:_R_EA_DST + 1, :], inter_m,
                        vec[_R_INTER_B:_R_INTER_B + 1, :])
    # row-stacked [intra; inter] output (no XLA concatenate in the wrapper)
    ii_ref[0:m_rows, :] = intra
    ii_ref[m_rows:2 * m_rows, :] = inter

    redw = redw_ref[...]                                                    # (2D, D)
    fused = (jnp.dot(intra.astype(BF16), redw[0:d_out, :],
                     preferred_element_type=jnp.float32)
             + jnp.dot(inter.astype(BF16), redw[d_out:2 * d_out, :],
                       preferred_element_type=jnp.float32)
             + vec[_R_RED_B:_R_RED_B + 1, :])

    # ---- C: SAGPooling(min_score=-1) readout + net LayerNorm + ELU ------------
    # GraphConv score: w_root.x_i + w_rel.(sum_{j in N(i)} x_j) + b; self loops
    # removed from the intra adjacency in-kernel (saves a second (M,M) input).
    row_i = jax.lax.broadcasted_iota(jnp.int32, adj_self.shape, 0)
    col_i = jax.lax.broadcasted_iota(jnp.int32, adj_self.shape, 1)
    adj_ns = jnp.where(row_i == col_i, 0.0, adj_self)
    sr = jnp.sum(fused * vec[_R_SAG_ROOT:_R_SAG_ROOT + 1, :],
                 axis=-1, keepdims=True)                                    # (M, 1)
    slv = jax.lax.dot_general(vec[_R_SAG_REL:_R_SAG_REL + 1, :], fused,
                              (((1,), (1,)), ((), ())),
                              preferred_element_type=jnp.float32)           # (1, M)
    agg = jnp.sum(adj_ns * slv, axis=-1, keepdims=True)                     # (M, 1)
    score = sr + agg + vec[_R_SAG_B:_R_SAG_B + 1, 0:1]                      # (M, 1)
    # per-graph softmax over nodes (min_score=-1 keeps every node)
    sc = jnp.where(n2g > 0, score, -1e9)                                    # (M, G)
    mg = jnp.max(sc, axis=0, keepdims=True)                                 # (1, G)
    es = jnp.where(n2g > 0, jnp.exp(sc - mg), 0.0)
    soft = es * pl.reciprocal(jnp.sum(es, axis=0, keepdims=True), approx=True)
    pooled_ref[...] = jax.lax.dot_general(soft, fused, (((0,), (0,)), ((), ())),
                                          preferred_element_type=jnp.float32)
    # next block sees ELU(net_norm(fused)); the score-scaled x only feeds the
    # pooled readout (h_data.x stays h_fused in the reference), dropout=identity.
    xnext_ref[...] = _elu(_ln_val(fused, vec[_R_NET_G:_R_NET_G + 1, :],
                                  vec[_R_NET_B:_R_NET_B + 1, :]))


# ----------------- contrastive branch: projector + NT-Xent + pooling ----------


def _contrastive_kernel(ii_ref, n2g_ref, w1_ref, b1_ref, w2_ref, b2_ref,
                        cfw1_ref, cfw2_ref, cfvec_ref, loss_ref, con_ref,
                        *, n, temperature):
    # rows of ii: [h_intra(0:n); t_intra(n:2n); h_inter(2n:3n); t_inter(3n:4n)]
    z = ii_ref[...]
    # projector: Linear -> BN(eval, folded) -> ReLU -> Linear -> BN(eval, folded)
    y = jnp.dot(z.astype(BF16), w1_ref[...],
                preferred_element_type=jnp.float32) + b1_ref[...]
    y = jnp.maximum(y, 0.0)
    p = jnp.dot(y.astype(BF16), w2_ref[...],
                preferred_element_type=jnp.float32) + b2_ref[...]
    p = p * jax.lax.rsqrt(jnp.sum(p * p, axis=-1, keepdims=True) + 1e-24)

    def ntxent(zz):
        zz = zz * jax.lax.rsqrt(jnp.sum(zz * zz, axis=-1, keepdims=True) + 1e-24)
        sim = jax.lax.dot_general(zz, zz, (((1,), (1,)), ((), ())),
                                  preferred_element_type=jnp.float32) * (1.0 / temperature)
        n2 = zz.shape[0]
        row = jax.lax.broadcasted_iota(jnp.int32, (n2, n2), 0)
        col = jax.lax.broadcasted_iota(jnp.int32, (n2, n2), 1)
        sim = sim - jnp.where(row == col, 1e9, 0.0)
        half = n2 // 2
        tgt_col = jnp.where(row < half, row + half, row - half)
        tgt = jnp.sum(jnp.where(col == tgt_col, sim, 0.0), axis=-1, keepdims=True)
        m = jnp.max(sim, axis=-1, keepdims=True)
        lse = jnp.log(jnp.sum(jnp.exp(sim - m), axis=-1, keepdims=True)) + m
        return jnp.mean(lse - tgt)

    zh = jnp.concatenate([p[0:n], p[2 * n:3 * n]], axis=0)
    zt = jnp.concatenate([p[n:2 * n], p[3 * n:4 * n]], axis=0)
    loss_ref[...] = (0.5 * (ntxent(zh) + ntxent(zt))).reshape(1, 1)

    # global_add_pool of normalized projections + contrastive_fusion_mlp
    n2g = n2g_ref[...].astype(jnp.float32)                                  # (2n, G)
    g_intra = jax.lax.dot_general(n2g, p[0:2 * n], (((0,), (0,)), ((), ())),
                                  preferred_element_type=jnp.float32)       # (G, P)
    g_inter = jax.lax.dot_general(n2g, p[2 * n:4 * n], (((0,), (0,)), ((), ())),
                                  preferred_element_type=jnp.float32)
    cfv = cfvec_ref[...]
    ycf = (jnp.dot(g_intra.astype(BF16), cfw1_ref[...],
                   preferred_element_type=jnp.float32)
           + jnp.dot(g_inter.astype(BF16), cfw2_ref[...],
                     preferred_element_type=jnp.float32)
           + cfv[0:1, :])
    con_ref[...] = jnp.maximum(_ln_val(ycf, cfv[1:2, :], cfv[2:3, :]), 0.0)


# ------------- head: fusion MLP + final LN + co-attention + RESCAL ------------


def _head_kernel(pooled_ref, con_ref, w1a_ref, w1b_ref, vec1_ref, w2_ref,
                 vec2_ref, rel_ref, cak_ref, caq_ref, cab_ref, caa_ref, o_ref,
                 *, b):
    v1 = vec1_ref[...]
    v2 = vec2_ref[...]
    y = (jnp.dot(pooled_ref[...].astype(BF16), w1a_ref[...],
                 preferred_element_type=jnp.float32)
         + jnp.dot(con_ref[...].astype(BF16), w1b_ref[...],
                   preferred_element_type=jnp.float32)
         + v1[0:1, :])
    y = jnp.maximum(_ln_val(y, v1[1:2, :], v1[2:3, :]), 0.0)
    y = jnp.dot(y.astype(BF16), w2_ref[...],
                preferred_element_type=jnp.float32) + v2[0:1, :]
    y = jnp.maximum(_ln_val(y, v2[1:2, :], v2[2:3, :]), 0.0)
    mu = jnp.mean(y, axis=-1, keepdims=True)                  # final no-affine LN
    var = jnp.mean((y - mu) ** 2, axis=-1, keepdims=True)
    f = (y - mu) * jax.lax.rsqrt(var + 1e-5)                  # (2B, K)

    # TODO(synk): CoAttentionLayer / RESCAL sources are not in models.py;
    # SSI-DDI-style additive co-attention + per-sample RESCAL scoring assumed.
    fh = f[0:b]
    ft = f[b:2 * b]
    keys = jnp.dot(fh, cak_ref[...], preferred_element_type=jnp.float32)
    queries = jnp.dot(ft, caq_ref[...], preferred_element_type=jnp.float32)
    attn = jnp.dot(jnp.tanh(keys + queries + cab_ref[...]), caa_ref[...],
                   preferred_element_type=jnp.float32)                      # (B, 1)
    h_hat = fh * jax.lax.rsqrt(jnp.sum(fh * fh, axis=-1, keepdims=True) + 1e-24)
    t_hat = ft * jax.lax.rsqrt(jnp.sum(ft * ft, axis=-1, keepdims=True) + 1e-24)
    rel = rel_ref[...]                                                      # (B, K, K)
    ssq = jnp.sum(jnp.sum(rel * rel, axis=-1), axis=-1, keepdims=True)      # (B, 1)
    # TODO(synk): at large B route this contraction through a batched dot_general.
    rt = jnp.sum(rel * t_hat[:, None, :], axis=-1)                          # (B, K)
    raw = jnp.sum(rt * h_hat, axis=-1, keepdims=True)                       # (B, 1)
    o_ref[...] = raw * jax.lax.rsqrt(ssq + 1e-24) * attn


# -------------------------------- wrappers ------------------------------------


def block_forward(x, adj_self, inter, n2g, blk, heads, d_head, pre):
    m = x.shape[0]
    d_out = heads * d_head
    g = n2g.shape[1]
    args = [x, adj_self, inter, n2g]
    if pre is not None:
        args.append(pre)
    args += [blk["fc_w"], blk["a_src"], blk["a_dst"], blk["att_w"],
             blk["red_w"], blk["vec"]]
    return pl.pallas_call(
        functools.partial(_block_kernel, heads=heads, d_head=d_head,
                          pre_ln=pre is not None),
        out_shape=(jax.ShapeDtypeStruct((g, d_out), F32),        # pooled readout
                   jax.ShapeDtypeStruct((m, d_out), F32),        # next-block x
                   jax.ShapeDtypeStruct((2 * m, d_out), F32)),   # [intra; inter]
        scratch_shapes=[pltpu.VMEM((m, d_out), jnp.float32)],
    )(*args)


def contrastive_forward(ii, n2g, cm, cf, n, temperature):
    p_dim = cm["w2"].shape[1]
    g = n2g.shape[1]
    return pl.pallas_call(
        functools.partial(_contrastive_kernel, n=n, temperature=temperature),
        out_shape=(jax.ShapeDtypeStruct((1, 1), F32),
                   jax.ShapeDtypeStruct((g, p_dim), F32)),
    )(ii, n2g, cm["w1"], cm["b1"], cm["w2"], cm["b2"],
      cf["w1"], cf["w2"], cf["vec"])


def head_forward(pooled, con, rel, fm, ca, b):
    return pl.pallas_call(
        functools.partial(_head_kernel, b=b),
        out_shape=jax.ShapeDtypeStruct((b, 1), F32),
    )(pooled, con, fm["w1a"], fm["w1b"], fm["vec1"], fm["w2"], fm["vec2"],
      rel, ca["w_k"], ca["w_q"], ca["bias"], ca["a"])


# ------------------------------- forward pass ---------------------------------


def mvn_ddi_forward(kp, block_cfgs, temperature, kge_dim, h_x, t_x, graphs, rels):
    n_side = h_x.shape[0]
    x = jnp.concatenate([h_x, t_x], axis=0)          # stacked (2N, F) node features
    adj_self = graphs["adj_self_i8"]
    inter = graphs["inter_i8"]
    n2g = graphs["node2graph_i8"]

    pooled_sum = None
    ii = None
    for bi, (blk, (n_heads, d_head)) in enumerate(zip(kp["blocks"], block_cfgs)):
        pre = kp["initial_norm"] if bi == 0 else None
        pooled, x, ii = block_forward(x, adj_self, inter, n2g, blk,
                                      n_heads, d_head, pre)
        pooled_sum = pooled if pooled_sum is None else pooled_sum + pooled
    pooled = pooled_sum / float(len(kp["blocks"]))   # torch.mean over blocks

    closs, con = contrastive_forward(ii, n2g, kp["contrastive"],
                                     kp["contrastive_fusion"], n_side, temperature)

    b = rels.shape[0]
    rel = kp["rel_emb"][rels].reshape(b, kge_dim, kge_dim)
    scores = head_forward(pooled, con, rel, kp["fusion"], kp["co_attention"], b)
    return scores[:, 0], closs[0, 0]


# ----------------------- module-like params + kernel packing ------------------


def make_params(key, in_features, hidd_dim, kge_dim, rel_total,
                heads_out_feat_params, blocks_params, projection_dim):
    keys = iter(jax.random.split(key, 512))

    def nrm(shape, scale=0.1):
        return scale * jax.random.normal(next(keys), shape, F32)

    def ln(d):
        return (jnp.ones((1, d), F32), jnp.zeros((1, d), F32))

    params = {"initial_norm": ln(in_features), "blocks": []}
    cur = in_features
    for d_head, n_heads in zip(heads_out_feat_params, blocks_params):
        out_dim = d_head * n_heads
        blk = {
            "feature_conv": {"w": nrm((cur, out_dim)),
                             "a_src": nrm((n_heads, d_head)),
                             "a_dst": nrm((n_heads, d_head)),
                             "bias": nrm((1, out_dim))},
            "post_gat_norm": ln(out_dim),
            "intra": {"w": nrm((out_dim, out_dim)),
                      "a_src": nrm((1, out_dim)), "a_dst": nrm((1, out_dim)),
                      "bias": nrm((1, out_dim))},
            "inter": {"w_src": nrm((out_dim, out_dim)), "w_dst": nrm((out_dim, out_dim)),
                      "a_src": nrm((1, out_dim)), "a_dst": nrm((1, out_dim)),
                      "bias": nrm((1, out_dim))},
            "sag_w_root": nrm((1, out_dim)),
            "sag_w_rel": nrm((1, out_dim)),
            "sag_b": nrm((1, 1)),
            "reduce_w1": nrm((out_dim, out_dim)),   # reduce_fc split: intra half
            "reduce_w2": nrm((out_dim, out_dim)),   # reduce_fc split: inter half
            "reduce_b": nrm((1, out_dim)),
            "net_norm": ln(out_dim),
        }
        params["blocks"].append(blk)
        cur = out_dim

    params["fusion"] = {
        "w1a": nrm((cur, hidd_dim)), "w1b": nrm((projection_dim, hidd_dim)),
        "b1": nrm((1, hidd_dim)), "ln1": ln(hidd_dim),
        "w2": nrm((hidd_dim, hidd_dim)), "b2": nrm((1, hidd_dim)), "ln2": ln(hidd_dim),
    }
    params["contrastive"] = {
        "w1": nrm((cur, cur)), "b1": nrm((1, cur)),
        "bn1_w": jnp.ones((1, cur), F32), "bn1_b": jnp.zeros((1, cur), F32),
        "bn1_rm": jnp.zeros((1, cur), F32), "bn1_rv": jnp.ones((1, cur), F32),
        "w2": nrm((cur, projection_dim)), "b2": nrm((1, projection_dim)),
        "bn2_w": jnp.ones((1, projection_dim), F32),
        "bn2_b": jnp.zeros((1, projection_dim), F32),
        "bn2_rm": jnp.zeros((1, projection_dim), F32),
        "bn2_rv": jnp.ones((1, projection_dim), F32),
    }
    params["contrastive_fusion"] = {
        "w1": nrm((projection_dim, projection_dim)),
        "w2": nrm((projection_dim, projection_dim)),
        "b": nrm((1, projection_dim)),
        "ln": ln(projection_dim),
    }
    params["co_attention"] = {
        "w_k": nrm((kge_dim, kge_dim // 2)), "w_q": nrm((kge_dim, kge_dim // 2)),
        "bias": nrm((1, kge_dim // 2)), "a": nrm((kge_dim // 2, 1)),
    }
    params["rel_emb"] = nrm((rel_total, kge_dim * kge_dim))
    return params


def _blockdiag_heads(a, heads, d_head):
    # (H, D) per-head attention vector -> block-diagonal (H*D, H) for one MXU pass
    out = jnp.zeros((heads * d_head, heads), F32)
    for h in range(heads):
        out = out.at[h * d_head:(h + 1) * d_head, h].set(a[h])
    return out


def prepare_params(params, block_cfgs):
    # pack module-like params into the fused-kernel layout: bf16 weight matrices,
    # fused projection weights, one (16, D) row-vector slab per block, BN folded.
    kp = {"initial_norm": jnp.concatenate(params["initial_norm"], axis=0)}
    kp["blocks"] = []
    for blk, (heads, d_head) in zip(params["blocks"], block_cfgs):
        d_out = heads * d_head
        fc = blk["feature_conv"]
        sagb_row = jnp.zeros((1, d_out), F32).at[0, 0].set(blk["sag_b"][0, 0])
        vec = jnp.concatenate([
            fc["bias"], blk["post_gat_norm"][0], blk["post_gat_norm"][1],
            blk["intra"]["bias"], blk["inter"]["bias"], blk["reduce_b"],
            blk["net_norm"][0], blk["net_norm"][1],
            blk["sag_w_root"], blk["sag_w_rel"],
            blk["intra"]["a_src"], blk["intra"]["a_dst"],
            blk["inter"]["a_src"], blk["inter"]["a_dst"],
            sagb_row, jnp.zeros((1, d_out), F32)], axis=0)
        kp["blocks"].append({
            "fc_w": fc["w"].astype(BF16),
            "a_src": _blockdiag_heads(fc["a_src"], heads, d_head),
            "a_dst": _blockdiag_heads(fc["a_dst"], heads, d_head),
            "att_w": jnp.concatenate([blk["intra"]["w"], blk["inter"]["w_src"],
                                      blk["inter"]["w_dst"]], axis=1).astype(BF16),
            "red_w": jnp.concatenate([blk["reduce_w1"], blk["reduce_w2"]],
                                     axis=0).astype(BF16),
            "vec": vec})

    cm = params["contrastive"]
    s1 = cm["bn1_w"] / jnp.sqrt(cm["bn1_rv"] + 1e-5)
    s2 = cm["bn2_w"] / jnp.sqrt(cm["bn2_rv"] + 1e-5)
    kp["contrastive"] = {
        "w1": (cm["w1"] * s1).astype(BF16),
        "b1": (cm["b1"] - cm["bn1_rm"]) * s1 + cm["bn1_b"],
        "w2": (cm["w2"] * s2).astype(BF16),
        "b2": (cm["b2"] - cm["bn2_rm"]) * s2 + cm["bn2_b"]}
    cf = params["contrastive_fusion"]
    kp["contrastive_fusion"] = {
        "w1": cf["w1"].astype(BF16), "w2": cf["w2"].astype(BF16),
        "vec": jnp.concatenate([cf["b"], cf["ln"][0], cf["ln"][1]], axis=0)}
    fm = params["fusion"]
    kp["fusion"] = {
        "w1a": fm["w1a"].astype(BF16), "w1b": fm["w1b"].astype(BF16),
        "vec1": jnp.concatenate([fm["b1"], fm["ln1"][0], fm["ln1"][1]], axis=0),
        "w2": fm["w2"].astype(BF16),
        "vec2": jnp.concatenate([fm["b2"], fm["ln2"][0], fm["ln2"][1]], axis=0)}
    kp["co_attention"] = params["co_attention"]
    kp["rel_emb"] = params["rel_emb"]
    return kp


# ---------------------------------- main --------------------------------------

if __name__ == "__main__":
    IN_FEATURES = 32
    HIDD_DIM = 64
    KGE_DIM = 64
    REL_TOTAL = 10
    HEADS_OUT_FEAT = [16, 16]   # head_out_feats per block
    BLOCKS_PARAMS = [2, 2]      # n_heads per block -> block out_dim = 32
    PROJECTION_DIM = 128
    TEMPERATURE = 0.5

    B = 2                       # drug pairs (graphs per side)
    NODES_PER_GRAPH = 8
    N = B * NODES_PER_GRAPH     # 16 nodes per side; 2N = 32 stacked

    root = jax.random.PRNGKey(0)
    k_param, k_hx, k_tx, k_ha, k_ta, k_b, k_rel = jax.random.split(root, 7)

    params = make_params(k_param, IN_FEATURES, HIDD_DIM, KGE_DIM, REL_TOTAL,
                         HEADS_OUT_FEAT, BLOCKS_PARAMS, PROJECTION_DIM)
    block_cfgs = [(n_heads, d_head)
                  for d_head, n_heads in zip(HEADS_OUT_FEAT, BLOCKS_PARAMS)]
    kparams = prepare_params(params, block_cfgs)

    h_x = jax.random.normal(k_hx, (N, IN_FEATURES), F32)
    t_x = jax.random.normal(k_tx, (N, IN_FEATURES), F32)

    batch_ids = jnp.repeat(jnp.arange(B), NODES_PER_GRAPH)
    onehot_side = jax.nn.one_hot(batch_ids, B, dtype=F32).T      # (B, N)
    same_graph = onehot_side.T @ onehot_side                     # (N, N)
    eye = jnp.eye(N, dtype=F32)

    def rand_adj(key, density):
        a = (jax.random.uniform(key, (N, N)) < density).astype(F32)
        a = jnp.maximum(a, a.T) * same_graph * (1.0 - eye)       # symmetric, no self loops
        return a

    h_adj = rand_adj(k_ha, 0.35)
    t_adj = rand_adj(k_ta, 0.35)
    b_adj_th = (jax.random.uniform(k_b, (N, N)) < 0.4).astype(F32) * same_graph  # t <- h

    h_adj_self = jnp.clip(h_adj + eye, 0.0, 1.0)
    t_adj_self = jnp.clip(t_adj + eye, 0.0, 1.0)
    z_nn = jnp.zeros((N, N), F32)
    z_bn = jnp.zeros((B, N), F32)
    onehot_full = jnp.block([[onehot_side, z_bn], [z_bn, onehot_side]])       # (2B, 2N)

    graphs = {
        # intra structure (+ GAT self loops): block-diagonal over stacked [h; t]
        "adj_self_i8": jnp.block([[h_adj_self, z_nn],
                                  [z_nn, t_adj_self]]).astype(jnp.int8),
        # bipartite inter structure: anti-block-diagonal (h dst <- t src on top)
        "inter_i8": jnp.block([[z_nn, b_adj_th.T],
                               [b_adj_th, z_nn]]).astype(jnp.int8),
        # node -> graph one-hot for the stacked node set, (2N, 2B)
        "node2graph_i8": onehot_full.T.astype(jnp.int8),
    }
    rels = jax.random.randint(k_rel, (B,), 0, REL_TOTAL)

    @jax.jit
    def fwd(kp, h_x, t_x, graphs, rels):
        return mvn_ddi_forward(kp, block_cfgs, TEMPERATURE, KGE_DIM,
                               h_x, t_x, graphs, rels)

    scores, contrastive_loss = fwd(kparams, h_x, t_x, graphs, rels)
    jax.block_until_ready((scores, contrastive_loss))
    assert scores.shape == (B,)
    assert bool(jnp.all(jnp.isfinite(scores))) and bool(jnp.isfinite(contrastive_loss))
    print("KERNEL_OK")
</pallas_src>

<mosaic_0001>
module attributes {stable_mosaic.version = 11 : i64} {
  func.func @_block_kernel(%arg0: memref<32x32xf32, #tpu.memory_space<vmem>>, %arg1: memref<32x32xi8, #tpu.memory_space<vmem>>, %arg2: memref<32x32xi8, #tpu.memory_space<vmem>>, %arg3: memref<32x4xi8, #tpu.memory_space<vmem>>, %arg4: memref<32x32xbf16, #tpu.memory_space<vmem>>, %arg5: memref<32x2xf32, #tpu.memory_space<vmem>>, %arg6: memref<32x2xf32, #tpu.memory_space<vmem>>, %arg7: memref<32x96xbf16, #tpu.memory_space<vmem>>, %arg8: memref<64x32xbf16, #tpu.memory_space<vmem>>, %arg9: memref<16x32xf32, #tpu.memory_space<vmem>>, %arg10: memref<4x32xf32, #tpu.memory_space<vmem>>, %arg11: memref<32x32xf32, #tpu.memory_space<vmem>>, %arg12: memref<64x32xf32, #tpu.memory_space<vmem>>, %arg13: memref<32x32xf32, #tpu.memory_space<vmem>>) attributes {dimension_semantics = [], scalar_prefetch = 0 : i64, scratch_operands = 1 : i64, tpu.core_type = #tpu.core_type<tc>} {
    %c0 = arith.constant 0 : index
    %c0_0 = arith.constant 0 : index
    %0 = vector.load %arg0[%c0, %c0_0] : memref<32x32xf32, #tpu.memory_space<vmem>>, vector<32x32xf32>
    %c0_1 = arith.constant 0 : index
    %c0_2 = arith.constant 0 : index
    %1 = vector.load %arg1[%c0_1, %c0_2] : memref<32x32xi8, #tpu.memory_space<vmem>>, vector<32x32xi8>
    %2 = arith.sitofp %1 : vector<32x32xi8> to vector<32x32xf32>
    %c0_3 = arith.constant 0 : index
    %c0_4 = arith.constant 0 : index
    %3 = vector.load %arg2[%c0_3, %c0_4] : memref<32x32xi8, #tpu.memory_space<vmem>>, vector<32x32xi8>
    %4 = arith.sitofp %3 : vector<32x32xi8> to vector<32x32xf32>
    %c0_5 = arith.constant 0 : index
    %c0_6 = arith.constant 0 : index
    %5 = vector.load %arg3[%c0_5, %c0_6] : memref<32x4xi8, #tpu.memory_space<vmem>>, vector<32x4xi8>
    %6 = arith.sitofp %5 : vector<32x4xi8> to vector<32x4xf32>
    %c0_7 = arith.constant 0 : index
    %c0_8 = arith.constant 0 : index
    %7 = vector.load %arg9[%c0_7, %c0_8] : memref<16x32xf32, #tpu.memory_space<vmem>>, vector<16x32xf32>
    %8 = arith.truncf %0 : vector<32x32xf32> to vector<32x32xbf16>
    %c0_9 = arith.constant 0 : index
    %c0_10 = arith.constant 0 : index
    %9 = vector.load %arg4[%c0_9, %c0_10] : memref<32x32xbf16, #tpu.memory_space<vmem>>, vector<32x32xbf16>
    %cst = arith.constant dense<0.000000e+00> : vector<32x32xf32>
    %10 = tpu.matmul %8, %9, %cst {dimension_numbers = #tpu.dot_dimension_numbers<[1], [0], [0], [1], [0, 0, 1, 1], [], []>} : vector<32x32xbf16>, vector<32x32xbf16>, vector<32x32xf32> -> vector<32x32xf32>
    %c0_11 = arith.constant 0 : index
    %c0_12 = arith.constant 0 : index
    %11 = vector.load %arg6[%c0_11, %c0_12] : memref<32x2xf32, #tpu.memory_space<vmem>>, vector<32x2xf32>
    %cst_13 = arith.constant dense<0.000000e+00> : vector<32x2xf32>
    %12 = tpu.matmul %10, %11, %cst_13 {dimension_numbers = #tpu.dot_dimension_numbers<[1], [0], [0], [1], [0, 0, 1, 1], [], []>} : vector<32x32xf32>, vector<32x2xf32>, vector<32x2xf32> -> vector<32x2xf32>
    %c0_14 = arith.constant 0 : index
    %c0_15 = arith.constant 0 : index
    %13 = vector.load %arg5[%c0_14, %c0_15] : memref<32x2xf32, #tpu.memory_space<vmem>>, vector<32x2xf32>
    %cst_16 = arith.constant dense<0.000000e+00> : vector<2x32xf32>
    %14 = tpu.matmul %13, %10, %cst_16 {dimension_numbers = #tpu.dot_dimension_numbers<[0], [1], [1], [0], [0, 1, 1, 0], [], []>} : vector<32x2xf32>, vector<32x32xf32>, vector<2x32xf32> -> vector<2x32xf32>
    %15 = vector.extract_strided_slice %12 {offsets = [0, 0], sizes = [32, 1], strides = [1, 1]} : vector<32x2xf32> to vector<32x1xf32>
    %16 = vector.extract_strided_slice %14 {offsets = [0, 0], sizes = [1, 32], strides = [1, 1]} : vector<2x32xf32> to vector<1x32xf32>
    %17 = vector.broadcast %15 : vector<32x1xf32> to vector<32x32xf32>
    %18 = vector.broadcast %16 : vector<1x32xf32> to vector<32x32xf32>
    %19 = arith.addf %17, %18 : vector<32x32xf32>
    %cst_17 = arith.constant 0.000000e+00 : f32
    %20 = vector.broadcast %cst_17 : f32 to vector<32x32xf32>
    %21 = arith.cmpf ogt, %19, %20 : vector<32x32xf32>
    %cst_18 = arith.constant 2.000000e-01 : f32
    %22 = vector.broadcast %cst_18 : f32 to vector<32x32xf32>
    %23 = arith.mulf %22, %19 : vector<32x32xf32>
    %24 = arith.select %21, %19, %23 : vector<32x32xi1>, vector<32x32xf32>
    %cst_19 = arith.constant 0.000000e+00 : f32
    %25 = vector.broadcast %cst_19 : f32 to vector<32x32xf32>
    %26 = arith.cmpf ogt, %2, %25 : vector<32x32xf32>
    %cst_20 = arith.constant -1.000000e+09 : f32
    %27 = vector.broadcast %cst_20 : f32 to vector<32x32xf32>
    %28 = arith.select %26, %24, %27 : vector<32x32xi1>, vector<32x32xf32>
    %cst_21 = arith.constant dense<0xFF800000> : vector<32xf32>
    %29 = vector.multi_reduction <maximumf>, %28, %cst_21 [1] : vector<32x32xf32> to vector<32xf32>
    %30 = vector.shape_cast %29 : vector<32xf32> to vector<32x1xf32>
    %cst_22 = arith.constant 0.000000e+00 : f32
    %31 = vector.broadcast %cst_22 : f32 to vector<32x32xf32>
    %32 = arith.cmpf ogt, %2, %31 : vector<32x32xf32>
    %33 = vector.broadcast %30 : vector<32x1xf32> to vector<32x32xf32>
    %34 = arith.subf %28, %33 : vector<32x32xf32>
    %35 = math.exp %34 : vector<32x32xf32>
    %cst_23 = arith.constant 0.000000e+00 : f32
    %36 = vector.broadcast %cst_23 : f32 to vector<32x32xf32>
    %37 = arith.select %32, %35, %36 : vector<32x32xi1>, vector<32x32xf32>
    %cst_24 = arith.constant dense<0.000000e+00> : vector<32xf32>
    %38 = vector.multi_reduction <add>, %37, %cst_24 [1] : vector<32x32xf32> to vector<32xf32>
    %39 = vector.shape_cast %38 : vector<32xf32> to vector<32x1xf32>
    %cst_25 = arith.constant 1.000000e-16 : f32
    %40 = vector.broadcast %cst_25 : f32 to vector<32x1xf32>
    %41 = arith.maximumf %39, %40 : vector<32x1xf32>
    %42 = tpu.reciprocal %41 {approx = true} : vector<32x1xf32> -> vector<32x1xf32>
    %43 = vector.broadcast %42 : vector<32x1xf32> to vector<32x32xf32>
    %44 = arith.mulf %37, %43 : vector<32x32xf32>
    %45 = vector.extract_strided_slice %10 {offsets = [0, 0], sizes = [32, 16], strides = [1, 1]} : vector<32x32xf32> to vector<32x16xf32>
    %cst_26 = arith.constant dense<0.000000e+00> : vector<32x16xf32>
    %46 = tpu.matmul %44, %45, %cst_26 {dimension_numbers = #tpu.dot_dimension_numbers<[1], [0], [0], [1], [0, 0, 1, 1], [], []>} : vector<32x32xf32>, vector<32x16xf32>, vector<32x16xf32> -> vector<32x16xf32>
    %c0_27 = arith.constant 0 : index
    %c0_28 = arith.constant 0 : index
    %47 = vector.load %arg13[%c0_27, %c0_28] : memref<32x32xf32, #tpu.memory_space<vmem>>, vector<32x16xf32>
    tpu.vector_store %arg13[%c0_27, %c0_28], %46 {strides = array<i32>} : memref<32x32xf32, #tpu.memory_space<vmem>>, vector<32x16xf32>,
    %48 = vector.extract_strided_slice %12 {offsets = [0, 1], sizes = [32, 1], strides = [1, 1]} : vector<32x2xf32> to vector<32x1xf32>
    %49 = vector.extract_strided_slice %14 {offsets = [1, 0], sizes = [1, 32], strides = [1, 1]} : vector<2x32xf32> to vector<1x32xf32>
    %50 = vector.broadcast %48 : vector<32x1xf32> to vector<32x32xf32>
    %51 = vector.broadcast %49 : vector<1x32xf32> to vector<32x32xf32>
    %52 = arith.addf %50, %51 : vector<32x32xf32>
    %cst_29 = arith.constant 0.000000e+00 : f32
    %53 = vector.broadcast %cst_29 : f32 to vector<32x32xf32>
    %54 = arith.cmpf ogt, %52, %53 : vector<32x32xf32>
    %cst_30 = arith.constant 2.000000e-01 : f32
    %55 = vector.broadcast %cst_30 : f32 to vector<32x32xf32>
    %56 = arith.mulf %55, %52 : vector<32x32xf32>
    %57 = arith.select %54, %52, %56 : vector<32x32xi1>, vector<32x32xf32>
    %cst_31 = arith.constant 0.000000e+00 : f32
    %58 = vector.broadcast %cst_31 : f32 to vector<32x32xf32>
    %59 = arith.cmpf ogt, %2, %58 : vector<32x32xf32>
    %cst_32 = arith.constant -1.000000e+09 : f32
    %60 = vector.broadcast %cst_32 : f32 to vector<32x32xf32>
    %61 = arith.select %59, %57, %60 : vector<32x32xi1>, vector<32x32xf32>
    %cst_33 = arith.constant dense<0xFF800000> : vector<32xf32>
    %62 = vector.multi_reduction <maximumf>, %61, %cst_33 [1] : vector<32x32xf32> to vector<32xf32>
    %63 = vector.shape_cast %62 : vector<32xf32> to vector<32x1xf32>
    %cst_34 = arith.constant 0.000000e+00 : f32
    %64 = vector.broadcast %cst_34 : f32 to vector<32x32xf32>
    %65 = arith.cmpf ogt, %2, %64 : vector<32x32xf32>
    %66 = vector.broadcast %63 : vector<32x1xf32> to vector<32x32xf32>
    %67 = arith.subf %61, %66 : vector<32x32xf32>
    %68 = math.exp %67 : vector<32x32xf32>
    %cst_35 = arith.constant 0.000000e+00 : f32
    %69 = vector.broadcast %cst_35 : f32 to vector<32x32xf32>
    %70 = arith.select %65, %68, %69 : vector<32x32xi1>, vector<32x32xf32>
    %cst_36 = arith.constant dense<0.000000e+00> : vector<32xf32>
    %71 = vector.multi_reduction <add>, %70, %cst_36 [1] : vector<32x32xf32> to vector<32xf32>
    %72 = vector.shape_cast %71 : vector<32xf32> to vector<32x1xf32>
    %cst_37 = arith.constant 1.000000e-16 : f32
    %73 = vector.broadcast %cst_37 : f32 to vector<32x1xf32>
    %74 = arith.maximumf %72, %73 : vector<32x1xf32>
    %75 = tpu.reciprocal %74 {approx = true} : vector<32x1xf32> -> vector<32x1xf32>
    %76 = vector.broadcast %75 : vector<32x1xf32> to vector<32x32xf32>
    %77 = arith.mulf %70, %76 : vector<32x32xf32>
    %78 = vector.extract_strided_slice %10 {offsets = [0, 16], sizes = [32, 16], strides = [1, 1]} : vector<32x32xf32> to vector<32x16xf32>
    %cst_38 = arith.constant dense<0.000000e+00> : vector<32x16xf32>
    %79 = tpu.matmul %77, %78, %cst_38 {dimension_numbers = #tpu.dot_dimension_numbers<[1], [0], [0], [1], [0, 0, 1, 1], [], []>} : vector<32x32xf32>, vector<32x16xf32>, vector<32x16xf32> -> vector<32x16xf32>
    %c0_39 = arith.constant 0 : index
    %c16 = arith.constant 16 : index
    %80 = vector.load %arg13[%c0_39, %c16] : memref<32x32xf32, #tpu.memory_space<vmem>>, vector<32x16xf32>
    tpu.vector_store %arg13[%c0_39, %c16], %79 {strides = array<i32>} : memref<32x32xf32, #tpu.memory_space<vmem>>, vector<32x16xf32>,
    %c0_40 = arith.constant 0 : index
    %c0_41 = arith.constant 0 : index
    %81 = vector.load %arg13[%c0_40, %c0_41] : memref<32x32xf32, #tpu.memory_space<vmem>>, vector<32x32xf32>
    %82 = vector.extract_strided_slice %7 {offsets = [0, 0], sizes = [1, 32], strides = [1, 1]} : vector<16x32xf32> to vector<1x32xf32>
    %83 = vector.broadcast %82 : vector<1x32xf32> to vector<32x32xf32>
    %84 = arith.addf %81, %83 : vector<32x32xf32>
    %85 = vector.extract_strided_slice %7 {offsets = [1, 0], sizes = [1, 32], strides = [1, 1]} : vector<16x32xf32> to vector<1x32xf32>
    %86 = vector.extract_strided_slice %7 {offsets = [2, 0], sizes = [1, 32], strides = [1, 1]} : vector<16x32xf32> to vector<1x32xf32>
    %cst_42 = arith.constant dense<0.000000e+00> : vector<32xf32>
    %87 = vector.multi_reduction <add>, %84, %cst_42 [1] : vector<32x32xf32> to vector<32xf32>
    %88 = vector.shape_cast %87 : vector<32xf32> to vector<32x1xf32>
    %cst_43 = arith.constant 3.200000e+01 : f32
    %89 = vector.broadcast %cst_43 : f32 to vector<32x1xf32>
    %90 = arith.divf %88, %89 : vector<32x1xf32>
    %91 = vector.broadcast %90 : vector<32x1xf32> to vector<32x32xf32>
    %92 = arith.subf %84, %91 : vector<32x32xf32>
    %93 = arith.mulf %92, %92 : vector<32x32xf32>
    %cst_44 = arith.constant dense<0.000000e+00> : vector<32xf32>
    %94 = vector.multi_reduction <add>, %93, %cst_44 [1] : vector<32x32xf32> to vector<32xf32>
    %95 = vector.shape_cast %94 : vector<32xf32> to vector<32x1xf32>
    %cst_45 = arith.constant 3.200000e+01 : f32
    %96 = vector.broadcast %cst_45 : f32 to vector<32x1xf32>
    %97 = arith.divf %95, %96 : vector<32x1xf32>
    %98 = vector.broadcast %90 : vector<32x1xf32> to vector<32x32xf32>
    %99 = arith.subf %84, %98 : vector<32x32xf32>
    %cst_46 = arith.constant 9.99999974E-6 : f32
    %100 = vector.broadcast %cst_46 : f32 to vector<32x1xf32>
    %101 = arith.addf %97, %100 : vector<32x1xf32>
    %102 = math.rsqrt %101 : vector<32x1xf32>
    %103 = vector.broadcast %102 : vector<32x1xf32> to vector<32x32xf32>
    %104 = arith.mulf %99, %103 : vector<32x32xf32>
    %105 = vector.broadcast %85 : vector<1x32xf32> to vector<32x32xf32>
    %106 = arith.mulf %104, %105 : vector<32x32xf32>
    %107 = vector.broadcast %86 : vector<1x32xf32> to vector<32x32xf32>
    %108 = arith.addf %106, %107 : vector<32x32xf32>
    %cst_47 = arith.constant 0.000000e+00 : f32
    %109 = vector.broadcast %cst_47 : f32 to vector<32x32xf32>
    %110 = arith.cmpf ogt, %108, %109 : vector<32x32xf32>
    %111 = math.exp %108 : vector<32x32xf32>
    %cst_48 = arith.constant 1.000000e+00 : f32
    %112 = vector.broadcast %cst_48 : f32 to vector<32x32xf32>
    %113 = arith.subf %111, %112 : vector<32x32xf32>
    %114 = arith.select %110, %108, %113 : vector<32x32xi1>, vector<32x32xf32>
    %115 = arith.truncf %114 : vector<32x32xf32> to vector<32x32xbf16>
    %c0_49 = arith.constant 0 : index
    %c0_50 = arith.constant 0 : index
    %116 = vector.load %arg7[%c0_49, %c0_50] : memref<32x96xbf16, #tpu.memory_space<vmem>>, vector<32x96xbf16>
    %cst_51 = arith.constant dense<0.000000e+00> : vector<32x96xf32>
    %117 = tpu.matmul %115, %116, %cst_51 {dimension_numbers = #tpu.dot_dimension_numbers<[1], [0], [0], [1], [0, 0, 1, 1], [], []>} : vector<32x32xbf16>, vector<32x96xbf16>, vector<32x96xf32> -> vector<32x96xf32>
    %118 = vector.extract_strided_slice %117 {offsets = [0, 0], sizes = [32, 32], strides = [1, 1]} : vector<32x96xf32> to vector<32x32xf32>
    %119 = vector.extract_strided_slice %117 {offsets = [0, 32], sizes = [32, 32], strides = [1, 1]} : vector<32x96xf32> to vector<32x32xf32>
    %120 = vector.extract_strided_slice %117 {offsets = [0, 64], sizes = [32, 32], strides = [1, 1]} : vector<32x96xf32> to vector<32x32xf32>
    %121 = vector.extract_strided_slice %7 {offsets = [10, 0], sizes = [1, 32], strides = [1, 1]} : vector<16x32xf32> to vector<1x32xf32>
    %122 = vector.extract_strided_slice %7 {offsets = [11, 0], sizes = [1, 32], strides = [1, 1]} : vector<16x32xf32> to vector<1x32xf32>
    %123 = vector.extract_strided_slice %7 {offsets = [3, 0], sizes = [1, 32], strides = [1, 1]} : vector<16x32xf32> to vector<1x32xf32>
    %cst_52 = arith.constant dense<0.000000e+00> : vector<1x32xf32>
    %124 = tpu.matmul %121, %118, %cst_52 {dimension_numbers = #tpu.dot_dimension_numbers<[1], [1], [0], [0], [0, 0, 1, 0], [], []>} : vector<1x32xf32>, vector<32x32xf32>, vector<1x32xf32> -> vector<1x32xf32>
    %125 = vector.broadcast %122 : vector<1x32xf32> to vector<32x32xf32>
    %126 = arith.mulf %118, %125 : vector<32x32xf32>
    %cst_53 = arith.constant dense<0.000000e+00> : vector<32xf32>
    %127 = vector.multi_reduction <add>, %126, %cst_53 [1] : vector<32x32xf32> to vector<32xf32>
    %128 = vector.shape_cast %127 : vector<32xf32> to vector<32x1xf32>
    %129 = vector.broadcast %128 : vector<32x1xf32> to vector<32x32xf32>
    %130 = vector.broadcast %124 : vector<1x32xf32> to vector<32x32xf32>
    %131 = arith.addf %129, %130 : vector<32x32xf32>
    %cst_54 = arith.constant 0.000000e+00 : f32
    %132 = vector.broadcast %cst_54 : f32 to vector<32x32xf32>
    %133 = arith.cmpf ogt, %131, %132 : vector<32x32xf32>
    %cst_55 = arith.constant 2.000000e-01 : f32
    %134 = vector.broadcast %cst_55 : f32 to vector<32x32xf32>
    %135 = arith.mulf %134, %131 : vector<32x32xf32>
    %136 = arith.select %133, %131, %135 : vector<32x32xi1>, vector<32x32xf32>
    %cst_56 = arith.constant 0.000000e+00 : f32
    %137 = vector.broadcast %cst_56 : f32 to vector<32x32xf32>
    %138 = arith.cmpf ogt, %2, %137 : vector<32x32xf32>
    %cst_57 = arith.constant -1.000000e+09 : f32
    %139 = vector.broadcast %cst_57 : f32 to vector<32x32xf32>
    %140 = arith.select %138, %136, %139 : vector<32x32xi1>, vector<32x32xf32>
    %cst_58 = arith.constant dense<0xFF800000> : vector<32xf32>
    %141 = vector.multi_reduction <maximumf>, %140, %cst_58 [1] : vector<32x32xf32> to vector<32xf32>
    %142 = vector.shape_cast %141 : vector<32xf32> to vector<32x1xf32>
    %cst_59 = arith.constant 0.000000e+00 : f32
    %143 = vector.broadcast %cst_59 : f32 to vector<32x32xf32>
    %144 = arith.cmpf ogt, %2, %143 : vector<32x32xf32>
    %145 = vector.broadcast %142 : vector<32x1xf32> to vector<32x32xf32>
    %146 = arith.subf %140, %145 : vector<32x32xf32>
    %147 = math.exp %146 : vector<32x32xf32>
    %cst_60 = arith.constant 0.000000e+00 : f32
    %148 = vector.broadcast %cst_60 : f32 to vector<32x32xf32>
    %149 = arith.select %144, %147, %148 : vector<32x32xi1>, vector<32x32xf32>
    %cst_61 = arith.constant dense<0.000000e+00> : vector<32xf32>
    %150 = vector.multi_reduction <add>, %149, %cst_61 [1] : vector<32x32xf32> to vector<32xf32>
    %151 = vector.shape_cast %150 : vector<32xf32> to vector<32x1xf32>
    %cst_62 = arith.constant 1.000000e-16 : f32
    %152 = vector.broadcast %cst_62 : f32 to vector<32x1xf32>
    %153 = arith.maximumf %151, %152 : vector<32x1xf32>
    %154 = tpu.reciprocal %153 {approx = true} : vector<32x1xf32> -> vector<32x1xf32>
    %155 = vector.broadcast %154 : vector<32x1xf32> to vector<32x32xf32>
    %156 = arith.mulf %149, %155 : vector<32x32xf32>
    %cst_63 = arith.constant dense<0.000000e+00> : vector<32x32xf32>
    %157 = tpu.matmul %156, %118, %cst_63 {dimension_numbers = #tpu.dot_dimension_numbers<[1], [0], [0], [1], [0, 0, 1, 1], [], []>} : vector<32x32xf32>, vector<32x32xf32>, vector<32x32xf32> -> vector<32x32xf32>
    %158 = vector.broadcast %123 : vector<1x32xf32> to vector<32x32xf32>
    %159 = arith.addf %157, %158 : vector<32x32xf32>
    %160 = vector.extract_strided_slice %7 {offsets = [12, 0], sizes = [1, 32], strides = [1, 1]} : vector<16x32xf32> to vector<1x32xf32>
    %161 = vector.extract_strided_slice %7 {offsets = [13, 0], sizes = [1, 32], strides = [1, 1]} : vector<16x32xf32> to vector<1x32xf32>
    %162 = vector.extract_strided_slice %7 {offsets = [4, 0], sizes = [1, 32], strides = [1, 1]} : vector<16x32xf32> to vector<1x32xf32>
    %cst_64 = arith.constant dense<0.000000e+00> : vector<1x32xf32>
    %163 = tpu.matmul %160, %119, %cst_64 {dimension_numbers = #tpu.dot_dimension_numbers<[1], [1], [0], [0], [0, 0, 1, 0], [], []>} : vector<1x32xf32>, vector<32x32xf32>, vector<1x32xf32> -> vector<1x32xf32>
    %164 = vector.broadcast %161 : vector<1x32xf32> to vector<32x32xf32>
    %165 = arith.mulf %120, %164 : vector<32x32xf32>
    %cst_65 = arith.constant dense<0.000000e+00> : vector<32xf32>
    %166 = vector.multi_reduction <add>, %165, %cst_65 [1] : vector<32x32xf32> to vector<32xf32>
    %167 = vector.shape_cast %166 : vector<32xf32> to vector<32x1xf32>
    %168 = vector.broadcast %167 : vector<32x1xf32> to vector<32x32xf32>
    %169 = vector.broadcast %163 : vector<1x32xf32> to vector<32x32xf32>
    %170 = arith.addf %168, %169 : vector<32x32xf32>
    %cst_66 = arith.constant 0.000000e+00 : f32
    %171 = vector.broadcast %cst_66 : f32 to vector<32x32xf32>
    %172 = arith.cmpf ogt, %170, %171 : vector<32x32xf32>
    %cst_67 = arith.constant 2.000000e-01 : f32
    %173 = vector.broadcast %cst_67 : f32 to vector<32x32xf32>
    %174 = arith.mulf %173, %170 : vector<32x32xf32>
    %175 = arith.select %172, %170, %174 : vector<32x32xi1>, vector<32x32xf32>
    %cst_68 = arith.constant 0.000000e+00 : f32
    %176 = vector.broadcast %cst_68 : f32 to vector<32x32xf32>
    %177 = arith.cmpf ogt, %4, %176 : vector<32x32xf32>
    %cst_69 = arith.constant -1.000000e+09 : f32
    %178 = vector.broadcast %cst_69 : f32 to vector<32x32xf32>
    %179 = arith.select %177, %175, %178 : vector<32x32xi1>, vector<32x32xf32>
    %cst_70 = arith.constant dense<0xFF800000> : vector<32xf32>
    %180 = vector.multi_reduction <maximumf>, %179, %cst_70 [1] : vector<32x32xf32> to vector<32xf32>
    %181 = vector.shape_cast %180 : vector<32xf32> to vector<32x1xf32>
    %cst_71 = arith.constant 0.000000e+00 : f32
    %182 = vector.broadcast %cst_71 : f32 to vector<32x32xf32>
    %183 = arith.cmpf ogt, %4, %182 : vector<32x32xf32>
    %184 = vector.broadcast %181 : vector<32x1xf32> to vector<32x32xf32>
    %185 = arith.subf %179, %184 : vector<32x32xf32>
    %186 = math.exp %185 : vector<32x32xf32>
    %cst_72 = arith.constant 0.000000e+00 : f32
    %187 = vector.broadcast %cst_72 : f32 to vector<32x32xf32>
    %188 = arith.select %183, %186, %187 : vector<32x32xi1>, vector<32x32xf32>
    %cst_73 = arith.constant dense<0.000000e+00> : vector<32xf32>
    %189 = vector.multi_reduction <add>, %188, %cst_73 [1] : vector<32x32xf32> to vector<32xf32>
    %190 = vector.shape_cast %189 : vector<32xf32> to vector<32x1xf32>
    %cst_74 = arith.constant 1.000000e-16 : f32
    %191 = vector.broadcast %cst_74 : f32 to vector<32x1xf32>
    %192 = arith.maximumf %190, %191 : vector<32x1xf32>
    %193 = tpu.reciprocal %192 {approx = true} : vector<32x1xf32> -> vector<32x1xf32>
    %194 = vector.broadcast %193 : vector<32x1xf32> to vector<32x32xf32>
    %195 = arith.mulf %188, %194 : vector<32x32xf32>
    %cst_75 = arith.constant dense<0.000000e+00> : vector<32x32xf32>
    %196 = tpu.matmul %195, %119, %cst_75 {dimension_numbers = #tpu.dot_dimension_numbers<[1], [0], [0], [1], [0, 0, 1, 1], [], []>} : vector<32x32xf32>, vector<32x32xf32>, vector<32x32xf32> -> vector<32x32xf32>
    %197 = vector.broadcast %162 : vector<1x32xf32> to vector<32x32xf32>
    %198 = arith.addf %196, %197 : vector<32x32xf32>
    %c0_76 = arith.constant 0 : index
    %c0_77 = arith.constant 0 : index
    %199 = vector.load %arg12[%c0_76, %c0_77] : memref<64x32xf32, #tpu.memory_space<vmem>>, vector<32x32xf32>
    tpu.vector_store %arg12[%c0_76, %c0_77], %159 {strides = array<i32>} : memref<64x32xf32, #tpu.memory_space<vmem>>, vector<32x32xf32>,
    %c32 = arith.constant 32 : index
    %c0_78 = arith.constant 0 : index
    %200 = vector.load %arg12[%c32, %c0_78] : memref<64x32xf32, #tpu.memory_space<vmem>>, vector<32x32xf32>
    tpu.vector_store %arg12[%c32, %c0_78], %198 {strides = array<i32>} : memref<64x32xf32, #tpu.memory_space<vmem>>, vector<32x32xf32>,
    %c0_79 = arith.constant 0 : index
    %c0_80 = arith.constant 0 : index
    %201 = vector.load %arg8[%c0_79, %c0_80] : memref<64x32xbf16, #tpu.memory_space<vmem>>, vector<64x32xbf16>
    %202 = arith.truncf %159 : vector<32x32xf32> to vector<32x32xbf16>
    %203 = vector.extract_strided_slice %201 {offsets = [0, 0], sizes = [32, 32], strides = [1, 1]} : vector<64x32xbf16> to vector<32x32xbf16>
    %cst_81 = arith.constant dense<0.000000e+00> : vector<32x32xf32>
    %204 = tpu.matmul %202, %203, %cst_81 {dimension_numbers = #tpu.dot_dimension_numbers<[1], [0], [0], [1], [0, 0, 1, 1], [], []>} : vector<32x32xbf16>, vector<32x32xbf16>, vector<32x32xf32> -> vector<32x32xf32>
    %205 = arith.truncf %198 : vector<32x32xf32> to vector<32x32xbf16>
    %206 = vector.extract_strided_slice %201 {offsets = [32, 0], sizes = [32, 32], strides = [1, 1]} : vector<64x32xbf16> to vector<32x32xbf16>
    %cst_82 = arith.constant dense<0.000000e+00> : vector<32x32xf32>
    %207 = tpu.matmul %205, %206, %cst_82 {dimension_numbers = #tpu.dot_dimension_numbers<[1], [0], [0], [1], [0, 0, 1, 1], [], []>} : vector<32x32xbf16>, vector<32x32xbf16>, vector<32x32xf32> -> vector<32x32xf32>
    %208 = arith.addf %204, %207 : vector<32x32xf32>
    %209 = vector.extract_strided_slice %7 {offsets = [5, 0], sizes = [1, 32], strides = [1, 1]} : vector<16x32xf32> to vector<1x32xf32>
    %210 = vector.broadcast %209 : vector<1x32xf32> to vector<32x32xf32>
    %211 = arith.addf %208, %210 : vector<32x32xf32>
    %212 = tpu.iota {dimensions = array<i32: 0>} : vector<32x32xi32>
    %213 = tpu.iota {dimensions = array<i32: 1>} : vector<32x32xi32>
    %214 = arith.cmpi eq, %212, %213 : vector<32x32xi32>
    %cst_83 = arith.constant 0.000000e+00 : f32
    %215 = vector.broadcast %cst_83 : f32 to vector<32x32xf32>
    %216 = arith.select %214, %215, %2 : vector<32x32xi1>, vector<32x32xf32>
    %217 = vector.extract_strided_slice %7 {offsets = [8, 0], sizes = [1, 32], strides = [1, 1]} : vector<16x32xf32> to vector<1x32xf32>
    %218 = vector.broadcast %217 : vector<1x32xf32> to vector<32x32xf32>
    %219 = arith.mulf %211, %218 : vector<32x32xf32>
    %cst_84 = arith.constant dense<0.000000e+00> : vector<32xf32>
    %220 = vector.multi_reduction <add>, %219, %cst_84 [1] : vector<32x32xf32> to vector<32xf32>
    %221 = vector.shape_cast %220 : vector<32xf32> to vector<32x1xf32>
    %222 = vector.extract_strided_slice %7 {offsets = [9, 0], sizes = [1, 32], strides = [1, 1]} : vector<16x32xf32> to vector<1x32xf32>
    %cst_85 = arith.constant dense<0.000000e+00> : vector<1x32xf32>
    %223 = tpu.matmul %222, %211, %cst_85 {dimension_numbers = #tpu.dot_dimension_numbers<[1], [1], [0], [0], [0, 0, 1, 0], [], []>} : vector<1x32xf32>, vector<32x32xf32>, vector<1x32xf32> -> vector<1x32xf32>
    %224 = vector.broadcast %223 : vector<1x32xf32> to vector<32x32xf32>
    %225 = arith.mulf %216, %224 : vector<32x32xf32>
    %cst_86 = arith.constant dense<0.000000e+00> : vector<32xf32>
    %226 = vector.multi_reduction <add>, %225, %cst_86 [1] : vector<32x32xf32> to vector<32xf32>
    %227 = vector.shape_cast %226 : vector<32xf32> to vector<32x1xf32>
    %228 = arith.addf %221, %227 : vector<32x1xf32>
    %229 = vector.extract_strided_slice %7 {offsets = [14, 0], sizes = [1, 1], strides = [1, 1]} : vector<16x32xf32> to vector<1x1xf32>
    %230 = vector.broadcast %229 : vector<1x1xf32> to vector<32x1xf32>
    %231 = arith.addf %228, %230 : vector<32x1xf32>
    %cst_87 = arith.constant 0.000000e+00 : f32
    %232 = vector.broadcast %cst_87 : f32 to vector<32x4xf32>
    %233 = arith.cmpf ogt, %6, %232 : vector<32x4xf32>
    %cst_88 = arith.constant -1.000000e+09 : f32
    %234 = vector.shape_cast %231 : vector<32x1xf32> to vector<32x1xf32>
    %235 = vector.broadcast %234 : vector<32x1xf32> to vector<32x4xf32>
    %236 = vector.broadcast %cst_88 : f32 to vector<32x4xf32>
    %237 = arith.select %233, %235, %236 : vector<32x4xi1>, vector<32x4xf32>
    %cst_89 = arith.constant dense<0xFF800000> : vector<4xf32>
    %238 = vector.multi_reduction <maximumf>, %237, %cst_89 [0] : vector<32x4xf32> to vector<4xf32>
    %239 = vector.shape_cast %238 : vector<4xf32> to vector<1x4xf32>
    %cst_90 = arith.constant 0.000000e+00 : f32
    %240 = vector.broadcast %cst_90 : f32 to vector<32x4xf32>
    %241 = arith.cmpf ogt, %6, %240 : vector<32x4xf32>
    %242 = vector.broadcast %239 : vector<1x4xf32> to vector<32x4xf32>
    %243 = arith.subf %237, %242 : vector<32x4xf32>
    %244 = math.exp %243 : vector<32x4xf32>
    %cst_91 = arith.constant 0.000000e+00 : f32
    %245 = vector.broadcast %cst_91 : f32 to vector<32x4xf32>
    %246 = arith.select %241, %244, %245 : vector<32x4xi1>, vector<32x4xf32>
    %cst_92 = arith.constant dense<0.000000e+00> : vector<4xf32>
    %247 = vector.multi_reduction <add>, %246, %cst_92 [0] : vector<32x4xf32> to vector<4xf32>
    %248 = vector.shape_cast %247 : vector<4xf32> to vector<1x4xf32>
    %249 = tpu.reciprocal %248 {approx = true} : vector<1x4xf32> -> vector<1x4xf32>
    %250 = vector.broadcast %249 : vector<1x4xf32> to vector<32x4xf32>
    %251 = arith.mulf %246, %250 : vector<32x4xf32>
    %cst_93 = arith.constant dense<0.000000e+00> : vector<4x32xf32>
    %252 = tpu.matmul %251, %211, %cst_93 {dimension_numbers = #tpu.dot_dimension_numbers<[0], [0], [1], [1], [0, 1, 1, 1], [], []>} : vector<32x4xf32>, vector<32x32xf32>, vector<4x32xf32> -> vector<4x32xf32>
    %c0_94 = arith.constant 0 : index
    %c0_95 = arith.constant 0 : index
    %253 = vector.load %arg10[%c0_94, %c0_95] : memref<4x32xf32, #tpu.memory_space<vmem>>, vector<4x32xf32>
    tpu.vector_store %arg10[%c0_94, %c0_95], %252 {strides = array<i32>} : memref<4x32xf32, #tpu.memory_space<vmem>>, vector<4x32xf32>,
    %254 = vector.extract_strided_slice %7 {offsets = [6, 0], sizes = [1, 32], strides = [1, 1]} : vector<16x32xf32> to vector<1x32xf32>
    %255 = vector.extract_strided_slice %7 {offsets = [7, 0], sizes = [1, 32], strides = [1, 1]} : vector<16x32xf32> to vector<1x32xf32>
    %cst_96 = arith.constant dense<0.000000e+00> : vector<32xf32>
    %256 = vector.multi_reduction <add>, %211, %cst_96 [1] : vector<32x32xf32> to vector<32xf32>
    %257 = vector.shape_cast %256 : vector<32xf32> to vector<32x1xf32>
    %cst_97 = arith.constant 3.200000e+01 : f32
    %258 = vector.broadcast %cst_97 : f32 to vector<32x1xf32>
    %259 = arith.divf %257, %258 : vector<32x1xf32>
    %260 = vector.broadcast %259 : vector<32x1xf32> to vector<32x32xf32>
    %261 = arith.subf %211, %260 : vector<32x32xf32>
    %262 = arith.mulf %261, %261 : vector<32x32xf32>
    %cst_98 = arith.constant dense<0.000000e+00> : vector<32xf32>
    %263 = vector.multi_reduction <add>, %262, %cst_98 [1] : vector<32x32xf32> to vector<32xf32>
    %264 = vector.shape_cast %263 : vector<32xf32> to vector<32x1xf32>
    %cst_99 = arith.constant 3.200000e+01 : f32
    %265 = vector.broadcast %cst_99 : f32 to vector<32x1xf32>
    %266 = arith.divf %264, %265 : vector<32x1xf32>
    %267 = vector.broadcast %259 : vector<32x1xf32> to vector<32x32xf32>
    %268 = arith.subf %211, %267 : vector<32x32xf32>
    %cst_100 = arith.constant 9.99999974E-6 : f32
    %269 = vector.broadcast %cst_100 : f32 to vector<32x1xf32>
    %270 = arith.addf %266, %269 : vector<32x1xf32>
    %271 = math.rsqrt %270 : vector<32x1xf32>
    %272 = vector.broadcast %271 : vector<32x1xf32> to vector<32x32xf32>
    %273 = arith.mulf %268, %272 : vector<32x32xf32>
    %274 = vector.broadcast %254 : vector<1x32xf32> to vector<32x32xf32>
    %275 = arith.mulf %273, %274 : vector<32x32xf32>
    %276 = vector.broadcast %255 : vector<1x32xf32> to vector<32x32xf32>
    %277 = arith.addf %275, %276 : vector<32x32xf32>
    %cst_101 = arith.constant 0.000000e+00 : f32
    %278 = vector.broadcast %cst_101 : f32 to vector<32x32xf32>
    %279 = arith.cmpf ogt, %277, %278 : vector<32x32xf32>
    %280 = math.exp %277 : vector<32x32xf32>
    %cst_102 = arith.constant 1.000000e+00 : f32
    %281 = vector.broadcast %cst_102 : f32 to vector<32x32xf32>
    %282 = arith.subf %280, %281 : vector<32x32xf32>
    %283 = arith.select %279, %277, %282 : vector<32x32xi1>, vector<32x32xf32>
    %c0_103 = arith.constant 0 : index
    %c0_104 = arith.constant 0 : index
    %284 = vector.load %arg11[%c0_103, %c0_104] : memref<32x32xf32, #tpu.memory_space<vmem>>, vector<32x32xf32>
    tpu.vector_store %arg11[%c0_103, %c0_104], %283 {strides = array<i32>} : memref<32x32xf32, #tpu.memory_space<vmem>>, vector<32x32xf32>,
    return
  }
}

module attributes {stable_mosaic.version = 11 : i64} {
  func.func @_contrastive_kernel(%arg0: memref<64x32xf32, #tpu.memory_space<vmem>>, %arg1: memref<32x4xi8, #tpu.memory_space<vmem>>, %arg2: memref<32x32xbf16, #tpu.memory_space<vmem>>, %arg3: memref<1x32xf32, #tpu.memory_space<vmem>>, %arg4: memref<32x128xbf16, #tpu.memory_space<vmem>>, %arg5: memref<1x128xf32, #tpu.memory_space<vmem>>, %arg6: memref<128x128xbf16, #tpu.memory_space<vmem>>, %arg7: memref<128x128xbf16, #tpu.memory_space<vmem>>, %arg8: memref<3x128xf32, #tpu.memory_space<vmem>>, %arg9: memref<1x1xf32, #tpu.memory_space<vmem>>, %arg10: memref<4x128xf32, #tpu.memory_space<vmem>>) attributes {dimension_semantics = [], scalar_prefetch = 0 : i64, scratch_operands = 0 : i64, tpu.core_type = #tpu.core_type<tc>} {
    %c0 = arith.constant 0 : index
    %c0_0 = arith.constant 0 : index
    %0 = vector.load %arg0[%c0, %c0_0] : memref<64x32xf32, #tpu.memory_space<vmem>>, vector<64x32xf32>
    %1 = arith.truncf %0 : vector<64x32xf32> to vector<64x32xbf16>
    %c0_1 = arith.constant 0 : index
    %c0_2 = arith.constant 0 : index
    %2 = vector.load %arg2[%c0_1, %c0_2] : memref<32x32xbf16, #tpu.memory_space<vmem>>, vector<32x32xbf16>
    %cst = arith.constant dense<0.000000e+00> : vector<64x32xf32>
    %3 = tpu.matmul %1, %2, %cst {dimension_numbers = #tpu.dot_dimension_numbers<[1], [0], [0], [1], [0, 0, 1, 1], [], []>} : vector<64x32xbf16>, vector<32x32xbf16>, vector<64x32xf32> -> vector<64x32xf32>
    %c0_3 = arith.constant 0 : index
    %c0_4 = arith.constant 0 : index
    %4 = vector.load %arg3[%c0_3, %c0_4] : memref<1x32xf32, #tpu.memory_space<vmem>>, vector<1x32xf32>
    %5 = vector.broadcast %4 : vector<1x32xf32> to vector<64x32xf32>
    %6 = arith.addf %3, %5 : vector<64x32xf32>
    %cst_5 = arith.constant 0.000000e+00 : f32
    %7 = vector.broadcast %cst_5 : f32 to vector<64x32xf32>
    %8 = arith.maximumf %6, %7 : vector<64x32xf32>
    %9 = arith.truncf %8 : vector<64x32xf32> to vector<64x32xbf16>
    %c0_6 = arith.constant 0 : index
    %c0_7 = arith.constant 0 : index
    %10 = vector.load %arg4[%c0_6, %c0_7] : memref<32x128xbf16, #tpu.memory_space<vmem>>, vector<32x128xbf16>
    %cst_8 = arith.constant dense<0.000000e+00> : vector<64x128xf32>
    %11 = tpu.matmul %9, %10, %cst_8 {dimension_numbers = #tpu.dot_dimension_numbers<[1], [0], [0], [1], [0, 0, 1, 1], [], []>} : vector<64x32xbf16>, vector<32x128xbf16>, vector<64x128xf32> -> vector<64x128xf32>
    %c0_9 = arith.constant 0 : index
    %c0_10 = arith.constant 0 : index
    %12 = vector.load %arg5[%c0_9, %c0_10] : memref<1x128xf32, #tpu.memory_space<vmem>>, vector<1x128xf32>
    %13 = vector.broadcast %12 : vector<1x128xf32> to vector<64x128xf32>
    %14 = arith.addf %11, %13 : vector<64x128xf32>
    %15 = arith.mulf %14, %14 : vector<64x128xf32>
    %cst_11 = arith.constant dense<0.000000e+00> : vector<64xf32>
    %16 = vector.multi_reduction <add>, %15, %cst_11 [1] : vector<64x128xf32> to vector<64xf32>
    %17 = vector.shape_cast %16 : vector<64xf32> to vector<64x1xf32>
    %cst_12 = arith.constant 1.000000e-24 : f32
    %18 = vector.broadcast %cst_12 : f32 to vector<64x1xf32>
    %19 = arith.addf %17, %18 : vector<64x1xf32>
    %20 = math.rsqrt %19 : vector<64x1xf32>
    %21 = vector.broadcast %20 : vector<64x1xf32> to vector<64x128xf32>
    %22 = arith.mulf %14, %21 : vector<64x128xf32>
    %23 = vector.extract_strided_slice %22 {offsets = [0, 0], sizes = [16, 128], strides = [1, 1]} : vector<64x128xf32> to vector<16x128xf32>
    %24 = vector.extract_strided_slice %22 {offsets = [32, 0], sizes = [16, 128], strides = [1, 1]} : vector<64x128xf32> to vector<16x128xf32>
    %25 = tpu.concatenate %23, %24 in 0 : vector<16x128xf32>, vector<16x128xf32> -> vector<32x128xf32>
    %26 = vector.extract_strided_slice %22 {offsets = [16, 0], sizes = [16, 128], strides = [1, 1]} : vector<64x128xf32> to vector<16x128xf32>
    %27 = vector.extract_strided_slice %22 {offsets = [48, 0], sizes = [16, 128], strides = [1, 1]} : vector<64x128xf32> to vector<16x128xf32>
    %28 = tpu.concatenate %26, %27 in 0 : vector<16x128xf32>, vector<16x128xf32> -> vector<32x128xf32>
    %29 = arith.mulf %25, %25 : vector<32x128xf32>
    %cst_13 = arith.constant dense<0.000000e+00> : vector<32xf32>
    %30 = vector.multi_reduction <add>, %29, %cst_13 [1] : vector<32x128xf32> to vector<32xf32>
    %31 = vector.shape_cast %30 : vector<32xf32> to vector<32x1xf32>
    %cst_14 = arith.constant 1.000000e-24 : f32
    %32 = vector.broadcast %cst_14 : f32 to vector<32x1xf32>
    %33 = arith.addf %31, %32 : vector<32x1xf32>
    %34 = math.rsqrt %33 : vector<32x1xf32>
    %35 = vector.broadcast %34 : vector<32x1xf32> to vector<32x128xf32>
    %36 = arith.mulf %25, %35 : vector<32x128xf32>
    %cst_15 = arith.constant dense<0.000000e+00> : vector<32x32xf32>
    %37 = tpu.matmul %36, %36, %cst_15 {dimension_numbers = #tpu.dot_dimension_numbers<[1], [1], [0], [0], [0, 0, 1, 0], [], []>} : vector<32x128xf32>, vector<32x128xf32>, vector<32x32xf32> -> vector<32x32xf32>
    %cst_16 = arith.constant 2.000000e+00 : f32
    %38 = vector.broadcast %cst_16 : f32 to vector<32x32xf32>
    %39 = arith.mulf %37, %38 : vector<32x32xf32>
    %40 = tpu.iota {dimensions = array<i32: 0>} : vector<32x32xi32>
    %41 = tpu.iota {dimensions = array<i32: 1>} : vector<32x32xi32>
    %42 = arith.cmpi eq, %40, %41 : vector<32x32xi32>
    %cst_17 = arith.constant 1.000000e+09 : f32
    %cst_18 = arith.constant 0.000000e+00 : f32
    %43 = vector.broadcast %cst_17 : f32 to vector<32x32xf32>
    %44 = vector.broadcast %cst_18 : f32 to vector<32x32xf32>
    %45 = arith.select %42, %43, %44 : vector<32x32xi1>, vector<32x32xf32>
    %46 = arith.subf %39, %45 : vector<32x32xf32>
    %c16_i32 = arith.constant 16 : i32
    %47 = vector.broadcast %c16_i32 : i32 to vector<32x32xi32>
    %48 = arith.cmpi slt, %40, %47 : vector<32x32xi32>
    %c16_i32_19 = arith.constant 16 : i32
    %49 = vector.broadcast %c16_i32_19 : i32 to vector<32x32xi32>
    %50 = arith.addi %40, %49 : vector<32x32xi32>
    %c16_i32_20 = arith.constant 16 : i32
    %51 = vector.broadcast %c16_i32_20 : i32 to vector<32x32xi32>
    %52 = arith.subi %40, %51 : vector<32x32xi32>
    %53 = arith.select %48, %50, %52 : vector<32x32xi1>, vector<32x32xi32>
    %54 = arith.cmpi eq, %41, %53 : vector<32x32xi32>
    %cst_21 = arith.constant 0.000000e+00 : f32
    %55 = vector.broadcast %cst_21 : f32 to vector<32x32xf32>
    %56 = arith.select %54, %46, %55 : vector<32x32xi1>, vector<32x32xf32>
    %cst_22 = arith.constant dense<0.000000e+00> : vector<32xf32>
    %57 = vector.multi_reduction <add>, %56, %cst_22 [1] : vector<32x32xf32> to vector<32xf32>
    %58 = vector.shape_cast %57 : vector<32xf32> to vector<32x1xf32>
    %cst_23 = arith.constant dense<0xFF800000> : vector<32xf32>
    %59 = vector.multi_reduction <maximumf>, %46, %cst_23 [1] : vector<32x32xf32> to vector<32xf32>
    %60 = vector.shape_cast %59 : vector<32xf32> to vector<32x1xf32>
    %61 = vector.broadcast %60 : vector<32x1xf32> to vector<32x32xf32>
    %62 = arith.subf %46, %61 : vector<32x32xf32>
    %63 = math.exp %62 : vector<32x32xf32>
    %cst_24 = arith.constant dense<0.000000e+00> : vector<32xf32>
    %64 = vector.multi_reduction <add>, %63, %cst_24 [1] : vector<32x32xf32> to vector<32xf32>
    %65 = vector.shape_cast %64 : vector<32xf32> to vector<32x1xf32>
    %66 = math.log %65 : vector<32x1xf32>
    %67 = arith.addf %66, %60 : vector<32x1xf32>
    %68 = arith.subf %67, %58 : vector<32x1xf32>
    %69 = vector.shape_cast %68 : vector<32x1xf32> to vector<1x32x1xf32>
    %cst_25 = arith.constant dense<0.000000e+00> : vector<1xf32>
    %70 = vector.multi_reduction <add>, %69, %cst_25 [1, 2] : vector<1x32x1xf32> to vector<1xf32>
    %71 = vector.shape_cast %70 : vector<1xf32> to vector<1x1x1xf32>
    %72 = vector.extract %71[0, 0, 0] : f32 from vector<1x1x1xf32>
    %cst_26 = arith.constant 3.200000e+01 : f32
    %73 = arith.divf %72, %cst_26 : f32
    %74 = arith.mulf %28, %28 : vector<32x128xf32>
    %cst_27 = arith.constant dense<0.000000e+00> : vector<32xf32>
    %75 = vector.multi_reduction <add>, %74, %cst_27 [1] : vector<32x128xf32> to vector<32xf32>
    %76 = vector.shape_cast %75 : vector<32xf32> to vector<32x1xf32>
    %cst_28 = arith.constant 1.000000e-24 : f32
    %77 = vector.broadcast %cst_28 : f32 to vector<32x1xf32>
    %78 = arith.addf %76, %77 : vector<32x1xf32>
    %79 = math.rsqrt %78 : vector<32x1xf32>
    %80 = vector.broadcast %79 : vector<32x1xf32> to vector<32x128xf32>
    %81 = arith.mulf %28, %80 : vector<32x128xf32>
    %cst_29 = arith.constant dense<0.000000e+00> : vector<32x32xf32>
    %82 = tpu.matmul %81, %81, %cst_29 {dimension_numbers = #tpu.dot_dimension_numbers<[1], [1], [0], [0], [0, 0, 1, 0], [], []>} : vector<32x128xf32>, vector<32x128xf32>, vector<32x32xf32> -> vector<32x32xf32>
    %cst_30 = arith.constant 2.000000e+00 : f32
    %83 = vector.broadcast %cst_30 : f32 to vector<32x32xf32>
    %84 = arith.mulf %82, %83 : vector<32x32xf32>
    %85 = tpu.iota {dimensions = array<i32: 0>} : vector<32x32xi32>
    %86 = tpu.iota {dimensions = array<i32: 1>} : vector<32x32xi32>
    %87 = arith.cmpi eq, %85, %86 : vector<32x32xi32>
    %cst_31 = arith.constant 1.000000e+09 : f32
    %cst_32 = arith.constant 0.000000e+00 : f32
    %88 = vector.broadcast %cst_31 : f32 to vector<32x32xf32>
    %89 = vector.broadcast %cst_32 : f32 to vector<32x32xf32>
    %90 = arith.select %87, %88, %89 : vector<32x32xi1>, vector<32x32xf32>
    %91 = arith.subf %84, %90 : vector<32x32xf32>
    %c16_i32_33 = arith.constant 16 : i32
    %92 = vector.broadcast %c16_i32_33 : i32 to vector<32x32xi32>
    %93 = arith.cmpi slt, %85, %92 : vector<32x32xi32>
    %c16_i32_34 = arith.constant 16 : i32
    %94 = vector.broadcast %c16_i32_34 : i32 to vector<32x32xi32>
    %95 = arith.addi %85, %94 : vector<32x32xi32>
    %c16_i32_35 = arith.constant 16 : i32
    %96 = vector.broadcast %c16_i32_35 : i32 to vector<32x32xi32>
    %97 = arith.subi %85, %96 : vector<32x32xi32>
    %98 = arith.select %93, %95, %97 : vector<32x32xi1>, vector<32x32xi32>
    %99 = arith.cmpi eq, %86, %98 : vector<32x32xi32>
    %cst_36 = arith.constant 0.000000e+00 : f32
    %100 = vector.broadcast %cst_36 : f32 to vector<32x32xf32>
    %101 = arith.select %99, %91, %100 : vector<32x32xi1>, vector<32x32xf32>
    %cst_37 = arith.constant dense<0.000000e+00> : vector<32xf32>
    %102 = vector.multi_reduction <add>, %101, %cst_37 [1] : vector<32x32xf32> to vector<32xf32>
    %103 = vector.shape_cast %102 : vector<32xf32> to vector<32x1xf32>
    %cst_38 = arith.constant dense<0xFF800000> : vector<32xf32>
    %104 = vector.multi_reduction <maximumf>, %91, %cst_38 [1] : vector<32x32xf32> to vector<32xf32>
    %105 = vector.shape_cast %104 : vector<32xf32> to vector<32x1xf32>
    %106 = vector.broadcast %105 : vector<32x1xf32> to vector<32x32xf32>
    %107 = arith.subf %91, %106 : vector<32x32xf32>
    %108 = math.exp %107 : vector<32x32xf32>
    %cst_39 = arith.constant dense<0.000000e+00> : vector<32xf32>
    %109 = vector.multi_reduction <add>, %108, %cst_39 [1] : vector<32x32xf32> to vector<32xf32>
    %110 = vector.shape_cast %109 : vector<32xf32> to vector<32x1xf32>
    %111 = math.log %110 : vector<32x1xf32>
    %112 = arith.addf %111, %105 : vector<32x1xf32>
    %113 = arith.subf %112, %103 : vector<32x1xf32>
    %114 = vector.shape_cast %113 : vector<32x1xf32> to vector<1x32x1xf32>
    %cst_40 = arith.constant dense<0.000000e+00> : vector<1xf32>
    %115 = vector.multi_reduction <add>, %114, %cst_40 [1, 2] : vector<1x32x1xf32> to vector<1xf32>
    %116 = vector.shape_cast %115 : vector<1xf32> to vector<1x1x1xf32>
    %117 = vector.extract %116[0, 0, 0] : f32 from vector<1x1x1xf32>
    %cst_41 = arith.constant 3.200000e+01 : f32
    %118 = arith.divf %117, %cst_41 : f32
    %119 = arith.addf %73, %118 : f32
    %cst_42 = arith.constant 5.000000e-01 : f32
    %120 = arith.mulf %cst_42, %119 : f32
    %121 = vector.broadcast %120 : f32 to vector<1x1xf32>
    %c0_43 = arith.constant 0 : index
    %c0_44 = arith.constant 0 : index
    %122 = vector.load %arg9[%c0_43, %c0_44] : memref<1x1xf32, #tpu.memory_space<vmem>>, vector<1x1xf32>
    tpu.vector_store %arg9[%c0_43, %c0_44], %121 {strides = array<i32>} : memref<1x1xf32, #tpu.memory_space<vmem>>, vector<1x1xf32>,
    %c0_45 = arith.constant 0 : index
    %c0_46 = arith.constant 0 : index
    %123 = vector.load %arg1[%c0_45, %c0_46] : memref<32x4xi8, #tpu.memory_space<vmem>>, vector<32x4xi8>
    %124 = arith.sitofp %123 : vector<32x4xi8> to vector<32x4xf32>
    %125 = vector.extract_strided_slice %22 {offsets = [0, 0], sizes = [32, 128], strides = [1, 1]} : vector<64x128xf32> to vector<32x128xf32>
    %cst_47 = arith.constant dense<0.000000e+00> : vector<4x128xf32>
    %126 = tpu.matmul %124, %125, %cst_47 {dimension_numbers = #tpu.dot_dimension_numbers<[0], [0], [1], [1], [0, 1, 1, 1], [], []>} : vector<32x4xf32>, vector<32x128xf32>, vector<4x128xf32> -> vector<4x128xf32>
    %127 = vector.extract_strided_slice %22 {offsets = [32, 0], sizes = [32, 128], strides = [1, 1]} : vector<64x128xf32> to vector<32x128xf32>
    %cst_48 = arith.constant dense<0.000000e+00> : vector<4x128xf32>
    %128 = tpu.matmul %124, %127, %cst_48 {dimension_numbers = #tpu.dot_dimension_numbers<[0], [0], [1], [1], [0, 1, 1, 1], [], []>} : vector<32x4xf32>, vector<32x128xf32>, vector<4x128xf32> -> vector<4x128xf32>
    %c0_49 = arith.constant 0 : index
    %c0_50 = arith.constant 0 : index
    %129 = vector.load %arg8[%c0_49, %c0_50] : memref<3x128xf32, #tpu.memory_space<vmem>>, vector<3x128xf32>
    %130 = arith.truncf %126 : vector<4x128xf32> to vector<4x128xbf16>
    %c0_51 = arith.constant 0 : index
    %c0_52 = arith.constant 0 : index
    %131 = vector.load %arg6[%c0_51, %c0_52] : memref<128x128xbf16, #tpu.memory_space<vmem>>, vector<128x128xbf16>
    %cst_53 = arith.constant dense<0.000000e+00> : vector<4x128xf32>
    %132 = tpu.matmul %130, %131, %cst_53 {dimension_numbers = #tpu.dot_dimension_numbers<[1], [0], [0], [1], [0, 0, 1, 1], [], []>} : vector<4x128xbf16>, vector<128x128xbf16>, vector<4x128xf32> -> vector<4x128xf32>
    %133 = arith.truncf %128 : vector<4x128xf32> to vector<4x128xbf16>
    %c0_54 = arith.constant 0 : index
    %c0_55 = arith.constant 0 : index
    %134 = vector.load %arg7[%c0_54, %c0_55] : memref<128x128xbf16, #tpu.memory_space<vmem>>, vector<128x128xbf16>
    %cst_56 = arith.constant dense<0.000000e+00> : vector<4x128xf32>
    %135 = tpu.matmul %133, %134, %cst_56 {dimension_numbers = #tpu.dot_dimension_numbers<[1], [0], [0], [1], [0, 0, 1, 1], [], []>} : vector<4x128xbf16>, vector<128x128xbf16>, vector<4x128xf32> -> vector<4x128xf32>
    %136 = arith.addf %132, %135 : vector<4x128xf32>
    %137 = vector.extract_strided_slice %129 {offsets = [0, 0], sizes = [1, 128], strides = [1, 1]} : vector<3x128xf32> to vector<1x128xf32>
    %138 = vector.broadcast %137 : vector<1x128xf32> to vector<4x128xf32>
    %139 = arith.addf %136, %138 : vector<4x128xf32>
    %140 = vector.extract_strided_slice %129 {offsets = [1, 0], sizes = [1, 128], strides = [1, 1]} : vector<3x128xf32> to vector<1x128xf32>
    %141 = vector.extract_strided_slice %129 {offsets = [2, 0], sizes = [1, 128], strides = [1, 1]} : vector<3x128xf32> to vector<1x128xf32>
    %cst_57 = arith.constant dense<0.000000e+00> : vector<4xf32>
    %142 = vector.multi_reduction <add>, %139, %cst_57 [1] : vector<4x128xf32> to vector<4xf32>
    %143 = vector.shape_cast %142 : vector<4xf32> to vector<4x1xf32>
    %cst_58 = arith.constant 1.280000e+02 : f32
    %144 = vector.broadcast %cst_58 : f32 to vector<4x1xf32>
    %145 = arith.divf %143, %144 : vector<4x1xf32>
    %146 = vector.broadcast %145 : vector<4x1xf32> to vector<4x128xf32>
    %147 = arith.subf %139, %146 : vector<4x128xf32>
    %148 = arith.mulf %147, %147 : vector<4x128xf32>
    %cst_59 = arith.constant dense<0.000000e+00> : vector<4xf32>
    %149 = vector.multi_reduction <add>, %148, %cst_59 [1] : vector<4x128xf32> to vector<4xf32>
    %150 = vector.shape_cast %149 : vector<4xf32> to vector<4x1xf32>
    %cst_60 = arith.constant 1.280000e+02 : f32
    %151 = vector.broadcast %cst_60 : f32 to vector<4x1xf32>
    %152 = arith.divf %150, %151 : vector<4x1xf32>
    %153 = vector.broadcast %145 : vector<4x1xf32> to vector<4x128xf32>
    %154 = arith.subf %139, %153 : vector<4x128xf32>
    %cst_61 = arith.constant 9.99999974E-6 : f32
    %155 = vector.broadcast %cst_61 : f32 to vector<4x1xf32>
    %156 = arith.addf %152, %155 : vector<4x1xf32>
    %157 = math.rsqrt %156 : vector<4x1xf32>
    %158 = vector.broadcast %157 : vector<4x1xf32> to vector<4x128xf32>
    %159 = arith.mulf %154, %158 : vector<4x128xf32>
    %160 = vector.broadcast %140 : vector<1x128xf32> to vector<4x128xf32>
    %161 = arith.mulf %159, %160 : vector<4x128xf32>
    %162 = vector.broadcast %141 : vector<1x128xf32> to vector<4x128xf32>
    %163 = arith.addf %161, %162 : vector<4x128xf32>
    %cst_62 = arith.constant 0.000000e+00 : f32
    %164 = vector.broadcast %cst_62 : f32 to vector<4x128xf32>
    %165 = arith.maximumf %163, %164 : vector<4x128xf32>
    %c0_63 = arith.constant 0 : index
    %c0_64 = arith.constant 0 : index
    %166 = vector.load %arg10[%c0_63, %c0_64] : memref<4x128xf32, #tpu.memory_space<vmem>>, vector<4x128xf32>
    tpu.vector_store %arg10[%c0_63, %c0_64], %165 {strides = array<i32>} : memref<4x128xf32, #tpu.memory_space<vmem>>, vector<4x128xf32>,
    return
  }
}

module attributes {stable_mosaic.version = 11 : i64} {
  func.func @_block_kernel(%arg0: memref<32x32xf32, #tpu.memory_space<vmem>>, %arg1: memref<32x32xi8, #tpu.memory_space<vmem>>, %arg2: memref<32x32xi8, #tpu.memory_space<vmem>>, %arg3: memref<32x4xi8, #tpu.memory_space<vmem>>, %arg4: memref<2x32xf32, #tpu.memory_space<vmem>>, %arg5: memref<32x32xbf16, #tpu.memory_space<vmem>>, %arg6: memref<32x2xf32, #tpu.memory_space<vmem>>, %arg7: memref<32x2xf32, #tpu.memory_space<vmem>>, %arg8: memref<32x96xbf16, #tpu.memory_space<vmem>>, %arg9: memref<64x32xbf16, #tpu.memory_space<vmem>>, %arg10: memref<16x32xf32, #tpu.memory_space<vmem>>, %arg11: memref<4x32xf32, #tpu.memory_space<vmem>>, %arg12: memref<32x32xf32, #tpu.memory_space<vmem>>, %arg13: memref<64x32xf32, #tpu.memory_space<vmem>>, %arg14: memref<32x32xf32, #tpu.memory_space<vmem>>) attributes {dimension_semantics = [], scalar_prefetch = 0 : i64, scratch_operands = 1 : i64, tpu.core_type = #tpu.core_type<tc>} {
    %c0 = arith.constant 0 : index
    %c0_0 = arith.constant 0 : index
    %0 = vector.load %arg0[%c0, %c0_0] : memref<32x32xf32, #tpu.memory_space<vmem>>, vector<32x32xf32>
    %c0_1 = arith.constant 0 : index
    %c0_2 = arith.constant 0 : index
    %1 = vector.load %arg4[%c0_1, %c0_2] : memref<2x32xf32, #tpu.memory_space<vmem>>, vector<1x32xf32>
    %c1 = arith.constant 1 : index
    %c0_3 = arith.constant 0 : index
    %2 = vector.load %arg4[%c1, %c0_3] : memref<2x32xf32, #tpu.memory_space<vmem>>, vector<1x32xf32>
    %cst = arith.constant dense<0.000000e+00> : vector<32xf32>
    %3 = vector.multi_reduction <add>, %0, %cst [1] : vector<32x32xf32> to vector<32xf32>
    %4 = vector.shape_cast %3 : vector<32xf32> to vector<32x1xf32>
    %cst_4 = arith.constant 3.200000e+01 : f32
    %5 = vector.broadcast %cst_4 : f32 to vector<32x1xf32>
    %6 = arith.divf %4, %5 : vector<32x1xf32>
    %7 = vector.broadcast %6 : vector<32x1xf32> to vector<32x32xf32>
    %8 = arith.subf %0, %7 : vector<32x32xf32>
    %9 = arith.mulf %8, %8 : vector<32x32xf32>
    %cst_5 = arith.constant dense<0.000000e+00> : vector<32xf32>
    %10 = vector.multi_reduction <add>, %9, %cst_5 [1] : vector<32x32xf32> to vector<32xf32>
    %11 = vector.shape_cast %10 : vector<32xf32> to vector<32x1xf32>
    %cst_6 = arith.constant 3.200000e+01 : f32
    %12 = vector.broadcast %cst_6 : f32 to vector<32x1xf32>
    %13 = arith.divf %11, %12 : vector<32x1xf32>
    %14 = vector.broadcast %6 : vector<32x1xf32> to vector<32x32xf32>
    %15 = arith.subf %0, %14 : vector<32x32xf32>
    %cst_7 = arith.constant 9.99999974E-6 : f32
    %16 = vector.broadcast %cst_7 : f32 to vector<32x1xf32>
    %17 = arith.addf %13, %16 : vector<32x1xf32>
    %18 = math.rsqrt %17 : vector<32x1xf32>
    %19 = vector.broadcast %18 : vector<32x1xf32> to vector<32x32xf32>
    %20 = arith.mulf %15, %19 : vector<32x32xf32>
    %21 = vector.broadcast %1 : vector<1x32xf32> to vector<32x32xf32>
    %22 = arith.mulf %20, %21 : vector<32x32xf32>
    %23 = vector.broadcast %2 : vector<1x32xf32> to vector<32x32xf32>
    %24 = arith.addf %22, %23 : vector<32x32xf32>
    %c0_8 = arith.constant 0 : index
    %c0_9 = arith.constant 0 : index
    %25 = vector.load %arg1[%c0_8, %c0_9] : memref<32x32xi8, #tpu.memory_space<vmem>>, vector<32x32xi8>
    %26 = arith.sitofp %25 : vector<32x32xi8> to vector<32x32xf32>
    %c0_10 = arith.constant 0 : index
    %c0_11 = arith.constant 0 : index
    %27 = vector.load %arg2[%c0_10, %c0_11] : memref<32x32xi8, #tpu.memory_space<vmem>>, vector<32x32xi8>
    %28 = arith.sitofp %27 : vector<32x32xi8> to vector<32x32xf32>
    %c0_12 = arith.constant 0 : index
    %c0_13 = arith.constant 0 : index
    %29 = vector.load %arg3[%c0_12, %c0_13] : memref<32x4xi8, #tpu.memory_space<vmem>>, vector<32x4xi8>
    %30 = arith.sitofp %29 : vector<32x4xi8> to vector<32x4xf32>
    %c0_14 = arith.constant 0 : index
    %c0_15 = arith.constant 0 : index
    %31 = vector.load %arg10[%c0_14, %c0_15] : memref<16x32xf32, #tpu.memory_space<vmem>>, vector<16x32xf32>
    %32 = arith.truncf %24 : vector<32x32xf32> to vector<32x32xbf16>
    %c0_16 = arith.constant 0 : index
    %c0_17 = arith.constant 0 : index
    %33 = vector.load %arg5[%c0_16, %c0_17] : memref<32x32xbf16, #tpu.memory_space<vmem>>, vector<32x32xbf16>
    %cst_18 = arith.constant dense<0.000000e+00> : vector<32x32xf32>
    %34 = tpu.matmul %32, %33, %cst_18 {dimension_numbers = #tpu.dot_dimension_numbers<[1], [0], [0], [1], [0, 0, 1, 1], [], []>} : vector<32x32xbf16>, vector<32x32xbf16>, vector<32x32xf32> -> vector<32x32xf32>
    %c0_19 = arith.constant 0 : index
    %c0_20 = arith.constant 0 : index
    %35 = vector.load %arg7[%c0_19, %c0_20] : memref<32x2xf32, #tpu.memory_space<vmem>>, vector<32x2xf32>
    %cst_21 = arith.constant dense<0.000000e+00> : vector<32x2xf32>
    %36 = tpu.matmul %34, %35, %cst_21 {dimension_numbers = #tpu.dot_dimension_numbers<[1], [0], [0], [1], [0, 0, 1, 1], [], []>} : vector<32x32xf32>, vector<32x2xf32>, vector<32x2xf32> -> vector<32x2xf32>
    %c0_22 = arith.constant 0 : index
    %c0_23 = arith.constant 0 : index
    %37 = vector.load %arg6[%c0_22, %c0_23] : memref<32x2xf32, #tpu.memory_space<vmem>>, vector<32x2xf32>
    %cst_24 = arith.constant dense<0.000000e+00> : vector<2x32xf32>
    %38 = tpu.matmul %37, %34, %cst_24 {dimension_numbers = #tpu.dot_dimension_numbers<[0], [1], [1], [0], [0, 1, 1, 0], [], []>} : vector<32x2xf32>, vector<32x32xf32>, vector<2x32xf32> -> vector<2x32xf32>
    %39 = vector.extract_strided_slice %36 {offsets = [0, 0], sizes = [32, 1], strides = [1, 1]} : vector<32x2xf32> to vector<32x1xf32>
    %40 = vector.extract_strided_slice %38 {offsets = [0, 0], sizes = [1, 32], strides = [1, 1]} : vector<2x32xf32> to vector<1x32xf32>
    %41 = vector.broadcast %39 : vector<32x1xf32> to vector<32x32xf32>
    %42 = vector.broadcast %40 : vector<1x32xf32> to vector<32x32xf32>
    %43 = arith.addf %41, %42 : vector<32x32xf32>
    %cst_25 = arith.constant 0.000000e+00 : f32
    %44 = vector.broadcast %cst_25 : f32 to vector<32x32xf32>
    %45 = arith.cmpf ogt, %43, %44 : vector<32x32xf32>
    %cst_26 = arith.constant 2.000000e-01 : f32
    %46 = vector.broadcast %cst_26 : f32 to vector<32x32xf32>
    %47 = arith.mulf %46, %43 : vector<32x32xf32>
    %48 = arith.select %45, %43, %47 : vector<32x32xi1>, vector<32x32xf32>
    %cst_27 = arith.constant 0.000000e+00 : f32
    %49 = vector.broadcast %cst_27 : f32 to vector<32x32xf32>
    %50 = arith.cmpf ogt, %26, %49 : vector<32x32xf32>
    %cst_28 = arith.constant -1.000000e+09 : f32
    %51 = vector.broadcast %cst_28 : f32 to vector<32x32xf32>
    %52 = arith.select %50, %48, %51 : vector<32x32xi1>, vector<32x32xf32>
    %cst_29 = arith.constant dense<0xFF800000> : vector<32xf32>
    %53 = vector.multi_reduction <maximumf>, %52, %cst_29 [1] : vector<32x32xf32> to vector<32xf32>
    %54 = vector.shape_cast %53 : vector<32xf32> to vector<32x1xf32>
    %cst_30 = arith.constant 0.000000e+00 : f32
    %55 = vector.broadcast %cst_30 : f32 to vector<32x32xf32>
    %56 = arith.cmpf ogt, %26, %55 : vector<32x32xf32>
    %57 = vector.broadcast %54 : vector<32x1xf32> to vector<32x32xf32>
    %58 = arith.subf %52, %57 : vector<32x32xf32>
    %59 = math.exp %58 : vector<32x32xf32>
    %cst_31 = arith.constant 0.000000e+00 : f32
    %60 = vector.broadcast %cst_31 : f32 to vector<32x32xf32>
    %61 = arith.select %56, %59, %60 : vector<32x32xi1>, vector<32x32xf32>
    %cst_32 = arith.constant dense<0.000000e+00> : vector<32xf32>
    %62 = vector.multi_reduction <add>, %61, %cst_32 [1] : vector<32x32xf32> to vector<32xf32>
    %63 = vector.shape_cast %62 : vector<32xf32> to vector<32x1xf32>
    %cst_33 = arith.constant 1.000000e-16 : f32
    %64 = vector.broadcast %cst_33 : f32 to vector<32x1xf32>
    %65 = arith.maximumf %63, %64 : vector<32x1xf32>
    %66 = tpu.reciprocal %65 {approx = true} : vector<32x1xf32> -> vector<32x1xf32>
    %67 = vector.broadcast %66 : vector<32x1xf32> to vector<32x32xf32>
    %68 = arith.mulf %61, %67 : vector<32x32xf32>
    %69 = vector.extract_strided_slice %34 {offsets = [0, 0], sizes = [32, 16], strides = [1, 1]} : vector<32x32xf32> to vector<32x16xf32>
    %cst_34 = arith.constant dense<0.000000e+00> : vector<32x16xf32>
    %70 = tpu.matmul %68, %69, %cst_34 {dimension_numbers = #tpu.dot_dimension_numbers<[1], [0], [0], [1], [0, 0, 1, 1], [], []>} : vector<32x32xf32>, vector<32x16xf32>, vector<32x16xf32> -> vector<32x16xf32>
    %c0_35 = arith.constant 0 : index
    %c0_36 = arith.constant 0 : index
    %71 = vector.load %arg14[%c0_35, %c0_36] : memref<32x32xf32, #tpu.memory_space<vmem>>, vector<32x16xf32>
    tpu.vector_store %arg14[%c0_35, %c0_36], %70 {strides = array<i32>} : memref<32x32xf32, #tpu.memory_space<vmem>>, vector<32x16xf32>,
    %72 = vector.extract_strided_slice %36 {offsets = [0, 1], sizes = [32, 1], strides = [1, 1]} : vector<32x2xf32> to vector<32x1xf32>
    %73 = vector.extract_strided_slice %38 {offsets = [1, 0], sizes = [1, 32], strides = [1, 1]} : vector<2x32xf32> to vector<1x32xf32>
    %74 = vector.broadcast %72 : vector<32x1xf32> to vector<32x32xf32>
    %75 = vector.broadcast %73 : vector<1x32xf32> to vector<32x32xf32>
    %76 = arith.addf %74, %75 : vector<32x32xf32>
    %cst_37 = arith.constant 0.000000e+00 : f32
    %77 = vector.broadcast %cst_37 : f32 to vector<32x32xf32>
    %78 = arith.cmpf ogt, %76, %77 : vector<32x32xf32>
    %cst_38 = arith.constant 2.000000e-01 : f32
    %79 = vector.broadcast %cst_38 : f32 to vector<32x32xf32>
    %80 = arith.mulf %79, %76 : vector<32x32xf32>
    %81 = arith.select %78, %76, %80 : vector<32x32xi1>, vector<32x32xf32>
    %cst_39 = arith.constant 0.000000e+00 : f32
    %82 = vector.broadcast %cst_39 : f32 to vector<32x32xf32>
    %83 = arith.cmpf ogt, %26, %82 : vector<32x32xf32>
    %cst_40 = arith.constant -1.000000e+09 : f32
    %84 = vector.broadcast %cst_40 : f32 to vector<32x32xf32>
    %85 = arith.select %83, %81, %84 : vector<32x32xi1>, vector<32x32xf32>
    %cst_41 = arith.constant dense<0xFF800000> : vector<32xf32>
    %86 = vector.multi_reduction <maximumf>, %85, %cst_41 [1] : vector<32x32xf32> to vector<32xf32>
    %87 = vector.shape_cast %86 : vector<32xf32> to vector<32x1xf32>
    %cst_42 = arith.constant 0.000000e+00 : f32
    %88 = vector.broadcast %cst_42 : f32 to vector<32x32xf32>
    %89 = arith.cmpf ogt, %26, %88 : vector<32x32xf32>
    %90 = vector.broadcast %87 : vector<32x1xf32> to vector<32x32xf32>
    %91 = arith.subf %85, %90 : vector<32x32xf32>
    %92 = math.exp %91 : vector<32x32xf32>
    %cst_43 = arith.constant 0.000000e+00 : f32
    %93 = vector.broadcast %cst_43 : f32 to vector<32x32xf32>
    %94 = arith.select %89, %92, %93 : vector<32x32xi1>, vector<32x32xf32>
    %cst_44 = arith.constant dense<0.000000e+00> : vector<32xf32>
    %95 = vector.multi_reduction <add>, %94, %cst_44 [1] : vector<32x32xf32> to vector<32xf32>
    %96 = vector.shape_cast %95 : vector<32xf32> to vector<32x1xf32>
    %cst_45 = arith.constant 1.000000e-16 : f32
    %97 = vector.broadcast %cst_45 : f32 to vector<32x1xf32>
    %98 = arith.maximumf %96, %97 : vector<32x1xf32>
    %99 = tpu.reciprocal %98 {approx = true} : vector<32x1xf32> -> vector<32x1xf32>
    %100 = vector.broadcast %99 : vector<32x1xf32> to vector<32x32xf32>
    %101 = arith.mulf %94, %100 : vector<32x32xf32>
    %102 = vector.extract_strided_slice %34 {offsets = [0, 16], sizes = [32, 16], strides = [1, 1]} : vector<32x32xf32> to vector<32x16xf32>
    %cst_46 = arith.constant dense<0.000000e+00> : vector<32x16xf32>
    %103 = tpu.matmul %101, %102, %cst_46 {dimension_numbers = #tpu.dot_dimension_numbers<[1], [0], [0], [1], [0, 0, 1, 1], [], []>} : vector<32x32xf32>, vector<32x16xf32>, vector<32x16xf32> -> vector<32x16xf32>
    %c0_47 = arith.constant 0 : index
    %c16 = arith.constant 16 : index
    %104 = vector.load %arg14[%c0_47, %c16] : memref<32x32xf32, #tpu.memory_space<vmem>>, vector<32x16xf32>
    tpu.vector_store %arg14[%c0_47, %c16], %103 {strides = array<i32>} : memref<32x32xf32, #tpu.memory_space<vmem>>, vector<32x16xf32>,
    %c0_48 = arith.constant 0 : index
    %c0_49 = arith.constant 0 : index
    %105 = vector.load %arg14[%c0_48, %c0_49] : memref<32x32xf32, #tpu.memory_space<vmem>>, vector<32x32xf32>
    %106 = vector.extract_strided_slice %31 {offsets = [0, 0], sizes = [1, 32], strides = [1, 1]} : vector<16x32xf32> to vector<1x32xf32>
    %107 = vector.broadcast %106 : vector<1x32xf32> to vector<32x32xf32>
    %108 = arith.addf %105, %107 : vector<32x32xf32>
    %109 = vector.extract_strided_slice %31 {offsets = [1, 0], sizes = [1, 32], strides = [1, 1]} : vector<16x32xf32> to vector<1x32xf32>
    %110 = vector.extract_strided_slice %31 {offsets = [2, 0], sizes = [1, 32], strides = [1, 1]} : vector<16x32xf32> to vector<1x32xf32>
    %cst_50 = arith.constant dense<0.000000e+00> : vector<32xf32>
    %111 = vector.multi_reduction <add>, %108, %cst_50 [1] : vector<32x32xf32> to vector<32xf32>
    %112 = vector.shape_cast %111 : vector<32xf32> to vector<32x1xf32>
    %cst_51 = arith.constant 3.200000e+01 : f32
    %113 = vector.broadcast %cst_51 : f32 to vector<32x1xf32>
    %114 = arith.divf %112, %113 : vector<32x1xf32>
    %115 = vector.broadcast %114 : vector<32x1xf32> to vector<32x32xf32>
    %116 = arith.subf %108, %115 : vector<32x32xf32>
    %117 = arith.mulf %116, %116 : vector<32x32xf32>
    %cst_52 = arith.constant dense<0.000000e+00> : vector<32xf32>
    %118 = vector.multi_reduction <add>, %117, %cst_52 [1] : vector<32x32xf32> to vector<32xf32>
    %119 = vector.shape_cast %118 : vector<32xf32> to vector<32x1xf32>
    %cst_53 = arith.constant 3.200000e+01 : f32
    %120 = vector.broadcast %cst_53 : f32 to vector<32x1xf32>
    %121 = arith.divf %119, %120 : vector<32x1xf32>
    %122 = vector.broadcast %114 : vector<32x1xf32> to vector<32x32xf32>
    %123 = arith.subf %108, %122 : vector<32x32xf32>
    %cst_54 = arith.constant 9.99999974E-6 : f32
    %124 = vector.broadcast %cst_54 : f32 to vector<32x1xf32>
    %125 = arith.addf %121, %124 : vector<32x1xf32>
    %126 = math.rsqrt %125 : vector<32x1xf32>
    %127 = vector.broadcast %126 : vector<32x1xf32> to vector<32x32xf32>
    %128 = arith.mulf %123, %127 : vector<32x32xf32>
    %129 = vector.broadcast %109 : vector<1x32xf32> to vector<32x32xf32>
    %130 = arith.mulf %128, %129 : vector<32x32xf32>
    %131 = vector.broadcast %110 : vector<1x32xf32> to vector<32x32xf32>
    %132 = arith.addf %130, %131 : vector<32x32xf32>
    %cst_55 = arith.constant 0.000000e+00 : f32
    %133 = vector.broadcast %cst_55 : f32 to vector<32x32xf32>
    %134 = arith.cmpf ogt, %132, %133 : vector<32x32xf32>
    %135 = math.exp %132 : vector<32x32xf32>
    %cst_56 = arith.constant 1.000000e+00 : f32
    %136 = vector.broadcast %cst_56 : f32 to vector<32x32xf32>
    %137 = arith.subf %135, %136 : vector<32x32xf32>
    %138 = arith.select %134, %132, %137 : vector<32x32xi1>, vector<32x32xf32>
    %139 = arith.truncf %138 : vector<32x32xf32> to vector<32x32xbf16>
    %c0_57 = arith.constant 0 : index
    %c0_58 = arith.constant 0 : index
    %140 = vector.load %arg8[%c0_57, %c0_58] : memref<32x96xbf16, #tpu.memory_space<vmem>>, vector<32x96xbf16>
    %cst_59 = arith.constant dense<0.000000e+00> : vector<32x96xf32>
    %141 = tpu.matmul %139, %140, %cst_59 {dimension_numbers = #tpu.dot_dimension_numbers<[1], [0], [0], [1], [0, 0, 1, 1], [], []>} : vector<32x32xbf16>, vector<32x96xbf16>, vector<32x96xf32> -> vector<32x96xf32>
    %142 = vector.extract_strided_slice %141 {offsets = [0, 0], sizes = [32, 32], strides = [1, 1]} : vector<32x96xf32> to vector<32x32xf32>
    %143 = vector.extract_strided_slice %141 {offsets = [0, 32], sizes = [32, 32], strides = [1, 1]} : vector<32x96xf32> to vector<32x32xf32>
    %144 = vector.extract_strided_slice %141 {offsets = [0, 64], sizes = [32, 32], strides = [1, 1]} : vector<32x96xf32> to vector<32x32xf32>
    %145 = vector.extract_strided_slice %31 {offsets = [10, 0], sizes = [1, 32], strides = [1, 1]} : vector<16x32xf32> to vector<1x32xf32>
    %146 = vector.extract_strided_slice %31 {offsets = [11, 0], sizes = [1, 32], strides = [1, 1]} : vector<16x32xf32> to vector<1x32xf32>
    %147 = vector.extract_strided_slice %31 {offsets = [3, 0], sizes = [1, 32], strides = [1, 1]} : vector<16x32xf32> to vector<1x32xf32>
    %cst_60 = arith.constant dense<0.000000e+00> : vector<1x32xf32>
    %148 = tpu.matmul %145, %142, %cst_60 {dimension_numbers = #tpu.dot_dimension_numbers<[1], [1], [0], [0], [0, 0, 1, 0], [], []>} : vector<1x32xf32>, vector<32x32xf32>, vector<1x32xf32> -> vector<1x32xf32>
    %149 = vector.broadcast %146 : vector<1x32xf32> to vector<32x32xf32>
    %150 = arith.mulf %142, %149 : vector<32x32xf32>
    %cst_61 = arith.constant dense<0.000000e+00> : vector<32xf32>
    %151 = vector.multi_reduction <add>, %150, %cst_61 [1] : vector<32x32xf32> to vector<32xf32>
    %152 = vector.shape_cast %151 : vector<32xf32> to vector<32x1xf32>
    %153 = vector.broadcast %152 : vector<32x1xf32> to vector<32x32xf32>
    %154 = vector.broadcast %148 : vector<1x32xf32> to vector<32x32xf32>
    %155 = arith.addf %153, %154 : vector<32x32xf32>
    %cst_62 = arith.constant 0.000000e+00 : f32
    %156 = vector.broadcast %cst_62 : f32 to vector<32x32xf32>
    %157 = arith.cmpf ogt, %155, %156 : vector<32x32xf32>
    %cst_63 = arith.constant 2.000000e-01 : f32
    %158 = vector.broadcast %cst_63 : f32 to vector<32x32xf32>
    %159 = arith.mulf %158, %155 : vector<32x32xf32>
    %160 = arith.select %157, %155, %159 : vector<32x32xi1>, vector<32x32xf32>
    %cst_64 = arith.constant 0.000000e+00 : f32
    %161 = vector.broadcast %cst_64 : f32 to vector<32x32xf32>
    %162 = arith.cmpf ogt, %26, %161 : vector<32x32xf32>
    %cst_65 = arith.constant -1.000000e+09 : f32
    %163 = vector.broadcast %cst_65 : f32 to vector<32x32xf32>
    %164 = arith.select %162, %160, %163 : vector<32x32xi1>, vector<32x32xf32>
    %cst_66 = arith.constant dense<0xFF800000> : vector<32xf32>
    %165 = vector.multi_reduction <maximumf>, %164, %cst_66 [1] : vector<32x32xf32> to vector<32xf32>
    %166 = vector.shape_cast %165 : vector<32xf32> to vector<32x1xf32>
    %cst_67 = arith.constant 0.000000e+00 : f32
    %167 = vector.broadcast %cst_67 : f32 to vector<32x32xf32>
    %168 = arith.cmpf ogt, %26, %167 : vector<32x32xf32>
    %169 = vector.broadcast %166 : vector<32x1xf32> to vector<32x32xf32>
    %170 = arith.subf %164, %169 : vector<32x32xf32>
    %171 = math.exp %170 : vector<32x32xf32>
    %cst_68 = arith.constant 0.000000e+00 : f32
    %172 = vector.broadcast %cst_68 : f32 to vector<32x32xf32>
    %173 = arith.select %168, %171, %172 : vector<32x32xi1>, vector<32x32xf32>
    %cst_69 = arith.constant dense<0.000000e+00> : vector<32xf32>
    %174 = vector.multi_reduction <add>, %173, %cst_69 [1] : vector<32x32xf32> to vector<32xf32>
    %175 = vector.shape_cast %174 : vector<32xf32> to vector<32x1xf32>
    %cst_70 = arith.constant 1.000000e-16 : f32
    %176 = vector.broadcast %cst_70 : f32 to vector<32x1xf32>
    %177 = arith.maximumf %175, %176 : vector<32x1xf32>
    %178 = tpu.reciprocal %177 {approx = true} : vector<32x1xf32> -> vector<32x1xf32>
    %179 = vector.broadcast %178 : vector<32x1xf32> to vector<32x32xf32>
    %180 = arith.mulf %173, %179 : vector<32x32xf32>
    %cst_71 = arith.constant dense<0.000000e+00> : vector<32x32xf32>
    %181 = tpu.matmul %180, %142, %cst_71 {dimension_numbers = #tpu.dot_dimension_numbers<[1], [0], [0], [1], [0, 0, 1, 1], [], []>} : vector<32x32xf32>, vector<32x32xf32>, vector<32x32xf32> -> vector<32x32xf32>
    %182 = vector.broadcast %147 : vector<1x32xf32> to vector<32x32xf32>
    %183 = arith.addf %181, %182 : vector<32x32xf32>
    %184 = vector.extract_strided_slice %31 {offsets = [12, 0], sizes = [1, 32], strides = [1, 1]} : vector<16x32xf32> to vector<1x32xf32>
    %185 = vector.extract_strided_slice %31 {offsets = [13, 0], sizes = [1, 32], strides = [1, 1]} : vector<16x32xf32> to vector<1x32xf32>
    %186 = vector.extract_strided_slice %31 {offsets = [4, 0], sizes = [1, 32], strides = [1, 1]} : vector<16x32xf32> to vector<1x32xf32>
    %cst_72 = arith.constant dense<0.000000e+00> : vector<1x32xf32>
    %187 = tpu.matmul %184, %143, %cst_72 {dimension_numbers = #tpu.dot_dimension_numbers<[1], [1], [0], [0], [0, 0, 1, 0], [], []>} : vector<1x32xf32>, vector<32x32xf32>, vector<1x32xf32> -> vector<1x32xf32>
    %188 = vector.broadcast %185 : vector<1x32xf32> to vector<32x32xf32>
    %189 = arith.mulf %144, %188 : vector<32x32xf32>
    %cst_73 = arith.constant dense<0.000000e+00> : vector<32xf32>
    %190 = vector.multi_reduction <add>, %189, %cst_73 [1] : vector<32x32xf32> to vector<32xf32>
    %191 = vector.shape_cast %190 : vector<32xf32> to vector<32x1xf32>
    %192 = vector.broadcast %191 : vector<32x1xf32> to vector<32x32xf32>
    %193 = vector.broadcast %187 : vector<1x32xf32> to vector<32x32xf32>
    %194 = arith.addf %192, %193 : vector<32x32xf32>
    %cst_74 = arith.constant 0.000000e+00 : f32
    %195 = vector.broadcast %cst_74 : f32 to vector<32x32xf32>
    %196 = arith.cmpf ogt, %194, %195 : vector<32x32xf32>
    %cst_75 = arith.constant 2.000000e-01 : f32
    %197 = vector.broadcast %cst_75 : f32 to vector<32x32xf32>
    %198 = arith.mulf %197, %194 : vector<32x32xf32>
    %199 = arith.select %196, %194, %198 : vector<32x32xi1>, vector<32x32xf32>
    %cst_76 = arith.constant 0.000000e+00 : f32
    %200 = vector.broadcast %cst_76 : f32 to vector<32x32xf32>
    %201 = arith.cmpf ogt, %28, %200 : vector<32x32xf32>
    %cst_77 = arith.constant -1.000000e+09 : f32
    %202 = vector.broadcast %cst_77 : f32 to vector<32x32xf32>
    %203 = arith.select %201, %199, %202 : vector<32x32xi1>, vector<32x32xf32>
    %cst_78 = arith.constant dense<0xFF800000> : vector<32xf32>
    %204 = vector.multi_reduction <maximumf>, %203, %cst_78 [1] : vector<32x32xf32> to vector<32xf32>
    %205 = vector.shape_cast %204 : vector<32xf32> to vector<32x1xf32>
    %cst_79 = arith.constant 0.000000e+00 : f32
    %206 = vector.broadcast %cst_79 : f32 to vector<32x32xf32>
    %207 = arith.cmpf ogt, %28, %206 : vector<32x32xf32>
    %208 = vector.broadcast %205 : vector<32x1xf32> to vector<32x32xf32>
    %209 = arith.subf %203, %208 : vector<32x32xf32>
    %210 = math.exp %209 : vector<32x32xf32>
    %cst_80 = arith.constant 0.000000e+00 : f32
    %211 = vector.broadcast %cst_80 : f32 to vector<32x32xf32>
    %212 = arith.select %207, %210, %211 : vector<32x32xi1>, vector<32x32xf32>
    %cst_81 = arith.constant dense<0.000000e+00> : vector<32xf32>
    %213 = vector.multi_reduction <add>, %212, %cst_81 [1] : vector<32x32xf32> to vector<32xf32>
    %214 = vector.shape_cast %213 : vector<32xf32> to vector<32x1xf32>
    %cst_82 = arith.constant 1.000000e-16 : f32
    %215 = vector.broadcast %cst_82 : f32 to vector<32x1xf32>
    %216 = arith.maximumf %214, %215 : vector<32x1xf32>
    %217 = tpu.reciprocal %216 {approx = true} : vector<32x1xf32> -> vector<32x1xf32>
    %218 = vector.broadcast %217 : vector<32x1xf32> to vector<32x32xf32>
    %219 = arith.mulf %212, %218 : vector<32x32xf32>
    %cst_83 = arith.constant dense<0.000000e+00> : vector<32x32xf32>
    %220 = tpu.matmul %219, %143, %cst_83 {dimension_numbers = #tpu.dot_dimension_numbers<[1], [0], [0], [1], [0, 0, 1, 1], [], []>} : vector<32x32xf32>, vector<32x32xf32>, vector<32x32xf32> -> vector<32x32xf32>
    %221 = vector.broadcast %186 : vector<1x32xf32> to vector<32x32xf32>
    %222 = arith.addf %220, %221 : vector<32x32xf32>
    %c0_84 = arith.constant 0 : index
    %c0_85 = arith.constant 0 : index
    %223 = vector.load %arg13[%c0_84, %c0_85] : memref<64x32xf32, #tpu.memory_space<vmem>>, vector<32x32xf32>
    tpu.vector_store %arg13[%c0_84, %c0_85], %183 {strides = array<i32>} : memref<64x32xf32, #tpu.memory_space<vmem>>, vector<32x32xf32>,
    %c32 = arith.constant 32 : index
    %c0_86 = arith.constant 0 : index
    %224 = vector.load %arg13[%c32, %c0_86] : memref<64x32xf32, #tpu.memory_space<vmem>>, vector<32x32xf32>
    tpu.vector_store %arg13[%c32, %c0_86], %222 {strides = array<i32>} : memref<64x32xf32, #tpu.memory_space<vmem>>, vector<32x32xf32>,
    %c0_87 = arith.constant 0 : index
    %c0_88 = arith.constant 0 : index
    %225 = vector.load %arg9[%c0_87, %c0_88] : memref<64x32xbf16, #tpu.memory_space<vmem>>, vector<64x32xbf16>
    %226 = arith.truncf %183 : vector<32x32xf32> to vector<32x32xbf16>
    %227 = vector.extract_strided_slice %225 {offsets = [0, 0], sizes = [32, 32], strides = [1, 1]} : vector<64x32xbf16> to vector<32x32xbf16>
    %cst_89 = arith.constant dense<0.000000e+00> : vector<32x32xf32>
    %228 = tpu.matmul %226, %227, %cst_89 {dimension_numbers = #tpu.dot_dimension_numbers<[1], [0], [0], [1], [0, 0, 1, 1], [], []>} : vector<32x32xbf16>, vector<32x32xbf16>, vector<32x32xf32> -> vector<32x32xf32>
    %229 = arith.truncf %222 : vector<32x32xf32> to vector<32x32xbf16>
    %230 = vector.extract_strided_slice %225 {offsets = [32, 0], sizes = [32, 32], strides = [1, 1]} : vector<64x32xbf16> to vector<32x32xbf16>
    %cst_90 = arith.constant dense<0.000000e+00> : vector<32x32xf32>
    %231 = tpu.matmul %229, %230, %cst_90 {dimension_numbers = #tpu.dot_dimension_numbers<[1], [0], [0], [1], [0, 0, 1, 1], [], []>} : vector<32x32xbf16>, vector<32x32xbf16>, vector<32x32xf32> -> vector<32x32xf32>
    %232 = arith.addf %228, %231 : vector<32x32xf32>
    %233 = vector.extract_strided_slice %31 {offsets = [5, 0], sizes = [1, 32], strides = [1, 1]} : vector<16x32xf32> to vector<1x32xf32>
    %234 = vector.broadcast %233 : vector<1x32xf32> to vector<32x32xf32>
    %235 = arith.addf %232, %234 : vector<32x32xf32>
    %236 = tpu.iota {dimensions = array<i32: 0>} : vector<32x32xi32>
    %237 = tpu.iota {dimensions = array<i32: 1>} : vector<32x32xi32>
    %238 = arith.cmpi eq, %236, %237 : vector<32x32xi32>
    %cst_91 = arith.constant 0.000000e+00 : f32
    %239 = vector.broadcast %cst_91 : f32 to vector<32x32xf32>
    %240 = arith.select %238, %239, %26 : vector<32x32xi1>, vector<32x32xf32>
    %241 = vector.extract_strided_slice %31 {offsets = [8, 0], sizes = [1, 32], strides = [1, 1]} : vector<16x32xf32> to vector<1x32xf32>
    %242 = vector.broadcast %241 : vector<1x32xf32> to vector<32x32xf32>
    %243 = arith.mulf %235, %242 : vector<32x32xf32>
    %cst_92 = arith.constant dense<0.000000e+00> : vector<32xf32>
    %244 = vector.multi_reduction <add>, %243, %cst_92 [1] : vector<32x32xf32> to vector<32xf32>
    %245 = vector.shape_cast %244 : vector<32xf32> to vector<32x1xf32>
    %246 = vector.extract_strided_slice %31 {offsets = [9, 0], sizes = [1, 32], strides = [1, 1]} : vector<16x32xf32> to vector<1x32xf32>
    %cst_93 = arith.constant dense<0.000000e+00> : vector<1x32xf32>
    %247 = tpu.matmul %246, %235, %cst_93 {dimension_numbers = #tpu.dot_dimension_numbers<[1], [1], [0], [0], [0, 0, 1, 0], [], []>} : vector<1x32xf32>, vector<32x32xf32>, vector<1x32xf32> -> vector<1x32xf32>
    %248 = vector.broadcast %247 : vector<1x32xf32> to vector<32x32xf32>
    %249 = arith.mulf %240, %248 : vector<32x32xf32>
    %cst_94 = arith.constant dense<0.000000e+00> : vector<32xf32>
    %250 = vector.multi_reduction <add>, %249, %cst_94 [1] : vector<32x32xf32> to vector<32xf32>
    %251 = vector.shape_cast %250 : vector<32xf32> to vector<32x1xf32>
    %252 = arith.addf %245, %251 : vector<32x1xf32>
    %253 = vector.extract_strided_slice %31 {offsets = [14, 0], sizes = [1, 1], strides = [1, 1]} : vector<16x32xf32> to vector<1x1xf32>
    %254 = vector.broadcast %253 : vector<1x1xf32> to vector<32x1xf32>
    %255 = arith.addf %252, %254 : vector<32x1xf32>
    %cst_95 = arith.constant 0.000000e+00 : f32
    %256 = vector.broadcast %cst_95 : f32 to vector<32x4xf32>
    %257 = arith.cmpf ogt, %30, %256 : vector<32x4xf32>
    %cst_96 = arith.constant -1.000000e+09 : f32
    %258 = vector.shape_cast %255 : vector<32x1xf32> to vector<32x1xf32>
    %259 = vector.broadcast %258 : vector<32x1xf32> to vector<32x4xf32>
    %260 = vector.broadcast %cst_96 : f32 to vector<32x4xf32>
    %261 = arith.select %257, %259, %260 : vector<32x4xi1>, vector<32x4xf32>
    %cst_97 = arith.constant dense<0xFF800000> : vector<4xf32>
    %262 = vector.multi_reduction <maximumf>, %261, %cst_97 [0] : vector<32x4xf32> to vector<4xf32>
    %263 = vector.shape_cast %262 : vector<4xf32> to vector<1x4xf32>
    %cst_98 = arith.constant 0.000000e+00 : f32
    %264 = vector.broadcast %cst_98 : f32 to vector<32x4xf32>
    %265 = arith.cmpf ogt, %30, %264 : vector<32x4xf32>
    %266 = vector.broadcast %263 : vector<1x4xf32> to vector<32x4xf32>
    %267 = arith.subf %261, %266 : vector<32x4xf32>
    %268 = math.exp %267 : vector<32x4xf32>
    %cst_99 = arith.constant 0.000000e+00 : f32
    %269 = vector.broadcast %cst_99 : f32 to vector<32x4xf32>
    %270 = arith.select %265, %268, %269 : vector<32x4xi1>, vector<32x4xf32>
    %cst_100 = arith.constant dense<0.000000e+00> : vector<4xf32>
    %271 = vector.multi_reduction <add>, %270, %cst_100 [0] : vector<32x4xf32> to vector<4xf32>
    %272 = vector.shape_cast %271 : vector<4xf32> to vector<1x4xf32>
    %273 = tpu.reciprocal %272 {approx = true} : vector<1x4xf32> -> vector<1x4xf32>
    %274 = vector.broadcast %273 : vector<1x4xf32> to vector<32x4xf32>
    %275 = arith.mulf %270, %274 : vector<32x4xf32>
    %cst_101 = arith.constant dense<0.000000e+00> : vector<4x32xf32>
    %276 = tpu.matmul %275, %235, %cst_101 {dimension_numbers = #tpu.dot_dimension_numbers<[0], [0], [1], [1], [0, 1, 1, 1], [], []>} : vector<32x4xf32>, vector<32x32xf32>, vector<4x32xf32> -> vector<4x32xf32>
    %c0_102 = arith.constant 0 : index
    %c0_103 = arith.constant 0 : index
    %277 = vector.load %arg11[%c0_102, %c0_103] : memref<4x32xf32, #tpu.memory_space<vmem>>, vector<4x32xf32>
    tpu.vector_store %arg11[%c0_102, %c0_103], %276 {strides = array<i32>} : memref<4x32xf32, #tpu.memory_space<vmem>>, vector<4x32xf32>,
    %278 = vector.extract_strided_slice %31 {offsets = [6, 0], sizes = [1, 32], strides = [1, 1]} : vector<16x32xf32> to vector<1x32xf32>
    %279 = vector.extract_strided_slice %31 {offsets = [7, 0], sizes = [1, 32], strides = [1, 1]} : vector<16x32xf32> to vector<1x32xf32>
    %cst_104 = arith.constant dense<0.000000e+00> : vector<32xf32>
    %280 = vector.multi_reduction <add>, %235, %cst_104 [1] : vector<32x32xf32> to vector<32xf32>
    %281 = vector.shape_cast %280 : vector<32xf32> to vector<32x1xf32>
    %cst_105 = arith.constant 3.200000e+01 : f32
    %282 = vector.broadcast %cst_105 : f32 to vector<32x1xf32>
    %283 = arith.divf %281, %282 : vector<32x1xf32>
    %284 = vector.broadcast %283 : vector<32x1xf32> to vector<32x32xf32>
    %285 = arith.subf %235, %284 : vector<32x32xf32>
    %286 = arith.mulf %285, %285 : vector<32x32xf32>
    %cst_106 = arith.constant dense<0.000000e+00> : vector<32xf32>
    %287 = vector.multi_reduction <add>, %286, %cst_106 [1] : vector<32x32xf32> to vector<32xf32>
    %288 = vector.shape_cast %287 : vector<32xf32> to vector<32x1xf32>
    %cst_107 = arith.constant 3.200000e+01 : f32
    %289 = vector.broadcast %cst_107 : f32 to vector<32x1xf32>
    %290 = arith.divf %288, %289 : vector<32x1xf32>
    %291 = vector.broadcast %283 : vector<32x1xf32> to vector<32x32xf32>
    %292 = arith.subf %235, %291 : vector<32x32xf32>
    %cst_108 = arith.constant 9.99999974E-6 : f32
    %293 = vector.broadcast %cst_108 : f32 to vector<32x1xf32>
    %294 = arith.addf %290, %293 : vector<32x1xf32>
    %295 = math.rsqrt %294 : vector<32x1xf32>
    %296 = vector.broadcast %295 : vector<32x1xf32> to vector<32x32xf32>
    %297 = arith.mulf %292, %296 : vector<32x32xf32>
    %298 = vector.broadcast %278 : vector<1x32xf32> to vector<32x32xf32>
    %299 = arith.mulf %297, %298 : vector<32x32xf32>
    %300 = vector.broadcast %279 : vector<1x32xf32> to vector<32x32xf32>
    %301 = arith.addf %299, %300 : vector<32x32xf32>
    %cst_109 = arith.constant 0.000000e+00 : f32
    %302 = vector.broadcast %cst_109 : f32 to vector<32x32xf32>
    %303 = arith.cmpf ogt, %301, %302 : vector<32x32xf32>
    %304 = math.exp %301 : vector<32x32xf32>
    %cst_110 = arith.constant 1.000000e+00 : f32
    %305 = vector.broadcast %cst_110 : f32 to vector<32x32xf32>
    %306 = arith.subf %304, %305 : vector<32x32xf32>
    %307 = arith.select %303, %301, %306 : vector<32x32xi1>, vector<32x32xf32>
    %c0_111 = arith.constant 0 : index
    %c0_112 = arith.constant 0 : index
    %308 = vector.load %arg12[%c0_111, %c0_112] : memref<32x32xf32, #tpu.memory_space<vmem>>, vector<32x32xf32>
    tpu.vector_store %arg12[%c0_111, %c0_112], %307 {strides = array<i32>} : memref<32x32xf32, #tpu.memory_space<vmem>>, vector<32x32xf32>,
    return
  }
}

module attributes {stable_mosaic.version = 11 : i64} {
  func.func @_head_kernel(%arg0: memref<4x32xf32, #tpu.memory_space<vmem>>, %arg1: memref<4x128xf32, #tpu.memory_space<vmem>>, %arg2: memref<32x64xbf16, #tpu.memory_space<vmem>>, %arg3: memref<128x64xbf16, #tpu.memory_space<vmem>>, %arg4: memref<3x64xf32, #tpu.memory_space<vmem>>, %arg5: memref<64x64xbf16, #tpu.memory_space<vmem>>, %arg6: memref<3x64xf32, #tpu.memory_space<vmem>>, %arg7: memref<2x64x64xf32, #tpu.memory_space<vmem>>, %arg8: memref<64x32xf32, #tpu.memory_space<vmem>>, %arg9: memref<64x32xf32, #tpu.memory_space<vmem>>, %arg10: memref<1x32xf32, #tpu.memory_space<vmem>>, %arg11: memref<32x1xf32, #tpu.memory_space<vmem>>, %arg12: memref<2x1xf32, #tpu.memory_space<vmem>>) attributes {dimension_semantics = [], scalar_prefetch = 0 : i64, scratch_operands = 0 : i64, tpu.core_type = #tpu.core_type<tc>} {
    %c0 = arith.constant 0 : index
    %c0_0 = arith.constant 0 : index
    %0 = vector.load %arg4[%c0, %c0_0] : memref<3x64xf32, #tpu.memory_space<vmem>>, vector<3x64xf32>
    %c0_1 = arith.constant 0 : index
    %c0_2 = arith.constant 0 : index
    %1 = vector.load %arg6[%c0_1, %c0_2] : memref<3x64xf32, #tpu.memory_space<vmem>>, vector<3x64xf32>
    %c0_3 = arith.constant 0 : index
    %c0_4 = arith.constant 0 : index
    %2 = vector.load %arg0[%c0_3, %c0_4] : memref<4x32xf32, #tpu.memory_space<vmem>>, vector<4x32xf32>
    %3 = arith.truncf %2 : vector<4x32xf32> to vector<4x32xbf16>
    %c0_5 = arith.constant 0 : index
    %c0_6 = arith.constant 0 : index
    %4 = vector.load %arg2[%c0_5, %c0_6] : memref<32x64xbf16, #tpu.memory_space<vmem>>, vector<32x64xbf16>
    %cst = arith.constant dense<0.000000e+00> : vector<4x64xf32>
    %5 = tpu.matmul %3, %4, %cst {dimension_numbers = #tpu.dot_dimension_numbers<[1], [0], [0], [1], [0, 0, 1, 1], [], []>} : vector<4x32xbf16>, vector<32x64xbf16>, vector<4x64xf32> -> vector<4x64xf32>
    %c0_7 = arith.constant 0 : index
    %c0_8 = arith.constant 0 : index
    %6 = vector.load %arg1[%c0_7, %c0_8] : memref<4x128xf32, #tpu.memory_space<vmem>>, vector<4x128xf32>
    %7 = arith.truncf %6 : vector<4x128xf32> to vector<4x128xbf16>
    %c0_9 = arith.constant 0 : index
    %c0_10 = arith.constant 0 : index
    %8 = vector.load %arg3[%c0_9, %c0_10] : memref<128x64xbf16, #tpu.memory_space<vmem>>, vector<128x64xbf16>
    %cst_11 = arith.constant dense<0.000000e+00> : vector<4x64xf32>
    %9 = tpu.matmul %7, %8, %cst_11 {dimension_numbers = #tpu.dot_dimension_numbers<[1], [0], [0], [1], [0, 0, 1, 1], [], []>} : vector<4x128xbf16>, vector<128x64xbf16>, vector<4x64xf32> -> vector<4x64xf32>
    %10 = arith.addf %5, %9 : vector<4x64xf32>
    %11 = vector.extract_strided_slice %0 {offsets = [0, 0], sizes = [1, 64], strides = [1, 1]} : vector<3x64xf32> to vector<1x64xf32>
    %12 = vector.broadcast %11 : vector<1x64xf32> to vector<4x64xf32>
    %13 = arith.addf %10, %12 : vector<4x64xf32>
    %14 = vector.extract_strided_slice %0 {offsets = [1, 0], sizes = [1, 64], strides = [1, 1]} : vector<3x64xf32> to vector<1x64xf32>
    %15 = vector.extract_strided_slice %0 {offsets = [2, 0], sizes = [1, 64], strides = [1, 1]} : vector<3x64xf32> to vector<1x64xf32>
    %cst_12 = arith.constant dense<0.000000e+00> : vector<4xf32>
    %16 = vector.multi_reduction <add>, %13, %cst_12 [1] : vector<4x64xf32> to vector<4xf32>
    %17 = vector.shape_cast %16 : vector<4xf32> to vector<4x1xf32>
    %cst_13 = arith.constant 6.400000e+01 : f32
    %18 = vector.broadcast %cst_13 : f32 to vector<4x1xf32>
    %19 = arith.divf %17, %18 : vector<4x1xf32>
    %20 = vector.broadcast %19 : vector<4x1xf32> to vector<4x64xf32>
    %21 = arith.subf %13, %20 : vector<4x64xf32>
    %22 = arith.mulf %21, %21 : vector<4x64xf32>
    %cst_14 = arith.constant dense<0.000000e+00> : vector<4xf32>
    %23 = vector.multi_reduction <add>, %22, %cst_14 [1] : vector<4x64xf32> to vector<4xf32>
    %24 = vector.shape_cast %23 : vector<4xf32> to vector<4x1xf32>
    %cst_15 = arith.constant 6.400000e+01 : f32
    %25 = vector.broadcast %cst_15 : f32 to vector<4x1xf32>
    %26 = arith.divf %24, %25 : vector<4x1xf32>
    %27 = vector.broadcast %19 : vector<4x1xf32> to vector<4x64xf32>
    %28 = arith.subf %13, %27 : vector<4x64xf32>
    %cst_16 = arith.constant 9.99999974E-6 : f32
    %29 = vector.broadcast %cst_16 : f32 to vector<4x1xf32>
    %30 = arith.addf %26, %29 : vector<4x1xf32>
    %31 = math.rsqrt %30 : vector<4x1xf32>
    %32 = vector.broadcast %31 : vector<4x1xf32> to vector<4x64xf32>
    %33 = arith.mulf %28, %32 : vector<4x64xf32>
    %34 = vector.broadcast %14 : vector<1x64xf32> to vector<4x64xf32>
    %35 = arith.mulf %33, %34 : vector<4x64xf32>
    %36 = vector.broadcast %15 : vector<1x64xf32> to vector<4x64xf32>
    %37 = arith.addf %35, %36 : vector<4x64xf32>
    %cst_17 = arith.constant 0.000000e+00 : f32
    %38 = vector.broadcast %cst_17 : f32 to vector<4x64xf32>
    %39 = arith.maximumf %37, %38 : vector<4x64xf32>
    %40 = arith.truncf %39 : vector<4x64xf32> to vector<4x64xbf16>
    %c0_18 = arith.constant 0 : index
    %c0_19 = arith.constant 0 : index
    %41 = vector.load %arg5[%c0_18, %c0_19] : memref<64x64xbf16, #tpu.memory_space<vmem>>, vector<64x64xbf16>
    %cst_20 = arith.constant dense<0.000000e+00> : vector<4x64xf32>
    %42 = tpu.matmul %40, %41, %cst_20 {dimension_numbers = #tpu.dot_dimension_numbers<[1], [0], [0], [1], [0, 0, 1, 1], [], []>} : vector<4x64xbf16>, vector<64x64xbf16>, vector<4x64xf32> -> vector<4x64xf32>
    %43 = vector.extract_strided_slice %1 {offsets = [0, 0], sizes = [1, 64], strides = [1, 1]} : vector<3x64xf32> to vector<1x64xf32>
    %44 = vector.broadcast %43 : vector<1x64xf32> to vector<4x64xf32>
    %45 = arith.addf %42, %44 : vector<4x64xf32>
    %46 = vector.extract_strided_slice %1 {offsets = [1, 0], sizes = [1, 64], strides = [1, 1]} : vector<3x64xf32> to vector<1x64xf32>
    %47 = vector.extract_strided_slice %1 {offsets = [2, 0], sizes = [1, 64], strides = [1, 1]} : vector<3x64xf32> to vector<1x64xf32>
    %cst_21 = arith.constant dense<0.000000e+00> : vector<4xf32>
    %48 = vector.multi_reduction <add>, %45, %cst_21 [1] : vector<4x64xf32> to vector<4xf32>
    %49 = vector.shape_cast %48 : vector<4xf32> to vector<4x1xf32>
    %cst_22 = arith.constant 6.400000e+01 : f32
    %50 = vector.broadcast %cst_22 : f32 to vector<4x1xf32>
    %51 = arith.divf %49, %50 : vector<4x1xf32>
    %52 = vector.broadcast %51 : vector<4x1xf32> to vector<4x64xf32>
    %53 = arith.subf %45, %52 : vector<4x64xf32>
    %54 = arith.mulf %53, %53 : vector<4x64xf32>
    %cst_23 = arith.constant dense<0.000000e+00> : vector<4xf32>
    %55 = vector.multi_reduction <add>, %54, %cst_23 [1] : vector<4x64xf32> to vector<4xf32>
    %56 = vector.shape_cast %55 : vector<4xf32> to vector<4x1xf32>
    %cst_24 = arith.constant 6.400000e+01 : f32
    %57 = vector.broadcast %cst_24 : f32 to vector<4x1xf32>
    %58 = arith.divf %56, %57 : vector<4x1xf32>
    %59 = vector.broadcast %51 : vector<4x1xf32> to vector<4x64xf32>
    %60 = arith.subf %45, %59 : vector<4x64xf32>
    %cst_25 = arith.constant 9.99999974E-6 : f32
    %61 = vector.broadcast %cst_25 : f32 to vector<4x1xf32>
    %62 = arith.addf %58, %61 : vector<4x1xf32>
    %63 = math.rsqrt %62 : vector<4x1xf32>
    %64 = vector.broadcast %63 : vector<4x1xf32> to vector<4x64xf32>
    %65 = arith.mulf %60, %64 : vector<4x64xf32>
    %66 = vector.broadcast %46 : vector<1x64xf32> to vector<4x64xf32>
    %67 = arith.mulf %65, %66 : vector<4x64xf32>
    %68 = vector.broadcast %47 : vector<1x64xf32> to vector<4x64xf32>
    %69 = arith.addf %67, %68 : vector<4x64xf32>
    %cst_26 = arith.constant 0.000000e+00 : f32
    %70 = vector.broadcast %cst_26 : f32 to vector<4x64xf32>
    %71 = arith.maximumf %69, %70 : vector<4x64xf32>
    %cst_27 = arith.constant dense<0.000000e+00> : vector<4xf32>
    %72 = vector.multi_reduction <add>, %71, %cst_27 [1] : vector<4x64xf32> to vector<4xf32>
    %73 = vector.shape_cast %72 : vector<4xf32> to vector<4x1xf32>
    %cst_28 = arith.constant 6.400000e+01 : f32
    %74 = vector.broadcast %cst_28 : f32 to vector<4x1xf32>
    %75 = arith.divf %73, %74 : vector<4x1xf32>
    %76 = vector.broadcast %75 : vector<4x1xf32> to vector<4x64xf32>
    %77 = arith.subf %71, %76 : vector<4x64xf32>
    %78 = arith.mulf %77, %77 : vector<4x64xf32>
    %cst_29 = arith.constant dense<0.000000e+00> : vector<4xf32>
    %79 = vector.multi_reduction <add>, %78, %cst_29 [1] : vector<4x64xf32> to vector<4xf32>
    %80 = vector.shape_cast %79 : vector<4xf32> to vector<4x1xf32>
    %cst_30 = arith.constant 6.400000e+01 : f32
    %81 = vector.broadcast %cst_30 : f32 to vector<4x1xf32>
    %82 = arith.divf %80, %81 : vector<4x1xf32>
    %83 = vector.broadcast %75 : vector<4x1xf32> to vector<4x64xf32>
    %84 = arith.subf %71, %83 : vector<4x64xf32>
    %cst_31 = arith.constant 9.99999974E-6 : f32
    %85 = vector.broadcast %cst_31 : f32 to vector<4x1xf32>
    %86 = arith.addf %82, %85 : vector<4x1xf32>
    %87 = math.rsqrt %86 : vector<4x1xf32>
    %88 = vector.broadcast %87 : vector<4x1xf32> to vector<4x64xf32>
    %89 = arith.mulf %84, %88 : vector<4x64xf32>
    %90 = vector.extract_strided_slice %89 {offsets = [0, 0], sizes = [2, 64], strides = [1, 1]} : vector<4x64xf32> to vector<2x64xf32>
    %91 = vector.extract_strided_slice %89 {offsets = [2, 0], sizes = [2, 64], strides = [1, 1]} : vector<4x64xf32> to vector<2x64xf32>
    %c0_32 = arith.constant 0 : index
    %c0_33 = arith.constant 0 : index
    %92 = vector.load %arg8[%c0_32, %c0_33] : memref<64x32xf32, #tpu.memory_space<vmem>>, vector<64x32xf32>
    %cst_34 = arith.constant dense<0.000000e+00> : vector<2x32xf32>
    %93 = tpu.matmul %90, %92, %cst_34 {dimension_numbers = #tpu.dot_dimension_numbers<[1], [0], [0], [1], [0, 0, 1, 1], [], []>} : vector<2x64xf32>, vector<64x32xf32>, vector<2x32xf32> -> vector<2x32xf32>
    %c0_35 = arith.constant 0 : index
    %c0_36 = arith.constant 0 : index
    %94 = vector.load %arg9[%c0_35, %c0_36] : memref<64x32xf32, #tpu.memory_space<vmem>>, vector<64x32xf32>
    %cst_37 = arith.constant dense<0.000000e+00> : vector<2x32xf32>
    %95 = tpu.matmul %91, %94, %cst_37 {dimension_numbers = #tpu.dot_dimension_numbers<[1], [0], [0], [1], [0, 0, 1, 1], [], []>} : vector<2x64xf32>, vector<64x32xf32>, vector<2x32xf32> -> vector<2x32xf32>
    %96 = arith.addf %93, %95 : vector<2x32xf32>
    %c0_38 = arith.constant 0 : index
    %c0_39 = arith.constant 0 : index
    %97 = vector.load %arg10[%c0_38, %c0_39] : memref<1x32xf32, #tpu.memory_space<vmem>>, vector<1x32xf32>
    %98 = vector.broadcast %97 : vector<1x32xf32> to vector<2x32xf32>
    %99 = arith.addf %96, %98 : vector<2x32xf32>
    %100 = math.tanh %99 : vector<2x32xf32>
    %c0_40 = arith.constant 0 : index
    %c0_41 = arith.constant 0 : index
    %101 = vector.load %arg11[%c0_40, %c0_41] : memref<32x1xf32, #tpu.memory_space<vmem>>, vector<32x1xf32>
    %cst_42 = arith.constant dense<0.000000e+00> : vector<2x1xf32>
    %102 = tpu.matmul %100, %101, %cst_42 {dimension_numbers = #tpu.dot_dimension_numbers<[1], [0], [0], [1], [0, 0, 1, 1], [], []>} : vector<2x32xf32>, vector<32x1xf32>, vector<2x1xf32> -> vector<2x1xf32>
    %103 = arith.mulf %90, %90 : vector<2x64xf32>
    %cst_43 = arith.constant dense<0.000000e+00> : vector<2xf32>
    %104 = vector.multi_reduction <add>, %103, %cst_43 [1] : vector<2x64xf32> to vector<2xf32>
    %105 = vector.shape_cast %104 : vector<2xf32> to vector<2x1xf32>
    %cst_44 = arith.constant 1.000000e-24 : f32
    %106 = vector.broadcast %cst_44 : f32 to vector<2x1xf32>
    %107 = arith.addf %105, %106 : vector<2x1xf32>
    %108 = math.rsqrt %107 : vector<2x1xf32>
    %109 = vector.broadcast %108 : vector<2x1xf32> to vector<2x64xf32>
    %110 = arith.mulf %90, %109 : vector<2x64xf32>
    %111 = arith.mulf %91, %91 : vector<2x64xf32>
    %cst_45 = arith.constant dense<0.000000e+00> : vector<2xf32>
    %112 = vector.multi_reduction <add>, %111, %cst_45 [1] : vector<2x64xf32> to vector<2xf32>
    %113 = vector.shape_cast %112 : vector<2xf32> to vector<2x1xf32>
    %cst_46 = arith.constant 1.000000e-24 : f32
    %114 = vector.broadcast %cst_46 : f32 to vector<2x1xf32>
    %115 = arith.addf %113, %114 : vector<2x1xf32>
    %116 = math.rsqrt %115 : vector<2x1xf32>
    %117 = vector.broadcast %116 : vector<2x1xf32> to vector<2x64xf32>
    %118 = arith.mulf %91, %117 : vector<2x64xf32>
    %c0_47 = arith.constant 0 : index
    %c0_48 = arith.constant 0 : index
    %c0_49 = arith.constant 0 : index
    %119 = vector.load %arg7[%c0_47, %c0_48, %c0_49] : memref<2x64x64xf32, #tpu.memory_space<vmem>>, vector<2x64x64xf32>
    %120 = arith.mulf %119, %119 : vector<2x64x64xf32>
    %cst_50 = arith.constant dense<0.000000e+00> : vector<2x64xf32>
    %121 = vector.multi_reduction <add>, %120, %cst_50 [2] : vector<2x64x64xf32> to vector<2x64xf32>
    %cst_51 = arith.constant dense<0.000000e+00> : vector<2xf32>
    %122 = vector.multi_reduction <add>, %121, %cst_51 [1] : vector<2x64xf32> to vector<2xf32>
    %123 = vector.shape_cast %122 : vector<2xf32> to vector<2x1xf32>
    %124 = vector.shape_cast %118 : vector<2x64xf32> to vector<2x1x64xf32>
    %125 = vector.broadcast %124 : vector<2x1x64xf32> to vector<2x64x64xf32>
    %126 = arith.mulf %119, %125 : vector<2x64x64xf32>
    %cst_52 = arith.constant dense<0.000000e+00> : vector<2x64xf32>
    %127 = vector.multi_reduction <add>, %126, %cst_52 [2] : vector<2x64x64xf32> to vector<2x64xf32>
    %128 = arith.mulf %127, %110 : vector<2x64xf32>
    %cst_53 = arith.constant dense<0.000000e+00> : vector<2xf32>
    %129 = vector.multi_reduction <add>, %128, %cst_53 [1] : vector<2x64xf32> to vector<2xf32>
    %130 = vector.shape_cast %129 : vector<2xf32> to vector<2x1xf32>
    %cst_54 = arith.constant 1.000000e-24 : f32
    %131 = vector.broadcast %cst_54 : f32 to vector<2x1xf32>
    %132 = arith.addf %123, %131 : vector<2x1xf32>
    %133 = math.rsqrt %132 : vector<2x1xf32>
    %134 = arith.mulf %130, %133 : vector<2x1xf32>
    %135 = arith.mulf %134, %102 : vector<2x1xf32>
    %c0_55 = arith.constant 0 : index
    %c0_56 = arith.constant 0 : index
    %136 = vector.load %arg12[%c0_55, %c0_56] : memref<2x1xf32, #tpu.memory_space<vmem>>, vector<2x1xf32>
    tpu.vector_store %arg12[%c0_55, %c0_56], %135 {strides = array<i32>} : memref<2x1xf32, #tpu.memory_space<vmem>>, vector<2x1xf32>,
    return
  }
}

</mosaic_0001>

<bundles_post_ra>
// kernel: fwd.6
= control target key start
LH: loop header
LB: loop body
LE: loop exit
PB: predicated region body
PF: predicated region fallthrough
CT: control target
= control target key end

     0   :  { %vm71_vm0 = vcmask 261120   ;;  %s1978_s0 = inlined_call_operand.vmem [shape: f32[64,32], index: 0, kind: input, shape index: {}]   ;;  %s1979_s1 = inlined_call_operand.vmem [shape: s8[32,4], index: 1, kind: input, shape index: {}]   ;;  %s1980_s2 = inlined_call_operand.vmem [shape: bf16[32,32], index: 2, kind: input, shape index: {}]   ;;  %s1981_s3 = inlined_call_operand.vmem [shape: f32[1,32], index: 3, kind: input, shape index: {}]   ;;  %s1982_s4 = inlined_call_operand.vmem [shape: bf16[32,128], index: 4, kind: input, shape index: {}]   ;;  %s1983_s5 = inlined_call_operand.vmem [shape: f32[1,128], index: 5, kind: input, shape index: {}]   ;;  %s1984_s6 = inlined_call_operand.vmem [shape: bf16[128,128], index: 6, kind: input, shape index: {}]   ;;  %s1985_s7 = inlined_call_operand.vmem [shape: bf16[128,128], index: 7, kind: input, shape index: {}]   ;;  %s1986_s8 = inlined_call_operand.vmem [shape: f32[3,128], index: 8, kind: input, shape index: {}]   ;;  %s1987_s9 = inlined_call_operand.hbm [shape: f32[1,1], index: 9, kind: output, shape index: {0}]   ;;  %s1988_s10 = inlined_call_operand.vmem [shape: f32[4,128], index: 10, kind: output, shape index: {1}]  }
   0x1   :  { %v1454_v0 = vld [vmem:[%s1980_s2] sm:$0xff]   ;;  %v1455_v1 = vld [vmem:[%s1980_s2 + $0x8] sm:$0xff]   ;;  %v38_v5 = vld [vmem:[%s1978_s0 + $0x10] sm:$0xff] }
   0x2   :  { %1303 = vmatprep.subr.bf16.mxu0 %v1454_v0  ;;  %v36_v2 = vld [vmem:[%s1978_s0] sm:$0xff]  ;;  %v37_v3 = vld [vmem:[%s1978_s0 + $0x8] sm:$0xff]  ;;  %v39_v6 = vld [vmem:[%s1978_s0 + $0x18] sm:$0xff] }
   0x3   :  { %1304 = vmatpush3.bf16.msra.mxu0 %v1454_v0  ;;  %v44_v4 = vpack.c.bf16 %v37_v3, %v36_v2  ;;  %v40_v7 = vld [vmem:[%s1978_s0 + $0x20] sm:$0xff]  ;;  %v41_v8 = vld [vmem:[%s1978_s0 + $0x28] sm:$0xff]  ;;  %v45_v9 = vpack.c.bf16 %v39_v6, %v38_v5  ;;  %v42_v11 = vld [vmem:[%s1978_s0 + $0x30] sm:$0xff] }
   0x4   :  { %1305 = vmatprep.subr.bf16.mxu0 %v1455_v1  ;;  %v46_v10 = vpack.c.bf16 %v41_v8, %v40_v7  ;;  %v43_v12 = vld [vmem:[%s1978_s0 + $0x38] sm:$0xff] }
   0x5   :  { %1307 = vmatprep.mubr.msk.bf16.mxu0 %vm71_vm0, %v44_v4  ;;  %v47_v13 = vpack.c.bf16 %v43_v12, %v42_v11 }
   0x7   :  { %1306 = vmatpush3.bf16.msra.mxu0 %v1455_v1 }
   0xa   :  { %1308 = vmatmul.mubr.msk.bf16.vlgmr.msra.gmra.mrb[0].mxu0 %vm71_vm0, %v45_v9 }
   0xb   :  { %1311 = vmatprep.mubr.msk.bf16.mxu0 %vm71_vm0, %v46_v10 }
   0xc   :  { %16 = vsyncpa [#allocation3], 0  ;;  %v1456_v14 = vld [vmem:[%s1982_s4] sm:$0xff]   ;;  %v1457_v15 = vld [vmem:[%s1982_s4 + $0x8] sm:$0xff]   ;;  %vm1565_vm1 = vmmov 0   ;;  %vm1159_vm10 = vcmask 1043456  }
   0xd   :  { %1315 = vmatprep.subr.bf16.mxu1 %v1456_v14  ;;  %v1204_v16 = vld [vmem:[%s1981_s3] ss:$0 sm:$0xff]  ;;  %vm527_vm11 = vcmask 7168   ;;  %s1567_s28 = smov [#allocation2]   ;;  %vm754_vm12 = vcmask 0  }
   0xe   :  { %1316 = vmatpush3.bf16.msra.mxu1 %v1456_v14  ;;  %v1211_v45 = vld [vmem:[%s1983_s5] ss:$0 sm:$0xff]  ;;  %s1192_s29 = sshll.u32 %s1567_s28, 4  ;;  %s1193_s29 = int_to_ptr.vmem [resolvable:$true] %s1192_s29 }
   0xf   :  { %1317 = vmatprep.subr.bf16.mxu1 %v1457_v15  ;;  %s1540_s11 = scalar_lea.vmem %s1193_s29, 16  ;;  %s1544_s12 = scalar_lea.vmem %s1193_s29, 32 }
  0x10   :  { %p1541_p0 = scmp.ne.s32.totalorder %s1193_s29, %s1540_s11  ;;  %p1545_p1 = scmp.lt.s32.totalorder %s1193_s29, %s1193_s29 }
  0x11   :  { %p1546_p2 = scmp.lt.s32.totalorder %s1544_s12, %s1540_s11 }
  0x12   :  { %1312 = vmatmul.mubr.msk.bf16.gmra.mrb[4].mxu0 %vm71_vm0, %v47_v13  ;;  %1318 = vmatpush3.bf16.msra.mxu1 %v1457_v15 }
  0x13   :  { %p1547_p3 = por %p1546_p2, %p1545_p1 }
  0x15   :  { %p1548_p4 = pnand %p1547_p3, %p1541_p0 }
  0xdd   :  { %v1309_v17 = vpop.f32.mrb[0].mxu0 }
  0xde   :  { %v127_v18 = vadd.f32 %v1309_v17, %v1204_v16  ;;  %v118_v19 = vpop.f32.mrb[1].mxu0 }
  0xdf   :  { %v119_v20 = vadd.f32 %v1204_v16, %v118_v19  ;;  %v1310_v21 = vpop.f32.mrb[2].mxu0 }
  0xe0   :  { %v130_v22 = vadd.f32 %v1310_v21, %v1204_v16  ;;  %v121_v23 = vpop.f32.mrb[3].mxu0  ;;  %v151_v25 = vmax.f32 %v127_v18, 0.0 }
  0xe1   :  { %v122_v24 = vadd.f32 %v1204_v16, %v121_v23  ;;  %v149_v27 = vmax.f32 %v119_v20, 0.0 }
  0xe2   :  { %v152_v26 = vmax.f32 %v130_v22, 0.0 }
  0xe3   :  { %v150_v28 = vmax.f32 %v122_v24, 0.0 }
  0xe4   :  { %v158_v29 = vpack.c.bf16 %v152_v26, %v151_v25 }
  0xe5   :  { %v1313_v30 = vpop.f32.mrb[4].mxu0  ;;  %v157_v31 = vpack.c.bf16 %v150_v28, %v149_v27 }
  0xe6   :  { %v143_v32 = vadd.f32 %v1313_v30, %v1204_v16  ;;  %v134_v33 = vpop.f32.mrb[5].mxu0 }
  0xe7   :  { %v135_v34 = vadd.f32 %v1204_v16, %v134_v33  ;;  %v1314_v35 = vpop.f32.mrb[6].mxu0  ;;  %1319 = vmatprep.mubr.msk.bf16.mxu1 %vm71_vm0, %v157_v31 }
  0xe8   :  { %v155_v36 = vmax.f32 %v143_v32, 0.0  ;;  %v146_v37 = vadd.f32 %v1314_v35, %v1204_v16  ;;  %v137_v38 = vpop.f32.mrb[7].mxu0  ;;  %1320 = vmatmul.mubr.msk.bf16.vlgmr.msra.gmra.mrb[0].mxu1 %vm71_vm0, %v158_v29 }
  0xe9   :  { %v138_v39 = vadd.f32 %v1204_v16, %v137_v38  ;;  %v153_v41 = vmax.f32 %v135_v34, 0.0 }
  0xea   :  { %v156_v40 = vmax.f32 %v146_v37, 0.0 }
  0xeb   :  { %v154_v42 = vmax.f32 %v138_v39, 0.0 }
  0xec   :  { %v160_v43 = vpack.c.bf16 %v156_v40, %v155_v36 }
  0xed   :  { %v159_v44 = vpack.c.bf16 %v154_v42, %v153_v41 }
  0xef   :  { %1323 = vmatprep.mubr.msk.bf16.mxu1 %vm71_vm0, %v159_v44 }
  0xf0   :  { %1324 = vmatmul.mubr.msk.bf16.gmra.mrb[4].mxu1 %vm71_vm0, %v160_v43 }
 0x1bb   :  { %v1321_v46 = vpop.f32.mrb[0].mxu1 }
 0x1bc   :  { %v239_v47 = vadd.f32 %v1321_v46, %v1211_v45  ;;  %v230_v48 = vpop.f32.mrb[1].mxu1  ;;  %v1240_v46 = vld [vmem:[%s1979_s1] sm:$0xff]  }
 0x1bd   :  { %v231_v49 = vadd.f32 %v1211_v45, %v230_v48  ;;  %v1322_v50 = vpop.f32.mrb[2].mxu1  ;;  %v1242_v48 = vunpack.c.1.s8 %v1240_v46 }
 0x1be   :  { %v242_v51 = vadd.f32 %v1322_v50, %v1211_v45  ;;  %v233_v52 = vpop.f32.mrb[3].mxu1  ;;  %v263_v53 = vmul.f32 %v239_v47, %v239_v47 }
 0x1bf   :  { %v234_v54 = vadd.f32 %v1211_v45, %v233_v52  ;;  %v261_v55 = vmul.f32 %v231_v49, %v231_v49  ;;  %v765_v50 = vcvt.s32.f32 %v1242_v48 }
 0x1c0   :  { %273 = vadd.xlane.f32.xlu1 %v263_v53  ;;  %v264_v56 = vmul.f32 %v242_v51, %v242_v51  ;;  %v1246_v53 = vunpack.c.3.s8 %v1240_v46 }
 0x1c1   :  { %269 = vadd.xlane.f32.xlu0 %v261_v55  ;;  %v262_v58 = vmul.f32 %v234_v54, %v234_v54 }
 0x1c3   :  { %v1325_v57 = vpop.f32.mrb[4].mxu1 }
 0x1c4   :  { %275 = vadd.xlane.f32.xlu1 %v264_v56  ;;  %v246_v59 = vpop.f32.mrb[5].mxu1  ;;  %v255_v63 = vadd.f32 %v1325_v57, %v1211_v45 }
 0x1c5   :  { %v247_v60 = vadd.f32 %v1211_v45, %v246_v59  ;;  %v1326_v61 = vpop.f32.mrb[6].mxu1  ;;  %271 = vadd.xlane.f32.xlu0 %v262_v58 }
 0x1c6   :  { %v249_v62 = vpop.f32.mrb[7].mxu1  ;;  %v258_v2 = vadd.f32 %v1326_v61, %v1211_v45  ;;  %v267_v4 = vmul.f32 %v255_v63, %v255_v63 }
 0x1c7   :  { %v250_v0 = vadd.f32 %v1211_v45, %v249_v62  ;;  %v265_v1 = vmul.f32 %v247_v60, %v247_v60 }
 0x1c8   :  { %v268_v5 = vmul.f32 %v258_v2, %v258_v2 }
 0x1c9   :  { %277 = vadd.xlane.f32.xlu0 %v265_v1  ;;  %v266_v3 = vmul.f32 %v250_v0, %v250_v0 }
 0x1cb   :  { %279 = vadd.xlane.f32.xlu1 %v266_v3 }
 0x1cd   :  { %281 = vadd.xlane.f32.xlu0 %v267_v4 }
 0x1cf   :  { %283 = vadd.xlane.f32.xlu1 %v268_v5 }
 0x24d   :  { %v274_v6 = vpop.xlane.xlu1 %273 }
 0x24e   :  { %v287_v7 = vadd.f32 1e-24, %v274_v6  ;;  %v270_v8 = vpop.xlane.xlu0 %269 }
 0x24f   :  { %v285_v9 = vadd.f32 1e-24, %v270_v8 }
 0x250   :  { %1474 = vrsqrt.f32 %v287_v7 }
 0x251   :  { %1476 = vrsqrt.f32 %v285_v9  ;;  %v276_v10 = vpop.xlane.xlu1 %275 }
 0x252   :  { %v288_v11 = vadd.f32 1e-24, %v276_v10  ;;  %v272_v12 = vpop.xlane.xlu0 %271 }
 0x253   :  { %v286_v13 = vadd.f32 1e-24, %v272_v12 }
 0x254   :  { %1478 = vrsqrt.f32 %v288_v11 }
 0x255   :  { %1480 = vrsqrt.f32 %v286_v13 }
 0x256   :  { %v278_v14 = vpop.xlane.xlu0 %277 }
 0x257   :  { %v289_v15 = vadd.f32 1e-24, %v278_v14 }
 0x258   :  { %v280_v16 = vpop.xlane.xlu1 %279 }
 0x259   :  { %1482 = vrsqrt.f32 %v289_v15  ;;  %v290_v17 = vadd.f32 1e-24, %v280_v16 }
 0x25a   :  { %v1475_v18 = vpop.eup %1474  ;;  %v282_v19 = vpop.xlane.xlu0 %281 }
 0x25b   :  { %v1477_v20 = vpop.eup %1476  ;;  %1484 = vrsqrt.f32 %v290_v17  ;;  %v291_v21 = vadd.f32 1e-24, %v282_v19  ;;  %v1673_v22 = vmul.f32 %v1475_v18, %v239_v47  ;;  %v1241_v47 = vunpack.c.0.s8 %v1240_v46 }
 0x25c   :  { %v284_v23 = vpop.xlane.xlu1 %283  ;;  %v1677_v26 = vmul.f32 %v1477_v20, %v231_v49 }
 0x25d   :  { %1486 = vrsqrt.f32 %v291_v21  ;;  %v292_v24 = vadd.f32 1e-24, %v284_v23  ;;  %v547_v25 = vmul.f32 %v1673_v22, %v1673_v22  ;;  %v764_v49 = vcvt.s32.f32 %v1241_v47  ;;  %v1469_v47 = vld [vmem:[%s1984_s6 + $0x28] sm:$0xff]  }
 0x25e   :  { %v1479_v27 = vpop.eup %1478  ;;  %v309_v31 = vmul.f32 %v1677_v26, %v1677_v26 }
 0x25f   :  { %v1481_v28 = vpop.eup %1480  ;;  %1488 = vrsqrt.f32 %v292_v24  ;;  %551 = vadd.xlane.f32.xlu0 %v547_v25  ;;  %v1679_v29 = vmul.f32 %v1479_v27, %v242_v51  ;;  %v1245_v51 = vunpack.c.2.s8 %v1240_v46  ;;  %v1468_v46 = vld [vmem:[%s1985_s7 + $0x28] sm:$0xff]  }
 0x260   :  { %v1685_v32 = vmul.f32 %v1481_v28, %v234_v54  ;;  %v767_v54 = vcvt.s32.f32 %v1246_v53 }
 0x261   :  { %v548_v30 = vmul.f32 %v1679_v29, %v1679_v29  ;;  %v766_v52 = vcvt.s32.f32 %v1245_v51  ;;  %v1471_v51 = vld [vmem:[%s1984_s6 + $0x30] sm:$0xff]  }
 0x262   :  { %v310_v36 = vmul.f32 %v1685_v32, %v1685_v32 }
 0x263   :  { %v1483_v33 = vpop.eup %1482  ;;  %553 = vadd.xlane.f32.xlu1 %v548_v30  ;;  %313 = vadd.xlane.f32.xlu0 %v309_v31  ;;  %v1564_v30 = vmov 0.0|0.0   ;;  %v1434_v31 = vpack.c.bf16 %v1685_v32, %v1677_v26 }
 0x264   :  { %v1687_v34 = vmul.f32 %v1483_v33, %v247_v60 }
 0x265   :  { %v1485_v35 = vpop.eup %1484 }
 0x266   :  { %v311_v37 = vmul.f32 %v1687_v34, %v1687_v34  ;;  %v1693_v38 = vmul.f32 %v1485_v35, %v250_v0  ;;  %v1437_v35 = vpack.c.bf16 %v1679_v29, %v1673_v22 }
 0x267   :  { %v1487_v39 = vpop.eup %1486  ;;  %315 = vadd.xlane.f32.xlu1 %v310_v36 }
 0x268   :  { %317 = vadd.xlane.f32.xlu0 %v311_v37  ;;  %v312_v40 = vmul.f32 %v1693_v38, %v1693_v38  ;;  %v1697_v41 = vmul.f32 %v1487_v39, %v255_v63  ;;  %v1440_v33 = vpack.c.bf16 %v1693_v38, %v1687_v34  ;;  %v1566_v37 = vmov 0.0   ;;  %v1463_v39 = vld [vmem:[%s1984_s6 + $0x10] sm:$0xff]  }
 0x269   :  { %v1489_v42 = vpop.eup %1488 }
 0x26a   :  { %v549_v43 = vmul.f32 %v1697_v41, %v1697_v41  ;;  %v1701_v44 = vmul.f32 %v1489_v42, %v258_v2  ;;  %v1466_v42 = vld [vmem:[%s1985_s7 + $0x20] sm:$0xff]  }
 0x26b   :  { %319 = vadd.xlane.f32.xlu1 %v312_v40  ;;  %v1464_v40 = vld [vmem:[%s1985_s7 + $0x18] sm:$0xff]  }
 0x26c   :  { %555 = vadd.xlane.f32.xlu0 %v549_v43  ;;  %v550_v45 = vmul.f32 %v1701_v44, %v1701_v44  ;;  %v1443_v36 = vpack.c.bf16 %v1701_v44, %v1697_v41  ;;  %v1467_v43 = vld [vmem:[%s1984_s6 + $0x20] sm:$0xff]  }
 0x26f   :  { %557 = vadd.xlane.f32.xlu1 %v550_v45 }
 0x299   :  { %768 = vxpose.xlu0.b32.start [1/4] (short) (narrow) %v764_v49, 8 }
 0x29d   :  { %769 = vxpose.xlu0.b32.cont [2/4] (short) (narrow) %v765_v50, 8  ;;  %v1470_v50 = vld [vmem:[%s1985_s7 + $0x30] sm:$0xff]  }
 0x2a1   :  { %770 = vxpose.xlu0.b32.cont [3/4] (short) (narrow) %v766_v52, 8 }
 0x2a5   :  { %771 = vxpose.xlu0.b32.end [4/4] (short) (narrow) %v767_v54, 8 }
 0x2ec   :  { %v552_v55 = vpop.xlane.xlu0 %551 }
 0x2ed   :  { %v559_v56 = vadd.f32 1e-24, %v552_v55  ;;  %v1472_v55 = vld [vmem:[%s1985_s7 + $0x38] sm:$0xff]  }
 0x2ef   :  { %1490 = vrsqrt.f32 %v559_v56  ;;  %v1473_v56 = vld [vmem:[%s1984_s6 + $0x38] sm:$0xff]  }
 0x2f0   :  { %v554_v57 = vpop.xlane.xlu1 %553  ;;  %v314_v58 = vpop.xlane.xlu0 %313 }
 0x2f1   :  { %v560_v59 = vadd.f32 1e-24, %v554_v57  ;;  %v321_v60 = vadd.f32 1e-24, %v314_v58 }
 0x2f3   :  { %1492 = vrsqrt.f32 %v560_v59 }
 0x2f4   :  { %1494 = vrsqrt.f32 %v321_v60  ;;  %v316_v61 = vpop.xlane.xlu1 %315 }
 0x2f5   :  { %v322_v62 = vadd.f32 1e-24, %v316_v61  ;;  %v318_v63 = vpop.xlane.xlu0 %317 }
 0x2f6   :  { %v323_v0 = vadd.f32 1e-24, %v318_v63 }
 0x2f7   :  { %1496 = vrsqrt.f32 %v322_v62 }
 0x2f8   :  { %v320_v1 = vpop.xlane.xlu1 %319  ;;  %1498 = vrsqrt.f32 %v323_v0 }
 0x2f9   :  { %v1491_v2 = vpop.eup %1490  ;;  %v324_v3 = vadd.f32 1e-24, %v320_v1  ;;  %v556_v4 = vpop.xlane.xlu0 %555 }
 0x2fa   :  { %v561_v5 = vadd.f32 1e-24, %v556_v4  ;;  %v567_v6 = vmul.f32 %v1491_v2, %v1673_v22  ;;  %v1459_v22 = vld [vmem:[%s1984_s6] sm:$0xff]  }
 0x2fb   :  { %1500 = vrsqrt.f32 %v324_v3 }
 0x2fc   :  { %v558_v7 = vpop.xlane.xlu1 %557  ;;  %1349 = vmatprep.mubr.f32.mxu1 %v567_v6  ;;  %1502 = vrsqrt.f32 %v561_v5 }
 0x2fd   :  { %v1493_v8 = vpop.eup %1492  ;;  %v562_v9 = vadd.f32 1e-24, %v558_v7 }
 0x2fe   :  { %v1495_v10 = vpop.eup %1494  ;;  %v568_v11 = vmul.f32 %v1493_v8, %v1679_v29  ;;  %v1460_v29 = vld [vmem:[%s1985_s7 + $0x8] sm:$0xff]  }
 0x2ff   :  { %1504 = vrsqrt.f32 %v562_v9  ;;  %v329_v12 = vmul.f32 %v1495_v10, %v1677_v26 }
 0x300   :  { %v1425_v13 = vpack.c.bf16 %v568_v11, %v567_v6 }
 0x301   :  { %v1497_v14 = vpop.eup %1496  ;;  %1335 = vmatprep.mubr.f32.mxu0 %v329_v12 }
 0x302   :  { %1426 = vmatprep.subr.bf16.mxu1 %v1425_v13  ;;  %v330_v15 = vmul.f32 %v1497_v14, %v1685_v32  ;;  %v1499_v16 = vpop.eup %1498  ;;  %v1458_v32 = vld [vmem:[%s1985_s7] sm:$0xff]  }
 0x303   :  { %1428 = vmatpush3.bf16.xpose.msra.mxu1 %v1425_v13  ;;  %v331_v19 = vmul.f32 %v1499_v16, %v1687_v34  ;;  %v1461_v34 = vld [vmem:[%s1984_s6 + $0x8] sm:$0xff]  }
 0x304   :  { %v1417_v17 = vpack.c.bf16 %v330_v15, %v329_v12 }
 0x305   :  { %v1501_v18 = vpop.eup %1500 }
 0x306   :  { %1418 = vmatprep.subr.bf16.mxu0 %v1417_v17  ;;  %v332_v20 = vmul.f32 %v1501_v18, %v1693_v38  ;;  %v1503_v21 = vpop.eup %1502  ;;  %v1462_v38 = vld [vmem:[%s1985_s7 + $0x10] sm:$0xff]  }
 0x307   :  { %1420 = vmatpush3.bf16.xpose.msra.mxu0 %v1417_v17  ;;  %v569_v25 = vmul.f32 %v1503_v21, %v1697_v41  ;;  %v1465_v41 = vld [vmem:[%s1984_s6 + $0x18] sm:$0xff]  }
 0x308   :  { %v1421_v23 = vpack.c.bf16 %v332_v20, %v331_v19 }
 0x309   :  { %v1505_v24 = vpop.eup %1504 }
 0x30a   :  { %1422 = vmatprep.subr.bf16.mxu0 %v1421_v23  ;;  %v570_v27 = vmul.f32 %v1505_v24, %v1701_v44  ;;  %v422_v44 = vlaneseq }
 0x30c   :  { %v1429_v28 = vpack.c.bf16 %v570_v27, %v569_v25  ;;  %v1776_v45 = vshrl.u32 %v422_v44, 7  ;;  %v1787_v49 = vand.u32 127, %v422_v44 }
 0x30e   :  { %1430 = vmatprep.subr.bf16.mxu1 %v1429_v28  ;;  %v424_v48 = vadd.s32 8, %v1776_v45  ;;  %v1798_v53 = vadd.s32 16, %v1776_v45  ;;  %v426_v54 = vadd.s32 24, %v1776_v45  ;;  %vm429_vm6 = vcmp.eq.s32.totalorder %v1776_v45, %v1787_v49 }
 0x30f   :  { %1424 = vmatpush3.bf16.xpose.msra.mxu0 %v1421_v23  ;;  %1432 = vmatpush3.bf16.xpose.msra.mxu1 %v1429_v28  ;;  %v433_v9 = vsel %vm429_vm6, 1e+09, %v1566_v37  ;;  %vm457_vm9 = vcmp.eq.s32.totalorder %v1787_v49, %v1776_v45 }
 0x310   :  { %1433 = vmatprep.subr.bf16.mxu0 %v1564_v30  ;;  %1439 = vmatprep.subr.bf16.mxu1 %v1564_v30  ;;  %v1795_v52 = vadd.s32 16, %v424_v48  ;;  %vm455_vm3 = vcmp.eq.s32.totalorder %v1787_v49, %v1798_v53  ;;  %v1813_v57 = vadd.s32 4294967280, %v426_v54  ;;  %vm430_vm5 = vcmp.eq.s32.totalorder %v424_v48, %v1787_v49 }
 0x311   :  { %v434_v59 = vsel %vm430_vm5, 1e+09, %v1566_v37  ;;  %vm431_vm7 = vcmp.eq.s32.totalorder %v1798_v53, %v1787_v49  ;;  %vm432_vm8 = vcmp.eq.s32.totalorder %v426_v54, %v1787_v49 }
 0x312   :  { %vm456_vm2 = vcmp.eq.s32.totalorder %v1787_v49, %v1795_v52  ;;  %vm458_vm4 = vcmp.eq.s32.totalorder %v1787_v49, %v1813_v57  ;;  %v435_v23 = vsel %vm431_vm7, 1e+09, %v1566_v37  ;;  %v436_v28 = vsel %vm432_vm8, 1e+09, %v1566_v37 }
 0x316   :  { %1336 = vmatmul.mubr.f32.vlgmr.msra.gmra.mrb[8].mxu0 %v330_v15  ;;  %1350 = vmatmul.mubr.f32.vlgmr.msra.gmra.mrb[8].mxu1 %v568_v11 }
 0x317   :  { %1338 = vmatprep.mubr.f32.mxu0 %v331_v19  ;;  %1352 = vmatprep.mubr.f32.mxu1 %v569_v25 }
 0x318   :  { %1435 = vmatpush3.bf16.msra.mxu0 %v1434_v31  ;;  %1441 = vmatpush3.bf16.msra.mxu1 %v1440_v33 }
 0x319   :  { %1436 = vmatprep.subr.bf16.mxu0 %v1564_v30  ;;  %1442 = vmatprep.subr.bf16.mxu1 %v1564_v30  ;;  %v784_v26 = vpop.trf.xlu0 }
 0x31a   :  { %1339 = vmatmul.mubr.f32.gmra.mrb[10].mxu0 %v332_v20  ;;  %1353 = vmatmul.mubr.f32.gmra.mrb[10].mxu1 %v570_v27 }
 0x31b   :  { %1363 = vmatprep.mubr.msk.f32.mxu0 %vm1565_vm1, %v1566_v37  ;;  %1374 = vmatprep.mubr.msk.f32.mxu1 %vm1565_vm1, %v1566_v37 }
 0x31c   :  { %1438 = vmatpush3.bf16.msra.mxu0 %v1437_v35  ;;  %1444 = vmatpush3.bf16.msra.mxu1 %v1443_v36 }
 0x31d   :  { %1377 = vmatprep.subr.bf16.mxu0 %v1566_v37  ;;  %1397 = vmatprep.subr.bf16.mxu1 %v1566_v37 }
 0x31f   :  { %1364 = vmatmul.mubr.msk.f32.vlgmr.msra.gmra.mrb[12].mxu0 %vm71_vm0, %v784_v26  ;;  %1375 = vmatmul.mubr.msk.f32.vlgmr.msra.gmra.mrb[12].mxu1 %vm71_vm0, %v784_v26 }
 0x320   :  { %1378 = vmatpush3.bf16.msra.mxu0 %v1458_v32  ;;  %1398 = vmatpush3.bf16.msra.mxu1 %v1459_v22 }
 0x321   :  { %1379 = vmatprep.subr.bf16.mxu0 %v1566_v37  ;;  %1399 = vmatprep.subr.bf16.mxu1 %v1566_v37 }
 0x322   :  { %1393 = vmatprep.mubr.msk.bf16.mxu0 %vm1565_vm1, %v1566_v37  ;;  %1413 = vmatprep.mubr.msk.bf16.mxu1 %vm1565_vm1, %v1566_v37 }
 0x324   :  { %1380 = vmatpush3.bf16.msra.mxu0 %v1460_v29  ;;  %1400 = vmatpush3.bf16.msra.mxu1 %v1461_v34 }
 0x325   :  { %1381 = vmatprep.subr.bf16.mxu0 %v1566_v37  ;;  %1401 = vmatprep.subr.bf16.mxu1 %v1566_v37 }
 0x328   :  { %1382 = vmatpush3.bf16.msra.mxu0 %v1462_v38  ;;  %1402 = vmatpush3.bf16.msra.mxu1 %v1463_v39 }
 0x329   :  { %1383 = vmatprep.subr.bf16.mxu0 %v1566_v37  ;;  %1403 = vmatprep.subr.bf16.mxu1 %v1566_v37 }
 0x32c   :  { %1384 = vmatpush3.bf16.msra.mxu0 %v1464_v40  ;;  %1404 = vmatpush3.bf16.msra.mxu1 %v1465_v41 }
 0x32d   :  { %1385 = vmatprep.subr.bf16.mxu0 %v1566_v37  ;;  %1405 = vmatprep.subr.bf16.mxu1 %v1566_v37 }
 0x330   :  { %1386 = vmatpush3.bf16.msra.mxu0 %v1466_v42  ;;  %1406 = vmatpush3.bf16.msra.mxu1 %v1467_v43 }
 0x331   :  { %1387 = vmatprep.subr.bf16.mxu0 %v1566_v37  ;;  %1407 = vmatprep.subr.bf16.mxu1 %v1566_v37 }
 0x334   :  { %1388 = vmatpush3.bf16.msra.mxu0 %v1468_v46  ;;  %1408 = vmatpush3.bf16.msra.mxu1 %v1469_v47 }
 0x335   :  { %1389 = vmatprep.subr.bf16.mxu0 %v1566_v37  ;;  %1409 = vmatprep.subr.bf16.mxu1 %v1566_v37 }
 0x338   :  { %1390 = vmatpush3.bf16.msra.mxu0 %v1470_v50  ;;  %1410 = vmatpush3.bf16.msra.mxu1 %v1471_v51 }
 0x339   :  { %1391 = vmatprep.subr.bf16.mxu0 %v1566_v37  ;;  %1411 = vmatprep.subr.bf16.mxu1 %v1566_v37 }
 0x33c   :  { %1392 = vmatpush3.bf16.msra.mxu0 %v1472_v55  ;;  %1412 = vmatpush3.bf16.msra.mxu1 %v1473_v56 }
 0x3e9   :  { %v1337_v58 = vpop.f32.mrb[8].mxu0  ;;  %v1351_v60 = vpop.f32.mrb[8].mxu1 }
 0x3ea   :  { %v419_v61 = vmul.f32 2.0, %v1337_v58  ;;  %v657_v62 = vmul.f32 2.0, %v1351_v60  ;;  %v399_v63 = vpop.f32.mrb[9].mxu0  ;;  %v637_v0 = vpop.f32.mrb[9].mxu1 }
 0x3eb   :  { %v656_v5 = vmul.f32 2.0, %v637_v0  ;;  %v418_v10 = vmul.f32 2.0, %v399_v63 }
 0x3ec   :  { %v1819_v1 = vsub.f32 %v657_v62, %v434_v59  ;;  %v1823_v4 = vsub.f32 %v419_v61, %v434_v59 }
 0x3ed   :  { %v1340_v2 = vpop.f32.mrb[10].mxu0  ;;  %v1354_v3 = vpop.f32.mrb[10].mxu1  ;;  %v1828_v11 = vsub.f32 %v656_v5, %v433_v9  ;;  %v437_v19 = vsub.f32 %v418_v10, %v433_v9 }
 0x3ee   :  { %v409_v6 = vpop.f32.mrb[11].mxu0  ;;  %v647_v7 = vpop.f32.mrb[11].mxu1  ;;  %v683_v8 = vsel %vm71_vm0, %v1819_v1, -inf  ;;  %v478_v14 = vsel %vm71_vm0, %v1823_v4, -inf  ;;  %v421_v24 = vmul.f32 2.0, %v1340_v2  ;;  %v659_v35 = vmul.f32 2.0, %v1354_v3 }
 0x3ef   :  { %684 = vmax.xlane.f32.xlu1 %v683_v8  ;;  %v658_v20 = vmul.f32 2.0, %v647_v7  ;;  %v680_v21 = vsel %vm71_vm0, %v1828_v11, -inf  ;;  %v475_v27 = vsel %vm71_vm0, %v437_v19, -inf  ;;  %v420_v31 = vmul.f32 2.0, %v409_v6 }
 0x3f0   :  { %v1842_v30 = vsub.f32 %v421_v24, %v436_v28  ;;  %v1850_v32 = vsub.f32 %v659_v35, %v436_v28  ;;  %v459_v7 = vsel %vm455_vm3, %v437_v19, 0.0 }
 0x3f1   :  { %v1838_v25 = vsub.f32 %v658_v20, %v435_v23  ;;  %v1846_v36 = vsub.f32 %v420_v31, %v435_v23 }
 0x3f2   :  { %v869_v12 = vpop.f32.mrb[12].mxu0  ;;  %v939_v13 = vpop.f32.mrb[12].mxu1  ;;  %v484_v26 = vsel %vm71_vm0, %v1842_v30, -inf  ;;  %v689_v22 = vsel %vm71_vm0, %v1850_v32, -inf  ;;  %v462_v52 = vsel %vm458_vm4, %v1842_v30, 0.0 }
 0x3f3   :  { %v944_v15 = vpack.c.bf16 %v869_v12, %v869_v12  ;;  %v961_v16 = vpack.c.bf16 %v939_v13, %v939_v13  ;;  %479 = vmax.xlane.f32.xlu1 %v478_v14  ;;  %v1365_v17 = vpop.f32.mrb[13].mxu0  ;;  %v1376_v18 = vpop.f32.mrb[13].mxu1  ;;  %v686_v33 = vsel %vm71_vm0, %v1838_v25, -inf  ;;  %v481_v37 = vsel %vm71_vm0, %v1846_v36, -inf }
 0x3f4   :  { %v463_v12 = vsel %vm71_vm0, %v459_v7, 0.0  ;;  %v460_v13 = vsel %vm456_vm2, %v1823_v4, 0.0  ;;  %v461_v28 = vsel %vm457_vm9, %v1846_v36, 0.0 }
 0x3f5   :  { %1394 = vmatmul.mubr.bf16.vlgmr.msra.gmra.mrb[16].mxu0 %v961_v16  ;;  %1414 = vmatmul.mubr.bf16.vlgmr.msra.gmra.mrb[16].mxu1 %v944_v15  ;;  %v466_v15 = vsel %vm71_vm0, %v460_v13, 0.0  ;;  %v664_v16 = vsel %vm455_vm3, %v1828_v11, 0.0  ;;  %v469_v31 = vsel %vm71_vm0, %v461_v28, 0.0 }
 0x3f6   :  { %v668_v17 = vsel %vm71_vm0, %v664_v16, 0.0 }
 0x3f7   :  { %681 = vmax.xlane.f32.xlu1 %v680_v21 }
 0x3fb   :  { %476 = vmax.xlane.f32.xlu1 %v475_v27 }
 0x3ff   :  { %687 = vmax.xlane.f32.xlu1 %v686_v33  ;;  %v666_v33 = vsel %vm457_vm9, %v1838_v25, 0.0 }
 0x400   :  { %v674_v35 = vsel %vm71_vm0, %v666_v33, 0.0 }
 0x403   :  { %485 = vmax.xlane.f32.xlu1 %v484_v26  ;;  %v1156_v26 = vsub.s32 0, %v1776_v45 }
 0x407   :  { %482 = vmax.xlane.f32.xlu1 %v481_v37  ;;  %v1934_v37 = vld [vmem:[%s1986_s8] sm:$0x7] }
 0x40b   :  { %690 = vmax.xlane.f32.xlu1 %v689_v22 }
 0x47c   :  { %v1856_v29 = vpop.xlane.xlu1 %684 }
 0x47d   :  { %v693_v34 = vsub.f32 %v1819_v1, %v1856_v29 }
 0x47f   :  { %v698_v38 = vmul.f32 1.442695, %v693_v34 }
 0x480   :  { %v1860_v39 = vpop.xlane.xlu1 %479 }
 0x481   :  { %1506 = vpow2.f32 %v698_v38  ;;  %v488_v40 = vsub.f32 %v1823_v4, %v1860_v39 }
 0x483   :  { %v493_v41 = vmul.f32 1.442695, %v488_v40 }
 0x484   :  { %v1864_v42 = vpop.xlane.xlu1 %681 }
 0x485   :  { %1508 = vpow2.f32 %v493_v41  ;;  %v692_v43 = vsub.f32 %v1828_v11, %v1864_v42  ;;  %v665_v11 = vsel %vm456_vm2, %v1819_v1, 0.0  ;;  %v472_v1 = vsel %vm71_vm0, %v462_v52, 0.0 }
 0x486   :  { %v671_v27 = vsel %vm71_vm0, %v665_v11, 0.0 }
 0x487   :  { %v696_v44 = vmul.f32 1.442695, %v692_v43 }
 0x488   :  { %v1868_v46 = vpop.xlane.xlu1 %476 }
 0x489   :  { %1510 = vpow2.f32 %v696_v44  ;;  %v487_v47 = vsub.f32 %v437_v19, %v1868_v46 }
 0x48b   :  { %v1507_v48 = vpop.eup %1506  ;;  %v491_v50 = vmul.f32 1.442695, %v487_v47 }
 0x48c   :  { %v1871_v51 = vpop.xlane.xlu1 %687  ;;  %v707_v54 = vsel %vm71_vm0, %v1507_v48, 0.0 }
 0x48d   :  { %1512 = vpow2.f32 %v491_v50  ;;  %708 = vadd.xlane.f32.xlu1 %v707_v54  ;;  %v694_v60 = vsub.f32 %v1838_v25, %v1871_v51 }
 0x48f   :  { %v1509_v55 = vpop.eup %1508  ;;  %v700_v0 = vmul.f32 1.442695, %v694_v60 }
 0x490   :  { %v1874_v56 = vpop.xlane.xlu1 %485  ;;  %v502_v58 = vsel %vm71_vm0, %v1509_v55, 0.0 }
 0x491   :  { %503 = vadd.xlane.f32.xlu1 %v502_v58  ;;  %v490_v2 = vsub.f32 %v1842_v30, %v1874_v56  ;;  %1514 = vpow2.f32 %v700_v0  ;;  %v1157_v30 = vrot.slane %v1934_v37, %v1156_v26 }
 0x493   :  { %v1511_v59 = vpop.eup %1510  ;;  %v497_v8 = vmul.f32 1.442695, %v490_v2 }
 0x494   :  { %v1879_v61 = vpop.xlane.xlu1 %482  ;;  %v704_v62 = vsel %vm71_vm0, %v1511_v59, 0.0 }
 0x495   :  { %705 = vadd.xlane.f32.xlu1 %v704_v62  ;;  %v489_v9 = vsub.f32 %v1846_v36, %v1879_v61  ;;  %v667_v36 = vsel %vm458_vm4, %v1850_v32, 0.0 }
 0x496   :  { %v677_v25 = vsel %vm71_vm0, %v667_v36, 0.0 }
 0x497   :  { %v1513_v63 = vpop.eup %1512  ;;  %v495_v14 = vmul.f32 1.442695, %v489_v9 }
 0x498   :  { %v1884_v3 = vpop.xlane.xlu1 %690  ;;  %v499_v5 = vsel %vm71_vm0, %v1513_v63, 0.0 }
 0x499   :  { %v695_v6 = vsub.f32 %v1850_v32, %v1884_v3  ;;  %500 = vadd.xlane.f32.xlu1 %v499_v5 }
 0x49b   :  { %v702_v10 = vmul.f32 1.442695, %v695_v6  ;;  %v1515_v18 = vpop.eup %1514 }
 0x49c   :  { %v710_v20 = vsel %vm71_vm0, %v1515_v18, 0.0 }
 0x49d   :  { %1516 = vpow2.f32 %v702_v10  ;;  %464 = vadd.xlane.f32.xlu1 %v463_v12 }
 0x49e   :  { %1518 = vpow2.f32 %v497_v8 }
 0x49f   :  { %1520 = vpow2.f32 %v495_v14 }
 0x4a1   :  { %467 = vadd.xlane.f32.xlu1 %v466_v15 }
 0x4a5   :  { %669 = vadd.xlane.f32.xlu1 %v668_v17 }
 0x4a7   :  { %v1517_v19 = vpop.eup %1516 }
 0x4a8   :  { %v713_v4 = vsel %vm71_vm0, %v1517_v19, 0.0  ;;  %v1519_v21 = vpop.eup %1518 }
 0x4a9   :  { %711 = vadd.xlane.f32.xlu1 %v710_v20  ;;  %714 = vadd.xlane.f32.xlu0 %v713_v4  ;;  %v508_v23 = vsel %vm71_vm0, %v1519_v21, 0.0  ;;  %v1521_v24 = vpop.eup %1520 }
 0x4aa   :  { %v505_v53 = vsel %vm71_vm0, %v1521_v24, 0.0 }
 0x4ad   :  { %509 = vadd.xlane.f32.xlu1 %v508_v23 }
 0x4b1   :  { %506 = vadd.xlane.f32.xlu1 %v505_v53 }
 0x4b5   :  { %672 = vadd.xlane.f32.xlu1 %v671_v27 }
 0x4b9   :  { %470 = vadd.xlane.f32.xlu1 %v469_v31 }
 0x4bd   :  { %675 = vadd.xlane.f32.xlu1 %v674_v35 }
 0x4c1   :  { %473 = vadd.xlane.f32.xlu1 %v472_v1 }
 0x4c5   :  { %678 = vadd.xlane.f32.xlu1 %v677_v25 }
 0x4c8   :  { %v1060_v22 = vpop.f32.mrb[16].mxu0  ;;  %v1148_v34 = vpop.f32.mrb[16].mxu1 }
 0x4c9   :  { %v1149_v38 = vadd.f32 %v1148_v34, %v1060_v22  ;;  %v1395_v40 = vpop.f32.mrb[17].mxu0  ;;  %v1415_v41 = vpop.f32.mrb[17].mxu1 }
 0x4ca   :  { %v1063_v49 = vpop.f32.mrb[18].mxu0  ;;  %v1151_v57 = vpop.f32.mrb[18].mxu1 }
 0x4cb   :  { %v1937_v32 = vadd.f32 %v1157_v30, %v1149_v38  ;;  %v1396_v43 = vpop.f32.mrb[19].mxu0  ;;  %v1416_v44 = vpop.f32.mrb[19].mxu1 }
 0x4cd   :  { %v1160_v47 = vsel %vm1159_vm10, %v1937_v32, 0.0 }
 0x4ce   :  { %1161 = vadd.xlane.f32.xlu1 %v1160_v47 }
 0x51a   :  { %v709_v48 = vpop.xlane.xlu1 %708 }
 0x51e   :  { %v504_v50 = vpop.xlane.xlu1 %503 }
 0x522   :  { %v706_v54 = vpop.xlane.xlu1 %705 }
 0x526   :  { %v501_v55 = vpop.xlane.xlu1 %500 }
 0x527   :  { %1522 = vlog2.f32 %v501_v55 }
 0x528   :  { %1524 = vlog2.f32 %v504_v50 }
 0x529   :  { %1526 = vlog2.f32 %v706_v54 }
 0x52a   :  { %v465_v58 = vpop.xlane.xlu1 %464  ;;  %1528 = vlog2.f32 %v709_v48 }
 0x52e   :  { %v468_v59 = vpop.xlane.xlu1 %467 }
 0x531   :  { %v1523_v0 = vpop.eup %1522 }
 0x532   :  { %v670_v60 = vpop.xlane.xlu1 %669  ;;  %v1525_v6 = vpop.eup %1524  ;;  %v512_v7 = vmul.f32 0.6931472, %v1523_v0 }
 0x533   :  { %v1527_v8 = vpop.eup %1526  ;;  %v514_v10 = vmul.f32 0.6931472, %v1525_v6 }
 0x534   :  { %v1529_v9 = vpop.eup %1528  ;;  %v717_v14 = vmul.f32 0.6931472, %v1527_v8  ;;  %v519_v15 = vadd.f32 %v512_v7, %v1868_v46 }
 0x535   :  { %v719_v16 = vmul.f32 0.6931472, %v1529_v9  ;;  %v520_v18 = vadd.f32 %v514_v10, %v1860_v39 }
 0x536   :  { %v712_v62 = vpop.xlane.xlu1 %711  ;;  %v715_v2 = vpop.xlane.xlu0 %714  ;;  %v523_v4 = vsub.f32 %v519_v15, %v465_v58  ;;  %v724_v21 = vadd.f32 %v717_v14, %v1864_v42 }
 0x537   :  { %1530 = vlog2.f32 %v712_v62  ;;  %v725_v53 = vadd.f32 %v719_v16, %v1856_v29  ;;  %v524_v27 = vsub.f32 %v520_v18, %v468_v59  ;;  %v1181_v18 = vsub.s32 2, %v1776_v45 }
 0x538   :  { %v528_v35 = vsel %vm527_vm11, %v523_v4, 0.0  ;;  %v728_v39 = vsub.f32 %v724_v21, %v670_v60 }
 0x539   :  { %v529_v26 = vsel %vm527_vm11, %v524_v27, 0.0  ;;  %v1182_v4 = vrot.slane %v1934_v37, %v1181_v18 }
 0x53a   :  { %v510_v63 = vpop.xlane.xlu1 %509  ;;  %v530_v30 = vadd.f32 %v529_v26, %v528_v35  ;;  %v732_v38 = vsel %vm527_vm11, %v728_v39, 0.0 }
 0x53b   :  { %1532 = vlog2.f32 %v510_v63 }
 0x53e   :  { %v507_v5 = vpop.xlane.xlu1 %506 }
 0x53f   :  { %1534 = vlog2.f32 %v507_v5 }
 0x540   :  { %1536 = vlog2.f32 %v715_v2 }
 0x541   :  { %v1531_v13 = vpop.eup %1530 }
 0x542   :  { %v673_v12 = vpop.xlane.xlu1 %672  ;;  %v721_v20 = vmul.f32 0.6931472, %v1531_v13 }
 0x543   :  { %v729_v33 = vsub.f32 %v725_v53, %v673_v12 }
 0x544   :  { %v726_v46 = vadd.f32 %v721_v20, %v1871_v51 }
 0x545   :  { %v1533_v17 = vpop.eup %1532  ;;  %v733_v22 = vsel %vm527_vm11, %v729_v33, 0.0 }
 0x546   :  { %v471_v19 = vpop.xlane.xlu1 %470  ;;  %v518_v24 = vmul.f32 0.6931472, %v1533_v17  ;;  %v1176_v17 = vsub.s32 1, %v1776_v45 }
 0x548   :  { %v522_v42 = vadd.f32 %v518_v24, %v1874_v56  ;;  %v734_v56 = vadd.f32 %v733_v22, %v732_v38 }
 0x549   :  { %v1535_v23 = vpop.eup %1534 }
 0x54a   :  { %v1537_v11 = vpop.eup %1536  ;;  %v516_v28 = vmul.f32 0.6931472, %v1535_v23  ;;  %v676_v31 = vpop.xlane.xlu1 %675 }
 0x54b   :  { %v723_v1 = vmul.f32 0.6931472, %v1537_v11  ;;  %v730_v36 = vsub.f32 %v726_v46, %v676_v31 }
 0x54c   :  { %v521_v52 = vadd.f32 %v516_v28, %v1879_v61 }
 0x54d   :  { %v735_v40 = vsel %vm527_vm11, %v730_v36, 0.0  ;;  %v727_v61 = vadd.f32 %v723_v1, %v1884_v3 }
 0x54e   :  { %v525_v29 = vsub.f32 %v521_v52, %v471_v19  ;;  %v474_v25 = vpop.xlane.xlu1 %473  ;;  %v736_v47 = vadd.f32 %v735_v40, %v734_v56  ;;  %v1177_v19 = vrot.slane %v1934_v37, %v1176_v17 }
 0x54f   :  { %v526_v34 = vsub.f32 %v522_v42, %v474_v25 }
 0x550   :  { %v531_v51 = vsel %vm527_vm11, %v525_v29, 0.0 }
 0x551   :  { %v532_v41 = vadd.f32 %v531_v51, %v530_v30  ;;  %v533_v49 = vsel %vm527_vm11, %v526_v34, 0.0 }
 0x552   :  { %v679_v57 = vpop.xlane.xlu1 %678 }
 0x553   :  { %v731_v43 = vsub.f32 %v727_v61, %v679_v57  ;;  %v534_v44 = vadd.f32 %v533_v49, %v532_v41 }
 0x555   :  { %535 = vadd.xlane.f32.xlu1 %v534_v44  ;;  %v737_v48 = vsel %vm527_vm11, %v731_v43, 0.0 }
 0x556   :  { %v738_v50 = vadd.f32 %v737_v48, %v736_v47 }
 0x559   :  { %739 = vadd.xlane.f32.xlu1 %v738_v50 }
 0x55b   :  { %v1162_v54 = vpop.xlane.xlu1 %1161 }
 0x55c   :  { %v1164_v55 = vmul.f32 0.0078125, %v1162_v54 }
 0x55e   :  { %v1165_v58 = vsub.f32 %v1937_v32, %v1164_v55 }
 0x560   :  { %v1166_v59 = vmul.f32 %v1165_v58, %v1165_v58 }
 0x562   :  { %v1167_v3 = vsel %vm1159_vm10, %v1166_v59, 0.0 }
 0x563   :  { %1168 = vadd.xlane.f32.xlu0 %v1167_v3 }
 0x5e2   :  { %v536_v60 = vpop.xlane.xlu1 %535 }
 0x5e3   :  { %v537_v62 = vrot.slane %v536_v60, 4 }
 0x5e5   :  { %v538_v63 = vadd.f32 %v537_v62, %v536_v60 }
 0x5e6   :  { %v740_v0 = vpop.xlane.xlu1 %739 }
 0x5e7   :  { %v539_v2 = vrot.slane %v538_v63, 2  ;;  %v741_v5 = vrot.slane %v740_v0, 4 }
 0x5e9   :  { %v742_v6 = vadd.f32 %v741_v5, %v740_v0  ;;  %v540_v7 = vadd.f32 %v539_v2, %v538_v63 }
 0x5eb   :  { %v743_v8 = vrot.slane %v742_v6, 2  ;;  %v541_v9 = vrot.slane %v540_v7, 1 }
 0x5ed   :  { %v744_v10 = vadd.f32 %v743_v8, %v742_v6  ;;  %v542_v12 = vadd.f32 %v541_v9, %v540_v7 }
 0x5ef   :  { %1446 = vpush %v542_v12  ;;  %v745_v13 = vrot.slane %v744_v10, 1 }
 0x5f0   :  { %v1169_v14 = vpop.xlane.xlu0 %1168 }
 0x5f1   :  { %v1170_v32 = vmul.f32 0.0078125, %v1169_v14  ;;  %v746_v15 = vadd.f32 %v745_v13, %v744_v10 }
 0x5f3   :  { %v1171_v16 = vadd.f32 1e-05, %v1170_v32  ;;  %1448 = vpush %v746_v15 }
 0x5f5   :  { %1538 = vrsqrt.f32 %v1171_v16 }
 0x5ff   :  { %v1539_v20 = vpop.eup %1538 }
 0x600   :  { %v1173_v21 = vmul.f32 %v1539_v20, %v1165_v58 }
 0x602   :  { %v1178_v23 = vmul.f32 %v1177_v19, %v1173_v21 }
 0x604   :  { %v1183_v24 = vadd.f32 %v1182_v4, %v1178_v23 }
 0x606   :  { %v1184_v53 = vmax.f32 %v1183_v24, 0.0 }
 0x608   :  { %1185 = vst [vmem:[%s1988_s10] sm:$0xf] %v1184_v53 }
 0x620   :  { %s1447_s24 = spop %1446 }
 0x621   :  { %s546_s2 = smul.f32 0.03125, %s1447_s24 }
 0x624   :  { %s1449_s25 = spop %1448 }
 0x625   :  { %s750_s26 = smul.f32 0.03125, %s1449_s25 }
 0x627   :  { %s751_s27 = sadd.f32 %s750_s26, %s546_s2 }
 0x629   :  { %s752_s30 = smul.f32 0.5, %s751_s27 }
 0x62b   :  { %v753_v45 = vstv %s752_s30 }
 0x62c   :  { %755 = vst.msk [vmem:[#allocation2] sm:$0x1] %vm754_vm12, %v753_v45 }
 0x62d   :  { %1551 = shalt.err (!%p1548_p4)
}
 0x62e   :  { %s1552_s14 = scalar_lea.hbm %s1987_s9, 16 }
 0x62f   :  { %p1553_p5 = scmp.ne.s32.totalorder %s1987_s9, %s1552_s14  ;;  %p1556_p6 = scmp.lt.u32.totalorder %s1552_s14, %s1987_s9 }
 0x631   :  { %p1558_p7 = pnand %p1556_p6, %p1553_p5 }
 0x633   :  { %1561 = shalt.err (!%p1558_p7)
}
 0x634   :  { %1195 = dma.vmem_to_hbm [thread:$0]  %s1193_s29, 16, %s1987_s9, [#allocation3]  }
 0x635   :  { %1562 = dma.done.wait [#allocation3], 16  }
 0x636   :  { %1563 = vsyncadd [#allocation3], 4294967280 }
 0x637   :  { %1203 = vsyncpa [#allocation3], 1 }

// kernel: fwd.5
= control target key start
LH: loop header
LB: loop body
LE: loop exit
PB: predicated region body
PF: predicated region fallthrough
CT: control target
= control target key end

     0   :  { %vm94_vm0 = vcmask 261120   ;;  %s3361_s0 = inlined_call_operand.vmem [shape: f32[32,32], index: 0, kind: input, shape index: {}]   ;;  %s3362_s1 = inlined_call_operand.vmem [shape: s8[32,32], index: 1, kind: input, shape index: {}]   ;;  %s3363_s2 = inlined_call_operand.vmem [shape: s8[32,32], index: 2, kind: input, shape index: {}]   ;;  %s3364_s3 = inlined_call_operand.vmem [shape: s8[32,4], index: 3, kind: input, shape index: {}]   ;;  %s3365_s4 = inlined_call_operand.vmem [shape: bf16[32,32], index: 4, kind: input, shape index: {}]   ;;  %s3366_s5 = inlined_call_operand.vmem [shape: f32[32,2], index: 5, kind: input, shape index: {}]   ;;  %s3367_s6 = inlined_call_operand.vmem [shape: f32[32,2], index: 6, kind: input, shape index: {}]   ;;  %s3368_s7 = inlined_call_operand.vmem [shape: bf16[32,96], index: 7, kind: input, shape index: {}]   ;;  %s3369_s8 = inlined_call_operand.vmem [shape: bf16[64,32], index: 8, kind: input, shape index: {}]   ;;  %s3370_s9 = inlined_call_operand.vmem [shape: f32[16,32], index: 9, kind: input, shape index: {}]   ;;  %s3371_s10 = inlined_call_operand.vmem [shape: f32[4,32], index: 10, kind: output, shape index: {0}]   ;;  %s3372_s11 = inlined_call_operand.hbm [shape: f32[32,32], index: 11, kind: output, shape index: {1}]   ;;  %s3373_s12 = inlined_call_operand.vmem [shape: f32[64,32], index: 12, kind: output, shape index: {2}]  }
   0x1   :  { %v2599_v0 = vld [vmem:[%s3365_s4] sm:$0xff]   ;;  %v2600_v1 = vld [vmem:[%s3365_s4 + $0x8] sm:$0xff]   ;;  %v42_v4 = vld [vmem:[%s3361_s0 + $0x10] sm:$0xff] }
   0x2   :  { %2322 = vmatprep.subr.bf16.mxu0 %v2599_v0  ;;  %v40_v2 = vld [vmem:[%s3361_s0] sm:$0xff]  ;;  %v41_v3 = vld [vmem:[%s3361_s0 + $0x8] sm:$0xff]  ;;  %v43_v6 = vld [vmem:[%s3361_s0 + $0x18] sm:$0xff] }
   0x3   :  { %2323 = vmatpush3.bf16.msra.mxu0 %v2599_v0  ;;  %v76_v5 = vpack.c.bf16 %v41_v3, %v40_v2  ;;  %v150_v7 = vld [vmem:[%s3367_s6] sm:$0xff]  ;;  %v151_v8 = vld [vmem:[%s3367_s6 + $0x8] sm:$0xff]  ;;  %v77_v10 = vpack.c.bf16 %v43_v6, %v42_v4 }
   0x4   :  { %2324 = vmatprep.subr.bf16.mxu0 %v2600_v1  ;;  %v2479_v9 = vpack.c.bf16 %v151_v8, %v150_v7 }
   0x5   :  { %2326 = vmatprep.mubr.msk.bf16.mxu0 %vm94_vm0, %v76_v5 }
   0x6   :  { %2480 = vmatprep.subr.bf16.mxu1 %v2479_v9 }
   0x7   :  { %2325 = vmatpush3.bf16.msra.mxu0 %v2600_v1  ;;  %2482 = vmatpush3.bf16.msra.mxu1 %v2479_v9 }
   0x8   :  { %18 = vsyncpa [#allocation4], 0  ;;  %v152_v11 = vld [vmem:[%s3367_s6 + $0x10] sm:$0xff]  ;;  %v153_v12 = vld [vmem:[%s3367_s6 + $0x18] sm:$0xff]  ;;  %v2738_v16 = vmov 0.0|0.0   ;;  %vm2739_vm1 = vmmov 0   ;;  %v380_v38 = vlaneseq }
   0x9   :  { %v2483_v13 = vpack.c.bf16 %v153_v12, %v152_v11  ;;  %v251_v14 = vld [vmem:[%s3366_s5] sm:$0xff]  ;;  %v252_v15 = vld [vmem:[%s3366_s5 + $0x8] sm:$0xff]  ;;  %2487 = vmatprep.subr.bf16.mxu0 %v2738_v16  ;;  %v253_v17 = vld [vmem:[%s3366_s5 + $0x10] sm:$0xff]  ;;  %v2740_v19 = vmov 0.0   ;;  %v2741_v20 = vmov 0   ;;  %v2742_v31 = vmov 1  }
   0xa   :  { %2327 = vmatmul.mubr.msk.bf16.vlgmr.msra.gmra.mrb[0].mxu0 %vm94_vm0, %v77_v10  ;;  %255 = vxpose.xlu0.b32.start [1/4] (short) (narrow) %v251_v14, 8  ;;  %v254_v18 = vld [vmem:[%s3366_s5 + $0x18] sm:$0xff]  ;;  %vm2878_vm2 = vmpackc.low %vm94_vm0, %vm94_vm0  ;;  %v2899_v39 = vshrl.u32 %v380_v38, 7  ;;  %v44_v40 = vld [vmem:[%s3362_s1] sm:$0xff]  ;;  %s2743_s1 = smov 112   ;;  %vm557_vm15 = vcmask 130048  }
   0xb   :  { %2484 = vmatprep.subr.bf16.mxu1 %v2483_v13  ;;  %2352 = vmatprep.mubr.msk.f32.mxu0 %vm2739_vm1, %v2740_v19  ;;  %v46_v43 = vunpack.c.1.s8 %v44_v40  ;;  %v45_v48 = vunpack.c.0.s8 %v44_v40  ;;  %v48_v55 = vunpack.c.3.s8 %v44_v40  ;;  %v47_v3 = vunpack.c.2.s8 %v44_v40  ;;  %s2744_s29 = smov 16   ;;  %s2745_s0 = smov 96  }
   0xc   :  { %2486 = vmatpush3.bf16.msra.mxu1 %v2483_v13  ;;  %2574 = vset.pattern.permute.xlu1 %v2741_v20  ;;  %v2905_v41 = vsub.s32 0, %v2899_v39  ;;  %v580_v42 = vsub.s32 1, %v2899_v39  ;;  %s2746_s18 = smov 64  }
   0xd   :  { %v2913_v46 = vcvt.s32.f32 %v46_v43  ;;  %v2917_v54 = vcvt.s32.f32 %v45_v48  ;;  %v2923_v63 = vcvt.s32.f32 %v48_v55  ;;  %v2931_v11 = vcvt.s32.f32 %v47_v3 }
   0xe   :  { %256 = vxpose.xlu0.b32.cont [2/4] (short) (narrow) %v252_v15, 8 }
   0xf   :  { %vm401_vm4 = vcmp.gt.f32.partialorder %v2913_v46, 0.0  ;;  %vm400_vm7 = vcmp.gt.f32.partialorder %v2917_v54, 0.0  ;;  %vm403_vm9 = vcmp.gt.f32.partialorder %v2923_v63, 0.0  ;;  %vm402_vm11 = vcmp.gt.f32.partialorder %v2931_v11, 0.0 }
  0x12   :  { %257 = vxpose.xlu0.b32.cont [3/4] (short) (narrow) %v253_v17, 8 }
  0x16   :  { %258 = vxpose.xlu0.b32.end [4/4] (short) (narrow) %v254_v18, 8 }
  0x3f   :  { %2575 = vset.pattern.permute.xlu0 %v2742_v31 }
  0x8a   :  { %v271_v30 = vpop.trf.xlu0 }
  0xdd   :  { %v2862_v21 = vpop.f32.mrb[0].mxu0 }
  0xde   :  { %v2864_v22 = vpop.f32.mrb[1].mxu0 }
  0xdf   :  { %v2866_v23 = vpop.f32.mrb[2].mxu0  ;;  %2338 = vmatprep.mubr.msk.f32.mxu1 %vm94_vm0, %v2864_v22 }
  0xe0   :  { %v2582_v24 = vpack.i.bf16 %v2866_v23, %v2862_v21  ;;  %v2492_v25 = vpack.c.bf16 %v2866_v23, %v2862_v21  ;;  %v2874_v26 = vpop.f32.mrb[3].mxu0 }
  0xe1   :  { %v2577_v28 = vpack.i.bf16 %v2874_v26, %v2864_v22  ;;  %v2488_v29 = vpack.c.bf16 %v2874_v26, %v2864_v22  ;;  %2339 = vmatmul.mubr.msk.f32.vlgmr.msra.gmra.mrb[0].mxu1 %vm94_vm0, %v2874_v26 }
  0xe2   :  { %2341 = vmatprep.mubr.msk.f32.mxu1 %vm94_vm0, %v2862_v21 }
  0xe3   :  { %2490 = vmatpush3.bf16.xpose.msk.msra.mxu0 %vm2878_vm2, %v2488_v29  ;;  %2496 = vmatprep.subr.bf16.mxu1 %v2488_v29 }
  0xe4   :  { %2498 = vmatpush3.bf16.msra.mxu1 %v2488_v29  ;;  %2491 = vmatprep.subr.bf16.mxu0 %v2738_v16 }
  0xe5   :  { %2342 = vmatmul.mubr.msk.f32.gmra.mrb[2].mxu1 %vm94_vm0, %v2866_v23  ;;  %2500 = vmatprep.subr.bf16.mxu1 %v2492_v25 }
  0xe8   :  { %2502 = vmatpush3.bf16.msra.mxu1 %v2492_v25 }
  0xeb   :  { %2494 = vmatpush3.bf16.xpose.msk.msra.mxu0 %vm2878_vm2, %v2492_v25 }
  0xf2   :  { %2353 = vmatmul.mubr.msk.f32.vlgmr.msra.gmra.mrb[4].mxu0 %vm94_vm0, %v271_v30 }
 0x1b4   :  { %v2340_v32 = vpop.f32.mrb[0].mxu1 }
 0x1b5   :  { %367 = vperm.xlu1 %2574, %v2340_v32   ;;  %v232_v33 = vpop.f32.mrb[1].mxu1 }
 0x1b6   :  { %563 = vperm.xlu0 %2575, %v232_v33  }
 0x1b8   :  { %v2343_v34 = vpop.f32.mrb[2].mxu1 }
 0x1b9   :  { %362 = vperm.xlu1 %2574, %v232_v33   ;;  %v242_v35 = vpop.f32.mrb[3].mxu1 }
 0x1ba   :  { %2598 = vset.pattern.permute.xlu0 %v2741_v20 }
 0x1bd   :  { %377 = vperm.xlu1 %2574, %v2343_v34  }
 0x1c1   :  { %372 = vperm.xlu1 %2574, %v242_v35  }
 0x1c5   :  { %2576 = vset.pattern.permute.xlu1 %v2742_v31  ;;  %v356_v36 = vpop.f32.mrb[4].mxu0 }
 0x1c6   :  { %567 = vperm.xlu1 %2576, %v2340_v32   ;;  %v2354_v37 = vpop.f32.mrb[5].mxu0  ;;  %v383_v44 = vrot.slane %v356_v36, %v2905_v41  ;;  %v2911_v45 = vrot.slane %v356_v36, %v580_v42 }
 0x1ca   :  { %571 = vperm.xlu1 %2576, %v242_v35  }
 0x1ce   :  { %575 = vperm.xlu1 %2576, %v2343_v34  }
 0x1d2   :  { %2597 = vset.pattern.permute.xlu1 %v2741_v20 }
 0x234   :  { %v368_v47 = vpop.permute.xlu1 %367 }
 0x235   :  { %v385_v49 = vadd.f32 %v383_v44, %v368_v47  ;;  %v564_v50 = vpop.permute.xlu0 %563 }
 0x236   :  { %v582_v51 = vadd.f32 %v2911_v45, %v564_v50 }
 0x237   :  { %v393_v52 = vmul.f32 0.2, %v385_v49  ;;  %vm389_vm3 = vcmp.gt.f32.partialorder %v385_v49, 0.0 }
 0x238   :  { %v363_v53 = vpop.permute.xlu1 %362  ;;  %v590_v56 = vmul.f32 0.2, %v582_v51  ;;  %vm586_vm5 = vcmp.gt.f32.partialorder %v582_v51, 0.0 }
 0x239   :  { %v384_v57 = vadd.f32 %v383_v44, %v363_v53  ;;  %v397_v58 = vsel %vm389_vm3, %v385_v49, %v393_v52  ;;  %vm779_vm3 = vcmask 261248  }
 0x23a   :  { %v405_v59 = vsel %vm401_vm4, %v397_v58, -1e+09  ;;  %v594_v2 = vsel %vm586_vm5, %v582_v51, %v590_v56 }
 0x23b   :  { %v392_v60 = vmul.f32 0.2, %v384_v57  ;;  %v411_v61 = vsel %vm94_vm0, %v405_v59, -inf  ;;  %vm388_vm6 = vcmp.gt.f32.partialorder %v384_v57, 0.0  ;;  %v598_v8 = vsel %vm400_vm7, %v594_v2, -1e+09 }
 0x23c   :  { %412 = vmax.xlane.f32.xlu0 %v411_v61  ;;  %v378_v62 = vpop.permute.xlu1 %377  ;;  %v602_v13 = vsel %vm94_vm0, %v598_v8, -inf }
 0x23d   :  { %v387_v0 = vadd.f32 %v383_v44, %v378_v62  ;;  %v396_v1 = vsel %vm388_vm6, %v384_v57, %v392_v60 }
 0x23e   :  { %v404_v4 = vsel %vm400_vm7, %v396_v1, -1e+09 }
 0x23f   :  { %v395_v5 = vmul.f32 0.2, %v387_v0  ;;  %v408_v6 = vsel %vm94_vm0, %v404_v4, -inf  ;;  %vm391_vm8 = vcmp.gt.f32.partialorder %v387_v0, 0.0 }
 0x240   :  { %409 = vmax.xlane.f32.xlu1 %v408_v6  ;;  %v373_v7 = vpop.permute.xlu1 %372 }
 0x241   :  { %v386_v9 = vadd.f32 %v383_v44, %v373_v7  ;;  %v399_v10 = vsel %vm391_vm8, %v387_v0, %v395_v5 }
 0x242   :  { %v407_v14 = vsel %vm403_vm9, %v399_v10, -1e+09 }
 0x243   :  { %v394_v12 = vmul.f32 0.2, %v386_v9  ;;  %vm390_vm10 = vcmp.gt.f32.partialorder %v386_v9, 0.0  ;;  %v417_v20 = vsel %vm94_vm0, %v407_v14, -inf }
 0x244   :  { %603 = vmax.xlane.f32.xlu1 %v602_v13 }
 0x245   :  { %v568_v15 = vpop.permute.xlu1 %567  ;;  %v398_v17 = vsel %vm390_vm10, %v386_v9, %v394_v12 }
 0x246   :  { %v583_v18 = vadd.f32 %v2911_v45, %v568_v15  ;;  %v406_v29 = vsel %vm402_vm11, %v398_v17, -1e+09 }
 0x247   :  { %v414_v33 = vsel %vm94_vm0, %v406_v29, -inf }
 0x248   :  { %v591_v25 = vmul.f32 0.2, %v583_v18  ;;  %418 = vmax.xlane.f32.xlu1 %v417_v20  ;;  %vm587_vm12 = vcmp.gt.f32.partialorder %v583_v18, 0.0 }
 0x249   :  { %v572_v30 = vpop.permute.xlu1 %571 }
 0x24a   :  { %v584_v31 = vadd.f32 %v2911_v45, %v572_v30  ;;  %v595_v32 = vsel %vm587_vm12, %v583_v18, %v591_v25 }
 0x24b   :  { %v599_v35 = vsel %vm401_vm4, %v595_v32, -1e+09 }
 0x24c   :  { %v592_v34 = vmul.f32 0.2, %v584_v31  ;;  %415 = vmax.xlane.f32.xlu1 %v414_v33  ;;  %vm588_vm13 = vcmp.gt.f32.partialorder %v584_v31, 0.0  ;;  %v605_v43 = vsel %vm94_vm0, %v599_v35, -inf }
 0x24d   :  { %v576_v36 = vpop.permute.xlu1 %575 }
 0x24e   :  { %v585_v37 = vadd.f32 %v2911_v45, %v576_v36  ;;  %v596_v40 = vsel %vm588_vm13, %v584_v31, %v592_v34 }
 0x24f   :  { %v600_v47 = vsel %vm402_vm11, %v596_v40, -1e+09 }
 0x250   :  { %v593_v44 = vmul.f32 0.2, %v585_v37  ;;  %606 = vmax.xlane.f32.xlu1 %v605_v43  ;;  %vm589_vm14 = vcmp.gt.f32.partialorder %v585_v37, 0.0  ;;  %v608_v49 = vsel %vm94_vm0, %v600_v47, -inf }
 0x252   :  { %v597_v48 = vsel %vm589_vm14, %v585_v37, %v593_v44 }
 0x253   :  { %v601_v50 = vsel %vm403_vm9, %v597_v48, -1e+09 }
 0x254   :  { %609 = vmax.xlane.f32.xlu1 %v608_v49  ;;  %v611_v51 = vsel %vm94_vm0, %v601_v50, -inf }
 0x258   :  { %612 = vmax.xlane.f32.xlu1 %v611_v51 }
 0x2c9   :  { %v413_v45 = vpop.xlane.xlu0 %412 }
 0x2ca   :  { %v421_v52 = vsub.f32 %v405_v59, %v413_v45 }
 0x2cc   :  { %v426_v53 = vmul.f32 1.442695, %v421_v52 }
 0x2cd   :  { %v410_v55 = vpop.xlane.xlu1 %409 }
 0x2ce   :  { %2607 = vpow2.f32 %v426_v53  ;;  %v420_v56 = vsub.f32 %v404_v4, %v410_v55 }
 0x2d0   :  { %v424_v57 = vmul.f32 1.442695, %v420_v56 }
 0x2d1   :  { %v604_v58 = vpop.xlane.xlu1 %603 }
 0x2d2   :  { %2609 = vpow2.f32 %v424_v57  ;;  %v614_v60 = vsub.f32 %v598_v8, %v604_v58 }
 0x2d4   :  { %v618_v61 = vmul.f32 1.442695, %v614_v60 }
 0x2d5   :  { %v419_v62 = vpop.xlane.xlu1 %418 }
 0x2d6   :  { %2611 = vpow2.f32 %v618_v61  ;;  %v423_v1 = vsub.f32 %v407_v14, %v419_v62 }
 0x2d8   :  { %v2608_v0 = vpop.eup %2607  ;;  %v430_v7 = vmul.f32 1.442695, %v423_v1 }
 0x2d9   :  { %v416_v2 = vpop.xlane.xlu1 %415  ;;  %v2955_v3 = vsel %vm401_vm4, %v2608_v0, 0.0 }
 0x2da   :  { %v422_v5 = vsub.f32 %v406_v29, %v416_v2  ;;  %v439_v59 = vsel %vm94_vm0, %v2955_v3, 0.0 }
 0x2db   :  { %440 = vadd.xlane.f32.xlu1 %v439_v59 }
 0x2dc   :  { %v2610_v4 = vpop.eup %2609  ;;  %v428_v6 = vmul.f32 1.442695, %v422_v5 }
 0x2dd   :  { %v607_v9 = vpop.xlane.xlu1 %606  ;;  %v432_v8 = vsel %vm400_vm7, %v2610_v4, 0.0 }
 0x2de   :  { %2613 = vpow2.f32 %v428_v6  ;;  %v615_v10 = vsub.f32 %v599_v35, %v607_v9  ;;  %v436_v12 = vsel %vm94_vm0, %v432_v8, 0.0 }
 0x2df   :  { %437 = vadd.xlane.f32.xlu0 %v436_v12  ;;  %2615 = vpow2.f32 %v430_v7 }
 0x2e0   :  { %v2612_v13 = vpop.eup %2611  ;;  %v620_v14 = vmul.f32 1.442695, %v615_v10 }
 0x2e1   :  { %v610_v15 = vpop.xlane.xlu1 %609  ;;  %v2964_v17 = vsel %vm400_vm7, %v2612_v13, 0.0 }
 0x2e2   :  { %2617 = vpow2.f32 %v620_v14  ;;  %v616_v18 = vsub.f32 %v600_v47, %v610_v15  ;;  %v630_v20 = vsel %vm94_vm0, %v2964_v17, 0.0 }
 0x2e3   :  { %631 = vadd.xlane.f32.xlu0 %v630_v20 }
 0x2e4   :  { %v622_v25 = vmul.f32 1.442695, %v616_v18 }
 0x2e5   :  { %v613_v29 = vpop.xlane.xlu1 %612 }
 0x2e6   :  { %2619 = vpow2.f32 %v622_v25  ;;  %v617_v30 = vsub.f32 %v601_v50, %v613_v29 }
 0x2e8   :  { %v2614_v31 = vpop.eup %2613  ;;  %v624_v32 = vmul.f32 1.442695, %v617_v30 }
 0x2e9   :  { %v434_v33 = vsel %vm402_vm11, %v2614_v31, 0.0  ;;  %v2616_v35 = vpop.eup %2615 }
 0x2ea   :  { %2621 = vpow2.f32 %v624_v32  ;;  %v442_v34 = vsel %vm94_vm0, %v434_v33, 0.0  ;;  %v435_v43 = vsel %vm403_vm9, %v2616_v35, 0.0 }
 0x2eb   :  { %443 = vadd.xlane.f32.xlu0 %v442_v34  ;;  %v445_v48 = vsel %vm94_vm0, %v435_v43, 0.0 }
 0x2ec   :  { %v2618_v36 = vpop.eup %2617 }
 0x2ed   :  { %v2973_v37 = vsel %vm401_vm4, %v2618_v36, 0.0 }
 0x2ee   :  { %v633_v40 = vsel %vm94_vm0, %v2973_v37, 0.0 }
 0x2ef   :  { %634 = vadd.xlane.f32.xlu1 %v633_v40 }
 0x2f0   :  { %v2620_v44 = vpop.eup %2619 }
 0x2f1   :  { %v2981_v47 = vsel %vm402_vm11, %v2620_v44, 0.0 }
 0x2f2   :  { %v636_v49 = vsel %vm94_vm0, %v2981_v47, 0.0 }
 0x2f3   :  { %446 = vadd.xlane.f32.xlu1 %v445_v48  ;;  %637 = vadd.xlane.f32.xlu0 %v636_v49  ;;  %v3017_v49 = vld [vmem:[%s3370_s9] sm:$0xff] }
 0x2f4   :  { %v2622_v50 = vpop.eup %2621 }
 0x2f5   :  { %v2988_v51 = vsel %vm403_vm9, %v2622_v50, 0.0 }
 0x2f6   :  { %v639_v45 = vsel %vm94_vm0, %v2988_v51, 0.0 }
 0x2f7   :  { %640 = vadd.xlane.f32.xlu1 %v639_v45  ;;  %v791_v45 = vrot.slane %v3017_v49, %v2905_v41 }
 0x308   :  { %2583 = vrot.lane.b32.xlu1 %v2582_v24, %s2743_s1 }
 0x309   :  { %2578 = vrot.lane.b32.xlu0 %v2577_v28, %s2743_s1 }
 0x368   :  { %v441_v52 = vpop.xlane.xlu1 %440 }
 0x369   :  { %v449_v53 = vmax.f32 %v441_v52, 1e-16 }
 0x36b   :  { %2623 = vrcp.f32 %v449_v53 }
 0x36c   :  { %v438_v55 = vpop.xlane.xlu0 %437 }
 0x36d   :  { %v448_v56 = vmax.f32 %v438_v55, 1e-16 }
 0x36f   :  { %2625 = vrcp.f32 %v448_v56 }
 0x370   :  { %v632_v57 = vpop.xlane.xlu0 %631 }
 0x371   :  { %v642_v22 = vmax.f32 %v632_v57, 1e-16 }
 0x375   :  { %v2624_v58 = vpop.eup %2623 }
 0x376   :  { %v457_v1 = vmul.f32 %v2624_v58, %v2955_v3 }
 0x378   :  { %v444_v60 = vpop.xlane.xlu0 %443 }
 0x379   :  { %v2626_v61 = vpop.eup %2625  ;;  %v450_v62 = vmax.f32 %v444_v60, 1e-16 }
 0x37a   :  { %v456_v0 = vmul.f32 %v2626_v61, %v432_v8 }
 0x37b   :  { %2627 = vrcp.f32 %v450_v62 }
 0x37c   :  { %2363 = vmatprep.mubr.msk.f32.mxu1 %vm94_vm0, %v456_v0  ;;  %v635_v21 = vpop.xlane.xlu1 %634  ;;  %2629 = vrcp.f32 %v642_v22 }
 0x37d   :  { %2364 = vmatmul.mubr.msk.f32.vlgmr.msra.gmra.mrb[4].mxu1 %vm94_vm0, %v457_v1  ;;  %v643_v28 = vmax.f32 %v635_v21, 1e-16 }
 0x380   :  { %v638_v23 = vpop.xlane.xlu0 %637  ;;  %v447_v24 = vpop.xlane.xlu1 %446 }
 0x381   :  { %v451_v26 = vmax.f32 %v447_v24, 1e-16  ;;  %v644_v2 = vmax.f32 %v638_v23, 1e-16 }
 0x383   :  { %2631 = vrcp.f32 %v451_v26 }
 0x384   :  { %v2579_v5 = vpop.permute.xlu0 %2578  ;;  %v641_v59 = vpop.xlane.xlu1 %640  ;;  %2633 = vrcp.f32 %v643_v28 }
 0x385   :  { %v2628_v4 = vpop.eup %2627  ;;  %v2581_v6 = vunpack.i.h.bf16 %v2579_v5  ;;  %v2580_v7 = vunpack.i.l.bf16 %v2579_v5  ;;  %v645_v3 = vmax.f32 %v641_v59, 1e-16  ;;  %2635 = vrcp.f32 %v644_v2 }
 0x386   :  { %v458_v9 = vmul.f32 %v2628_v4, %v434_v33  ;;  %v2630_v15 = vpop.eup %2629 }
 0x387   :  { %v2503_v8 = vpack.c.bf16 %v2581_v6, %v2580_v7  ;;  %2637 = vrcp.f32 %v645_v3  ;;  %v650_v29 = vmul.f32 %v2630_v15, %v2964_v17 }
 0x388   :  { %2366 = vmatprep.mubr.msk.f32.mxu1 %vm94_vm0, %v458_v9  ;;  %v2584_v10 = vpop.permute.xlu1 %2583 }
 0x389   :  { %v2586_v12 = vunpack.i.h.bf16 %v2584_v10  ;;  %v2585_v13 = vunpack.i.l.bf16 %v2584_v10  ;;  %2504 = vmatprep.subr.bf16.mxu1 %v2503_v8 }
 0x38a   :  { %2506 = vmatpush3.bf16.msra.mxu1 %v2503_v8 }
 0x38b   :  { %v2507_v14 = vpack.c.bf16 %v2586_v12, %v2585_v13 }
 0x38d   :  { %2508 = vmatprep.subr.bf16.mxu1 %v2507_v14  ;;  %v2632_v18 = vpop.eup %2631 }
 0x38e   :  { %2510 = vmatpush3.bf16.msra.mxu1 %v2507_v14  ;;  %v459_v20 = vmul.f32 %v2632_v18, %v435_v43  ;;  %v2634_v25 = vpop.eup %2633 }
 0x38f   :  { %2511 = vmatprep.subr.bf16.mxu1 %v2738_v16  ;;  %v2636_v30 = vpop.eup %2635  ;;  %v651_v31 = vmul.f32 %v2634_v25, %v2973_v37  ;;  %v2601_v25 = vld [vmem:[%s3368_s7] sm:$0xff]  }
 0x390   :  { %2367 = vmatmul.mubr.msk.f32.gmra.mrb[6].mxu1 %vm94_vm0, %v459_v20  ;;  %v652_v33 = vmul.f32 %v2636_v30, %v2981_v47  ;;  %2383 = vmatprep.subr.bf16.mxu0 %v2601_v25 }
 0x391   :  { %2377 = vmatprep.mubr.msk.f32.mxu1 %vm94_vm0, %v650_v29  ;;  %v2638_v32 = vpop.eup %2637  ;;  %2384 = vmatpush3.bf16.msra.mxu0 %v2601_v25  ;;  %v2602_v29 = vld [vmem:[%s3368_s7 + $0x8] sm:$0xff]  }
 0x392   :  { %v653_v34 = vmul.f32 %v2638_v32, %v2988_v51  ;;  %2385 = vmatprep.subr.bf16.mxu0 %v2602_v29 }
 0x394   :  { %2378 = vmatmul.mubr.msk.f32.vlgmr.msra.gmra.mrb[8].mxu1 %vm94_vm0, %v651_v31 }
 0x395   :  { %2380 = vmatprep.mubr.msk.f32.mxu1 %vm94_vm0, %v652_v33  ;;  %2386 = vmatpush3.bf16.msra.mxu0 %v2602_v29 }
 0x398   :  { %2381 = vmatmul.mubr.msk.f32.gmra.mrb[10].mxu1 %vm94_vm0, %v653_v34 }
 0x399   :  { %2399 = vmatprep.mubr.msk.f32.mxu1 %vm2739_vm1, %v2740_v19 }
 0x450   :  { %v2365_v17 = vpop.f32.mrb[4].mxu1 }
 0x451   :  { %559 = vst.msk [vmem:[#allocation2 + $0x8] sm:$0xff] %vm557_vm15, %v2365_v17  ;;  %v538_v35 = vpop.f32.mrb[5].mxu1 }
 0x452   :  { %558 = vst.msk [vmem:[#allocation2] sm:$0xff] %vm557_vm15, %v538_v35 }
 0x463   :  { %v2368_v36 = vpop.f32.mrb[6].mxu1 }
 0x464   :  { %561 = vst.msk [vmem:[#allocation2 + $0x18] sm:$0xff] %vm557_vm15, %v2368_v36  ;;  %v548_v37 = vpop.f32.mrb[7].mxu1 }
 0x465   :  { %560 = vst.msk [vmem:[#allocation2 + $0x10] sm:$0xff] %vm557_vm15, %v548_v37 }
 0x467   :  { %v2379_v40 = vpop.f32.mrb[8].mxu1 }
 0x468   :  { %769 = vrot.lane.b32.xlu1 %v2379_v40, %s2744_s29  ;;  %v744_v43 = vpop.f32.mrb[9].mxu1  ;;  %v859_v40 = vsub.s32 2, %v2899_v39 }
 0x46b   :  { %v2382_v44 = vpop.f32.mrb[10].mxu1 }
 0x46c   :  { %767 = vrot.lane.b32.xlu1 %v744_v43, %s2744_s29  ;;  %v754_v47 = vpop.f32.mrb[11].mxu1 }
 0x46d   :  { %771 = vrot.lane.b32.xlu0 %v754_v47, %s2744_s29  ;;  %v852_v47 = vrot.slane %v3017_v49, %v580_v42 }
 0x470   :  { %773 = vrot.lane.b32.xlu1 %v2382_v44, %s2744_s29 }
 0x4da   :  { %v770_v48 = vpop.permute.xlu1 %769 }
 0x4db   :  { %781 = vst.msk [vmem:[#allocation2 + $0x8] sm:$0xff] %vm779_vm3, %v770_v48 }
 0x4de   :  { %v768_v50 = vpop.permute.xlu1 %767 }
 0x4df   :  { %780 = vst.msk [vmem:[#allocation2] sm:$0xff] %vm779_vm3, %v768_v50  ;;  %v772_v51 = vpop.permute.xlu0 %771 }
 0x4e0   :  { %782 = vst.msk [vmem:[#allocation2 + $0x10] sm:$0xff] %vm779_vm3, %v772_v51 }
 0x4e2   :  { %v774_v52 = vpop.permute.xlu1 %773  ;;  %v785_v53 = vld [vmem:[#allocation2 + $0x8] sm:$0xff] }
 0x4e3   :  { %783 = vst.msk [vmem:[#allocation2 + $0x18] sm:$0xff] %vm779_vm3, %v774_v52  ;;  %v793_v55 = vadd.f32 %v791_v45, %v785_v53 }
 0x4e5   :  { %v799_v56 = vsel %vm94_vm0, %v793_v55, 0.0 }
 0x4e6   :  { %800 = vadd.xlane.f32.xlu1 %v799_v56  ;;  %v784_v57 = vld [vmem:[#allocation2] sm:$0xff] }
 0x4e7   :  { %v792_v58 = vadd.f32 %v791_v45, %v784_v57  ;;  %v786_v60 = vld [vmem:[#allocation2 + $0x10] sm:$0xff] }
 0x4e8   :  { %v794_v62 = vadd.f32 %v791_v45, %v786_v60 }
 0x4e9   :  { %v796_v61 = vsel %vm94_vm0, %v792_v58, 0.0 }
 0x4ea   :  { %797 = vadd.xlane.f32.xlu0 %v796_v61  ;;  %v787_v0 = vld [vmem:[#allocation2 + $0x18] sm:$0xff]  ;;  %v802_v1 = vsel %vm94_vm0, %v794_v62, 0.0 }
 0x4eb   :  { %v795_v21 = vadd.f32 %v791_v45, %v787_v0  ;;  %v860_v45 = vrot.slane %v3017_v49, %v859_v40 }
 0x4ed   :  { %v805_v22 = vsel %vm94_vm0, %v795_v21, 0.0 }
 0x4ee   :  { %803 = vadd.xlane.f32.xlu0 %v802_v1 }
 0x4f2   :  { %806 = vadd.xlane.f32.xlu0 %v805_v22 }
 0x573   :  { %v801_v23 = vpop.xlane.xlu1 %800 }
 0x574   :  { %v810_v24 = vmul.f32 0.03125, %v801_v23 }
 0x576   :  { %v814_v26 = vsub.f32 %v793_v55, %v810_v24 }
 0x577   :  { %v798_v28 = vpop.xlane.xlu0 %797 }
 0x578   :  { %v809_v2 = vmul.f32 0.03125, %v798_v28  ;;  %v818_v5 = vmul.f32 %v814_v26, %v814_v26 }
 0x57a   :  { %v813_v59 = vsub.f32 %v792_v58, %v809_v2  ;;  %v824_v4 = vsel %vm94_vm0, %v818_v5, 0.0 }
 0x57b   :  { %825 = vadd.xlane.f32.xlu1 %v824_v4  ;;  %v804_v6 = vpop.xlane.xlu0 %803 }
 0x57c   :  { %v811_v7 = vmul.f32 0.03125, %v804_v6  ;;  %v817_v3 = vmul.f32 %v813_v59, %v813_v59 }
 0x57e   :  { %v815_v9 = vsub.f32 %v794_v62, %v811_v7  ;;  %v821_v8 = vsel %vm94_vm0, %v817_v3, 0.0 }
 0x57f   :  { %822 = vadd.xlane.f32.xlu0 %v821_v8  ;;  %v807_v10 = vpop.xlane.xlu0 %806 }
 0x580   :  { %v812_v12 = vmul.f32 0.03125, %v807_v10  ;;  %v819_v13 = vmul.f32 %v815_v9, %v815_v9 }
 0x582   :  { %v816_v14 = vsub.f32 %v795_v21, %v812_v12  ;;  %v827_v15 = vsel %vm94_vm0, %v819_v13, 0.0 }
 0x583   :  { %828 = vadd.xlane.f32.xlu0 %v827_v15 }
 0x584   :  { %v820_v18 = vmul.f32 %v816_v14, %v816_v14 }
 0x586   :  { %v830_v20 = vsel %vm94_vm0, %v820_v18, 0.0  ;;  %v1046_v18 = vsub.s32 3, %v2899_v39 }
 0x587   :  { %831 = vadd.xlane.f32.xlu1 %v830_v20  ;;  %v3046_v20 = vld [vmem:[%s3370_s9 + $0x8] sm:$0xff] }
 0x588   :  { %v1047_v25 = vrot.slane %v3046_v20, %v1046_v18 }
 0x608   :  { %v826_v30 = vpop.xlane.xlu1 %825 }
 0x609   :  { %v834_v31 = vmul.f32 0.03125, %v826_v30 }
 0x60b   :  { %v838_v32 = vadd.f32 1e-05, %v834_v31 }
 0x60c   :  { %v823_v33 = vpop.xlane.xlu0 %822 }
 0x60d   :  { %2639 = vrsqrt.f32 %v838_v32  ;;  %v833_v34 = vmul.f32 0.03125, %v823_v33 }
 0x60f   :  { %v837_v17 = vadd.f32 1e-05, %v833_v34 }
 0x610   :  { %v829_v35 = vpop.xlane.xlu0 %828 }
 0x611   :  { %2641 = vrsqrt.f32 %v837_v17  ;;  %v835_v36 = vmul.f32 0.03125, %v829_v35 }
 0x613   :  { %v839_v37 = vadd.f32 1e-05, %v835_v36 }
 0x614   :  { %v832_v43 = vpop.xlane.xlu1 %831 }
 0x615   :  { %2643 = vrsqrt.f32 %v839_v37  ;;  %v836_v44 = vmul.f32 0.03125, %v832_v43 }
 0x617   :  { %v2640_v48 = vpop.eup %2639  ;;  %v840_v50 = vadd.f32 1e-05, %v836_v44 }
 0x618   :  { %v846_v51 = vmul.f32 %v2640_v48, %v814_v26 }
 0x619   :  { %2645 = vrsqrt.f32 %v840_v50 }
 0x61a   :  { %v854_v52 = vmul.f32 %v852_v47, %v846_v51  ;;  %v959_v51 = vrot.slane %v3046_v20, 2 }
 0x61b   :  { %v2642_v53 = vpop.eup %2641 }
 0x61c   :  { %v845_v55 = vmul.f32 %v2642_v53, %v813_v59  ;;  %v862_v56 = vadd.f32 %v860_v45, %v854_v52 }
 0x61e   :  { %v853_v57 = vmul.f32 %v852_v47, %v845_v55  ;;  %v871_v58 = vmul.f32 1.442695, %v862_v56  ;;  %vm866_vm6 = vcmp.gt.f32.partialorder %v862_v56, 0.0 }
 0x61f   :  { %v2644_v60 = vpop.eup %2643 }
 0x620   :  { %v847_v61 = vmul.f32 %v2644_v60, %v815_v9  ;;  %v861_v62 = vadd.f32 %v860_v45, %v853_v57  ;;  %2647 = vpow2.f32 %v871_v58 }
 0x622   :  { %v855_v0 = vmul.f32 %v852_v47, %v847_v61  ;;  %v869_v1 = vmul.f32 1.442695, %v861_v62  ;;  %vm865_vm5 = vcmp.gt.f32.partialorder %v861_v62, 0.0 }
 0x623   :  { %v2646_v21 = vpop.eup %2645 }
 0x624   :  { %v863_v42 = vadd.f32 %v860_v45, %v855_v0  ;;  %v848_v22 = vmul.f32 %v2646_v21, %v816_v14  ;;  %2649 = vpow2.f32 %v869_v1 }
 0x626   :  { %v856_v23 = vmul.f32 %v852_v47, %v848_v22  ;;  %v873_v24 = vmul.f32 1.442695, %v863_v42  ;;  %vm867_vm8 = vcmp.gt.f32.partialorder %v863_v42, 0.0 }
 0x628   :  { %v864_v26 = vadd.f32 %v860_v45, %v856_v23  ;;  %2651 = vpow2.f32 %v873_v24 }
 0x62a   :  { %v2648_v28 = vpop.eup %2647  ;;  %v875_v2 = vmul.f32 1.442695, %v864_v26  ;;  %vm868_vm10 = vcmp.gt.f32.partialorder %v864_v26, 0.0 }
 0x62b   :  { %v2190_v5 = vadd.f32 -1.0, %v2648_v28 }
 0x62c   :  { %2653 = vpow2.f32 %v875_v2 }
 0x62d   :  { %v882_v7 = vsel %vm866_vm6, %v862_v56, %v2190_v5 }
 0x62e   :  { %v2650_v59 = vpop.eup %2649 }
 0x62f   :  { %v2189_v4 = vadd.f32 -1.0, %v2650_v59 }
 0x631   :  { %v881_v6 = vsel %vm865_vm5, %v861_v62, %v2189_v4 }
 0x632   :  { %v2652_v3 = vpop.eup %2651  ;;  %v885_v9 = vpack.c.bf16 %v882_v7, %v881_v6 }
 0x633   :  { %v2191_v8 = vadd.f32 -1.0, %v2652_v3 }
 0x634   :  { %2387 = vmatprep.mubr.msk.bf16.mxu0 %vm94_vm0, %v885_v9 }
 0x635   :  { %v883_v13 = vsel %vm867_vm8, %v863_v42, %v2191_v8 }
 0x636   :  { %v2654_v10 = vpop.eup %2653 }
 0x637   :  { %v2192_v12 = vadd.f32 -1.0, %v2654_v10 }
 0x639   :  { %v884_v14 = vsel %vm868_vm10, %v864_v26, %v2192_v12 }
 0x63a   :  { %v886_v15 = vpack.c.bf16 %v884_v14, %v883_v13 }
 0x63c   :  { %2388 = vmatmul.mubr.msk.bf16.vlgmr.msra.gmra.mrb[8].mxu0 %vm94_vm0, %v886_v15 }
 0x70f   :  { %v3051_v29 = vpop.f32.mrb[8].mxu0 }
 0x710   :  { %v3053_v30 = vpop.f32.mrb[9].mxu0  ;;  %v1050_v17 = vmul.f32 %v3051_v29, %v1047_v25 }
 0x711   :  { %v3055_v31 = vpop.f32.mrb[10].mxu0  ;;  %v1048_v32 = vmul.f32 %v1047_v25, %v3053_v30 }
 0x712   :  { %v3058_v33 = vpop.f32.mrb[11].mxu0  ;;  %v2516_v34 = vpack.c.bf16 %v3055_v31, %v3051_v29  ;;  %v2592_v35 = vpack.i.bf16 %v3055_v31, %v3051_v29  ;;  %v1051_v47 = vmul.f32 %v3055_v31, %v1047_v25  ;;  %v1058_v48 = vsel %vm94_vm0, %v1050_v17, 0.0 }
 0x713   :  { %v2512_v36 = vpack.c.bf16 %v3058_v33, %v3053_v30  ;;  %v1052_v37 = vsel %vm94_vm0, %v1048_v32, 0.0  ;;  %v1049_v40 = vmul.f32 %v1047_v25, %v3058_v33  ;;  %v2587_v43 = vpack.i.bf16 %v3058_v33, %v3053_v30 }
 0x714   :  { %1053 = vadd.xlane.f32.xlu0 %v1052_v37  ;;  %v1061_v50 = vsel %vm94_vm0, %v1051_v47, 0.0 }
 0x715   :  { %2514 = vmatpush3.bf16.xpose.msk.msra.mxu1 %vm2878_vm2, %v2512_v36  ;;  %2520 = vmatprep.subr.bf16.mxu0 %v2512_v36  ;;  %v1055_v44 = vsel %vm94_vm0, %v1049_v40, 0.0 }
 0x716   :  { %1056 = vadd.xlane.f32.xlu1 %v1055_v44  ;;  %2522 = vmatpush3.bf16.msra.mxu0 %v2512_v36 }
 0x717   :  { %2524 = vmatprep.subr.bf16.mxu0 %v2516_v34  ;;  %2515 = vmatprep.subr.bf16.mxu1 %v2738_v16 }
 0x718   :  { %1059 = vadd.xlane.f32.xlu0 %v1058_v48 }
 0x71a   :  { %1062 = vadd.xlane.f32.xlu1 %v1061_v50  ;;  %2526 = vmatpush3.bf16.msra.mxu0 %v2516_v34 }
 0x71b   :  { %2527 = vmatprep.subr.bf16.mxu0 %v2738_v16 }
 0x71d   :  { %2518 = vmatpush3.bf16.xpose.msk.msra.mxu1 %vm2878_vm2, %v2516_v34 }
 0x724   :  { %2400 = vmatmul.mubr.msk.f32.vlgmr.msra.gmra.mrb[12].mxu1 %vm94_vm0, %v959_v51 }
 0x7a1   :  { %v1054_v45 = vpop.xlane.xlu0 %1053 }
 0x7a3   :  { %v1057_v52 = vpop.xlane.xlu1 %1056 }
 0x7a5   :  { %v1060_v57 = vpop.xlane.xlu0 %1059 }
 0x7a7   :  { %v1063_v58 = vpop.xlane.xlu1 %1062 }
 0x7f7   :  { %v1040_v53 = vpop.f32.mrb[12].mxu1 }
 0x7f8   :  { %v1067_v55 = vrot.slane %v1040_v53, %v2905_v41  ;;  %v2401_v56 = vpop.f32.mrb[13].mxu1 }
 0x7fa   :  { %v1069_v60 = vadd.f32 %v1067_v55, %v1057_v52  ;;  %v1068_v61 = vadd.f32 %v1067_v55, %v1054_v45  ;;  %v1071_v62 = vadd.f32 %v1067_v55, %v1063_v58  ;;  %v1070_v0 = vadd.f32 %v1067_v55, %v1060_v57 }
 0x7fb   :  { %v1332_v58 = vsub.s32 5, %v2899_v39 }
 0x7fc   :  { %vm1073_vm12 = vcmp.gt.f32.partialorder %v1069_v60, 0.0  ;;  %v1077_v1 = vmul.f32 0.2, %v1069_v60  ;;  %vm1072_vm13 = vcmp.gt.f32.partialorder %v1068_v61, 0.0  ;;  %v1076_v21 = vmul.f32 0.2, %v1068_v61 }
 0x7fd   :  { %vm1075_vm14 = vcmp.gt.f32.partialorder %v1071_v62, 0.0  ;;  %v1079_v42 = vmul.f32 0.2, %v1071_v62  ;;  %vm1074_vm15 = vcmp.gt.f32.partialorder %v1070_v0, 0.0  ;;  %v1078_v22 = vmul.f32 0.2, %v1070_v0 }
 0x7fe   :  { %v1081_v23 = vsel %vm1073_vm12, %v1069_v60, %v1077_v1  ;;  %v1080_v24 = vsel %vm1072_vm13, %v1068_v61, %v1076_v21  ;;  %v1333_v60 = vrot.slane %v3046_v20, %v1332_v58 }
 0x7ff   :  { %v1085_v26 = vsel %vm401_vm4, %v1081_v23, -1e+09  ;;  %v1084_v28 = vsel %vm400_vm7, %v1080_v24, -1e+09  ;;  %v1083_v2 = vsel %vm1075_vm14, %v1071_v62, %v1079_v42  ;;  %v1082_v5 = vsel %vm1074_vm15, %v1070_v0, %v1078_v22 }
 0x800   :  { %v1091_v59 = vsel %vm94_vm0, %v1085_v26, -inf  ;;  %v1088_v4 = vsel %vm94_vm0, %v1084_v28, -inf  ;;  %v1087_v6 = vsel %vm403_vm9, %v1083_v2, -1e+09  ;;  %v1086_v7 = vsel %vm402_vm11, %v1082_v5, -1e+09 }
 0x801   :  { %1092 = vmax.xlane.f32.xlu1 %v1091_v59  ;;  %1089 = vmax.xlane.f32.xlu0 %v1088_v4  ;;  %v1097_v3 = vsel %vm94_vm0, %v1087_v6, -inf  ;;  %v1094_v9 = vsel %vm94_vm0, %v1086_v7, -inf }
 0x805   :  { %1098 = vmax.xlane.f32.xlu1 %v1097_v3  ;;  %1095 = vmax.xlane.f32.xlu0 %v1094_v9 }
 0x88e   :  { %v1093_v8 = vpop.xlane.xlu1 %1092  ;;  %v1090_v10 = vpop.xlane.xlu0 %1089 }
 0x88f   :  { %v1101_v12 = vsub.f32 %v1085_v26, %v1093_v8  ;;  %v1100_v13 = vsub.f32 %v1084_v28, %v1090_v10 }
 0x891   :  { %v1106_v14 = vmul.f32 1.442695, %v1101_v12  ;;  %v1104_v15 = vmul.f32 1.442695, %v1100_v13 }
 0x892   :  { %v1099_v25 = vpop.xlane.xlu1 %1098  ;;  %v1096_v32 = vpop.xlane.xlu0 %1095 }
 0x893   :  { %2655 = vpow2.f32 %v1106_v14  ;;  %v1103_v34 = vsub.f32 %v1087_v6, %v1099_v25  ;;  %v1102_v17 = vsub.f32 %v1086_v7, %v1096_v32 }
 0x894   :  { %2657 = vpow2.f32 %v1104_v15 }
 0x895   :  { %v1110_v36 = vmul.f32 1.442695, %v1103_v34  ;;  %v1108_v37 = vmul.f32 1.442695, %v1102_v17 }
 0x897   :  { %2659 = vpow2.f32 %v1110_v36 }
 0x898   :  { %2661 = vpow2.f32 %v1108_v37 }
 0x89d   :  { %v2656_v40 = vpop.eup %2655 }
 0x89e   :  { %v2658_v44 = vpop.eup %2657  ;;  %v1113_v47 = vsel %vm401_vm4, %v2656_v40, 0.0 }
 0x89f   :  { %v1119_v48 = vsel %vm94_vm0, %v1113_v47, 0.0  ;;  %v1112_v50 = vsel %vm400_vm7, %v2658_v44, 0.0  ;;  %v1143_v44 = vrot.slane %v3017_v49, %v1046_v18 }
 0x8a0   :  { %1120 = vadd.xlane.f32.xlu1 %v1119_v48  ;;  %v1116_v51 = vsel %vm94_vm0, %v1112_v50, 0.0 }
 0x8a1   :  { %v2660_v45 = vpop.eup %2659  ;;  %1117 = vadd.xlane.f32.xlu0 %v1116_v51 }
 0x8a2   :  { %v2662_v52 = vpop.eup %2661  ;;  %v1115_v53 = vsel %vm403_vm9, %v2660_v45, 0.0 }
 0x8a3   :  { %v1125_v55 = vsel %vm94_vm0, %v1115_v53, 0.0  ;;  %v1114_v56 = vsel %vm402_vm11, %v2662_v52, 0.0 }
 0x8a4   :  { %1126 = vadd.xlane.f32.xlu1 %v1125_v55  ;;  %v1122_v57 = vsel %vm94_vm0, %v1114_v56, 0.0 }
 0x8a5   :  { %1123 = vadd.xlane.f32.xlu0 %v1122_v57 }
 0x8b5   :  { %2593 = vrot.lane.b32.xlu1 %v2592_v35, %s2745_s0 }
 0x8b9   :  { %1335 = vrot.lane.b32.xlu1 %v1333_v60, %s2746_s18 }
 0x8bb   :  { %2588 = vrot.lane.b32.xlu0 %v2587_v43, %s2745_s0 }
 0x92d   :  { %v1121_v61 = vpop.xlane.xlu1 %1120 }
 0x92e   :  { %v1129_v62 = vmax.f32 %v1121_v61, 1e-16  ;;  %v1118_v0 = vpop.xlane.xlu0 %1117  ;;  %v53_v61 = vld [vmem:[%s3363_s2] sm:$0xff] }
 0x92f   :  { %v1128_v1 = vmax.f32 %v1118_v0, 1e-16  ;;  %v55_v0 = vunpack.c.1.s8 %v53_v61 }
 0x930   :  { %2663 = vrcp.f32 %v1129_v62  ;;  %v54_v62 = vunpack.c.0.s8 %v53_v61 }
 0x931   :  { %2665 = vrcp.f32 %v1128_v1  ;;  %v1127_v21 = vpop.xlane.xlu1 %1126 }
 0x932   :  { %v1131_v42 = vmax.f32 %v1127_v21, 1e-16  ;;  %v1124_v35 = vpop.xlane.xlu0 %1123  ;;  %v58_v21 = vcvt.s32.f32 %v54_v62 }
 0x933   :  { %v1130_v22 = vmax.f32 %v1124_v35, 1e-16 }
 0x934   :  { %2667 = vrcp.f32 %v1131_v42  ;;  %v56_v42 = vunpack.c.2.s8 %v53_v61  ;;  %vm1390_vm7 = vcmp.gt.f32.partialorder %v58_v21, 0.0 }
 0x935   :  { %2669 = vrcp.f32 %v1130_v22  ;;  %v2594_v23 = vpop.permute.xlu1 %2593  ;;  %v59_v22 = vcvt.s32.f32 %v55_v0 }
 0x936   :  { %v2589_v24 = vpop.permute.xlu0 %2588  ;;  %v2596_v26 = vunpack.i.h.bf16 %v2594_v23  ;;  %v2595_v28 = vunpack.i.l.bf16 %v2594_v23 }
 0x937   :  { %v2591_v2 = vunpack.i.h.bf16 %v2589_v24  ;;  %v2590_v5 = vunpack.i.l.bf16 %v2589_v24  ;;  %vm1391_vm11 = vcmp.gt.f32.partialorder %v59_v22, 0.0 }
 0x938   :  { %v2532_v9 = vpack.c.bf16 %v2596_v26, %v2595_v28 }
 0x939   :  { %v2528_v59 = vpack.c.bf16 %v2591_v2, %v2590_v5  ;;  %v1336_v43 = vpop.permute.xlu1 %1335  ;;  %v60_v2 = vcvt.s32.f32 %v56_v42 }
 0x93a   :  { %v2664_v4 = vpop.eup %2663  ;;  %v1338_v6 = vmul.f32 %v1336_v43, %v3053_v30  ;;  %v1339_v7 = vmul.f32 %v1336_v43, %v3058_v33  ;;  %v1340_v30 = vmul.f32 %v3051_v29, %v1336_v43  ;;  %v1341_v33 = vmul.f32 %v3055_v31, %v1336_v43 }
 0x93b   :  { %v2666_v3 = vpop.eup %2665  ;;  %2536 = vmatprep.subr.bf16.mxu1 %v2528_v59  ;;  %v1137_v8 = vmul.f32 %v2664_v4, %v1113_v47  ;;  %v1241_v29 = vrot.slane %v3046_v20, 4  ;;  %vm1392_vm3 = vcmp.gt.f32.partialorder %v60_v2, 0.0 }
 0x93c   :  { %2538 = vmatpush3.bf16.msra.mxu1 %v2528_v59  ;;  %1346 = vrot.lane.b32.xlu1 %v1338_v6, %s2746_s18  ;;  %v1136_v10 = vmul.f32 %v2666_v3, %v1112_v50 }
 0x93d   :  { %1348 = vrot.lane.b32.xlu0 %v1339_v7, %s2746_s18  ;;  %2540 = vmatprep.subr.bf16.mxu1 %v2532_v9 }
 0x93e   :  { %v2668_v12 = vpop.eup %2667  ;;  %2410 = vmatprep.mubr.msk.f32.mxu0 %vm94_vm0, %v1136_v10 }
 0x93f   :  { %v2670_v13 = vpop.eup %2669  ;;  %2411 = vmatmul.mubr.msk.f32.vlgmr.msra.gmra.mrb[6].mxu0 %vm94_vm0, %v1137_v8  ;;  %v1139_v14 = vmul.f32 %v2668_v12, %v1115_v53 }
 0x940   :  { %2530 = vmatpush3.bf16.xpose.msk.msra.mxu0 %vm2878_vm2, %v2528_v59  ;;  %2542 = vmatpush3.bf16.msra.mxu1 %v2532_v9  ;;  %v1138_v15 = vmul.f32 %v2670_v13, %v1114_v56  ;;  %v57_v59 = vunpack.c.3.s8 %v53_v61 }
 0x941   :  { %1350 = vrot.lane.b32.xlu1 %v1340_v30, %s2746_s18  ;;  %1352 = vrot.lane.b32.xlu0 %v1341_v33, %s2746_s18 }
 0x942   :  { %2413 = vmatprep.mubr.msk.f32.mxu0 %vm94_vm0, %v1138_v15  ;;  %2531 = vmatprep.subr.bf16.mxu0 %v2738_v16  ;;  %v61_v13 = vcvt.s32.f32 %v57_v59 }
 0x943   :  { %2414 = vmatmul.mubr.msk.f32.gmra.mrb[12].mxu0 %vm94_vm0, %v1139_v14 }
 0x944   :  { %2424 = vmatprep.mubr.msk.f32.mxu0 %vm2739_vm1, %v2740_v19  ;;  %vm1393_vm8 = vcmp.gt.f32.partialorder %v61_v13, 0.0 }
 0x948   :  { %2534 = vmatpush3.bf16.xpose.msk.msra.mxu0 %vm2878_vm2, %v2532_v9 }
 0x949   :  { %2543 = vmatprep.subr.bf16.mxu0 %v2738_v16 }
 0x94f   :  { %2425 = vmatmul.mubr.msk.f32.vlgmr.msra.gmra.mrb[14].mxu0 %vm94_vm0, %v1241_v29 }
 0x950   :  { %2465 = vmatprep.mubr.msk.f32.mxu0 %vm2739_vm1, %v2740_v19 }
 0x9ae   :  { %v1347_v31 = vpop.permute.xlu1 %1346 }
 0x9af   :  { %v1349_v25 = vpop.permute.xlu0 %1348  ;;  %v1358_v32 = vsel %vm94_vm0, %v1347_v31, 0.0 }
 0x9b0   :  { %1359 = vadd.xlane.f32.xlu1 %v1358_v32  ;;  %v1361_v34 = vsel %vm94_vm0, %v1349_v25, 0.0 }
 0x9b1   :  { %1362 = vadd.xlane.f32.xlu0 %v1361_v34 }
 0x9b3   :  { %v1351_v17 = vpop.permute.xlu1 %1350  ;;  %v1353_v37 = vpop.permute.xlu0 %1352 }
 0x9b4   :  { %v1364_v36 = vsel %vm94_vm0, %v1351_v17, 0.0  ;;  %v1367_v40 = vsel %vm94_vm0, %v1353_v37, 0.0 }
 0x9b5   :  { %1365 = vadd.xlane.f32.xlu0 %v1364_v36 }
 0x9b9   :  { %1368 = vadd.xlane.f32.xlu0 %v1367_v40 }
 0xa12   :  { %v2412_v47 = vpop.f32.mrb[6].mxu0 }
 0xa13   :  { %v3150_v48 = vadd.f32 %v2412_v47, %v1143_v44  ;;  %v1222_v50 = vpop.f32.mrb[7].mxu0 }
 0xa14   :  { %v3152_v51 = vadd.f32 %v1222_v50, %v1143_v44 }
 0xa15   :  { %1556 = vst.msk [vmem:[%s3373_s12 + $0x8] sm:$0xff] %vm94_vm0, %v3150_v48 }
 0xa16   :  { %1555 = vst.msk [vmem:[%s3373_s12] sm:$0xff] %vm94_vm0, %v3152_v51  ;;  %v1571_v18 = vpack.c.bf16 %v3150_v48, %v3152_v51  ;;  %v2415_v45 = vpop.f32.mrb[12].mxu0  ;;  %v1735_v48 = vrot.slane %v3046_v20, %v2905_v41 }
 0xa17   :  { %v3166_v52 = vadd.f32 %v2415_v45, %v1143_v44  ;;  %v1232_v53 = vpop.f32.mrb[13].mxu0 }
 0xa18   :  { %v3168_v55 = vadd.f32 %v1232_v53, %v1143_v44 }
 0xa19   :  { %1558 = vst.msk [vmem:[%s3373_s12 + $0x18] sm:$0xff] %vm94_vm0, %v3166_v52 }
 0xa1a   :  { %1557 = vst.msk [vmem:[%s3373_s12 + $0x10] sm:$0xff] %vm94_vm0, %v3168_v55  ;;  %v1572_v56 = vpack.c.bf16 %v3166_v52, %v3168_v55 }
 0xa22   :  { %v1326_v57 = vpop.f32.mrb[14].mxu0 }
 0xa23   :  { %v2426_v60 = vpop.f32.mrb[15].mxu0  ;;  %v1373_v1 = vrot.slane %v1326_v57, %v2905_v41 }
 0xa3d   :  { %v1360_v35 = vpop.xlane.xlu1 %1359 }
 0xa3e   :  { %v1374_v23 = vadd.f32 %v1373_v1, %v1360_v35  ;;  %v1363_v24 = vpop.xlane.xlu0 %1362 }
 0xa3f   :  { %v1375_v26 = vadd.f32 %v1373_v1, %v1363_v24 }
 0xa40   :  { %v1382_v28 = vmul.f32 0.2, %v1374_v23  ;;  %vm1378_vm4 = vcmp.gt.f32.partialorder %v1374_v23, 0.0 }
 0xa41   :  { %v1383_v5 = vmul.f32 0.2, %v1375_v26  ;;  %vm1379_vm9 = vcmp.gt.f32.partialorder %v1375_v26, 0.0 }
 0xa42   :  { %v1366_v43 = vpop.xlane.xlu0 %1365  ;;  %v1386_v4 = vsel %vm1378_vm4, %v1374_v23, %v1382_v28  ;;  %vm1897_vm4 = vcmask 31744  }
 0xa43   :  { %v1376_v6 = vadd.f32 %v1373_v1, %v1366_v43  ;;  %v1387_v7 = vsel %vm1379_vm9, %v1375_v26, %v1383_v5  ;;  %v1394_v3 = vsel %vm1390_vm7, %v1386_v4, -1e+09 }
 0xa44   :  { %v1395_v9 = vsel %vm1391_vm11, %v1387_v7, -1e+09  ;;  %v1398_v8 = vsel %vm94_vm0, %v1394_v3, -inf }
 0xa45   :  { %v1384_v10 = vmul.f32 0.2, %v1376_v6  ;;  %v1401_v12 = vsel %vm94_vm0, %v1395_v9, -inf  ;;  %1399 = vmax.xlane.f32.xlu1 %v1398_v8  ;;  %vm1380_vm5 = vcmp.gt.f32.partialorder %v1376_v6, 0.0 }
 0xa46   :  { %v1369_v30 = vpop.xlane.xlu0 %1368  ;;  %1402 = vmax.xlane.f32.xlu0 %v1401_v12 }
 0xa47   :  { %v1377_v33 = vadd.f32 %v1373_v1, %v1369_v30  ;;  %v1388_v14 = vsel %vm1380_vm5, %v1376_v6, %v1384_v10 }
 0xa48   :  { %v1396_v15 = vsel %vm1392_vm3, %v1388_v14, -1e+09 }
 0xa49   :  { %v1385_v29 = vmul.f32 0.2, %v1377_v33  ;;  %v1404_v31 = vsel %vm94_vm0, %v1396_v15, -inf  ;;  %vm1381_vm6 = vcmp.gt.f32.partialorder %v1377_v33, 0.0 }
 0xa4a   :  { %1405 = vmax.xlane.f32.xlu1 %v1404_v31  ;;  %v2604_v31 = vld [vmem:[%s3369_s8 + $0x18] sm:$0xff]  }
 0xa4b   :  { %v1389_v25 = vsel %vm1381_vm6, %v1377_v33, %v1385_v29  ;;  %v2603_v29 = vld [vmem:[%s3369_s8 + $0x10] sm:$0xff]  }
 0xa4c   :  { %v1397_v32 = vsel %vm1393_vm8, %v1389_v25, -1e+09  ;;  %2441 = vmatprep.subr.bf16.mxu1 %v2603_v29  ;;  %v2605_v25 = vld [vmem:[%s3369_s8] sm:$0xff]  }
 0xa4d   :  { %v1407_v34 = vsel %vm94_vm0, %v1397_v32, -inf }
 0xa4e   :  { %1408 = vmax.xlane.f32.xlu0 %v1407_v34 }
 0xad2   :  { %v1400_v17 = vpop.xlane.xlu1 %1399 }
 0xad3   :  { %v1403_v36 = vpop.xlane.xlu0 %1402  ;;  %v1410_v37 = vsub.f32 %v1394_v3, %v1400_v17 }
 0xad4   :  { %v1411_v40 = vsub.f32 %v1395_v9, %v1403_v36 }
 0xad5   :  { %v1414_v44 = vmul.f32 1.442695, %v1410_v37 }
 0xad6   :  { %v1416_v47 = vmul.f32 1.442695, %v1411_v40 }
 0xad7   :  { %2671 = vpow2.f32 %v1414_v44  ;;  %v1406_v50 = vpop.xlane.xlu1 %1405 }
 0xad8   :  { %2673 = vpow2.f32 %v1416_v47  ;;  %v1412_v45 = vsub.f32 %v1396_v15, %v1406_v50 }
 0xada   :  { %v1418_v53 = vmul.f32 1.442695, %v1412_v45 }
 0xadb   :  { %v1409_v57 = vpop.xlane.xlu0 %1408 }
 0xadc   :  { %2675 = vpow2.f32 %v1418_v53  ;;  %v1413_v60 = vsub.f32 %v1397_v32, %v1409_v57  ;;  %v1452_v32 = vsub.s32 4, %v2899_v39 }
 0xade   :  { %v1420_v61 = vmul.f32 1.442695, %v1413_v60  ;;  %v1453_v34 = vrot.slane %v3017_v49, %v1452_v32  ;;  %v2606_v60 = vld [vmem:[%s3369_s8 + $0x8] sm:$0xff]  }
 0xae0   :  { %2677 = vpow2.f32 %v1420_v61  ;;  %v1712_v61 = vrot.slane %v3017_v49, %v1332_v58 }
 0xae1   :  { %v2672_v62 = vpop.eup %2671 }
 0xae2   :  { %v2674_v0 = vpop.eup %2673  ;;  %v1422_v1 = vsel %vm1390_vm7, %v2672_v62, 0.0 }
 0xae3   :  { %v1423_v42 = vsel %vm1391_vm11, %v2674_v0, 0.0  ;;  %v1426_v35 = vsel %vm94_vm0, %v1422_v1, 0.0  ;;  %vm2050_vm11 = vcmask 257024  }
 0xae4   :  { %v1429_v23 = vsel %vm94_vm0, %v1423_v42, 0.0  ;;  %1427 = vadd.xlane.f32.xlu1 %v1426_v35 }
 0xae5   :  { %1430 = vadd.xlane.f32.xlu0 %v1429_v23 }
 0xae6   :  { %v2676_v24 = vpop.eup %2675 }
 0xae7   :  { %v1424_v26 = vsel %vm1392_vm3, %v2676_v24, 0.0 }
 0xae8   :  { %v1432_v28 = vsel %vm94_vm0, %v1424_v26, 0.0 }
 0xae9   :  { %1433 = vadd.xlane.f32.xlu1 %v1432_v28 }
 0xaea   :  { %v2678_v5 = vpop.eup %2677 }
 0xaeb   :  { %v1425_v59 = vsel %vm1393_vm8, %v2678_v5, 0.0 }
 0xaec   :  { %v1435_v21 = vsel %vm94_vm0, %v1425_v59, 0.0 }
 0xaed   :  { %1436 = vadd.xlane.f32.xlu0 %v1435_v21  ;;  %v1723_v21 = vand.u32 127, %v380_v38 }
 0xb71   :  { %v1428_v22 = vpop.xlane.xlu1 %1427 }
 0xb72   :  { %v1431_v43 = vpop.xlane.xlu0 %1430  ;;  %v1438_v4 = vmax.f32 %v1428_v22, 1e-16  ;;  %v1719_v22 = vadd.s32 8, %v2899_v39 }
 0xb73   :  { %v1439_v6 = vmax.f32 %v1431_v43, 1e-16  ;;  %v1721_v43 = vadd.s32 24, %v2899_v39 }
 0xb74   :  { %2679 = vrcp.f32 %v1438_v4  ;;  %vm1725_vm10 = vcmp.eq.s32.totalorder %v1719_v22, %v1723_v21 }
 0xb75   :  { %2681 = vrcp.f32 %v1439_v6  ;;  %vm1727_vm13 = vcmp.eq.s32.totalorder %v1721_v43, %v1723_v21  ;;  %v1729_v6 = vsel %vm1725_vm10, 0.0, %v2913_v46 }
 0xb76   :  { %v1434_v7 = vpop.xlane.xlu1 %1433 }
 0xb77   :  { %v1440_v3 = vmax.f32 %v1434_v7, 1e-16 }
 0xb79   :  { %2683 = vrcp.f32 %v1440_v3 }
 0xb7a   :  { %v1437_v2 = vpop.xlane.xlu0 %1436 }
 0xb7b   :  { %v1441_v9 = vmax.f32 %v1437_v2, 1e-16  ;;  %v1731_v2 = vsel %vm1727_vm13, 0.0, %v2923_v63  ;;  %v1863_v63 = vsub.s32 6, %v2899_v39 }
 0xb7d   :  { %2685 = vrcp.f32 %v1441_v9 }
 0xb7e   :  { %v2680_v8 = vpop.eup %2679 }
 0xb7f   :  { %v2682_v10 = vpop.eup %2681  ;;  %v1446_v12 = vmul.f32 %v2680_v8, %v1422_v1 }
 0xb80   :  { %v1447_v13 = vmul.f32 %v2682_v10, %v1423_v42 }
 0xb81   :  { %2435 = vmatprep.mubr.msk.f32.mxu1 %vm94_vm0, %v1446_v12 }
 0xb82   :  { %2436 = vmatmul.mubr.msk.f32.vlgmr.msra.gmra.mrb[14].mxu1 %vm94_vm0, %v1447_v13 }
 0xb83   :  { %v2684_v30 = vpop.eup %2683  ;;  %2442 = vmatpush3.bf16.msra.mxu1 %v2603_v29 }
 0xb84   :  { %v1448_v33 = vmul.f32 %v2684_v30, %v1424_v26  ;;  %2443 = vmatprep.subr.bf16.mxu1 %v2604_v31 }
 0xb86   :  { %2438 = vmatprep.mubr.msk.f32.mxu1 %vm94_vm0, %v1448_v33 }
 0xb87   :  { %v2686_v14 = vpop.eup %2685  ;;  %2444 = vmatpush3.bf16.msra.mxu1 %v2604_v31 }
 0xb88   :  { %v1449_v15 = vmul.f32 %v2686_v14, %v1425_v59  ;;  %2449 = vmatprep.subr.bf16.mxu1 %v2605_v25  ;;  %v1752_v59 = vrot.slane %v3046_v20, 1 }
 0xb8a   :  { %2439 = vmatmul.mubr.msk.f32.gmra.mrb[16].mxu1 %vm94_vm0, %v1449_v15  ;;  %v1864_v15 = vrot.slane %v3046_v20, %v1863_v63 }
 0xc55   :  { %v2437_v17 = vpop.f32.mrb[14].mxu1 }
 0xc56   :  { %v1542_v36 = vadd.f32 %v2437_v17, %v1453_v34  ;;  %v1536_v37 = vpop.f32.mrb[15].mxu1 }
 0xc57   :  { %v1537_v40 = vadd.f32 %v1536_v37, %v1453_v34 }
 0xc58   :  { %1560 = vst.msk [vmem:[%s3373_s12 + $0x28] sm:$0xff] %vm94_vm0, %v1542_v36 }
 0xc59   :  { %1559 = vst.msk [vmem:[%s3373_s12 + $0x20] sm:$0xff] %vm94_vm0, %v1537_v40  ;;  %v1573_v44 = vpack.c.bf16 %v1542_v36, %v1537_v40 }
 0xc5b   :  { %2445 = vmatprep.mubr.msk.bf16.mxu1 %vm94_vm0, %v1573_v44 }
 0xc5d   :  { %v2440_v47 = vpop.f32.mrb[16].mxu1 }
 0xc5e   :  { %v1552_v50 = vadd.f32 %v2440_v47, %v1453_v34  ;;  %v1546_v45 = vpop.f32.mrb[17].mxu1 }
 0xc5f   :  { %v1547_v53 = vadd.f32 %v1546_v45, %v1453_v34 }
 0xc60   :  { %1562 = vst.msk [vmem:[%s3373_s12 + $0x38] sm:$0xff] %vm94_vm0, %v1552_v50 }
 0xc61   :  { %1561 = vst.msk [vmem:[%s3373_s12 + $0x30] sm:$0xff] %vm94_vm0, %v1547_v53  ;;  %v1574_v57 = vpack.c.bf16 %v1552_v50, %v1547_v53 }
 0xc63   :  { %2446 = vmatmul.mubr.msk.bf16.vlgmr.msra.gmra.mrb[20].mxu1 %vm94_vm0, %v1574_v57  ;;  %v2234_v57 = vld [vmem:[%s3364_s3] sm:$0xff]  }
 0xc64   :  { %2450 = vmatpush3.bf16.msra.mxu1 %v2605_v25  ;;  %2453 = vmatprep.mubr.msk.bf16.mxu1 %vm94_vm0, %v1571_v18 }
 0xc65   :  { %2451 = vmatprep.subr.bf16.mxu1 %v2606_v60 }
 0xc68   :  { %2452 = vmatpush3.bf16.msra.mxu1 %v2606_v60  ;;  %v2235_v60 = vunpack.c.0.s8 %v2234_v57 }
 0xc69   :  { %2551 = vmatprep.subr.bf16.mxu1 %v2738_v16 }
 0xc6f   :  { %2454 = vmatmul.mubr.msk.bf16.vlgmr.msra.gmra.mrb[20].mxu1 %vm94_vm0, %v1572_v56 }
 0xc70   :  { %2476 = vmatprep.mubr.msk.f32.mxu1 %vm2739_vm1, %v2740_v19  ;;  %vm1724_vm1 = vcmp.eq.s32.totalorder %v2899_v39, %v1723_v21 }
 0xc71   :  { %v1728_v27 = vsel %vm1724_vm1, 0.0, %v2917_v54 }
 0xd42   :  { %v2455_v51 = vpop.f32.mrb[20].mxu1 }
 0xd43   :  { %v3254_v18 = vadd.f32 %v2455_v51, %v1712_v61  ;;  %v1694_v62 = vpop.f32.mrb[21].mxu1  ;;  %v70_v51 = vcvt.s32.f32 %v2235_v60 }
 0xd44   :  { %v3256_v0 = vadd.f32 %v1712_v61, %v1694_v62  ;;  %v2456_v1 = vpop.f32.mrb[22].mxu1 }
 0xd45   :  { %v3258_v52 = vadd.f32 %v2456_v1, %v1712_v61  ;;  %v1697_v55 = vpop.f32.mrb[23].mxu1  ;;  %v1738_v56 = vmul.f32 %v1735_v48, %v3254_v18  ;;  %v2058_v20 = vsel %vm94_vm0, %v3254_v18, 0.0  ;;  %v2240_v1 = vunpack.c.3.s8 %v2234_v57 }
 0xd46   :  { %v3261_v19 = vadd.f32 %v1712_v61, %v1697_v55  ;;  %v1736_v58 = vmul.f32 %v1735_v48, %v3256_v0  ;;  %v2052_v45 = vsel %vm94_vm0, %v3256_v0, 0.0  ;;  %v2236_v61 = vunpack.c.1.s8 %v2234_v57 }
 0xd47   :  { %v1746_v42 = vsel %vm94_vm0, %v1738_v56, 0.0  ;;  %v1739_v49 = vmul.f32 %v1735_v48, %v3258_v52  ;;  %v2548_v28 = vpack.c.bf16 %v3258_v52, %v3254_v18  ;;  %v2061_v53 = vsel %vm94_vm0, %v3258_v52, 0.0 }
 0xd48   :  { %v2544_v35 = vpack.c.bf16 %v3261_v19, %v3256_v0  ;;  %1747 = vadd.xlane.f32.xlu1 %v1746_v42  ;;  %v1737_v24 = vmul.f32 %v1735_v48, %v3261_v19  ;;  %v1740_v26 = vsel %vm94_vm0, %v1736_v58, 0.0  ;;  %v2239_v48 = vunpack.c.2.s8 %v2234_v57 }
 0xd49   :  { %v1749_v23 = vsel %vm94_vm0, %v1739_v49, 0.0  ;;  %v71_v62 = vcvt.s32.f32 %v2236_v61  ;;  %v73_v49 = vcvt.s32.f32 %v2240_v1 }
 0xd4a   :  { %1750 = vadd.xlane.f32.xlu0 %v1749_v23  ;;  %2546 = vmatpush3.bf16.xpose.msk.msra.mxu0 %vm2878_vm2, %v2544_v35  ;;  %v1743_v5 = vsel %vm94_vm0, %v1737_v24, 0.0  ;;  %v72_v56 = vcvt.s32.f32 %v2239_v48 }
 0xd4b   :  { %2553 = vmatpush3.bf16.msra.mxu1 %v2544_v35  ;;  %2547 = vmatprep.subr.bf16.mxu0 %v2738_v16  ;;  %vm1870_vm14 = vcmp.gt.f32.partialorder %v71_v62, 0.0  ;;  %vm1872_vm7 = vcmp.gt.f32.partialorder %v73_v49, 0.0  ;;  %v2055_v49 = vsel %vm94_vm0, %v3261_v19, 0.0 }
 0xd4c   :  { %1741 = vadd.xlane.f32.xlu1 %v1740_v26  ;;  %2554 = vmatprep.subr.bf16.mxu1 %v2738_v16  ;;  %v1720_v16 = vadd.s32 16, %v2899_v39  ;;  %vm1871_vm15 = vcmp.gt.f32.partialorder %v72_v56, 0.0 }
 0xd4e   :  { %1744 = vadd.xlane.f32.xlu0 %v1743_v5  ;;  %vm1726_vm12 = vcmp.eq.s32.totalorder %v1720_v16, %v1723_v21 }
 0xd4f   :  { %2556 = vmatpush3.bf16.msra.mxu1 %v2548_v28  ;;  %v1730_v38 = vsel %vm1726_vm12, 0.0, %v2931_v11 }
 0xd52   :  { %2550 = vmatpush3.bf16.xpose.msk.msra.mxu0 %vm2878_vm2, %v2548_v28  ;;  %vm1869_vm2 = vcmp.gt.f32.partialorder %v70_v51, 0.0 }
 0xd59   :  { %2466 = vmatmul.mubr.msk.f32.vlgmr.msra.gmra.mrb[16].mxu0 %vm94_vm0, %v1752_v59 }
 0xdd7   :  { %v1751_v11 = vpop.xlane.xlu0 %1750 }
 0xddb   :  { %v1745_v14 = vpop.xlane.xlu0 %1744 }
 0xe2c   :  { %v1833_v4 = vpop.f32.mrb[16].mxu0 }
 0xe2d   :  { %v1840_v7 = vrot.slane %v1833_v4, %v2905_v41  ;;  %v2467_v3 = vpop.f32.mrb[17].mxu0  ;;  %v1748_v41 = vpop.xlane.xlu1 %1747 }
 0xe2f   :  { %v1841_v9 = vmul.f32 %v1840_v7, %v1728_v27  ;;  %v1842_v8 = vmul.f32 %v1840_v7, %v1729_v6  ;;  %v1843_v13 = vmul.f32 %v1840_v7, %v1730_v38  ;;  %v1844_v30 = vmul.f32 %v1840_v7, %v1731_v2 }
 0xe31   :  { %v1845_v10 = vsel %vm94_vm0, %v1841_v9, 0.0  ;;  %v1848_v12 = vsel %vm94_vm0, %v1842_v8, 0.0  ;;  %v1851_v54 = vsel %vm94_vm0, %v1843_v13, 0.0  ;;  %v1854_v46 = vsel %vm94_vm0, %v1844_v30, 0.0  ;;  %v1742_v33 = vpop.xlane.xlu1 %1741 }
 0xe32   :  { %1846 = vadd.xlane.f32.xlu1 %v1845_v10  ;;  %1849 = vadd.xlane.f32.xlu0 %v1848_v12 }
 0xe36   :  { %1852 = vadd.xlane.f32.xlu1 %v1851_v54  ;;  %1855 = vadd.xlane.f32.xlu0 %v1854_v46 }
 0xebf   :  { %v1847_v29 = vpop.xlane.xlu1 %1846  ;;  %v1850_v31 = vpop.xlane.xlu0 %1849 }
 0xec0   :  { %v1857_v25 = vadd.f32 %v1847_v29, %v1742_v33  ;;  %v1858_v32 = vadd.f32 %v1850_v31, %v1745_v14 }
 0xec2   :  { %v1865_v34 = vadd.f32 %v1864_v15, %v1857_v25  ;;  %v1866_v17 = vadd.f32 %v1864_v15, %v1858_v32 }
 0xec3   :  { %v1853_v36 = vpop.xlane.xlu1 %1852  ;;  %v1856_v37 = vpop.xlane.xlu0 %1855 }
 0xec4   :  { %v1859_v40 = vadd.f32 %v1853_v36, %v1748_v41  ;;  %1875 = vperm.xlu1 %2597, %v1865_v34   ;;  %1880 = vperm.xlu0 %2598, %v1866_v17   ;;  %v1860_v47 = vadd.f32 %v1856_v37, %v1751_v11 }
 0xec6   :  { %v1867_v44 = vadd.f32 %v1864_v15, %v1859_v40  ;;  %v1868_v50 = vadd.f32 %v1864_v15, %v1860_v47 }
 0xec8   :  { %1885 = vperm.xlu1 %2597, %v1867_v44  }
 0xecc   :  { %1890 = vperm.xlu1 %2597, %v1868_v50  }
 0xee3   :  { %2053 = vadd.xlane.f32.xlu0 %v2052_v45 }
 0xee7   :  { %2059 = vadd.xlane.f32.xlu0 %v2058_v20 }
 0xeeb   :  { %2062 = vadd.xlane.f32.xlu0 %v2061_v53 }
 0xf43   :  { %v1876_v55 = vpop.permute.xlu1 %1875  ;;  %v1881_v42 = vpop.permute.xlu0 %1880 }
 0xf44   :  { %v1893_v35 = vsel %vm1869_vm2, %v1876_v55, -1e+09  ;;  %v1894_v23 = vsel %vm1870_vm14, %v1881_v42, -1e+09 }
 0xf45   :  { %v1898_v26 = vsel %vm1897_vm4, %v1893_v35, -inf  ;;  %v1899_v28 = vsel %vm1897_vm4, %v1894_v23, -inf }
 0xf46   :  { %v1902_v16 = vmax.f32 %v1898_v26, %v1899_v28 }
 0xf47   :  { %v1886_v58 = vpop.permute.xlu1 %1885 }
 0xf48   :  { %v1895_v24 = vsel %vm1871_vm15, %v1886_v58, -1e+09 }
 0xf49   :  { %v1900_v21 = vsel %vm1897_vm4, %v1895_v24, -inf }
 0xf4b   :  { %v1891_v5 = vpop.permute.xlu1 %1890 }
 0xf4c   :  { %v1896_v59 = vsel %vm1872_vm7, %v1891_v5, -1e+09  ;;  %v2114_v5 = vsub.s32 7, %v2899_v39 }
 0xf4d   :  { %v1901_v22 = vsel %vm1897_vm4, %v1896_v59, -inf }
 0xf4e   :  { %v1903_v43 = vmax.f32 %v1900_v21, %v1901_v22 }
 0xf50   :  { %v1904_v4 = vmax.f32 %v1902_v16, %v1903_v43 }
 0xf52   :  { %v1905_v27 = vrot.slane %v1904_v4, 4 }
 0xf54   :  { %v1906_v6 = vmax.f32 %v1904_v4, %v1905_v27 }
 0xf56   :  { %v1907_v7 = vrot.slane %v1906_v6, 2 }
 0xf58   :  { %v1908_v3 = vmax.f32 %v1906_v6, %v1907_v7 }
 0xf5a   :  { %v1909_v38 = vrot.slane %v1908_v3, 1 }
 0xf5c   :  { %v1910_v2 = vmax.f32 %v1908_v3, %v1909_v38 }
 0xf5e   :  { %v1911_v9 = vsub.f32 %v1893_v35, %v1910_v2  ;;  %v1912_v8 = vsub.f32 %v1894_v23, %v1910_v2  ;;  %v1913_v10 = vsub.f32 %v1895_v24, %v1910_v2  ;;  %v1914_v12 = vsub.f32 %v1896_v59, %v1910_v2  ;;  %v2713_v59 = vld [vmem:[%s3370_s9] sm:$0xff] }
 0xf5f   :  { %v2107_v21 = vrot.slane %v2713_v59, %v1863_v63  ;;  %v2115_v16 = vrot.slane %v2713_v59, %v2114_v5 }
 0xf60   :  { %v1915_v13 = vmul.f32 1.442695, %v1911_v9  ;;  %v1917_v30 = vmul.f32 1.442695, %v1912_v8  ;;  %v1919_v54 = vmul.f32 1.442695, %v1913_v10 }
 0xf61   :  { %v1921_v46 = vmul.f32 1.442695, %v1914_v12 }
 0xf62   :  { %2687 = vpow2.f32 %v1915_v13 }
 0xf63   :  { %2689 = vpow2.f32 %v1917_v30 }
 0xf64   :  { %2691 = vpow2.f32 %v1919_v54 }
 0xf65   :  { %2693 = vpow2.f32 %v1921_v46 }
 0xf6c   :  { %v2688_v41 = vpop.eup %2687 }
 0xf6d   :  { %v2690_v11 = vpop.eup %2689  ;;  %v1923_v33 = vsel %vm1869_vm2, %v2688_v41, 0.0 }
 0xf6e   :  { %v2692_v14 = vpop.eup %2691  ;;  %v1924_v15 = vsel %vm1870_vm14, %v2690_v11, 0.0  ;;  %v1927_v29 = vsel %vm1897_vm4, %v1923_v33, 0.0 }
 0xf6f   :  { %v2694_v31 = vpop.eup %2693  ;;  %v1925_v25 = vsel %vm1871_vm15, %v2692_v14, 0.0  ;;  %v1928_v32 = vsel %vm1897_vm4, %v1924_v15, 0.0 }
 0xf70   :  { %v1926_v34 = vsel %vm1872_vm7, %v2694_v31, 0.0  ;;  %v1929_v17 = vadd.f32 %v1928_v32, %v1927_v29  ;;  %v2054_v36 = vpop.xlane.xlu0 %2053  ;;  %v1930_v37 = vsel %vm1897_vm4, %v1925_v25, 0.0 }
 0xf71   :  { %v2064_v40 = vmul.f32 0.03125, %v2054_v36  ;;  %v1932_v47 = vsel %vm1897_vm4, %v1926_v34, 0.0 }
 0xf72   :  { %v1931_v44 = vadd.f32 %v1930_v37, %v1929_v17 }
 0xf73   :  { %v2068_v50 = vsub.f32 %v3256_v0, %v2064_v40 }
 0xf74   :  { %v1933_v45 = vadd.f32 %v1932_v47, %v1931_v44  ;;  %v2060_v58 = vpop.xlane.xlu0 %2059 }
 0xf75   :  { %v2072_v20 = vmul.f32 %v2068_v50, %v2068_v50  ;;  %v2066_v2 = vmul.f32 0.03125, %v2060_v58 }
 0xf76   :  { %v1934_v53 = vrot.slane %v1933_v45, 4 }
 0xf77   :  { %v2076_v57 = vsel %vm94_vm0, %v2072_v20, 0.0  ;;  %v2070_v10 = vsub.f32 %v3254_v18, %v2066_v2 }
 0xf78   :  { %v1935_v60 = vadd.f32 %v1934_v53, %v1933_v45  ;;  %2077 = vadd.xlane.f32.xlu0 %v2076_v57  ;;  %v2063_v35 = vpop.xlane.xlu0 %2062 }
 0xf79   :  { %v2067_v39 = vmul.f32 0.03125, %v2063_v35  ;;  %v2074_v54 = vmul.f32 %v2070_v10, %v2070_v10 }
 0xf7a   :  { %v1936_v61 = vrot.slane %v1935_v60, 2 }
 0xf7b   :  { %v2071_v13 = vsub.f32 %v3258_v52, %v2067_v39  ;;  %v2082_v46 = vsel %vm94_vm0, %v2074_v54, 0.0 }
 0xf7c   :  { %v1937_v48 = vadd.f32 %v1936_v61, %v1935_v60 }
 0xf7d   :  { %v2075_v41 = vmul.f32 %v2071_v13, %v2071_v13 }
 0xf7e   :  { %v1938_v51 = vrot.slane %v1937_v48, 1 }
 0xf7f   :  { %v2085_v11 = vsel %vm94_vm0, %v2075_v41, 0.0 }
 0xf80   :  { %v1939_v62 = vadd.f32 %v1938_v51, %v1937_v48 }
 0xf82   :  { %2695 = vrcp.f32 %v1939_v62 }
 0xf8c   :  { %v2696_v1 = vpop.eup %2695 }
 0xf8d   :  { %v1941_v55 = vmul.f32 %v2696_v1, %v1923_v33  ;;  %v1942_v56 = vmul.f32 %v2696_v1, %v1924_v15  ;;  %v1943_v42 = vmul.f32 %v2696_v1, %v1925_v25  ;;  %v1944_v0 = vmul.f32 %v2696_v1, %v1926_v34 }
 0xf8f   :  { %1945 = vxpose.xlu1.b32.start [1/4] (short) (narrow) %v1941_v55, 8 }
 0xf93   :  { %1946 = vxpose.xlu1.b32.cont [2/4] (short) (narrow) %v1942_v56, 8 }
 0xf97   :  { %1947 = vxpose.xlu1.b32.cont [3/4] (short) (narrow) %v1943_v42, 8 }
 0xf9b   :  { %1948 = vxpose.xlu1.b32.end [4/4] (short) (narrow) %v1944_v0, 8 }
 0xfc2   :  { %2056 = vadd.xlane.f32.xlu1 %v2055_v49 }
0x1005   :  { %v2078_v23 = vpop.xlane.xlu0 %2077 }
0x1006   :  { %v2088_v24 = vmul.f32 0.03125, %v2078_v23 }
0x1008   :  { %v2092_v26 = vadd.f32 1e-05, %v2088_v24 }
0x100a   :  { %2697 = vrsqrt.f32 %v2092_v26 }
0x100f   :  { %v1961_v28 = vpop.trf.xlu1 }
0x1010   :  { %2477 = vmatmul.mubr.msk.f32.vlgmr.msra.gmra.mrb[18].mxu1 %vm94_vm0, %v1961_v28 }
0x1014   :  { %v2698_v22 = vpop.eup %2697 }
0x1015   :  { %v2100_v43 = vmul.f32 %v2698_v22, %v2068_v50 }
0x1017   :  { %v2108_v4 = vmul.f32 %v2107_v21, %v2100_v43 }
0x1019   :  { %v2116_v27 = vadd.f32 %v2115_v16, %v2108_v4 }
0x101b   :  { %v2124_v6 = vmul.f32 1.442695, %v2116_v27  ;;  %vm2120_vm9 = vcmp.gt.f32.partialorder %v2116_v27, 0.0 }
0x101d   :  { %2699 = vpow2.f32 %v2124_v6 }
0x1027   :  { %v2700_v7 = vpop.eup %2699 }
0x1028   :  { %v2229_v3 = vadd.f32 -1.0, %v2700_v7 }
0x102a   :  { %v2136_v38 = vsel %vm2120_vm9, %v2116_v27, %v2229_v3 }
0x102b   :  { %2140 = vst.msk [vmem:[#allocation3] sm:$0xff] %vm94_vm0, %v2136_v38 }
0x104f   :  { %v2057_v9 = vpop.xlane.xlu1 %2056 }
0x1050   :  { %v2065_v8 = vmul.f32 0.03125, %v2057_v9 }
0x1052   :  { %v2069_v63 = vsub.f32 %v3261_v19, %v2065_v8 }
0x1054   :  { %v2073_v12 = vmul.f32 %v2069_v63, %v2069_v63 }
0x1056   :  { %v2079_v30 = vsel %vm94_vm0, %v2073_v12, 0.0 }
0x1057   :  { %2080 = vadd.xlane.f32.xlu0 %v2079_v30 }
0x105b   :  { %2083 = vadd.xlane.f32.xlu0 %v2082_v46 }
0x105f   :  { %2086 = vadd.xlane.f32.xlu0 %v2085_v11 }
0x10e3   :  { %v2046_v33 = vpop.f32.mrb[18].mxu1 }
0x10e4   :  { %v2081_v18 = vpop.xlane.xlu0 %2080  ;;  %2051 = vst.msk [vmem:[%s3371_s10] sm:$0xf] %vm2050_vm11, %v2046_v33  ;;  %v2478_v19 = vpop.f32.mrb[19].mxu1  ;;  %s2747_s10 = smov [#allocation3]  }
0x10e5   :  { %v2089_v52 = vmul.f32 0.03125, %v2081_v18  ;;  %s2151_s22 = sshll.u32 %s2747_s10, 4  ;;  %s2152_s22 = int_to_ptr.vmem [resolvable:$true] %s2151_s22 }
0x10e6   :  { %s2714_s23 = scalar_lea.vmem %s2152_s22, 512  ;;  %p2719_p1 = scmp.lt.s32.totalorder %s2152_s22, %s2152_s22 }
0x10e7   :  { %v2093_v14 = vadd.f32 1e-05, %v2089_v52  ;;  %p2715_p0 = scmp.ne.s32.totalorder %s2152_s22, %s2714_s23  ;;  %p2720_p2 = scmp.lt.s32.totalorder %s2714_s23, %s2714_s23 }
0x10e8   :  { %v2084_v15 = vpop.xlane.xlu0 %2083 }
0x10e9   :  { %2701 = vrsqrt.f32 %v2093_v14  ;;  %v2090_v29 = vmul.f32 0.03125, %v2084_v15  ;;  %p2721_p3 = por %p2720_p2, %p2719_p1 }
0x10eb   :  { %v2094_v31 = vadd.f32 1e-05, %v2090_v29  ;;  %p2722_p4 = pnand %p2721_p3, %p2715_p0 }
0x10ec   :  { %v2087_v25 = vpop.xlane.xlu0 %2086 }
0x10ed   :  { %2703 = vrsqrt.f32 %v2094_v31  ;;  %v2091_v32 = vmul.f32 0.03125, %v2087_v25 }
0x10ef   :  { %v2095_v34 = vadd.f32 1e-05, %v2091_v32 }
0x10f1   :  { %2705 = vrsqrt.f32 %v2095_v34 }
0x10f3   :  { %v2702_v17 = vpop.eup %2701 }
0x10f4   :  { %v2101_v36 = vmul.f32 %v2702_v17, %v2069_v63 }
0x10f6   :  { %v2109_v37 = vmul.f32 %v2107_v21, %v2101_v36 }
0x10f7   :  { %v2704_v40 = vpop.eup %2703 }
0x10f8   :  { %v2117_v44 = vadd.f32 %v2115_v16, %v2109_v37  ;;  %v2102_v47 = vmul.f32 %v2704_v40, %v2070_v10 }
0x10fa   :  { %v2126_v50 = vmul.f32 1.442695, %v2117_v44  ;;  %v2110_v45 = vmul.f32 %v2107_v21, %v2102_v47  ;;  %vm2121_vm3 = vcmp.gt.f32.partialorder %v2117_v44, 0.0 }
0x10fb   :  { %v2706_v20 = vpop.eup %2705 }
0x10fc   :  { %2707 = vpow2.f32 %v2126_v50  ;;  %v2118_v53 = vadd.f32 %v2115_v16, %v2110_v45  ;;  %v2103_v57 = vmul.f32 %v2706_v20, %v2071_v13 }
0x10fe   :  { %v2128_v60 = vmul.f32 1.442695, %v2118_v53  ;;  %v2111_v61 = vmul.f32 %v2107_v21, %v2103_v57  ;;  %vm2122_vm5 = vcmp.gt.f32.partialorder %v2118_v53, 0.0 }
0x1100   :  { %2709 = vpow2.f32 %v2128_v60  ;;  %v2119_v48 = vadd.f32 %v2115_v16, %v2111_v61 }
0x1102   :  { %v2130_v51 = vmul.f32 1.442695, %v2119_v48  ;;  %vm2123_vm6 = vcmp.gt.f32.partialorder %v2119_v48, 0.0 }
0x1104   :  { %2711 = vpow2.f32 %v2130_v51 }
0x1106   :  { %v2708_v62 = vpop.eup %2707 }
0x1107   :  { %v2230_v1 = vadd.f32 -1.0, %v2708_v62 }
0x1109   :  { %v2137_v55 = vsel %vm2121_vm3, %v2117_v44, %v2230_v1 }
0x110a   :  { %v2710_v56 = vpop.eup %2709  ;;  %2141 = vst.msk [vmem:[#allocation3 + $0x8] sm:$0xff] %vm94_vm0, %v2137_v55 }
0x110b   :  { %v2231_v42 = vadd.f32 -1.0, %v2710_v56 }
0x110d   :  { %v2138_v0 = vsel %vm2122_vm5, %v2118_v53, %v2231_v42 }
0x110e   :  { %v2712_v49 = vpop.eup %2711  ;;  %2142 = vst.msk [vmem:[#allocation3 + $0x10] sm:$0xff] %vm94_vm0, %v2138_v0 }
0x110f   :  { %v2232_v58 = vadd.f32 -1.0, %v2712_v49 }
0x1111   :  { %v2139_v35 = vsel %vm2123_vm6, %v2119_v48, %v2232_v58 }
0x1112   :  { %2143 = vst.msk [vmem:[#allocation3 + $0x18] sm:$0xff] %vm94_vm0, %v2139_v35 }
0x1113   :  { %2725 = shalt.err (!%p2722_p4)
}
0x1114   :  { %s2726_s26 = scalar_lea.hbm %s3372_s11, 512 }
0x1115   :  { %p2727_p5 = scmp.ne.s32.totalorder %s3372_s11, %s2726_s26  ;;  %p2730_p6 = scmp.lt.u32.totalorder %s2726_s26, %s3372_s11 }
0x1117   :  { %p2732_p7 = pnand %p2730_p6, %p2727_p5 }
0x1119   :  { %2735 = shalt.err (!%p2732_p7)
}
0x111a   :  { %s2748_s28 = smov 128   ;;  %s2749_s1 = smov 8  }
0x111b   :  { %2157 = dma.vmem_to_hbm [thread:$0]  %s2152_s22, 512, %s3372_s11, [#allocation4], %s2748_s28, %s2748_s28, %s2749_s1  }
0x111c   :  { %2736 = dma.done.wait [#allocation4], 512  }
0x111d   :  { %2737 = vsyncadd [#allocation4], 4294966784 }
0x111e   :  { %2167 = vsyncpa [#allocation4], 1 }

// kernel: fwd.4
= control target key start
LH: loop header
LB: loop body
LE: loop exit
PB: predicated region body
PF: predicated region fallthrough
CT: control target
= control target key end

     0   :  { %vm49_vm0 = vcmask 261120   ;;  %s3462_s0 = inlined_call_operand.vmem [shape: f32[32,32], index: 0, kind: input, shape index: {}]   ;;  %s3463_s1 = inlined_call_operand.vmem [shape: s8[32,32], index: 1, kind: input, shape index: {}]   ;;  %s3464_s2 = inlined_call_operand.vmem [shape: s8[32,32], index: 2, kind: input, shape index: {}]   ;;  %s3465_s3 = inlined_call_operand.vmem [shape: s8[32,4], index: 3, kind: input, shape index: {}]   ;;  %s3466_s4 = inlined_call_operand.vmem [shape: f32[2,32], index: 4, kind: input, shape index: {}]   ;;  %s3467_s5 = inlined_call_operand.vmem [shape: bf16[32,32], index: 5, kind: input, shape index: {}]   ;;  %s3468_s6 = inlined_call_operand.vmem [shape: f32[32,2], index: 6, kind: input, shape index: {}]   ;;  %s3469_s7 = inlined_call_operand.vmem [shape: f32[32,2], index: 7, kind: input, shape index: {}]   ;;  %s3470_s8 = inlined_call_operand.vmem [shape: bf16[32,96], index: 8, kind: input, shape index: {}]   ;;  %s3471_s9 = inlined_call_operand.vmem [shape: bf16[64,32], index: 9, kind: input, shape index: {}]   ;;  %s3472_s10 = inlined_call_operand.vmem [shape: f32[16,32], index: 10, kind: input, shape index: {}]   ;;  %s3473_s11 = inlined_call_operand.vmem [shape: f32[4,32], index: 11, kind: output, shape index: {0}]   ;;  %s3474_s12 = inlined_call_operand.vmem [shape: f32[32,32], index: 12, kind: output, shape index: {1}]   ;;  %s3475_s13 = inlined_call_operand.hbm [shape: f32[64,32], index: 13, kind: output, shape index: {2}]  }
   0x1   :  { %v43_v0 = vld [vmem:[%s3462_s0] sm:$0xff]  ;;  %v45_v1 = vld [vmem:[%s3462_s0 + $0x10] sm:$0xff]  ;;  %v44_v2 = vld [vmem:[%s3462_s0 + $0x8] sm:$0xff] }
   0x2   :  { %v50_v3 = vsel %vm49_vm0, %v43_v0, 0.0  ;;  %v56_v4 = vsel %vm49_vm0, %v45_v1, 0.0  ;;  %v46_v5 = vld [vmem:[%s3462_s0 + $0x18] sm:$0xff]  ;;  %v53_v6 = vsel %vm49_vm0, %v44_v2, 0.0 }
   0x3   :  { %51 = vadd.xlane.f32.xlu0 %v50_v3  ;;  %57 = vadd.xlane.f32.xlu1 %v56_v4  ;;  %v59_v7 = vsel %vm49_vm0, %v46_v5, 0.0 }
   0x7   :  { %54 = vadd.xlane.f32.xlu0 %v53_v6  ;;  %60 = vadd.xlane.f32.xlu1 %v59_v7 }
   0x8   :  { %19 = vsyncpa [#allocation4], 0  ;;  %v2675_v28 = vld [vmem:[%s3467_s5] sm:$0xff]   ;;  %v2676_v29 = vld [vmem:[%s3467_s5 + $0x8] sm:$0xff]   ;;  %v2822_v6 = vmov 0.0|0.0   ;;  %vm2823_vm1 = vmmov 0  }
   0x9   :  { %2397 = vmatprep.subr.bf16.mxu0 %v2675_v28  ;;  %v224_v30 = vld [vmem:[%s3469_s7] sm:$0xff]  ;;  %v225_v31 = vld [vmem:[%s3469_s7 + $0x8] sm:$0xff]  ;;  %v327_v7 = vld [vmem:[%s3468_s6 + $0x10] sm:$0xff]  ;;  %vm631_vm15 = vcmask 130048   ;;  %s2828_s19 = smov 16   ;;  %s2829_s26 = smov 96  }
   0xa   :  { %2398 = vmatpush3.bf16.msra.mxu0 %v2675_v28  ;;  %v2554_v32 = vpack.c.bf16 %v225_v31, %v224_v30  ;;  %v2241_v47 = vld [vmem:[%s3466_s4] ss:$0 sm:$0xff]  ;;  %v2242_v53 = vld [vmem:[%s3466_s4 + $0x1] ss:$0 sm:$0xff]  ;;  %vm2981_vm2 = vmpackc.low %vm49_vm0, %vm49_vm0  ;;  %v454_v28 = vlaneseq  ;;  %s2830_s27 = smov 64   ;;  %s2831_s20 = smov [#allocation3]  }
   0xb   :  { %2399 = vmatprep.subr.bf16.mxu0 %v2676_v29  ;;  %v325_v4 = vld [vmem:[%s3468_s6] sm:$0xff]  ;;  %s2226_s21 = sshll.u32 %s2831_s20, 4  ;;  %s2227_s21 = int_to_ptr.vmem [resolvable:$true] %s2226_s21 }
   0xc   :  { %2555 = vmatprep.subr.bf16.mxu1 %v2554_v32  ;;  %v119_v30 = vld [vmem:[%s3463_s1] sm:$0xff]  ;;  %s2827_s1 = smov 112   ;;  %s2798_s22 = scalar_lea.vmem %s2227_s21, 1024 }
   0xd   :  { %2557 = vmatpush3.bf16.msra.mxu1 %v2554_v32  ;;  %v121_v32 = vunpack.c.1.s8 %v119_v30  ;;  %p2799_p0 = scmp.ne.s32.totalorder %s2227_s21, %s2798_s22  ;;  %p2803_p1 = scmp.lt.s32.totalorder %s2227_s21, %s2227_s21 }
   0xe   :  { %2400 = vmatpush3.bf16.msra.mxu0 %v2676_v29  ;;  %v3002_v29 = vshrl.u32 %v454_v28, 7  ;;  %p2804_p2 = scmp.lt.s32.totalorder %s2798_s22, %s2798_s22 }
   0xf   :  { %2562 = vmatprep.subr.bf16.mxu0 %v2822_v6 }
  0x10   :  { %v3008_v31 = vsub.s32 0, %v3002_v29  ;;  %p2805_p3 = por %p2804_p2, %p2803_p1 }
  0x12   :  { %p2806_p4 = pnand %p2805_p3, %p2799_p0 }
  0x90   :  { %v52_v8 = vpop.xlane.xlu0 %51  ;;  %v58_v9 = vpop.xlane.xlu1 %57 }
  0x91   :  { %v63_v10 = vmul.f32 0.03125, %v52_v8  ;;  %v65_v11 = vmul.f32 0.03125, %v58_v9  ;;  %v328_v8 = vld [vmem:[%s3468_s6 + $0x18] sm:$0xff]  ;;  %v2824_v9 = vmov 0.0  }
  0x93   :  { %v67_v12 = vsub.f32 %v43_v0, %v63_v10  ;;  %v69_v13 = vsub.f32 %v45_v1, %v65_v11  ;;  %v226_v1 = vld [vmem:[%s3469_s7 + $0x10] sm:$0xff]  ;;  %v2825_v10 = vmov 0  }
  0x94   :  { %v55_v14 = vpop.xlane.xlu0 %54  ;;  %v61_v15 = vpop.xlane.xlu1 %60  ;;  %2649 = vset.pattern.permute.xlu1 %v2825_v10 }
  0x95   :  { %v64_v16 = vmul.f32 0.03125, %v55_v14  ;;  %v66_v17 = vmul.f32 0.03125, %v61_v15  ;;  %v71_v18 = vmul.f32 %v67_v12, %v67_v12  ;;  %v73_v19 = vmul.f32 %v69_v13, %v69_v13 }
  0x97   :  { %v68_v20 = vsub.f32 %v44_v2, %v64_v16  ;;  %v70_v21 = vsub.f32 %v46_v5, %v66_v17  ;;  %v75_v22 = vsel %vm49_vm0, %v71_v18, 0.0  ;;  %v81_v23 = vsel %vm49_vm0, %v73_v19, 0.0  ;;  %v227_v2 = vld [vmem:[%s3469_s7 + $0x18] sm:$0xff]  ;;  %v326_v5 = vld [vmem:[%s3468_s6 + $0x8] sm:$0xff] }
  0x98   :  { %76 = vadd.xlane.f32.xlu0 %v75_v22  ;;  %v2558_v3 = vpack.c.bf16 %v227_v2, %v226_v1 }
  0x99   :  { %v72_v24 = vmul.f32 %v68_v20, %v68_v20  ;;  %v74_v25 = vmul.f32 %v70_v21, %v70_v21 }
  0x9a   :  { %2559 = vmatprep.subr.bf16.mxu1 %v2558_v3 }
  0x9b   :  { %v78_v26 = vsel %vm49_vm0, %v72_v24, 0.0  ;;  %v84_v27 = vsel %vm49_vm0, %v74_v25, 0.0  ;;  %2561 = vmatpush3.bf16.msra.mxu1 %v2558_v3  ;;  %v2826_v25 = vmov 1  }
  0x9c   :  { %82 = vadd.xlane.f32.xlu0 %v81_v23  ;;  %79 = vadd.xlane.f32.xlu1 %v78_v26 }
  0xa0   :  { %85 = vadd.xlane.f32.xlu1 %v84_v27 }
  0xc9   :  { %329 = vxpose.xlu0.b32.start [1/4] (short) (narrow) %v325_v4, 8 }
  0xcd   :  { %330 = vxpose.xlu0.b32.cont [2/4] (short) (narrow) %v326_v5, 8 }
  0xd1   :  { %331 = vxpose.xlu0.b32.cont [3/4] (short) (narrow) %v327_v7, 8 }
  0xd5   :  { %332 = vxpose.xlu0.b32.end [4/4] (short) (narrow) %v328_v8, 8 }
  0xfe   :  { %2674 = vset.pattern.permute.xlu0 %v2825_v10 }
 0x125   :  { %v77_v33 = vpop.xlane.xlu0 %76 }
 0x126   :  { %v87_v34 = vmul.f32 0.03125, %v77_v33 }
 0x128   :  { %v91_v35 = vadd.f32 1e-05, %v87_v34  ;;  %v3011_v34 = vcvt.s32.f32 %v121_v32 }
 0x129   :  { %v80_v36 = vpop.xlane.xlu1 %79  ;;  %v83_v37 = vpop.xlane.xlu0 %82 }
 0x12a   :  { %2683 = vrsqrt.f32 %v91_v35  ;;  %v88_v38 = vmul.f32 0.03125, %v80_v36  ;;  %v89_v39 = vmul.f32 0.03125, %v83_v37  ;;  %v120_v35 = vunpack.c.0.s8 %v119_v30 }
 0x12b   :  { %vm475_vm4 = vcmp.gt.f32.partialorder %v3011_v34, 0.0 }
 0x12c   :  { %v92_v40 = vadd.f32 1e-05, %v88_v38  ;;  %v93_v41 = vadd.f32 1e-05, %v89_v39  ;;  %v3014_v39 = vcvt.s32.f32 %v120_v35 }
 0x12d   :  { %v86_v42 = vpop.xlane.xlu1 %85 }
 0x12e   :  { %2685 = vrsqrt.f32 %v92_v40  ;;  %v90_v43 = vmul.f32 0.03125, %v86_v42  ;;  %v654_v40 = vsub.s32 1, %v3002_v29  ;;  %vm474_vm6 = vcmp.gt.f32.partialorder %v3014_v39, 0.0 }
 0x12f   :  { %2687 = vrsqrt.f32 %v93_v41 }
 0x130   :  { %v94_v44 = vadd.f32 1e-05, %v90_v43 }
 0x132   :  { %2689 = vrsqrt.f32 %v94_v44 }
 0x134   :  { %v2684_v45 = vpop.eup %2683 }
 0x135   :  { %v99_v46 = vmul.f32 %v2684_v45, %v67_v12 }
 0x137   :  { %v107_v51 = vmul.f32 %v2241_v47, %v99_v46 }
 0x138   :  { %v2686_v48 = vpop.eup %2685 }
 0x139   :  { %v2688_v49 = vpop.eup %2687  ;;  %v100_v50 = vmul.f32 %v2686_v48, %v68_v20  ;;  %v115_v56 = vadd.f32 %v2242_v53, %v107_v51 }
 0x13a   :  { %v101_v52 = vmul.f32 %v2688_v49, %v69_v13 }
 0x13b   :  { %v108_v54 = vmul.f32 %v2241_v47, %v100_v50  ;;  %v123_v50 = vunpack.c.3.s8 %v119_v30 }
 0x13c   :  { %v2690_v55 = vpop.eup %2689  ;;  %v109_v59 = vmul.f32 %v2241_v47, %v101_v52 }
 0x13d   :  { %v116_v57 = vadd.f32 %v2242_v53, %v108_v54  ;;  %v102_v58 = vmul.f32 %v2690_v55, %v70_v21  ;;  %v3029_v55 = vcvt.s32.f32 %v123_v50 }
 0x13e   :  { %v117_v62 = vadd.f32 %v2242_v53, %v109_v59 }
 0x13f   :  { %v151_v60 = vpack.c.bf16 %v116_v57, %v115_v56  ;;  %v110_v61 = vmul.f32 %v2241_v47, %v102_v58  ;;  %v122_v56 = vunpack.c.2.s8 %v119_v30  ;;  %vm477_vm9 = vcmp.gt.f32.partialorder %v3029_v55, 0.0 }
 0x141   :  { %2401 = vmatprep.mubr.msk.bf16.mxu0 %vm49_vm0, %v151_v60  ;;  %v118_v63 = vadd.f32 %v2242_v53, %v110_v61 }
 0x143   :  { %v152_v0 = vpack.c.bf16 %v118_v63, %v117_v62  ;;  %v3035_v63 = vcvt.s32.f32 %v122_v56 }
 0x145   :  { %2402 = vmatmul.mubr.msk.bf16.vlgmr.msra.gmra.mrb[0].mxu0 %vm49_vm0, %v152_v0  ;;  %vm476_vm11 = vcmp.gt.f32.partialorder %v3035_v63, 0.0 }
 0x146   :  { %2427 = vmatprep.mubr.msk.f32.mxu0 %vm2823_vm1, %v2824_v9 }
 0x149   :  { %v345_v20 = vpop.trf.xlu0 }
 0x218   :  { %v2965_v11 = vpop.f32.mrb[0].mxu0 }
 0x219   :  { %v2967_v12 = vpop.f32.mrb[1].mxu0 }
 0x21a   :  { %v2969_v13 = vpop.f32.mrb[2].mxu0  ;;  %2413 = vmatprep.mubr.msk.f32.mxu1 %vm49_vm0, %v2967_v12 }
 0x21b   :  { %v2658_v14 = vpack.i.bf16 %v2969_v13, %v2965_v11  ;;  %v2567_v15 = vpack.c.bf16 %v2969_v13, %v2965_v11  ;;  %v2977_v16 = vpop.f32.mrb[3].mxu0 }
 0x21c   :  { %v2653_v18 = vpack.i.bf16 %v2977_v16, %v2967_v12  ;;  %v2563_v19 = vpack.c.bf16 %v2977_v16, %v2967_v12  ;;  %2414 = vmatmul.mubr.msk.f32.vlgmr.msra.gmra.mrb[0].mxu1 %vm49_vm0, %v2977_v16 }
 0x21d   :  { %2416 = vmatprep.mubr.msk.f32.mxu1 %vm49_vm0, %v2965_v11 }
 0x21e   :  { %2565 = vmatpush3.bf16.xpose.msk.msra.mxu0 %vm2981_vm2, %v2563_v19  ;;  %2571 = vmatprep.subr.bf16.mxu1 %v2563_v19 }
 0x21f   :  { %2573 = vmatpush3.bf16.msra.mxu1 %v2563_v19  ;;  %2566 = vmatprep.subr.bf16.mxu0 %v2822_v6 }
 0x220   :  { %2417 = vmatmul.mubr.msk.f32.gmra.mrb[2].mxu1 %vm49_vm0, %v2969_v13  ;;  %2575 = vmatprep.subr.bf16.mxu1 %v2567_v15 }
 0x223   :  { %2577 = vmatpush3.bf16.msra.mxu1 %v2567_v15 }
 0x226   :  { %2569 = vmatpush3.bf16.xpose.msk.msra.mxu0 %vm2981_vm2, %v2567_v15 }
 0x22d   :  { %2428 = vmatmul.mubr.msk.f32.vlgmr.msra.gmra.mrb[4].mxu0 %vm49_vm0, %v345_v20 }
 0x2ef   :  { %v2415_v21 = vpop.f32.mrb[0].mxu1 }
 0x2f0   :  { %441 = vperm.xlu1 %2649, %v2415_v21   ;;  %v306_v22 = vpop.f32.mrb[1].mxu1 }
 0x2f3   :  { %v2418_v23 = vpop.f32.mrb[2].mxu1 }
 0x2f4   :  { %436 = vperm.xlu1 %2649, %v306_v22   ;;  %v316_v24 = vpop.f32.mrb[3].mxu1 }
 0x2f8   :  { %2650 = vset.pattern.permute.xlu1 %v2826_v25 }
 0x2f9   :  { %637 = vperm.xlu1 %2650, %v306_v22  }
 0x2fd   :  { %2651 = vset.pattern.permute.xlu1 %v2825_v10 }
 0x2fe   :  { %451 = vperm.xlu1 %2651, %v2418_v23  }
 0x300   :  { %v430_v26 = vpop.f32.mrb[4].mxu0 }
 0x301   :  { %v2429_v27 = vpop.f32.mrb[5].mxu0  ;;  %v457_v33 = vrot.slane %v430_v26, %v3008_v31  ;;  %v655_v47 = vrot.slane %v430_v26, %v654_v40 }
 0x302   :  { %446 = vperm.xlu1 %2651, %v316_v24  }
 0x306   :  { %2652 = vset.pattern.permute.xlu1 %v2826_v25 }
 0x307   :  { %641 = vperm.xlu1 %2652, %v2415_v21  }
 0x30b   :  { %645 = vperm.xlu1 %2652, %v316_v24  }
 0x30f   :  { %649 = vperm.xlu1 %2652, %v2418_v23  }
 0x313   :  { %2673 = vset.pattern.permute.xlu1 %v2825_v10 }
 0x36f   :  { %v442_v36 = vpop.permute.xlu1 %441 }
 0x370   :  { %v459_v37 = vadd.f32 %v457_v33, %v442_v36 }
 0x372   :  { %v467_v38 = vmul.f32 0.2, %v459_v37  ;;  %vm463_vm3 = vcmp.gt.f32.partialorder %v459_v37, 0.0 }
 0x373   :  { %v437_v41 = vpop.permute.xlu1 %436 }
 0x374   :  { %v458_v42 = vadd.f32 %v457_v33, %v437_v41  ;;  %v471_v43 = vsel %vm463_vm3, %v459_v37, %v467_v38  ;;  %vm853_vm3 = vcmask 261248  }
 0x375   :  { %v3019_v44 = vsel %vm475_vm4, %v471_v43, -1e+09 }
 0x376   :  { %v466_v45 = vmul.f32 0.2, %v458_v42  ;;  %v485_v46 = vsel %vm49_vm0, %v3019_v44, -inf  ;;  %vm462_vm5 = vcmp.gt.f32.partialorder %v458_v42, 0.0 }
 0x377   :  { %486 = vmax.xlane.f32.xlu0 %v485_v46 }
 0x378   :  { %v638_v48 = vpop.permute.xlu1 %637  ;;  %v470_v49 = vsel %vm462_vm5, %v458_v42, %v466_v45 }
 0x379   :  { %v656_v51 = vadd.f32 %v655_v47, %v638_v48  ;;  %v478_v52 = vsel %vm474_vm6, %v470_v49, -1e+09 }
 0x37a   :  { %v482_v53 = vsel %vm49_vm0, %v478_v52, -inf }
 0x37b   :  { %v664_v54 = vmul.f32 0.2, %v656_v51  ;;  %483 = vmax.xlane.f32.xlu1 %v482_v53  ;;  %vm660_vm7 = vcmp.gt.f32.partialorder %v656_v51, 0.0 }
 0x37d   :  { %v452_v57 = vpop.permute.xlu1 %451  ;;  %v668_v58 = vsel %vm660_vm7, %v656_v51, %v664_v54 }
 0x37e   :  { %v461_v59 = vadd.f32 %v457_v33, %v452_v57  ;;  %v672_v60 = vsel %vm474_vm6, %v668_v58, -1e+09 }
 0x37f   :  { %v676_v61 = vsel %vm49_vm0, %v672_v60, -inf }
 0x380   :  { %v469_v62 = vmul.f32 0.2, %v461_v59  ;;  %677 = vmax.xlane.f32.xlu1 %v676_v61  ;;  %vm465_vm8 = vcmp.gt.f32.partialorder %v461_v59, 0.0 }
 0x381   :  { %v447_v0 = vpop.permute.xlu1 %446 }
 0x382   :  { %v460_v1 = vadd.f32 %v457_v33, %v447_v0  ;;  %v473_v2 = vsel %vm465_vm8, %v461_v59, %v469_v62 }
 0x383   :  { %v481_v3 = vsel %vm477_vm9, %v473_v2, -1e+09 }
 0x384   :  { %v468_v4 = vmul.f32 0.2, %v460_v1  ;;  %v491_v5 = vsel %vm49_vm0, %v481_v3, -inf  ;;  %vm464_vm10 = vcmp.gt.f32.partialorder %v460_v1, 0.0 }
 0x385   :  { %492 = vmax.xlane.f32.xlu1 %v491_v5 }
 0x386   :  { %v642_v7 = vpop.permute.xlu1 %641  ;;  %v472_v8 = vsel %vm464_vm10, %v460_v1, %v468_v4 }
 0x387   :  { %v657_v10 = vadd.f32 %v655_v47, %v642_v7  ;;  %v480_v15 = vsel %vm476_vm11, %v472_v8, -1e+09 }
 0x388   :  { %v488_v19 = vsel %vm49_vm0, %v480_v15, -inf }
 0x389   :  { %v665_v20 = vmul.f32 0.2, %v657_v10  ;;  %489 = vmax.xlane.f32.xlu1 %v488_v19  ;;  %vm661_vm12 = vcmp.gt.f32.partialorder %v657_v10, 0.0 }
 0x38a   :  { %v646_v21 = vpop.permute.xlu1 %645 }
 0x38b   :  { %v658_v22 = vadd.f32 %v655_v47, %v646_v21  ;;  %v669_v23 = vsel %vm661_vm12, %v657_v10, %v665_v20 }
 0x38c   :  { %v673_v24 = vsel %vm475_vm4, %v669_v23, -1e+09 }
 0x38d   :  { %v666_v25 = vmul.f32 0.2, %v658_v22  ;;  %v679_v26 = vsel %vm49_vm0, %v673_v24, -inf  ;;  %vm662_vm13 = vcmp.gt.f32.partialorder %v658_v22, 0.0 }
 0x38e   :  { %v650_v27 = vpop.permute.xlu1 %649  ;;  %680 = vmax.xlane.f32.xlu1 %v679_v26 }
 0x38f   :  { %v659_v30 = vadd.f32 %v655_v47, %v650_v27  ;;  %v670_v32 = vsel %vm662_vm13, %v658_v22, %v666_v25 }
 0x390   :  { %v674_v33 = vsel %vm476_vm11, %v670_v32, -1e+09 }
 0x391   :  { %v667_v35 = vmul.f32 0.2, %v659_v30  ;;  %v682_v36 = vsel %vm49_vm0, %v674_v33, -inf  ;;  %vm663_vm14 = vcmp.gt.f32.partialorder %v659_v30, 0.0 }
 0x392   :  { %683 = vmax.xlane.f32.xlu1 %v682_v36 }
 0x393   :  { %v671_v37 = vsel %vm663_vm14, %v659_v30, %v667_v35 }
 0x394   :  { %v675_v38 = vsel %vm477_vm9, %v671_v37, -1e+09 }
 0x395   :  { %v685_v41 = vsel %vm49_vm0, %v675_v38, -inf }
 0x396   :  { %686 = vmax.xlane.f32.xlu1 %v685_v41 }
 0x404   :  { %v487_v42 = vpop.xlane.xlu0 %486 }
 0x405   :  { %v495_v43 = vsub.f32 %v3019_v44, %v487_v42 }
 0x407   :  { %v500_v45 = vmul.f32 1.442695, %v495_v43 }
 0x408   :  { %v484_v46 = vpop.xlane.xlu1 %483 }
 0x409   :  { %2691 = vpow2.f32 %v500_v45  ;;  %v494_v47 = vsub.f32 %v478_v52, %v484_v46 }
 0x40b   :  { %v498_v48 = vmul.f32 1.442695, %v494_v47 }
 0x40d   :  { %2693 = vpow2.f32 %v498_v48  ;;  %v678_v49 = vpop.xlane.xlu1 %677 }
 0x40e   :  { %v688_v50 = vsub.f32 %v672_v60, %v678_v49 }
 0x410   :  { %v692_v51 = vmul.f32 1.442695, %v688_v50 }
 0x412   :  { %2695 = vpow2.f32 %v692_v51  ;;  %v493_v53 = vpop.xlane.xlu1 %492 }
 0x413   :  { %v2692_v54 = vpop.eup %2691  ;;  %v497_v59 = vsub.f32 %v481_v3, %v493_v53 }
 0x414   :  { %v3056_v56 = vsel %vm475_vm4, %v2692_v54, 0.0 }
 0x415   :  { %v513_v57 = vsel %vm49_vm0, %v3056_v56, 0.0  ;;  %v504_v0 = vmul.f32 1.442695, %v497_v59 }
 0x416   :  { %514 = vadd.xlane.f32.xlu1 %v513_v57  ;;  %v490_v44 = vpop.xlane.xlu1 %489 }
 0x417   :  { %v2694_v58 = vpop.eup %2693  ;;  %v496_v52 = vsub.f32 %v480_v15, %v490_v44 }
 0x418   :  { %v506_v61 = vsel %vm474_vm6, %v2694_v58, 0.0 }
 0x419   :  { %v502_v60 = vmul.f32 1.442695, %v496_v52  ;;  %v510_v62 = vsel %vm49_vm0, %v506_v61, 0.0 }
 0x41a   :  { %511 = vadd.xlane.f32.xlu0 %v510_v62 }
 0x41b   :  { %2697 = vpow2.f32 %v502_v60  ;;  %v681_v1 = vpop.xlane.xlu1 %680 }
 0x41c   :  { %v2696_v2 = vpop.eup %2695  ;;  %v689_v4 = vsub.f32 %v673_v24, %v681_v1  ;;  %2699 = vpow2.f32 %v504_v0 }
 0x41d   :  { %v3065_v5 = vsel %vm474_vm6, %v2696_v2, 0.0 }
 0x41e   :  { %v694_v7 = vmul.f32 1.442695, %v689_v4  ;;  %v704_v3 = vsel %vm49_vm0, %v3065_v5, 0.0 }
 0x41f   :  { %705 = vadd.xlane.f32.xlu0 %v704_v3  ;;  %v684_v8 = vpop.xlane.xlu1 %683 }
 0x420   :  { %2701 = vpow2.f32 %v694_v7  ;;  %v690_v10 = vsub.f32 %v674_v33, %v684_v8 }
 0x422   :  { %v696_v15 = vmul.f32 1.442695, %v690_v10 }
 0x423   :  { %v687_v19 = vpop.xlane.xlu1 %686 }
 0x424   :  { %2703 = vpow2.f32 %v696_v15  ;;  %v691_v20 = vsub.f32 %v675_v38, %v687_v19 }
 0x425   :  { %v2698_v21 = vpop.eup %2697 }
 0x426   :  { %v698_v22 = vmul.f32 1.442695, %v691_v20  ;;  %v508_v23 = vsel %vm476_vm11, %v2698_v21, 0.0  ;;  %v2700_v25 = vpop.eup %2699 }
 0x427   :  { %v516_v24 = vsel %vm49_vm0, %v508_v23, 0.0  ;;  %v509_v32 = vsel %vm477_vm9, %v2700_v25, 0.0 }
 0x428   :  { %2705 = vpow2.f32 %v698_v22  ;;  %517 = vadd.xlane.f32.xlu0 %v516_v24  ;;  %v519_v36 = vsel %vm49_vm0, %v509_v32, 0.0 }
 0x42a   :  { %v2702_v26 = vpop.eup %2701 }
 0x42b   :  { %v3074_v27 = vsel %vm475_vm4, %v2702_v26, 0.0 }
 0x42c   :  { %v707_v30 = vsel %vm49_vm0, %v3074_v27, 0.0 }
 0x42d   :  { %708 = vadd.xlane.f32.xlu1 %v707_v30 }
 0x42e   :  { %v2704_v33 = vpop.eup %2703 }
 0x42f   :  { %v3082_v35 = vsel %vm476_vm11, %v2704_v33, 0.0 }
 0x430   :  { %v710_v37 = vsel %vm49_vm0, %v3082_v35, 0.0 }
 0x431   :  { %520 = vadd.xlane.f32.xlu1 %v519_v36  ;;  %711 = vadd.xlane.f32.xlu0 %v710_v37 }
 0x432   :  { %v2706_v38 = vpop.eup %2705 }
 0x433   :  { %v3089_v41 = vsel %vm477_vm9, %v2706_v38, 0.0  ;;  %v3118_v38 = vld [vmem:[%s3472_s10] sm:$0xff] }
 0x434   :  { %v713_v42 = vsel %vm49_vm0, %v3089_v41, 0.0 }
 0x435   :  { %714 = vadd.xlane.f32.xlu1 %v713_v42 }
 0x446   :  { %2659 = vrot.lane.b32.xlu1 %v2658_v14, %s2827_s1 }
 0x447   :  { %2654 = vrot.lane.b32.xlu0 %v2653_v18, %s2827_s1 }
 0x4a3   :  { %v515_v43 = vpop.xlane.xlu1 %514 }
 0x4a4   :  { %v523_v45 = vmax.f32 %v515_v43, 1e-16  ;;  %v865_v43 = vrot.slane %v3118_v38, %v3008_v31 }
 0x4a6   :  { %2707 = vrcp.f32 %v523_v45 }
 0x4a7   :  { %v512_v46 = vpop.xlane.xlu0 %511 }
 0x4a8   :  { %v522_v47 = vmax.f32 %v512_v46, 1e-16 }
 0x4aa   :  { %2709 = vrcp.f32 %v522_v47 }
 0x4ac   :  { %v706_v48 = vpop.xlane.xlu0 %705 }
 0x4ad   :  { %v716_v12 = vmax.f32 %v706_v48, 1e-16 }
 0x4b0   :  { %v2708_v49 = vpop.eup %2707 }
 0x4b1   :  { %v531_v54 = vmul.f32 %v2708_v49, %v3056_v56 }
 0x4b4   :  { %v2710_v50 = vpop.eup %2709 }
 0x4b5   :  { %v518_v51 = vpop.xlane.xlu0 %517  ;;  %v530_v53 = vmul.f32 %v2710_v50, %v506_v61 }
 0x4b6   :  { %v524_v57 = vmax.f32 %v518_v51, 1e-16 }
 0x4b7   :  { %2438 = vmatprep.mubr.msk.f32.mxu1 %vm49_vm0, %v530_v53 }
 0x4b8   :  { %2711 = vrcp.f32 %v524_v57  ;;  %2439 = vmatmul.mubr.msk.f32.vlgmr.msra.gmra.mrb[4].mxu1 %vm49_vm0, %v531_v54 }
 0x4b9   :  { %2713 = vrcp.f32 %v716_v12 }
 0x4ba   :  { %v709_v11 = vpop.xlane.xlu1 %708 }
 0x4bb   :  { %v717_v18 = vmax.f32 %v709_v11, 1e-16 }
 0x4be   :  { %v712_v13 = vpop.xlane.xlu0 %711  ;;  %v521_v14 = vpop.xlane.xlu1 %520 }
 0x4bf   :  { %v525_v16 = vmax.f32 %v521_v14, 1e-16  ;;  %v718_v44 = vmax.f32 %v712_v13, 1e-16 }
 0x4c1   :  { %2715 = vrcp.f32 %v525_v16 }
 0x4c2   :  { %v2712_v58 = vpop.eup %2711  ;;  %v2655_v59 = vpop.permute.xlu0 %2654  ;;  %2717 = vrcp.f32 %v717_v18 }
 0x4c3   :  { %v715_v52 = vpop.xlane.xlu1 %714  ;;  %v2657_v61 = vunpack.i.h.bf16 %v2655_v59  ;;  %v2656_v56 = vunpack.i.l.bf16 %v2655_v59  ;;  %v532_v60 = vmul.f32 %v2712_v58, %v508_v23  ;;  %2719 = vrcp.f32 %v718_v44  ;;  %v2714_v3 = vpop.eup %2713 }
 0x4c4   :  { %v719_v62 = vmax.f32 %v715_v52, 1e-16  ;;  %v724_v19 = vmul.f32 %v2714_v3, %v3065_v5 }
 0x4c5   :  { %v2578_v0 = vpack.c.bf16 %v2657_v61, %v2656_v56  ;;  %2441 = vmatprep.mubr.msk.f32.mxu1 %vm49_vm0, %v532_v60 }
 0x4c6   :  { %2721 = vrcp.f32 %v719_v62 }
 0x4c7   :  { %v2660_v1 = vpop.permute.xlu1 %2659  ;;  %2579 = vmatprep.subr.bf16.mxu1 %v2578_v0 }
 0x4c8   :  { %v2662_v2 = vunpack.i.h.bf16 %v2660_v1  ;;  %v2661_v4 = vunpack.i.l.bf16 %v2660_v1  ;;  %2581 = vmatpush3.bf16.msra.mxu1 %v2578_v0 }
 0x4ca   :  { %v2582_v7 = vpack.c.bf16 %v2662_v2, %v2661_v4 }
 0x4cb   :  { %v2716_v8 = vpop.eup %2715 }
 0x4cc   :  { %2583 = vmatprep.subr.bf16.mxu1 %v2582_v7  ;;  %v533_v10 = vmul.f32 %v2716_v8, %v509_v32  ;;  %v2718_v15 = vpop.eup %2717 }
 0x4cd   :  { %2585 = vmatpush3.bf16.msra.mxu1 %v2582_v7  ;;  %v2720_v20 = vpop.eup %2719  ;;  %v725_v21 = vmul.f32 %v2718_v15, %v3074_v27  ;;  %v2677_v15 = vld [vmem:[%s3470_s8] sm:$0xff]  }
 0x4ce   :  { %2586 = vmatprep.subr.bf16.mxu1 %v2822_v6  ;;  %2442 = vmatmul.mubr.msk.f32.gmra.mrb[6].mxu1 %vm49_vm0, %v533_v10  ;;  %v726_v23 = vmul.f32 %v2720_v20, %v3082_v35 }
 0x4cf   :  { %2452 = vmatprep.mubr.msk.f32.mxu1 %vm49_vm0, %v724_v19  ;;  %v2678_v19 = vld [vmem:[%s3470_s8 + $0x8] sm:$0xff]   ;;  %2458 = vmatprep.subr.bf16.mxu0 %v2677_v15 }
 0x4d0   :  { %v2722_v22 = vpop.eup %2721  ;;  %2459 = vmatpush3.bf16.msra.mxu0 %v2677_v15 }
 0x4d1   :  { %v727_v24 = vmul.f32 %v2722_v22, %v3089_v41  ;;  %2460 = vmatprep.subr.bf16.mxu0 %v2678_v19 }
 0x4d2   :  { %2453 = vmatmul.mubr.msk.f32.vlgmr.msra.gmra.mrb[8].mxu1 %vm49_vm0, %v725_v21 }
 0x4d3   :  { %2455 = vmatprep.mubr.msk.f32.mxu1 %vm49_vm0, %v726_v23 }
 0x4d4   :  { %2461 = vmatpush3.bf16.msra.mxu0 %v2678_v19 }
 0x4d6   :  { %2456 = vmatmul.mubr.msk.f32.gmra.mrb[10].mxu1 %vm49_vm0, %v727_v24 }
 0x4d7   :  { %2474 = vmatprep.mubr.msk.f32.mxu1 %vm2823_vm1, %v2824_v9 }
 0x58b   :  { %v2440_v5 = vpop.f32.mrb[4].mxu1 }
 0x58c   :  { %633 = vst.msk [vmem:[#allocation2 + $0x8] sm:$0xff] %vm631_vm15, %v2440_v5  ;;  %v612_v25 = vpop.f32.mrb[5].mxu1 }
 0x58d   :  { %632 = vst.msk [vmem:[#allocation2] sm:$0xff] %vm631_vm15, %v612_v25 }
 0x5a1   :  { %v2443_v26 = vpop.f32.mrb[6].mxu1 }
 0x5a2   :  { %635 = vst.msk [vmem:[#allocation2 + $0x18] sm:$0xff] %vm631_vm15, %v2443_v26  ;;  %v622_v27 = vpop.f32.mrb[7].mxu1 }
 0x5a3   :  { %634 = vst.msk [vmem:[#allocation2 + $0x10] sm:$0xff] %vm631_vm15, %v622_v27 }
 0x5a5   :  { %v2454_v30 = vpop.f32.mrb[8].mxu1 }
 0x5a6   :  { %843 = vrot.lane.b32.xlu0 %v2454_v30, %s2828_s19  ;;  %v818_v32 = vpop.f32.mrb[9].mxu1 }
 0x5a7   :  { %841 = vrot.lane.b32.xlu1 %v818_v32, %s2828_s19 }
 0x5a9   :  { %v2457_v33 = vpop.f32.mrb[10].mxu1 }
 0x5aa   :  { %847 = vrot.lane.b32.xlu0 %v2457_v33, %s2828_s19  ;;  %v828_v35 = vpop.f32.mrb[11].mxu1 }
 0x5ab   :  { %845 = vrot.lane.b32.xlu1 %v828_v35, %s2828_s19  ;;  %v932_v35 = vsub.s32 2, %v3002_v29 }
 0x618   :  { %v844_v36 = vpop.permute.xlu0 %843 }
 0x619   :  { %855 = vst.msk [vmem:[#allocation2 + $0x8] sm:$0xff] %vm853_vm3, %v844_v36  ;;  %v842_v37 = vpop.permute.xlu1 %841  ;;  %v925_v36 = vrot.slane %v3118_v38, %v654_v40 }
 0x61a   :  { %854 = vst.msk [vmem:[#allocation2] sm:$0xff] %vm853_vm3, %v842_v37 }
 0x61c   :  { %v848_v41 = vpop.permute.xlu0 %847 }
 0x61d   :  { %857 = vst.msk [vmem:[#allocation2 + $0x18] sm:$0xff] %vm853_vm3, %v848_v41  ;;  %v846_v42 = vpop.permute.xlu1 %845 }
 0x61e   :  { %856 = vst.msk [vmem:[#allocation2 + $0x10] sm:$0xff] %vm853_vm3, %v846_v42 }
 0x620   :  { %v859_v45 = vld [vmem:[#allocation2 + $0x8] sm:$0xff] }
 0x621   :  { %v867_v46 = vadd.f32 %v865_v43, %v859_v45  ;;  %v858_v47 = vld [vmem:[#allocation2] sm:$0xff] }
 0x622   :  { %v866_v48 = vadd.f32 %v865_v43, %v858_v47 }
 0x623   :  { %v873_v49 = vsel %vm49_vm0, %v867_v46, 0.0 }
 0x624   :  { %874 = vadd.xlane.f32.xlu0 %v873_v49  ;;  %v870_v50 = vsel %vm49_vm0, %v866_v48, 0.0  ;;  %v861_v51 = vld [vmem:[#allocation2 + $0x18] sm:$0xff] }
 0x625   :  { %871 = vadd.xlane.f32.xlu1 %v870_v50  ;;  %v869_v53 = vadd.f32 %v865_v43, %v861_v51  ;;  %v860_v54 = vld [vmem:[#allocation2 + $0x10] sm:$0xff] }
 0x626   :  { %v868_v57 = vadd.f32 %v865_v43, %v860_v54  ;;  %v933_v43 = vrot.slane %v3118_v38, %v932_v35 }
 0x627   :  { %v879_v11 = vsel %vm49_vm0, %v869_v53, 0.0 }
 0x628   :  { %v876_v12 = vsel %vm49_vm0, %v868_v57, 0.0 }
 0x629   :  { %880 = vadd.xlane.f32.xlu1 %v879_v11  ;;  %877 = vadd.xlane.f32.xlu0 %v876_v12 }
 0x6b1   :  { %v875_v13 = vpop.xlane.xlu0 %874 }
 0x6b2   :  { %v883_v14 = vmul.f32 0.03125, %v875_v13  ;;  %v872_v16 = vpop.xlane.xlu1 %871 }
 0x6b3   :  { %v882_v18 = vmul.f32 0.03125, %v872_v16 }
 0x6b4   :  { %v887_v44 = vsub.f32 %v867_v46, %v883_v14 }
 0x6b5   :  { %v886_v58 = vsub.f32 %v866_v48, %v882_v18 }
 0x6b6   :  { %v878_v59 = vpop.xlane.xlu0 %877  ;;  %v881_v52 = vpop.xlane.xlu1 %880  ;;  %v891_v61 = vmul.f32 %v887_v44, %v887_v44 }
 0x6b7   :  { %v884_v56 = vmul.f32 0.03125, %v878_v59  ;;  %v885_v60 = vmul.f32 0.03125, %v881_v52  ;;  %v890_v62 = vmul.f32 %v886_v58, %v886_v58 }
 0x6b8   :  { %v897_v0 = vsel %vm49_vm0, %v891_v61, 0.0 }
 0x6b9   :  { %v888_v1 = vsub.f32 %v868_v57, %v884_v56  ;;  %v889_v2 = vsub.f32 %v869_v53, %v885_v60  ;;  %898 = vadd.xlane.f32.xlu1 %v897_v0  ;;  %v894_v4 = vsel %vm49_vm0, %v890_v62, 0.0 }
 0x6ba   :  { %895 = vadd.xlane.f32.xlu0 %v894_v4 }
 0x6bb   :  { %v892_v7 = vmul.f32 %v888_v1, %v888_v1  ;;  %v893_v3 = vmul.f32 %v889_v2, %v889_v2 }
 0x6bd   :  { %v900_v8 = vsel %vm49_vm0, %v892_v7, 0.0  ;;  %v903_v10 = vsel %vm49_vm0, %v893_v3, 0.0 }
 0x6be   :  { %901 = vadd.xlane.f32.xlu0 %v900_v8  ;;  %904 = vadd.xlane.f32.xlu1 %v903_v10  ;;  %v1119_v8 = vsub.s32 3, %v3002_v29  ;;  %v3147_v10 = vld [vmem:[%s3472_s10 + $0x8] sm:$0xff] }
 0x6c0   :  { %v1120_v15 = vrot.slane %v3147_v10, %v1119_v8 }
 0x746   :  { %v899_v20 = vpop.xlane.xlu1 %898 }
 0x747   :  { %v907_v21 = vmul.f32 0.03125, %v899_v20  ;;  %v896_v22 = vpop.xlane.xlu0 %895 }
 0x748   :  { %v906_v23 = vmul.f32 0.03125, %v896_v22 }
 0x749   :  { %v911_v24 = vadd.f32 1e-05, %v907_v21 }
 0x74a   :  { %v910_v5 = vadd.f32 1e-05, %v906_v23 }
 0x74b   :  { %2723 = vrsqrt.f32 %v911_v24  ;;  %v902_v25 = vpop.xlane.xlu0 %901  ;;  %v905_v26 = vpop.xlane.xlu1 %904 }
 0x74c   :  { %2725 = vrsqrt.f32 %v910_v5  ;;  %v908_v27 = vmul.f32 0.03125, %v902_v25  ;;  %v909_v30 = vmul.f32 0.03125, %v905_v26 }
 0x74e   :  { %v912_v32 = vadd.f32 1e-05, %v908_v27  ;;  %v913_v33 = vadd.f32 1e-05, %v909_v30 }
 0x750   :  { %2727 = vrsqrt.f32 %v912_v32 }
 0x751   :  { %2729 = vrsqrt.f32 %v913_v33 }
 0x755   :  { %v2724_v37 = vpop.eup %2723 }
 0x756   :  { %v2726_v41 = vpop.eup %2725  ;;  %v919_v42 = vmul.f32 %v2724_v37, %v887_v44 }
 0x757   :  { %v918_v45 = vmul.f32 %v2726_v41, %v886_v58  ;;  %v1032_v41 = vrot.slane %v3147_v10, 2 }
 0x758   :  { %v927_v46 = vmul.f32 %v925_v36, %v919_v42 }
 0x759   :  { %v926_v47 = vmul.f32 %v925_v36, %v918_v45 }
 0x75a   :  { %v2728_v48 = vpop.eup %2727  ;;  %v935_v49 = vadd.f32 %v933_v43, %v927_v46 }
 0x75b   :  { %v2730_v50 = vpop.eup %2729  ;;  %v920_v51 = vmul.f32 %v2728_v48, %v888_v1  ;;  %v934_v53 = vadd.f32 %v933_v43, %v926_v47 }
 0x75c   :  { %v921_v54 = vmul.f32 %v2730_v50, %v889_v2  ;;  %v944_v57 = vmul.f32 1.442695, %v935_v49  ;;  %vm939_vm5 = vcmp.gt.f32.partialorder %v935_v49, 0.0 }
 0x75d   :  { %v928_v11 = vmul.f32 %v925_v36, %v920_v51  ;;  %v942_v12 = vmul.f32 1.442695, %v934_v53  ;;  %vm938_vm7 = vcmp.gt.f32.partialorder %v934_v53, 0.0 }
 0x75e   :  { %v929_v13 = vmul.f32 %v925_v36, %v921_v54  ;;  %2731 = vpow2.f32 %v944_v57 }
 0x75f   :  { %v936_v40 = vadd.f32 %v933_v43, %v928_v11  ;;  %2733 = vpow2.f32 %v942_v12 }
 0x760   :  { %v937_v14 = vadd.f32 %v933_v43, %v929_v13 }
 0x761   :  { %v946_v16 = vmul.f32 1.442695, %v936_v40  ;;  %vm940_vm8 = vcmp.gt.f32.partialorder %v936_v40, 0.0 }
 0x762   :  { %v948_v18 = vmul.f32 1.442695, %v937_v14  ;;  %vm941_vm10 = vcmp.gt.f32.partialorder %v937_v14, 0.0 }
 0x763   :  { %2735 = vpow2.f32 %v946_v16 }
 0x764   :  { %2737 = vpow2.f32 %v948_v18 }
 0x768   :  { %v2732_v44 = vpop.eup %2731 }
 0x769   :  { %v2734_v58 = vpop.eup %2733  ;;  %v2265_v59 = vadd.f32 -1.0, %v2732_v44 }
 0x76a   :  { %v2264_v52 = vadd.f32 -1.0, %v2734_v58 }
 0x76b   :  { %v955_v61 = vsel %vm939_vm5, %v935_v49, %v2265_v59 }
 0x76c   :  { %v954_v56 = vsel %vm938_vm7, %v934_v53, %v2264_v52 }
 0x76d   :  { %v2736_v60 = vpop.eup %2735  ;;  %v958_v62 = vpack.c.bf16 %v955_v61, %v954_v56 }
 0x76e   :  { %v2738_v0 = vpop.eup %2737  ;;  %v2266_v1 = vadd.f32 -1.0, %v2736_v60 }
 0x76f   :  { %2462 = vmatprep.mubr.msk.bf16.mxu0 %vm49_vm0, %v958_v62  ;;  %v2267_v2 = vadd.f32 -1.0, %v2738_v0 }
 0x770   :  { %v956_v4 = vsel %vm940_vm8, %v936_v40, %v2266_v1 }
 0x771   :  { %v957_v7 = vsel %vm941_vm10, %v937_v14, %v2267_v2 }
 0x772   :  { %v959_v3 = vpack.c.bf16 %v957_v7, %v956_v4 }
 0x774   :  { %2463 = vmatmul.mubr.msk.bf16.vlgmr.msra.gmra.mrb[8].mxu0 %vm49_vm0, %v959_v3 }
 0x847   :  { %v3152_v19 = vpop.f32.mrb[8].mxu0 }
 0x848   :  { %v3154_v20 = vpop.f32.mrb[9].mxu0  ;;  %v1123_v5 = vmul.f32 %v3152_v19, %v1120_v15 }
 0x849   :  { %v3156_v21 = vpop.f32.mrb[10].mxu0  ;;  %v1121_v22 = vmul.f32 %v1120_v15, %v3154_v20 }
 0x84a   :  { %v3159_v23 = vpop.f32.mrb[11].mxu0  ;;  %v2591_v24 = vpack.c.bf16 %v3156_v21, %v3152_v19  ;;  %v2668_v25 = vpack.i.bf16 %v3156_v21, %v3152_v19  ;;  %v1124_v35 = vmul.f32 %v3156_v21, %v1120_v15  ;;  %v1131_v36 = vsel %vm49_vm0, %v1123_v5, 0.0 }
 0x84b   :  { %v2587_v26 = vpack.c.bf16 %v3159_v23, %v3154_v20  ;;  %v1125_v27 = vsel %vm49_vm0, %v1121_v22, 0.0  ;;  %v1122_v30 = vmul.f32 %v1120_v15, %v3159_v23  ;;  %v2663_v32 = vpack.i.bf16 %v3159_v23, %v3154_v20 }
 0x84c   :  { %1126 = vadd.xlane.f32.xlu0 %v1125_v27  ;;  %v1134_v37 = vsel %vm49_vm0, %v1124_v35, 0.0 }
 0x84d   :  { %2589 = vmatpush3.bf16.xpose.msk.msra.mxu1 %vm2981_vm2, %v2587_v26  ;;  %2595 = vmatprep.subr.bf16.mxu0 %v2587_v26  ;;  %v1128_v33 = vsel %vm49_vm0, %v1122_v30, 0.0 }
 0x84e   :  { %1129 = vadd.xlane.f32.xlu1 %v1128_v33  ;;  %2597 = vmatpush3.bf16.msra.mxu0 %v2587_v26 }
 0x84f   :  { %2599 = vmatprep.subr.bf16.mxu0 %v2591_v24  ;;  %2590 = vmatprep.subr.bf16.mxu1 %v2822_v6 }
 0x850   :  { %1132 = vadd.xlane.f32.xlu0 %v1131_v36 }
 0x852   :  { %1135 = vadd.xlane.f32.xlu1 %v1134_v37  ;;  %2601 = vmatpush3.bf16.msra.mxu0 %v2591_v24 }
 0x853   :  { %2602 = vmatprep.subr.bf16.mxu0 %v2822_v6 }
 0x855   :  { %2593 = vmatpush3.bf16.xpose.msk.msra.mxu1 %vm2981_vm2, %v2591_v24 }
 0x85c   :  { %2475 = vmatmul.mubr.msk.f32.vlgmr.msra.gmra.mrb[12].mxu1 %vm49_vm0, %v1032_v41 }
 0x8d9   :  { %v1127_v42 = vpop.xlane.xlu0 %1126 }
 0x8db   :  { %v1130_v43 = vpop.xlane.xlu1 %1129 }
 0x8dd   :  { %v1133_v48 = vpop.xlane.xlu0 %1132 }
 0x8df   :  { %v1136_v49 = vpop.xlane.xlu1 %1135 }
 0x92f   :  { %v1113_v45 = vpop.f32.mrb[12].mxu1 }
 0x930   :  { %v1140_v46 = vrot.slane %v1113_v45, %v3008_v31  ;;  %v2476_v47 = vpop.f32.mrb[13].mxu1 }
 0x932   :  { %v1142_v50 = vadd.f32 %v1140_v46, %v1130_v43  ;;  %v1141_v51 = vadd.f32 %v1140_v46, %v1127_v42  ;;  %v1144_v53 = vadd.f32 %v1140_v46, %v1136_v49  ;;  %v1143_v54 = vadd.f32 %v1140_v46, %v1133_v48 }
 0x933   :  { %v1405_v49 = vsub.s32 5, %v3002_v29 }
 0x934   :  { %vm1146_vm12 = vcmp.gt.f32.partialorder %v1142_v50, 0.0  ;;  %v1150_v57 = vmul.f32 0.2, %v1142_v50  ;;  %vm1145_vm13 = vcmp.gt.f32.partialorder %v1141_v51, 0.0  ;;  %v1149_v11 = vmul.f32 0.2, %v1141_v51 }
 0x935   :  { %vm1148_vm14 = vcmp.gt.f32.partialorder %v1144_v53, 0.0  ;;  %v1152_v12 = vmul.f32 0.2, %v1144_v53  ;;  %vm1147_vm15 = vcmp.gt.f32.partialorder %v1143_v54, 0.0  ;;  %v1151_v13 = vmul.f32 0.2, %v1143_v54 }
 0x936   :  { %v1154_v40 = vsel %vm1146_vm12, %v1142_v50, %v1150_v57  ;;  %v1153_v14 = vsel %vm1145_vm13, %v1141_v51, %v1149_v11  ;;  %v1406_v50 = vrot.slane %v3147_v10, %v1405_v49 }
 0x937   :  { %v1158_v16 = vsel %vm475_vm4, %v1154_v40, -1e+09  ;;  %v1157_v18 = vsel %vm474_vm6, %v1153_v14, -1e+09  ;;  %v1156_v44 = vsel %vm1148_vm14, %v1144_v53, %v1152_v12  ;;  %v1155_v58 = vsel %vm1147_vm15, %v1143_v54, %v1151_v13 }
 0x938   :  { %v1164_v59 = vsel %vm49_vm0, %v1158_v16, -inf  ;;  %v1161_v52 = vsel %vm49_vm0, %v1157_v18, -inf  ;;  %v1160_v61 = vsel %vm477_vm9, %v1156_v44, -1e+09  ;;  %v1159_v56 = vsel %vm476_vm11, %v1155_v58, -1e+09 }
 0x939   :  { %1165 = vmax.xlane.f32.xlu1 %v1164_v59  ;;  %1162 = vmax.xlane.f32.xlu0 %v1161_v52  ;;  %v1170_v60 = vsel %vm49_vm0, %v1160_v61, -inf  ;;  %v1167_v62 = vsel %vm49_vm0, %v1159_v56, -inf }
 0x93d   :  { %1171 = vmax.xlane.f32.xlu1 %v1170_v60  ;;  %1168 = vmax.xlane.f32.xlu0 %v1167_v62 }
 0x9c6   :  { %v1166_v0 = vpop.xlane.xlu1 %1165  ;;  %v1163_v1 = vpop.xlane.xlu0 %1162 }
 0x9c7   :  { %v1174_v2 = vsub.f32 %v1158_v16, %v1166_v0  ;;  %v1173_v4 = vsub.f32 %v1157_v18, %v1163_v1 }
 0x9c9   :  { %v1179_v7 = vmul.f32 1.442695, %v1174_v2  ;;  %v1177_v3 = vmul.f32 1.442695, %v1173_v4 }
 0x9ca   :  { %v1172_v15 = vpop.xlane.xlu1 %1171  ;;  %v1169_v22 = vpop.xlane.xlu0 %1168 }
 0x9cb   :  { %2739 = vpow2.f32 %v1179_v7  ;;  %v1176_v24 = vsub.f32 %v1160_v61, %v1172_v15  ;;  %v1175_v5 = vsub.f32 %v1159_v56, %v1169_v22 }
 0x9cc   :  { %2741 = vpow2.f32 %v1177_v3 }
 0x9cd   :  { %v1183_v26 = vmul.f32 1.442695, %v1176_v24  ;;  %v1181_v27 = vmul.f32 1.442695, %v1175_v5 }
 0x9cf   :  { %2743 = vpow2.f32 %v1183_v26 }
 0x9d0   :  { %2745 = vpow2.f32 %v1181_v27 }
 0x9d5   :  { %v2740_v30 = vpop.eup %2739 }
 0x9d6   :  { %v2742_v33 = vpop.eup %2741  ;;  %v1186_v35 = vsel %vm475_vm4, %v2740_v30, 0.0 }
 0x9d7   :  { %v1192_v36 = vsel %vm49_vm0, %v1186_v35, 0.0  ;;  %v1185_v37 = vsel %vm474_vm6, %v2742_v33, 0.0  ;;  %v1216_v33 = vrot.slane %v3118_v38, %v1119_v8 }
 0x9d8   :  { %1193 = vadd.xlane.f32.xlu1 %v1192_v36  ;;  %v1189_v41 = vsel %vm49_vm0, %v1185_v37, 0.0 }
 0x9d9   :  { %v2744_v42 = vpop.eup %2743  ;;  %1190 = vadd.xlane.f32.xlu0 %v1189_v41 }
 0x9da   :  { %v2746_v43 = vpop.eup %2745  ;;  %v1188_v45 = vsel %vm477_vm9, %v2744_v42, 0.0 }
 0x9db   :  { %v1198_v46 = vsel %vm49_vm0, %v1188_v45, 0.0  ;;  %v1187_v47 = vsel %vm476_vm11, %v2746_v43, 0.0 }
 0x9dc   :  { %1199 = vadd.xlane.f32.xlu1 %v1198_v46  ;;  %v1195_v48 = vsel %vm49_vm0, %v1187_v47, 0.0 }
 0x9dd   :  { %1196 = vadd.xlane.f32.xlu0 %v1195_v48 }
 0x9ed   :  { %2669 = vrot.lane.b32.xlu1 %v2668_v25, %s2829_s26 }
 0x9f1   :  { %1408 = vrot.lane.b32.xlu1 %v1406_v50, %s2830_s27 }
 0x9f3   :  { %2664 = vrot.lane.b32.xlu0 %v2663_v32, %s2829_s26 }
 0xa65   :  { %v1194_v51 = vpop.xlane.xlu1 %1193 }
 0xa66   :  { %v1202_v53 = vmax.f32 %v1194_v51, 1e-16  ;;  %v1191_v54 = vpop.xlane.xlu0 %1190  ;;  %v128_v51 = vld [vmem:[%s3464_s2] sm:$0xff] }
 0xa67   :  { %v1201_v57 = vmax.f32 %v1191_v54, 1e-16  ;;  %v129_v54 = vunpack.c.0.s8 %v128_v51 }
 0xa68   :  { %2747 = vrcp.f32 %v1202_v53  ;;  %v130_v53 = vunpack.c.1.s8 %v128_v51 }
 0xa69   :  { %2749 = vrcp.f32 %v1201_v57  ;;  %v1200_v11 = vpop.xlane.xlu1 %1199 }
 0xa6a   :  { %v1204_v12 = vmax.f32 %v1200_v11, 1e-16  ;;  %v1197_v25 = vpop.xlane.xlu0 %1196  ;;  %v134_v11 = vcvt.s32.f32 %v130_v53 }
 0xa6b   :  { %v1203_v13 = vmax.f32 %v1197_v25, 1e-16 }
 0xa6c   :  { %2751 = vrcp.f32 %v1204_v12  ;;  %v131_v12 = vunpack.c.2.s8 %v128_v51  ;;  %vm1464_vm6 = vcmp.gt.f32.partialorder %v134_v11, 0.0 }
 0xa6d   :  { %2753 = vrcp.f32 %v1203_v13  ;;  %v2670_v40 = vpop.permute.xlu1 %2669  ;;  %v133_v13 = vcvt.s32.f32 %v129_v54 }
 0xa6e   :  { %v2665_v14 = vpop.permute.xlu0 %2664  ;;  %v2672_v16 = vunpack.i.h.bf16 %v2670_v40  ;;  %v2671_v18 = vunpack.i.l.bf16 %v2670_v40 }
 0xa6f   :  { %v2667_v44 = vunpack.i.h.bf16 %v2665_v14  ;;  %v2666_v58 = vunpack.i.l.bf16 %v2665_v14  ;;  %vm1463_vm11 = vcmp.gt.f32.partialorder %v133_v13, 0.0 }
 0xa70   :  { %v2607_v62 = vpack.c.bf16 %v2672_v16, %v2671_v18 }
 0xa71   :  { %v2603_v59 = vpack.c.bf16 %v2667_v44, %v2666_v58  ;;  %v1409_v32 = vpop.permute.xlu1 %1408  ;;  %v135_v44 = vcvt.s32.f32 %v131_v12 }
 0xa72   :  { %v2748_v52 = vpop.eup %2747  ;;  %v1412_v61 = vmul.f32 %v1409_v32, %v3159_v23  ;;  %v1411_v56 = vmul.f32 %v1409_v32, %v3154_v20  ;;  %v1414_v23 = vmul.f32 %v3156_v21, %v1409_v32  ;;  %v1413_v20 = vmul.f32 %v3152_v19, %v1409_v32 }
 0xa73   :  { %v2750_v60 = vpop.eup %2749  ;;  %2611 = vmatprep.subr.bf16.mxu1 %v2603_v59  ;;  %v1210_v0 = vmul.f32 %v2748_v52, %v1186_v35  ;;  %v1314_v19 = vrot.slane %v3147_v10, 4  ;;  %vm1465_vm3 = vcmp.gt.f32.partialorder %v135_v44, 0.0 }
 0xa74   :  { %2613 = vmatpush3.bf16.msra.mxu1 %v2603_v59  ;;  %1421 = vrot.lane.b32.xlu1 %v1412_v61, %s2830_s27  ;;  %v1209_v1 = vmul.f32 %v2750_v60, %v1185_v37 }
 0xa75   :  { %1419 = vrot.lane.b32.xlu0 %v1411_v56, %s2830_s27  ;;  %2615 = vmatprep.subr.bf16.mxu1 %v2607_v62 }
 0xa76   :  { %v2752_v2 = vpop.eup %2751  ;;  %2485 = vmatprep.mubr.msk.f32.mxu0 %vm49_vm0, %v1209_v1 }
 0xa77   :  { %v2754_v4 = vpop.eup %2753  ;;  %2486 = vmatmul.mubr.msk.f32.vlgmr.msra.gmra.mrb[6].mxu0 %vm49_vm0, %v1210_v0  ;;  %v1212_v7 = vmul.f32 %v2752_v2, %v1188_v45 }
 0xa78   :  { %2605 = vmatpush3.bf16.xpose.msk.msra.mxu0 %vm2981_vm2, %v2603_v59  ;;  %2617 = vmatpush3.bf16.msra.mxu1 %v2607_v62  ;;  %v1211_v3 = vmul.f32 %v2754_v4, %v1187_v47  ;;  %v132_v59 = vunpack.c.3.s8 %v128_v51 }
 0xa79   :  { %1425 = vrot.lane.b32.xlu1 %v1414_v23, %s2830_s27  ;;  %1423 = vrot.lane.b32.xlu0 %v1413_v20, %s2830_s27 }
 0xa7a   :  { %2488 = vmatprep.mubr.msk.f32.mxu0 %vm49_vm0, %v1211_v3  ;;  %2606 = vmatprep.subr.bf16.mxu0 %v2822_v6  ;;  %v136_v4 = vcvt.s32.f32 %v132_v59 }
 0xa7b   :  { %2489 = vmatmul.mubr.msk.f32.gmra.mrb[12].mxu0 %vm49_vm0, %v1212_v7 }
 0xa7c   :  { %2499 = vmatprep.mubr.msk.f32.mxu0 %vm2823_vm1, %v2824_v9  ;;  %vm1466_vm8 = vcmp.gt.f32.partialorder %v136_v4, 0.0 }
 0xa80   :  { %2609 = vmatpush3.bf16.xpose.msk.msra.mxu0 %vm2981_vm2, %v2607_v62 }
 0xa81   :  { %2618 = vmatprep.subr.bf16.mxu0 %v2822_v6 }
 0xa87   :  { %2500 = vmatmul.mubr.msk.f32.vlgmr.msra.gmra.mrb[14].mxu0 %vm49_vm0, %v1314_v19 }
 0xa88   :  { %2540 = vmatprep.mubr.msk.f32.mxu0 %vm2823_vm1, %v2824_v9 }
 0xae6   :  { %v1422_v21 = vpop.permute.xlu1 %1421 }
 0xae7   :  { %v1420_v15 = vpop.permute.xlu0 %1419  ;;  %v1434_v22 = vsel %vm49_vm0, %v1422_v21, 0.0 }
 0xae8   :  { %1435 = vadd.xlane.f32.xlu1 %v1434_v22  ;;  %v1431_v24 = vsel %vm49_vm0, %v1420_v15, 0.0 }
 0xae9   :  { %1432 = vadd.xlane.f32.xlu0 %v1431_v24 }
 0xaeb   :  { %v1424_v5 = vpop.permute.xlu0 %1423  ;;  %v1426_v27 = vpop.permute.xlu1 %1425 }
 0xaec   :  { %v1437_v26 = vsel %vm49_vm0, %v1424_v5, 0.0  ;;  %v1440_v30 = vsel %vm49_vm0, %v1426_v27, 0.0 }
 0xaed   :  { %1438 = vadd.xlane.f32.xlu0 %v1437_v26 }
 0xaf1   :  { %1441 = vadd.xlane.f32.xlu0 %v1440_v30 }
 0xb4a   :  { %v2487_v35 = vpop.f32.mrb[6].mxu0 }
 0xb4b   :  { %v3251_v36 = vadd.f32 %v2487_v35, %v1216_v33  ;;  %v1295_v37 = vpop.f32.mrb[7].mxu0 }
 0xb4c   :  { %v3253_v41 = vadd.f32 %v1295_v37, %v1216_v33 }
 0xb4d   :  { %1629 = vst.msk [vmem:[#allocation3 + $0x8] sm:$0xff] %vm49_vm0, %v3251_v36 }
 0xb4e   :  { %1628 = vst.msk [vmem:[#allocation3] sm:$0xff] %vm49_vm0, %v3253_v41  ;;  %v1644_v42 = vpack.c.bf16 %v3251_v36, %v3253_v41  ;;  %v2490_v43 = vpop.f32.mrb[12].mxu0  ;;  %v1808_v36 = vrot.slane %v3147_v10, %v3008_v31 }
 0xb4f   :  { %v3261_v45 = vadd.f32 %v2490_v43, %v1216_v33  ;;  %v1305_v46 = vpop.f32.mrb[13].mxu0 }
 0xb50   :  { %v3263_v8 = vadd.f32 %v1305_v46, %v1216_v33 }
 0xb51   :  { %1631 = vst.msk [vmem:[#allocation3 + $0x18] sm:$0xff] %vm49_vm0, %v3261_v45 }
 0xb52   :  { %1630 = vst.msk [vmem:[#allocation3 + $0x10] sm:$0xff] %vm49_vm0, %v3263_v8  ;;  %v1645_v47 = vpack.c.bf16 %v3261_v45, %v3263_v8 }
 0xb5a   :  { %v1399_v48 = vpop.f32.mrb[14].mxu0 }
 0xb5b   :  { %v2501_v50 = vpop.f32.mrb[15].mxu0  ;;  %v1446_v57 = vrot.slane %v1399_v48, %v3008_v31 }
 0xb75   :  { %v1436_v25 = vpop.xlane.xlu1 %1435 }
 0xb76   :  { %v1448_v40 = vadd.f32 %v1446_v57, %v1436_v25  ;;  %v1433_v14 = vpop.xlane.xlu0 %1432 }
 0xb77   :  { %v1447_v16 = vadd.f32 %v1446_v57, %v1433_v14 }
 0xb78   :  { %v1456_v18 = vmul.f32 0.2, %v1448_v40  ;;  %vm1452_vm4 = vcmp.gt.f32.partialorder %v1448_v40, 0.0 }
 0xb79   :  { %v1455_v58 = vmul.f32 0.2, %v1447_v16  ;;  %vm1451_vm9 = vcmp.gt.f32.partialorder %v1447_v16, 0.0 }
 0xb7a   :  { %v1439_v32 = vpop.xlane.xlu0 %1438  ;;  %v1460_v52 = vsel %vm1452_vm4, %v1448_v40, %v1456_v18  ;;  %vm1970_vm4 = vcmask 31744  }
 0xb7b   :  { %v1449_v61 = vadd.f32 %v1446_v57, %v1439_v32  ;;  %v1468_v56 = vsel %vm1464_vm6, %v1460_v52, -1e+09  ;;  %v1459_v60 = vsel %vm1451_vm9, %v1447_v16, %v1455_v58 }
 0xb7c   :  { %v1474_v62 = vsel %vm49_vm0, %v1468_v56, -inf  ;;  %v1467_v0 = vsel %vm1463_vm11, %v1459_v60, -1e+09 }
 0xb7d   :  { %v1457_v1 = vmul.f32 0.2, %v1449_v61  ;;  %1475 = vmax.xlane.f32.xlu0 %v1474_v62  ;;  %v1471_v2 = vsel %vm49_vm0, %v1467_v0, -inf  ;;  %vm1453_vm5 = vcmp.gt.f32.partialorder %v1449_v61, 0.0 }
 0xb7e   :  { %v1442_v23 = vpop.xlane.xlu0 %1441  ;;  %1472 = vmax.xlane.f32.xlu1 %v1471_v2 }
 0xb7f   :  { %v1450_v20 = vadd.f32 %v1446_v57, %v1442_v23  ;;  %v1461_v7 = vsel %vm1453_vm5, %v1449_v61, %v1457_v1 }
 0xb80   :  { %v1469_v3 = vsel %vm1465_vm3, %v1461_v7, -1e+09 }
 0xb81   :  { %v1458_v19 = vmul.f32 0.2, %v1450_v20  ;;  %v1477_v21 = vsel %vm49_vm0, %v1469_v3, -inf  ;;  %vm1454_vm7 = vcmp.gt.f32.partialorder %v1450_v20, 0.0 }
 0xb82   :  { %1478 = vmax.xlane.f32.xlu1 %v1477_v21  ;;  %v2680_v21 = vld [vmem:[%s3471_s9 + $0x18] sm:$0xff]  }
 0xb83   :  { %v1462_v15 = vsel %vm1454_vm7, %v1450_v20, %v1458_v19  ;;  %v2679_v19 = vld [vmem:[%s3471_s9 + $0x10] sm:$0xff]  }
 0xb84   :  { %v1470_v22 = vsel %vm1466_vm8, %v1462_v15, -1e+09  ;;  %2516 = vmatprep.subr.bf16.mxu1 %v2679_v19  ;;  %v2681_v15 = vld [vmem:[%s3471_s9] sm:$0xff]  }
 0xb85   :  { %v1480_v24 = vsel %vm49_vm0, %v1470_v22, -inf }
 0xb86   :  { %1481 = vmax.xlane.f32.xlu0 %v1480_v24 }
 0xc0a   :  { %v1476_v5 = vpop.xlane.xlu0 %1475 }
 0xc0b   :  { %v1484_v26 = vsub.f32 %v1468_v56, %v1476_v5  ;;  %v1473_v27 = vpop.xlane.xlu1 %1472 }
 0xc0c   :  { %v1483_v30 = vsub.f32 %v1467_v0, %v1473_v27 }
 0xc0d   :  { %v1489_v33 = vmul.f32 1.442695, %v1484_v26 }
 0xc0e   :  { %v1487_v35 = vmul.f32 1.442695, %v1483_v30 }
 0xc0f   :  { %2755 = vpow2.f32 %v1489_v33  ;;  %v1479_v37 = vpop.xlane.xlu1 %1478 }
 0xc10   :  { %2757 = vpow2.f32 %v1487_v35  ;;  %v1485_v43 = vsub.f32 %v1469_v3, %v1479_v37 }
 0xc12   :  { %v1491_v46 = vmul.f32 1.442695, %v1485_v43 }
 0xc13   :  { %v1482_v48 = vpop.xlane.xlu0 %1481 }
 0xc14   :  { %2759 = vpow2.f32 %v1491_v46  ;;  %v1486_v50 = vsub.f32 %v1470_v22, %v1482_v48  ;;  %v1525_v22 = vsub.s32 4, %v3002_v29 }
 0xc16   :  { %v1493_v51 = vmul.f32 1.442695, %v1486_v50  ;;  %v1526_v24 = vrot.slane %v3118_v38, %v1525_v22  ;;  %v2682_v50 = vld [vmem:[%s3471_s9 + $0x8] sm:$0xff]  }
 0xc18   :  { %2761 = vpow2.f32 %v1493_v51  ;;  %v1785_v51 = vrot.slane %v3118_v38, %v1405_v49 }
 0xc19   :  { %v2756_v53 = vpop.eup %2755 }
 0xc1a   :  { %v2758_v54 = vpop.eup %2757  ;;  %v1496_v57 = vsel %vm1464_vm6, %v2756_v53, 0.0 }
 0xc1b   :  { %v1502_v12 = vsel %vm49_vm0, %v1496_v57, 0.0  ;;  %v1495_v25 = vsel %vm1463_vm11, %v2758_v54, 0.0 }
 0xc1c   :  { %1503 = vadd.xlane.f32.xlu0 %v1502_v12  ;;  %v1499_v40 = vsel %vm49_vm0, %v1495_v25, 0.0 }
 0xc1d   :  { %1500 = vadd.xlane.f32.xlu1 %v1499_v40 }
 0xc1e   :  { %v2760_v14 = vpop.eup %2759 }
 0xc1f   :  { %v1497_v16 = vsel %vm1465_vm3, %v2760_v14, 0.0 }
 0xc20   :  { %v1505_v18 = vsel %vm49_vm0, %v1497_v16, 0.0 }
 0xc21   :  { %1506 = vadd.xlane.f32.xlu1 %v1505_v18 }
 0xc22   :  { %v2762_v58 = vpop.eup %2761 }
 0xc23   :  { %v1498_v59 = vsel %vm1466_vm8, %v2762_v58, 0.0 }
 0xc24   :  { %v1508_v11 = vsel %vm49_vm0, %v1498_v59, 0.0 }
 0xc25   :  { %1509 = vadd.xlane.f32.xlu0 %v1508_v11  ;;  %v1796_v11 = vand.u32 127, %v454_v28 }
 0xca9   :  { %v1504_v32 = vpop.xlane.xlu0 %1503 }
 0xcaa   :  { %v1512_v52 = vmax.f32 %v1504_v32, 1e-16  ;;  %v1501_v13 = vpop.xlane.xlu1 %1500  ;;  %v1792_v32 = vadd.s32 8, %v3002_v29 }
 0xcab   :  { %v1511_v61 = vmax.f32 %v1501_v13, 1e-16 }
 0xcac   :  { %2763 = vrcp.f32 %v1512_v52  ;;  %v1794_v52 = vadd.s32 24, %v3002_v29  ;;  %vm1798_vm10 = vcmp.eq.s32.totalorder %v1792_v32, %v1796_v11 }
 0xcad   :  { %2765 = vrcp.f32 %v1511_v61  ;;  %v1802_v61 = vsel %vm1798_vm10, 0.0, %v3011_v34 }
 0xcae   :  { %v1507_v56 = vpop.xlane.xlu1 %1506  ;;  %vm1800_vm13 = vcmp.eq.s32.totalorder %v1794_v52, %v1796_v11 }
 0xcaf   :  { %v1513_v60 = vmax.f32 %v1507_v56, 1e-16 }
 0xcb1   :  { %2767 = vrcp.f32 %v1513_v60 }
 0xcb2   :  { %v1510_v44 = vpop.xlane.xlu0 %1509 }
 0xcb3   :  { %v1514_v62 = vmax.f32 %v1510_v44, 1e-16  ;;  %v1804_v44 = vsel %vm1800_vm13, 0.0, %v3029_v55  ;;  %v1936_v55 = vsub.s32 6, %v3002_v29 }
 0xcb5   :  { %2769 = vrcp.f32 %v1514_v62 }
 0xcb6   :  { %v2764_v0 = vpop.eup %2763 }
 0xcb7   :  { %v2766_v1 = vpop.eup %2765  ;;  %v1520_v2 = vmul.f32 %v2764_v0, %v1496_v57 }
 0xcb8   :  { %v1519_v4 = vmul.f32 %v2766_v1, %v1495_v25 }
 0xcba   :  { %2510 = vmatprep.mubr.msk.f32.mxu1 %vm49_vm0, %v1519_v4 }
 0xcbb   :  { %v2768_v23 = vpop.eup %2767  ;;  %2511 = vmatmul.mubr.msk.f32.vlgmr.msra.gmra.mrb[14].mxu1 %vm49_vm0, %v1520_v2 }
 0xcbc   :  { %v1521_v20 = vmul.f32 %v2768_v23, %v1497_v16  ;;  %2517 = vmatpush3.bf16.msra.mxu1 %v2679_v19 }
 0xcbd   :  { %2518 = vmatprep.subr.bf16.mxu1 %v2680_v21 }
 0xcbe   :  { %2513 = vmatprep.mubr.msk.f32.mxu1 %vm49_vm0, %v1521_v20 }
 0xcbf   :  { %v2770_v7 = vpop.eup %2769 }
 0xcc0   :  { %v1522_v3 = vmul.f32 %v2770_v7, %v1498_v59  ;;  %2519 = vmatpush3.bf16.msra.mxu1 %v2680_v21  ;;  %v1825_v59 = vrot.slane %v3147_v10, 1 }
 0xcc1   :  { %2524 = vmatprep.subr.bf16.mxu1 %v2681_v15 }
 0xcc2   :  { %2514 = vmatmul.mubr.msk.f32.gmra.mrb[16].mxu1 %vm49_vm0, %v1522_v3  ;;  %v1937_v3 = vrot.slane %v3147_v10, %v1936_v55 }
 0xd8e   :  { %v2512_v5 = vpop.f32.mrb[14].mxu1 }
 0xd8f   :  { %v1615_v26 = vadd.f32 %v2512_v5, %v1526_v24  ;;  %v1609_v27 = vpop.f32.mrb[15].mxu1 }
 0xd90   :  { %v1610_v30 = vadd.f32 %v1609_v27, %v1526_v24 }
 0xd91   :  { %1633 = vst.msk [vmem:[#allocation3 + $0x28] sm:$0xff] %vm49_vm0, %v1615_v26 }
 0xd92   :  { %1632 = vst.msk [vmem:[#allocation3 + $0x20] sm:$0xff] %vm49_vm0, %v1610_v30  ;;  %v1646_v33 = vpack.c.bf16 %v1615_v26, %v1610_v30 }
 0xd94   :  { %2520 = vmatprep.mubr.msk.bf16.mxu1 %vm49_vm0, %v1646_v33 }
 0xd95   :  { %v2515_v35 = vpop.f32.mrb[16].mxu1 }
 0xd96   :  { %v1625_v37 = vadd.f32 %v2515_v35, %v1526_v24  ;;  %v1619_v43 = vpop.f32.mrb[17].mxu1 }
 0xd97   :  { %v1620_v46 = vadd.f32 %v1619_v43, %v1526_v24 }
 0xd98   :  { %1635 = vst.msk [vmem:[#allocation3 + $0x38] sm:$0xff] %vm49_vm0, %v1625_v37 }
 0xd99   :  { %1634 = vst.msk [vmem:[#allocation3 + $0x30] sm:$0xff] %vm49_vm0, %v1620_v46  ;;  %v1647_v48 = vpack.c.bf16 %v1625_v37, %v1620_v46 }
 0xd9b   :  { %2521 = vmatmul.mubr.msk.bf16.vlgmr.msra.gmra.mrb[20].mxu1 %vm49_vm0, %v1647_v48  ;;  %v2309_v48 = vld [vmem:[%s3465_s3] sm:$0xff]  }
 0xd9c   :  { %2525 = vmatpush3.bf16.msra.mxu1 %v2681_v15  ;;  %2528 = vmatprep.mubr.msk.bf16.mxu1 %vm49_vm0, %v1644_v42 }
 0xd9d   :  { %2526 = vmatprep.subr.bf16.mxu1 %v2682_v50 }
 0xda0   :  { %2527 = vmatpush3.bf16.msra.mxu1 %v2682_v50  ;;  %v2310_v50 = vunpack.c.0.s8 %v2309_v48 }
 0xda1   :  { %2626 = vmatprep.subr.bf16.mxu1 %v2822_v6 }
 0xda7   :  { %2529 = vmatmul.mubr.msk.bf16.vlgmr.msra.gmra.mrb[20].mxu1 %vm49_vm0, %v1645_v47 }
 0xda8   :  { %2551 = vmatprep.mubr.msk.f32.mxu1 %vm2823_vm1, %v2824_v9  ;;  %vm1797_vm1 = vcmp.eq.s32.totalorder %v3002_v29, %v1796_v11 }
 0xda9   :  { %v1801_v17 = vsel %vm1797_vm1, 0.0, %v3014_v39 }
 0xe7a   :  { %v2530_v41 = vpop.f32.mrb[20].mxu1 }
 0xe7b   :  { %v3331_v42 = vadd.f32 %v2530_v41, %v1785_v51  ;;  %v1767_v53 = vpop.f32.mrb[21].mxu1  ;;  %v145_v41 = vcvt.s32.f32 %v2310_v50 }
 0xe7c   :  { %v3333_v54 = vadd.f32 %v1785_v51, %v1767_v53  ;;  %v2531_v57 = vpop.f32.mrb[22].mxu1 }
 0xe7d   :  { %v3335_v45 = vadd.f32 %v2531_v57, %v1785_v51  ;;  %v1770_v8 = vpop.f32.mrb[23].mxu1  ;;  %v1811_v47 = vmul.f32 %v1808_v36, %v3331_v42  ;;  %v2315_v57 = vunpack.c.3.s8 %v2309_v48 }
 0xe7e   :  { %v3338_v9 = vadd.f32 %v1785_v51, %v1770_v8  ;;  %v1809_v49 = vmul.f32 %v1808_v36, %v3333_v54  ;;  %v2125_v43 = vsel %vm49_vm0, %v3333_v54, 0.0  ;;  %v2311_v51 = vunpack.c.1.s8 %v2309_v48 }
 0xe7f   :  { %v1819_v12 = vsel %vm49_vm0, %v1811_v47, 0.0  ;;  %v1812_v38 = vmul.f32 %v1808_v36, %v3335_v45  ;;  %v2623_v18 = vpack.c.bf16 %v3335_v45, %v3331_v42  ;;  %v2134_v46 = vsel %vm49_vm0, %v3335_v45, 0.0 }
 0xe80   :  { %v2619_v25 = vpack.c.bf16 %v3338_v9, %v3333_v54  ;;  %1820 = vadd.xlane.f32.xlu1 %v1819_v12  ;;  %v1810_v14 = vmul.f32 %v1808_v36, %v3338_v9  ;;  %v1813_v16 = vsel %vm49_vm0, %v1809_v49, 0.0  ;;  %v2128_v10 = vsel %vm49_vm0, %v3338_v9, 0.0 }
 0xe81   :  { %v1822_v40 = vsel %vm49_vm0, %v1812_v38, 0.0  ;;  %v2314_v36 = vunpack.c.2.s8 %v2309_v48  ;;  %v146_v53 = vcvt.s32.f32 %v2311_v51  ;;  %v148_v38 = vcvt.s32.f32 %v2315_v57 }
 0xe82   :  { %1823 = vadd.xlane.f32.xlu0 %v1822_v40  ;;  %2621 = vmatpush3.bf16.xpose.msk.msra.mxu0 %vm2981_vm2, %v2619_v25  ;;  %v1816_v58 = vsel %vm49_vm0, %v1810_v14, 0.0 }
 0xe83   :  { %2628 = vmatpush3.bf16.msra.mxu1 %v2619_v25  ;;  %2622 = vmatprep.subr.bf16.mxu0 %v2822_v6  ;;  %v147_v47 = vcvt.s32.f32 %v2314_v36  ;;  %vm1943_vm14 = vcmp.gt.f32.partialorder %v146_v53, 0.0  ;;  %vm1945_vm6 = vcmp.gt.f32.partialorder %v148_v38, 0.0 }
 0xe84   :  { %1814 = vadd.xlane.f32.xlu1 %v1813_v16  ;;  %2629 = vmatprep.subr.bf16.mxu1 %v2822_v6  ;;  %v1793_v6 = vadd.s32 16, %v3002_v29 }
 0xe85   :  { %vm1944_vm15 = vcmp.gt.f32.partialorder %v147_v47, 0.0 }
 0xe86   :  { %1817 = vadd.xlane.f32.xlu0 %v1816_v58  ;;  %vm1799_vm12 = vcmp.eq.s32.totalorder %v1793_v6, %v1796_v11 }
 0xe87   :  { %2631 = vmatpush3.bf16.msra.mxu1 %v2623_v18  ;;  %v1803_v28 = vsel %vm1799_vm12, 0.0, %v3035_v63 }
 0xe8a   :  { %2625 = vmatpush3.bf16.xpose.msk.msra.mxu0 %vm2981_vm2, %v2623_v18  ;;  %vm1942_vm2 = vcmp.gt.f32.partialorder %v145_v41, 0.0 }
 0xe91   :  { %2541 = vmatmul.mubr.msk.f32.vlgmr.msra.gmra.mrb[16].mxu0 %vm49_vm0, %v1825_v59 }
 0xf0f   :  { %v1824_v63 = vpop.xlane.xlu0 %1823 }
 0xf13   :  { %v1818_v7 = vpop.xlane.xlu0 %1817 }
 0xf64   :  { %v1906_v13 = vpop.f32.mrb[16].mxu0 }
 0xf65   :  { %v1913_v56 = vrot.slane %v1906_v13, %v3008_v31  ;;  %v2542_v60 = vpop.f32.mrb[17].mxu0  ;;  %v1821_v31 = vpop.xlane.xlu1 %1820 }
 0xf67   :  { %v1914_v62 = vmul.f32 %v1913_v56, %v1801_v17  ;;  %v1915_v0 = vmul.f32 %v1913_v56, %v1802_v61  ;;  %v1916_v4 = vmul.f32 %v1913_v56, %v1803_v28  ;;  %v1917_v23 = vmul.f32 %v1913_v56, %v1804_v44 }
 0xf69   :  { %v1918_v1 = vsel %vm49_vm0, %v1914_v62, 0.0  ;;  %v1921_v2 = vsel %vm49_vm0, %v1915_v0, 0.0  ;;  %v1924_v39 = vsel %vm49_vm0, %v1916_v4, 0.0  ;;  %v1927_v34 = vsel %vm49_vm0, %v1917_v23, 0.0  ;;  %v1815_v20 = vpop.xlane.xlu1 %1814 }
 0xf6a   :  { %1919 = vadd.xlane.f32.xlu1 %v1918_v1  ;;  %1922 = vadd.xlane.f32.xlu0 %v1921_v2 }
 0xf6e   :  { %1925 = vadd.xlane.f32.xlu1 %v1924_v39  ;;  %1928 = vadd.xlane.f32.xlu0 %v1927_v34 }
 0xff7   :  { %v1920_v19 = vpop.xlane.xlu1 %1919  ;;  %v1923_v21 = vpop.xlane.xlu0 %1922 }
 0xff8   :  { %v1930_v15 = vadd.f32 %v1920_v19, %v1815_v20  ;;  %v1931_v22 = vadd.f32 %v1923_v21, %v1818_v7 }
 0xffa   :  { %v1938_v24 = vadd.f32 %v1937_v3, %v1930_v15  ;;  %v1939_v5 = vadd.f32 %v1937_v3, %v1931_v22 }
 0xffb   :  { %v1926_v26 = vpop.xlane.xlu1 %1925  ;;  %v1929_v27 = vpop.xlane.xlu0 %1928 }
 0xffc   :  { %v1932_v30 = vadd.f32 %v1926_v26, %v1821_v31  ;;  %1948 = vperm.xlu1 %2673, %v1938_v24   ;;  %1953 = vperm.xlu0 %2674, %v1939_v5   ;;  %v1933_v35 = vadd.f32 %v1929_v27, %v1824_v63 }
 0xffe   :  { %v1940_v33 = vadd.f32 %v1937_v3, %v1932_v30  ;;  %v1941_v37 = vadd.f32 %v1937_v3, %v1933_v35 }
0x1000   :  { %1958 = vperm.xlu1 %2673, %v1940_v33  }
0x1004   :  { %1963 = vperm.xlu1 %2673, %v1941_v37  }
0x101b   :  { %2126 = vadd.xlane.f32.xlu0 %v2125_v43 }
0x101f   :  { %2129 = vadd.xlane.f32.xlu0 %v2128_v10 }
0x1023   :  { %2135 = vadd.xlane.f32.xlu0 %v2134_v46 }
0x107b   :  { %v1949_v8 = vpop.permute.xlu1 %1948  ;;  %v1954_v12 = vpop.permute.xlu0 %1953 }
0x107c   :  { %v1966_v25 = vsel %vm1942_vm2, %v1949_v8, -1e+09  ;;  %v1967_v40 = vsel %vm1943_vm14, %v1954_v12, -1e+09 }
0x107d   :  { %v1971_v16 = vsel %vm1970_vm4, %v1966_v25, -inf  ;;  %v1972_v18 = vsel %vm1970_vm4, %v1967_v40, -inf }
0x107e   :  { %v1975_v6 = vmax.f32 %v1971_v16, %v1972_v18 }
0x107f   :  { %v1959_v49 = vpop.permute.xlu1 %1958 }
0x1080   :  { %v1968_v14 = vsel %vm1944_vm15, %v1959_v49, -1e+09 }
0x1081   :  { %v1973_v11 = vsel %vm1970_vm4, %v1968_v14, -inf }
0x1083   :  { %v1964_v58 = vpop.permute.xlu1 %1963 }
0x1084   :  { %v1969_v59 = vsel %vm1945_vm6, %v1964_v58, -1e+09 }
0x1085   :  { %v1974_v32 = vsel %vm1970_vm4, %v1969_v59, -inf }
0x1086   :  { %v1976_v52 = vmax.f32 %v1973_v11, %v1974_v32 }
0x1088   :  { %v1977_v13 = vmax.f32 %v1975_v6, %v1976_v52 }
0x108a   :  { %v1978_v17 = vrot.slane %v1977_v13, 4 }
0x108c   :  { %v1979_v61 = vmax.f32 %v1977_v13, %v1978_v17  ;;  %v2187_v13 = vsub.s32 7, %v3002_v29  ;;  %v2797_v17 = vld [vmem:[%s3472_s10] sm:$0xff] }
0x108e   :  { %v1980_v56 = vrot.slane %v1979_v61, 2 }
0x1090   :  { %v1981_v60 = vmax.f32 %v1979_v61, %v1980_v56  ;;  %v3415_v61 = vrot.slane %v2797_v17, %v1936_v55 }
0x1092   :  { %v1982_v28 = vrot.slane %v1981_v60, 1 }
0x1094   :  { %v1983_v44 = vmax.f32 %v1981_v60, %v1982_v28  ;;  %v3417_v60 = vrot.slane %v2797_v17, %v2187_v13 }
0x1096   :  { %v1984_v62 = vsub.f32 %v1966_v25, %v1983_v44  ;;  %v1985_v0 = vsub.f32 %v1967_v40, %v1983_v44  ;;  %v1986_v1 = vsub.f32 %v1968_v14, %v1983_v44  ;;  %v1987_v2 = vsub.f32 %v1969_v59, %v1983_v44 }
0x1097   :  { %v2131_v14 = vsel %vm49_vm0, %v3331_v42, 0.0 }
0x1098   :  { %v1988_v4 = vmul.f32 1.442695, %v1984_v62  ;;  %v1990_v23 = vmul.f32 1.442695, %v1985_v0  ;;  %v1992_v39 = vmul.f32 1.442695, %v1986_v1 }
0x1099   :  { %v1994_v34 = vmul.f32 1.442695, %v1987_v2 }
0x109a   :  { %2771 = vpow2.f32 %v1988_v4 }
0x109b   :  { %2773 = vpow2.f32 %v1990_v23 }
0x109c   :  { %2775 = vpow2.f32 %v1992_v39 }
0x109d   :  { %2777 = vpow2.f32 %v1994_v34 }
0x10a4   :  { %v2772_v31 = vpop.eup %2771 }
0x10a5   :  { %v2774_v63 = vpop.eup %2773  ;;  %v1996_v20 = vsel %vm1942_vm2, %v2772_v31, 0.0 }
0x10a6   :  { %v2776_v7 = vpop.eup %2775  ;;  %v1997_v3 = vsel %vm1943_vm14, %v2774_v63, 0.0  ;;  %v2000_v19 = vsel %vm1970_vm4, %v1996_v20, 0.0 }
0x10a7   :  { %v2778_v21 = vpop.eup %2777  ;;  %v1998_v15 = vsel %vm1944_vm15, %v2776_v7, 0.0  ;;  %v2001_v22 = vsel %vm1970_vm4, %v1997_v3, 0.0 }
0x10a8   :  { %v1999_v24 = vsel %vm1945_vm6, %v2778_v21, 0.0  ;;  %v2002_v5 = vadd.f32 %v2001_v22, %v2000_v19  ;;  %v2127_v26 = vpop.xlane.xlu0 %2126  ;;  %v2003_v27 = vsel %vm1970_vm4, %v1998_v15, 0.0 }
0x10a9   :  { %v2137_v30 = vmul.f32 0.03125, %v2127_v26  ;;  %v2005_v35 = vsel %vm1970_vm4, %v1999_v24, 0.0 }
0x10aa   :  { %v2004_v33 = vadd.f32 %v2003_v27, %v2002_v5 }
0x10ab   :  { %v2141_v37 = vsub.f32 %v3333_v54, %v2137_v30 }
0x10ac   :  { %v2006_v43 = vadd.f32 %v2005_v35, %v2004_v33  ;;  %v2130_v10 = vpop.xlane.xlu0 %2129 }
0x10ad   :  { %v2138_v46 = vmul.f32 0.03125, %v2130_v10  ;;  %v2145_v48 = vmul.f32 %v2141_v37, %v2141_v37 }
0x10ae   :  { %v2007_v50 = vrot.slane %v2006_v43, 4 }
0x10af   :  { %v2142_v51 = vsub.f32 %v3338_v9, %v2138_v46  ;;  %v2149_v36 = vsel %vm49_vm0, %v2145_v48, 0.0 }
0x10b0   :  { %v2008_v41 = vadd.f32 %v2007_v50, %v2006_v43  ;;  %2150 = vadd.xlane.f32.xlu0 %v2149_v36  ;;  %v2136_v16 = vpop.xlane.xlu0 %2135 }
0x10b1   :  { %v2146_v53 = vmul.f32 %v2142_v51, %v2142_v51  ;;  %v2140_v7 = vmul.f32 0.03125, %v2136_v16 }
0x10b2   :  { %v2009_v57 = vrot.slane %v2008_v41, 2 }
0x10b3   :  { %v2152_v8 = vsel %vm49_vm0, %v2146_v53, 0.0  ;;  %v2144_v21 = vsub.f32 %v3335_v45, %v2140_v7 }
0x10b4   :  { %v2010_v47 = vadd.f32 %v2009_v57, %v2008_v41  ;;  %2153 = vadd.xlane.f32.xlu0 %v2152_v8 }
0x10b5   :  { %v2148_v5 = vmul.f32 %v2144_v21, %v2144_v21 }
0x10b6   :  { %v2011_v12 = vrot.slane %v2010_v47, 1 }
0x10b7   :  { %v2158_v26 = vsel %vm49_vm0, %v2148_v5, 0.0 }
0x10b8   :  { %v2012_v38 = vadd.f32 %v2011_v12, %v2010_v47 }
0x10ba   :  { %2779 = vrcp.f32 %v2012_v38 }
0x10c4   :  { %v2780_v54 = vpop.eup %2779 }
0x10c5   :  { %v2014_v49 = vmul.f32 %v2780_v54, %v1996_v20  ;;  %v2015_v25 = vmul.f32 %v2780_v54, %v1997_v3  ;;  %v2016_v40 = vmul.f32 %v2780_v54, %v1998_v15  ;;  %v2017_v9 = vmul.f32 %v2780_v54, %v1999_v24 }
0x10c7   :  { %2018 = vxpose.xlu1.b32.start [1/4] (short) (narrow) %v2014_v49, 8 }
0x10cb   :  { %2019 = vxpose.xlu1.b32.cont [2/4] (short) (narrow) %v2015_v25, 8 }
0x10cf   :  { %2020 = vxpose.xlu1.b32.cont [3/4] (short) (narrow) %v2016_v40, 8 }
0x10d3   :  { %2021 = vxpose.xlu1.b32.end [4/4] (short) (narrow) %v2017_v9, 8 }
0x10fa   :  { %2132 = vadd.xlane.f32.xlu1 %v2131_v14 }
0x113d   :  { %v2151_v18 = vpop.xlane.xlu0 %2150 }
0x113e   :  { %v2161_v58 = vmul.f32 0.03125, %v2151_v18 }
0x1140   :  { %v2165_v59 = vadd.f32 1e-05, %v2161_v58 }
0x1141   :  { %v2154_v11 = vpop.xlane.xlu0 %2153 }
0x1142   :  { %2781 = vrsqrt.f32 %v2165_v59  ;;  %v2162_v32 = vmul.f32 0.03125, %v2154_v11 }
0x1144   :  { %v2166_v6 = vadd.f32 1e-05, %v2162_v32 }
0x1146   :  { %2783 = vrsqrt.f32 %v2166_v6 }
0x1147   :  { %v2034_v52 = vpop.trf.xlu1 }
0x1148   :  { %2552 = vmatmul.mubr.msk.f32.vlgmr.msra.gmra.mrb[18].mxu1 %vm49_vm0, %v2034_v52 }
0x114c   :  { %v2782_v56 = vpop.eup %2781 }
0x114d   :  { %v2173_v28 = vmul.f32 %v2782_v56, %v2141_v37 }
0x114f   :  { %v2181_v44 = vmul.f32 %v3415_v61, %v2173_v28 }
0x1150   :  { %v2784_v62 = vpop.eup %2783 }
0x1151   :  { %v2189_v0 = vadd.f32 %v3417_v60, %v2181_v44  ;;  %v2174_v1 = vmul.f32 %v2784_v62, %v2142_v51 }
0x1153   :  { %v2197_v2 = vmul.f32 1.442695, %v2189_v0  ;;  %v2182_v4 = vmul.f32 %v3415_v61, %v2174_v1  ;;  %vm2193_vm9 = vcmp.gt.f32.partialorder %v2189_v0, 0.0 }
0x1155   :  { %2785 = vpow2.f32 %v2197_v2  ;;  %v2190_v23 = vadd.f32 %v3417_v60, %v2182_v4 }
0x1157   :  { %v2199_v39 = vmul.f32 1.442695, %v2190_v23  ;;  %vm2194_vm11 = vcmp.gt.f32.partialorder %v2190_v23, 0.0 }
0x1159   :  { %2787 = vpow2.f32 %v2199_v39 }
0x115f   :  { %v2786_v29 = vpop.eup %2785 }
0x1160   :  { %v2304_v55 = vadd.f32 -1.0, %v2786_v29 }
0x1162   :  { %v2209_v34 = vsel %vm2193_vm9, %v2189_v0, %v2304_v55 }
0x1163   :  { %v2788_v31 = vpop.eup %2787  ;;  %2213 = vst.msk [vmem:[%s3474_s12] sm:$0xff] %vm49_vm0, %v2209_v34 }
0x1164   :  { %v2305_v63 = vadd.f32 -1.0, %v2788_v31 }
0x1166   :  { %v2210_v20 = vsel %vm2194_vm11, %v2190_v23, %v2305_v63 }
0x1167   :  { %2214 = vst.msk [vmem:[%s3474_s12 + $0x8] sm:$0xff] %vm49_vm0, %v2210_v20 }
0x1187   :  { %v2133_v3 = vpop.xlane.xlu1 %2132 }
0x1188   :  { %v2139_v19 = vmul.f32 0.03125, %v2133_v3 }
0x118a   :  { %v2143_v15 = vsub.f32 %v3331_v42, %v2139_v19 }
0x118c   :  { %v2147_v22 = vmul.f32 %v2143_v15, %v2143_v15 }
0x118e   :  { %v2155_v24 = vsel %vm49_vm0, %v2147_v22, 0.0 }
0x118f   :  { %2156 = vadd.xlane.f32.xlu0 %v2155_v24 }
0x1193   :  { %2159 = vadd.xlane.f32.xlu0 %v2158_v26 }
0x1194   :  { %2809 = shalt.err (!%p2806_p4)
}
0x1195   :  { %s2810_s24 = scalar_lea.hbm %s3475_s13, 1024 }
0x1196   :  { %p2811_p5 = scmp.ne.s32.totalorder %s3475_s13, %s2810_s24  ;;  %p2814_p6 = scmp.lt.u32.totalorder %s2810_s24, %s3475_s13 }
0x1198   :  { %p2816_p7 = pnand %p2814_p6, %p2811_p5 }
0x119a   :  { %2819 = shalt.err (!%p2816_p7)
}
0x119b   :  { %s2832_s4 = smov 128   ;;  %s2833_s28 = smov 8   ;;  %vm2123_vm3 = vcmask 257024  }
0x119c   :  { %2232 = dma.vmem_to_hbm [thread:$0]  %s2227_s21, 1024, %s3475_s13, [#allocation4], %s2832_s4, %s2832_s4, %s2833_s28  }
0x121b   :  { %v2119_v42 = vpop.f32.mrb[18].mxu1 }
0x121c   :  { %v2157_v45 = vpop.xlane.xlu0 %2156  ;;  %2124 = vst.msk [vmem:[%s3473_s11] sm:$0xf] %vm2123_vm3, %v2119_v42  ;;  %v2553_v27 = vpop.f32.mrb[19].mxu1 }
0x121d   :  { %v2163_v30 = vmul.f32 0.03125, %v2157_v45 }
0x121f   :  { %v2167_v33 = vadd.f32 1e-05, %v2163_v30 }
0x1220   :  { %v2160_v35 = vpop.xlane.xlu0 %2159 }
0x1221   :  { %2789 = vrsqrt.f32 %v2167_v33  ;;  %v2164_v37 = vmul.f32 0.03125, %v2160_v35 }
0x1223   :  { %v2168_v43 = vadd.f32 1e-05, %v2164_v37 }
0x1225   :  { %2791 = vrsqrt.f32 %v2168_v43 }
0x122b   :  { %v2790_v10 = vpop.eup %2789 }
0x122c   :  { %v2175_v46 = vmul.f32 %v2790_v10, %v2143_v15 }
0x122e   :  { %v2183_v48 = vmul.f32 %v3415_v61, %v2175_v46 }
0x122f   :  { %v2792_v50 = vpop.eup %2791 }
0x1230   :  { %v2191_v51 = vadd.f32 %v3417_v60, %v2183_v48  ;;  %v2176_v36 = vmul.f32 %v2792_v50, %v2144_v21 }
0x1232   :  { %v2201_v41 = vmul.f32 1.442695, %v2191_v51  ;;  %v2184_v53 = vmul.f32 %v3415_v61, %v2176_v36  ;;  %vm2195_vm5 = vcmp.gt.f32.partialorder %v2191_v51, 0.0 }
0x1234   :  { %2793 = vpow2.f32 %v2201_v41  ;;  %v2192_v57 = vadd.f32 %v3417_v60, %v2184_v53 }
0x1236   :  { %v2203_v8 = vmul.f32 1.442695, %v2192_v57  ;;  %vm2196_vm7 = vcmp.gt.f32.partialorder %v2192_v57, 0.0 }
0x1238   :  { %2795 = vpow2.f32 %v2203_v8 }
0x123e   :  { %v2794_v47 = vpop.eup %2793 }
0x123f   :  { %v2306_v12 = vadd.f32 -1.0, %v2794_v47 }
0x1241   :  { %v2211_v38 = vsel %vm2195_vm5, %v2191_v51, %v2306_v12 }
0x1242   :  { %v2796_v54 = vpop.eup %2795  ;;  %2215 = vst.msk [vmem:[%s3474_s12 + $0x10] sm:$0xff] %vm49_vm0, %v2211_v38 }
0x1243   :  { %v2307_v49 = vadd.f32 -1.0, %v2796_v54 }
0x1245   :  { %v2212_v25 = vsel %vm2196_vm7, %v2192_v57, %v2307_v49 }
0x1246   :  { %2216 = vst.msk [vmem:[%s3474_s12 + $0x18] sm:$0xff] %vm49_vm0, %v2212_v25 }
0x1247   :  { %2820 = dma.done.wait [#allocation4], 1024  }
0x1248   :  { %2821 = vsyncadd [#allocation4], 4294966272 }
0x1249   :  { %2240 = vsyncpa [#allocation4], 1 }

// kernel: fwd.7
= control target key start
LH: loop header
LB: loop body
LE: loop exit
PB: predicated region body
PF: predicated region fallthrough
CT: control target
= control target key end

     0   :  { %v1393_v0 = vmov 0.0   ;;  %vm1394_vm0 = vmmov 0   ;;  %vm168_vm1 = vcmask 261120   ;;  %v212_v19 = vlaneseq  ;;  %s1890_s3 = inlined_call_operand.vmem [shape: bf16[128,64], index: 3, kind: input, shape index: {}]   ;;  %s1891_s2 = inlined_call_operand.vmem [shape: bf16[32,64], index: 2, kind: input, shape index: {}]   ;;  %s1892_s0 = inlined_call_operand.vmem [shape: f32[4,32], index: 0, kind: input, shape index: {}]   ;;  %s1893_s1 = inlined_call_operand.vmem [shape: f32[4,128], index: 1, kind: input, shape index: {}]   ;;  %s1894_s4 = inlined_call_operand.vmem [shape: f32[3,64], index: 4, kind: input, shape index: {}]   ;;  %s1895_s5 = inlined_call_operand.vmem [shape: bf16[64,64], index: 5, kind: input, shape index: {}]   ;;  %s1896_s6 = inlined_call_operand.vmem [shape: f32[3,64], index: 6, kind: input, shape index: {}]   ;;  %s1897_s8 = inlined_call_operand.vmem [shape: f32[64,32], index: 8, kind: input, shape index: {}]   ;;  %s1898_s9 = inlined_call_operand.vmem [shape: f32[64,32], index: 9, kind: input, shape index: {}]   ;;  %s1899_s11 = inlined_call_operand.vmem [shape: f32[32,1], index: 11, kind: input, shape index: {}]   ;;  %s1900_s7 = inlined_call_operand.vmem [shape: f32[2,64,64], index: 7, kind: input, shape index: {}]   ;;  %s1901_s10 = inlined_call_operand.vmem [shape: f32[1,32], index: 10, kind: input, shape index: {}]   ;;  %s1902_s12 = inlined_call_operand.vmem [shape: f32[2,1], index: 12, kind: output, shape index: {}]  }
   0x1   :  { %1239 = vmatprep.subr.bf16.mxu0 %v1393_v0  ;;  %v1365_v1 = vld [vmem:[%s1890_s3] sm:$0xff]   ;;  %1259 = vmatprep.subr.bf16.mxu1 %v1393_v0  ;;  %v1366_v2 = vld [vmem:[%s1890_s3 + $0x8] sm:$0xff]   ;;  %v1367_v3 = vld [vmem:[%s1890_s3 + $0x10] sm:$0xff]   ;;  %vm217_vm2 = vcmask 519168   ;;  %vm280_vm3 = vcmask 523264   ;;  %vm617_vm4 = vcmask 519170  }
   0x2   :  { %1263 = vmatprep.mubr.msk.bf16.mxu1 %vm1394_vm0, %v1393_v0  ;;  %1255 = vmatprep.mubr.msk.bf16.mxu0 %vm1394_vm0, %v1393_v0  ;;  %v1371_v4 = vld [vmem:[%s1891_s2] sm:$0xff]   ;;  %v1373_v5 = vld [vmem:[%s1891_s2 + $0x8] sm:$0xff]   ;;  %v1368_v6 = vld [vmem:[%s1890_s3 + $0x18] sm:$0xff]   ;;  %v1520_v20 = vshrl.u32 %v212_v19, 7  ;;  %vm610_vm5 = vcmask 517120   ;;  %vm731_vm6 = vcmask 130112  }
   0x3   :  { %1240 = vmatpush3.bf16.msra.mxu0 %v1365_v1  ;;  %1260 = vmatpush3.bf16.msra.mxu1 %v1371_v4  ;;  %v44_v7 = vld [vmem:[%s1892_s0] sm:$0xf]  ;;  %v1370_v10 = vld [vmem:[%s1890_s3 + $0x28] sm:$0xff]   ;;  %v1372_v11 = vld [vmem:[%s1890_s3 + $0x30] sm:$0xff]   ;;  %vm738_vm7 = vcmask 195712   ;;  %vm745_vm8 = vcmask 261312  }
   0x4   :  { %1241 = vmatprep.subr.bf16.mxu0 %v1393_v0  ;;  %1261 = vmatprep.subr.bf16.mxu1 %v1393_v0  ;;  %v45_v8 = vpack.c.bf16 %v44_v7, %v44_v7  ;;  %v1369_v9 = vld [vmem:[%s1890_s3 + $0x20] sm:$0xff]   ;;  %v1374_v12 = vld [vmem:[%s1890_s3 + $0x38] sm:$0xff]   ;;  %v1523_v21 = vsub.s32 0, %v1520_v20  ;;  %v1376_v37 = vld [vmem:[%s1895_s5 + $0x8] sm:$0xff]   ;;  %v1547_v43 = vsub.s32 1, %v1520_v20  ;;  %v239_v44 = vsub.s32 2, %v1520_v20 }
   0x5   :  { %v50_v13 = vld [vmem:[%s1893_s1] sm:$0xf]  ;;  %v1377_v38 = vld [vmem:[%s1895_s5 + $0x10] sm:$0xff]   ;;  %v1378_v39 = vld [vmem:[%s1895_s5 + $0x18] sm:$0xff]   ;;  %vm752_vm9 = vcmask 326912   ;;  %vm759_vm10 = vcmask 392512  }
   0x6   :  { %v51_v14 = vpack.c.bf16 %v50_v13, %v50_v13  ;;  %v42_v22 = vld [vmem:[%s1894_s4] sm:$0x7]  ;;  %vm766_vm11 = vcmask 458112   ;;  %vm773_vm12 = vcmask 523712   ;;  %vm814_vm13 = vcmask 1041409  }
   0x7   :  { %1242 = vmatpush3.bf16.msra.mxu0 %v1366_v2  ;;  %1262 = vmatpush3.bf16.msra.mxu1 %v1373_v5  ;;  %v215_v23 = vrot.slane %v42_v22, %v1523_v21  ;;  %v1375_v36 = vld [vmem:[%s1895_s5] sm:$0xff]   ;;  %v235_v45 = vrot.slane %v42_v22, %v1547_v43  ;;  %v240_v47 = vrot.slane %v42_v22, %v239_v44  ;;  %vm1173_vm14 = vcmask 1024  }
   0x8   :  { %1243 = vmatprep.subr.bf16.mxu0 %v1393_v0  ;;  %1267 = vmatprep.subr.bf16.mxu1 %v1393_v0  ;;  %v43_v53 = vld [vmem:[%s1896_s6] sm:$0x7] }
   0x9   :  { %v255_v54 = vrot.slane %v43_v53, %v1523_v21  ;;  %v361_v22 = vld [vmem:[%s1897_s8] sm:$0xff] }
   0xa   :  { %1264 = vmatmul.mubr.msk.bf16.vlgmr.msra.gmra.mrb[0].mxu1 %vm168_vm1, %v45_v8 }
   0xb   :  { %1244 = vmatpush3.bf16.msra.mxu0 %v1367_v3  ;;  %1275 = vmatprep.mubr.msk.bf16.mxu1 %vm1394_vm0, %v1393_v0 }
   0xc   :  { %1245 = vmatprep.subr.bf16.mxu0 %v1393_v0  ;;  %1268 = vmatpush3.bf16.msra.mxu1 %v1375_v36  ;;  %v366_v36 = vld [vmem:[%s1897_s8 + $0x28] sm:$0xff] }
   0xd   :  { %1269 = vmatprep.subr.bf16.mxu1 %v1393_v0 }
   0xf   :  { %1246 = vmatpush3.bf16.msra.mxu0 %v1368_v6  ;;  %v340_v6 = vrot.slane %v43_v53, %v1547_v43 }
  0x10   :  { %1247 = vmatprep.subr.bf16.mxu0 %v1393_v0  ;;  %1270 = vmatpush3.bf16.msra.mxu1 %v1376_v37  ;;  %v373_v37 = vld [vmem:[%s1898_s9 + $0x20] sm:$0xff] }
  0x11   :  { %1271 = vmatprep.subr.bf16.mxu1 %v1393_v0 }
  0x13   :  { %1248 = vmatpush3.bf16.msra.mxu0 %v1369_v9  ;;  %v345_v9 = vrot.slane %v43_v53, %v239_v44  ;;  %v375_v44 = vld [vmem:[%s1898_s9 + $0x30] sm:$0xff] }
  0x14   :  { %1249 = vmatprep.subr.bf16.mxu0 %v1393_v0  ;;  %1272 = vmatpush3.bf16.msra.mxu1 %v1377_v38  ;;  %v374_v38 = vld [vmem:[%s1898_s9 + $0x28] sm:$0xff] }
  0x15   :  { %1273 = vmatprep.subr.bf16.mxu1 %v1393_v0 }
  0x17   :  { %1250 = vmatpush3.bf16.msra.mxu0 %v1370_v10 }
  0x18   :  { %1251 = vmatprep.subr.bf16.mxu0 %v1393_v0  ;;  %1274 = vmatpush3.bf16.msra.mxu1 %v1378_v39 }
  0x1b   :  { %1252 = vmatpush3.bf16.msra.mxu0 %v1372_v11 }
  0x1c   :  { %1253 = vmatprep.subr.bf16.mxu0 %v1393_v0 }
  0x1f   :  { %1254 = vmatpush3.bf16.msra.mxu0 %v1374_v12 }
  0x22   :  { %1256 = vmatmul.mubr.bf16.vlgmr.msra.gmra.mrb[0].mxu0 %v51_v14 }
  0x23   :  { %1314 = vmatprep.mubr.msk.f32.mxu0 %vm1394_vm0, %v1393_v0 }
  0xdd   :  { %v206_v15 = vpop.f32.mrb[0].mxu1 }
  0xde   :  { %v1265_v16 = vpop.f32.mrb[1].mxu1 }
  0xdf   :  { %v209_v17 = vpop.f32.mrb[2].mxu1 }
  0xe0   :  { %v1266_v18 = vpop.f32.mrb[3].mxu1 }
  0xf5   :  { %v150_v24 = vpop.f32.mrb[0].mxu0 }
  0xf6   :  { %v207_v25 = vadd.f32 %v206_v15, %v150_v24  ;;  %v1257_v26 = vpop.f32.mrb[1].mxu0 }
  0xf7   :  { %v153_v27 = vpop.f32.mrb[2].mxu0  ;;  %v369_v26 = vld [vmem:[%s1898_s9] sm:$0xff] }
  0xf8   :  { %v1258_v28 = vpop.f32.mrb[3].mxu0  ;;  %v216_v29 = vadd.f32 %v215_v23, %v207_v25  ;;  %v362_v23 = vld [vmem:[%s1897_s8 + $0x8] sm:$0xff]  ;;  %v1395_v25 = vmov 0.0|0.0  }
  0xf9   :  { %v1341_v24 = vpack.c.bf16 %v362_v23, %v361_v22  ;;  %1340 = vmatprep.subr.bf16.mxu0 %v1395_v25  ;;  %1328 = vmatprep.subr.bf16.mxu1 %v1395_v25  ;;  %v370_v27 = vld [vmem:[%s1898_s9 + $0x8] sm:$0xff]  ;;  %v1197_v23 = vld [vmem:[%s1901_s10] ss:$0 sm:$0xff] }
  0xfa   :  { %v218_v30 = vsel %vm217_vm2, %v216_v29, 0.0  ;;  %v1329_v28 = vpack.c.bf16 %v370_v27, %v369_v26  ;;  %v1644_v27 = vld [vmem:[%s1900_s7 + $0x10] sm:$0xff] }
  0xfb   :  { %219 = vadd.xlane.f32.xlu0 %v218_v30  ;;  %1342 = vmatpush3.bf16.msra.mxu0 %v1341_v24  ;;  %v364_v30 = vld [vmem:[%s1897_s8 + $0x18] sm:$0xff] }
  0xfc   :  { %1343 = vmatprep.subr.bf16.mxu0 %v1395_v25 }
 0x188   :  { %v220_v31 = vpop.xlane.xlu0 %219 }
 0x189   :  { %v222_v32 = vmul.f32 0.015625, %v220_v31 }
 0x18b   :  { %v223_v33 = vsub.f32 %v216_v29, %v222_v32  ;;  %v363_v29 = vld [vmem:[%s1897_s8 + $0x10] sm:$0xff] }
 0x18c   :  { %v1344_v31 = vpack.c.bf16 %v364_v30, %v363_v29  ;;  %v371_v32 = vld [vmem:[%s1898_s9 + $0x10] sm:$0xff] }
 0x18d   :  { %v224_v34 = vmul.f32 %v223_v33, %v223_v33 }
 0x18e   :  { %1345 = vmatpush3.bf16.msra.mxu0 %v1344_v31  ;;  %v1651_v31 = vld [vmem:[%s1900_s7 + $0x18] sm:$0xff] }
 0x18f   :  { %v225_v35 = vsel %vm217_vm2, %v224_v34, 0.0  ;;  %v365_v34 = vld [vmem:[%s1897_s8 + $0x20] sm:$0xff]  ;;  %1346 = vmatprep.subr.bf16.mxu0 %v1395_v25 }
 0x190   :  { %226 = vadd.xlane.f32.xlu0 %v225_v35  ;;  %v1347_v39 = vpack.c.bf16 %v366_v36, %v365_v34  ;;  %v1658_v34 = vld [vmem:[%s1900_s7 + $0x20] sm:$0xff] }
 0x192   :  { %1348 = vmatpush3.bf16.msra.mxu0 %v1347_v39 }
 0x193   :  { %1349 = vmatprep.subr.bf16.mxu0 %v1395_v25 }
 0x21d   :  { %v227_v40 = vpop.xlane.xlu0 %226 }
 0x21e   :  { %v228_v41 = vmul.f32 0.015625, %v227_v40  ;;  %v367_v40 = vld [vmem:[%s1897_s8 + $0x30] sm:$0xff] }
 0x220   :  { %v229_v42 = vadd.f32 1e-05, %v228_v41  ;;  %v368_v41 = vld [vmem:[%s1897_s8 + $0x38] sm:$0xff] }
 0x222   :  { %1379 = vrsqrt.f32 %v229_v42  ;;  %v1335_v42 = vpack.c.bf16 %v374_v38, %v373_v37 }
 0x22c   :  { %v1380_v46 = vpop.eup %1379 }
 0x22d   :  { %v231_v48 = vmul.f32 %v1380_v46, %v223_v33  ;;  %v372_v33 = vld [vmem:[%s1898_s9 + $0x18] sm:$0xff]  ;;  %v1350_v46 = vpack.c.bf16 %v368_v41, %v367_v40  ;;  %v1668_v40 = vld [vmem:[%s1900_s7 + $0x28] sm:$0xff] }
 0x22e   :  { %v1332_v35 = vpack.c.bf16 %v372_v33, %v371_v32 }
 0x22f   :  { %v236_v49 = vmul.f32 %v235_v45, %v231_v48  ;;  %v376_v45 = vld [vmem:[%s1898_s9 + $0x38] sm:$0xff]  ;;  %1351 = vmatpush3.bf16.msra.mxu0 %v1350_v46 }
 0x231   :  { %v241_v50 = vadd.f32 %v240_v47, %v236_v49  ;;  %v1338_v47 = vpack.c.bf16 %v376_v45, %v375_v44 }
 0x233   :  { %v242_v51 = vmax.f32 %v241_v50, 0.0 }
 0x235   :  { %v243_v52 = vpack.c.bf16 %v242_v51, %v242_v51 }
 0x237   :  { %1276 = vmatmul.mubr.msk.bf16.vlgmr.msra.gmra.mrb[4].mxu1 %vm280_vm3, %v243_v52 }
 0x238   :  { %1295 = vmatprep.mubr.msk.f32.mxu1 %vm1394_vm0, %v1393_v0  ;;  %1330 = vmatpush3.bf16.msra.mxu1 %v1329_v28 }
 0x239   :  { %1331 = vmatprep.subr.bf16.mxu1 %v1395_v25 }
 0x23c   :  { %1333 = vmatpush3.bf16.msra.mxu1 %v1332_v35  ;;  %v625_v35 = vld [vmem:[%s1900_s7 + $0x8] sm:$0xff] }
 0x23d   :  { %1334 = vmatprep.subr.bf16.mxu1 %v1395_v25 }
 0x240   :  { %1336 = vmatpush3.bf16.msra.mxu1 %v1335_v42  ;;  %v641_v42 = vmul.f32 %v625_v35, %v625_v35 }
 0x241   :  { %1337 = vmatprep.subr.bf16.mxu1 %v1395_v25 }
 0x244   :  { %1339 = vmatpush3.bf16.msra.mxu1 %v1338_v47 }
 0x245   :  { %1352 = vmatprep.subr.bf16.mxu1 %v1395_v25 }
 0x30a   :  { %v318_v55 = vpop.f32.mrb[4].mxu1 }
 0x30b   :  { %v319_v56 = vadd.f32 %v318_v55, %v255_v54  ;;  %v1277_v57 = vpop.f32.mrb[5].mxu1 }
 0x30c   :  { %v321_v58 = vpop.f32.mrb[6].mxu1  ;;  %v532_v57 = vld [vmem:[%s1899_s11] sm:$0xff] }
 0x30d   :  { %v1278_v59 = vpop.f32.mrb[7].mxu1  ;;  %v324_v60 = vsel %vm217_vm2, %v319_v56, 0.0  ;;  %v533_v58 = vld [vmem:[%s1899_s11 + $0x8] sm:$0xff] }
 0x30e   :  { %325 = vadd.xlane.f32.xlu1 %v324_v60  ;;  %v1353_v59 = vpack.c.bf16 %v533_v58, %v532_v57  ;;  %v534_v60 = vld [vmem:[%s1899_s11 + $0x10] sm:$0xff]  ;;  %v635_v57 = vld [vmem:[%s1900_s7 + $0x58] sm:$0xff] }
 0x39b   :  { %v326_v61 = vpop.xlane.xlu1 %325 }
 0x39c   :  { %v327_v62 = vmul.f32 0.015625, %v326_v61  ;;  %v535_v61 = vld [vmem:[%s1899_s11 + $0x18] sm:$0xff] }
 0x39e   :  { %v328_v63 = vsub.f32 %v319_v56, %v327_v62 }
 0x3a0   :  { %v329_v1 = vmul.f32 %v328_v63, %v328_v63 }
 0x3a2   :  { %v330_v2 = vsel %vm217_vm2, %v329_v1, 0.0 }
 0x3a3   :  { %331 = vadd.xlane.f32.xlu1 %v330_v2 }
 0x430   :  { %v332_v3 = vpop.xlane.xlu1 %331 }
 0x431   :  { %v333_v4 = vmul.f32 0.015625, %v332_v3 }
 0x433   :  { %v334_v5 = vadd.f32 1e-05, %v333_v4 }
 0x435   :  { %1381 = vrsqrt.f32 %v334_v5 }
 0x43f   :  { %v1382_v7 = vpop.eup %1381 }
 0x440   :  { %v336_v8 = vmul.f32 %v1382_v7, %v328_v63  ;;  %v1396_v7 = vmov 1966171168  }
 0x442   :  { %v341_v10 = vmul.f32 %v340_v6, %v336_v8  ;;  %v822_v8 = vunpack.c.l.s4 %v1396_v7 }
 0x444   :  { %v346_v11 = vadd.f32 %v345_v9, %v341_v10  ;;  %v823_v9 = vunpack.c.0.s8 %v822_v8 }
 0x446   :  { %v347_v12 = vmax.f32 %v346_v11, 0.0 }
 0x448   :  { %v348_v13 = vsel %vm217_vm2, %v347_v12, 0.0 }
 0x449   :  { %349 = vadd.xlane.f32.xlu0 %v348_v13 }
 0x4d6   :  { %v350_v14 = vpop.xlane.xlu0 %349 }
 0x4d7   :  { %v351_v15 = vmul.f32 0.015625, %v350_v14 }
 0x4d9   :  { %v352_v16 = vsub.f32 %v347_v12, %v351_v15 }
 0x4db   :  { %v353_v17 = vmul.f32 %v352_v16, %v352_v16 }
 0x4dd   :  { %v354_v18 = vsel %vm217_vm2, %v353_v17, 0.0 }
 0x4de   :  { %355 = vadd.xlane.f32.xlu1 %v354_v18 }
 0x56b   :  { %v356_v48 = vpop.xlane.xlu1 %355 }
 0x56c   :  { %v357_v49 = vmul.f32 0.015625, %v356_v48  ;;  %v1677_v48 = vld [vmem:[%s1900_s7 + $0x30] sm:$0xff] }
 0x56e   :  { %v358_v50 = vadd.f32 1e-05, %v357_v49  ;;  %v634_v49 = vld [vmem:[%s1900_s7 + $0x50] sm:$0xff] }
 0x570   :  { %1383 = vrsqrt.f32 %v358_v50  ;;  %v659_v50 = vsel %vm280_vm3, %v641_v42, 0.0 }
 0x57a   :  { %v1384_v51 = vpop.eup %1383 }
 0x57b   :  { %v360_v52 = vmul.f32 %v1384_v51, %v352_v16  ;;  %v1635_v16 = vld [vmem:[%s1900_s7] sm:$0xff]  ;;  %v650_v51 = vmul.f32 %v634_v49, %v634_v49 }
 0x57d   :  { %1315 = vmatmul.mubr.msk.f32.vlgmr.msra.gmra.mrb[4].mxu0 %vm280_vm3, %v360_v52  ;;  %v378_v53 = vrot.slane %v360_v52, 2  ;;  %v609_v54 = vmul.f32 %v360_v52, %v360_v52  ;;  %v686_v58 = vsel %vm280_vm3, %v650_v51, 0.0 }
 0x57f   :  { %1296 = vmatmul.mubr.msk.f32.vlgmr.msra.gmra.mrb[8].mxu1 %vm280_vm3, %v378_v53  ;;  %v618_v55 = vsel %vm617_vm4, %v609_v54, 0.0  ;;  %v611_v56 = vsel %vm610_vm5, %v609_v54, 0.0 }
 0x580   :  { %619 = vadd.xlane.f32.xlu0 %v618_v55  ;;  %612 = vadd.xlane.f32.xlu1 %v611_v56  ;;  %v1397_v55 = vmov 0   ;;  %v1688_v56 = vld [vmem:[%s1900_s7 + $0x38] sm:$0xff] }
 0x581   :  { %1325 = vmatprep.mubr.msk.f32.mxu1 %vm1394_vm0, %v1393_v0  ;;  %1354 = vmatpush3.bf16.msra.mxu1 %v1353_v59  ;;  %v1356_v0 = vpack.c.bf16 %v535_v61, %v534_v60  ;;  %v651_v59 = vmul.f32 %v635_v57, %v635_v57 }
 0x582   :  { %1355 = vmatprep.subr.bf16.mxu1 %v1395_v25  ;;  %1363 = vset.pattern.permute.xlu0 %v1397_v55 }
 0x583   :  { %1364 = vset.pattern.permute.xlu1 %v1397_v55 }
 0x585   :  { %1357 = vmatpush3.bf16.msra.mxu1 %v1356_v0 }
 0x60d   :  { %v613_v62 = vpop.xlane.xlu1 %612  ;;  %v620_v5 = vpop.xlane.xlu0 %619 }
 0x60e   :  { %v614_v63 = vadd.f32 1e-24, %v613_v62  ;;  %v621_v6 = vadd.f32 1e-24, %v620_v5  ;;  %v632_v62 = vld [vmem:[%s1900_s7 + $0x40] sm:$0xff]  ;;  %v637_v5 = vld [vmem:[%s1900_s7 + $0x68] sm:$0xff] }
 0x60f   :  { %v653_v7 = vmul.f32 %v637_v5, %v637_v5 }
 0x610   :  { %1385 = vrsqrt.f32 %v614_v63  ;;  %v636_v63 = vld [vmem:[%s1900_s7 + $0x60] sm:$0xff] }
 0x611   :  { %1387 = vrsqrt.f32 %v621_v6 }
 0x61a   :  { %v1386_v1 = vpop.eup %1385 }
 0x61b   :  { %v616_v2 = vmul.f32 %v1386_v1, %v360_v52  ;;  %v1388_v10 = vpop.eup %1387  ;;  %v689_v1 = vsel %vm280_vm3, %v651_v59, 0.0 }
 0x61c   :  { %v623_v11 = vmul.f32 %v1388_v10, %v360_v52  ;;  %v648_v10 = vmul.f32 %v632_v62, %v632_v62 }
 0x61d   :  { %v923_v3 = vrot.slane %v616_v2, %v1523_v21  ;;  %v958_v4 = vrot.slane %v616_v2, %v1547_v43  ;;  %v826_v43 = vsub.s32 %v823_v9, %v1520_v20  ;;  %v652_v2 = vmul.f32 %v636_v63, %v636_v63 }
 0x61f   :  { %929 = vbcast.lane.b32.xlu1 %v923_v3, 264  ;;  %925 = vbcast.lane.b32.xlu0 %v923_v3, 256  ;;  %v827_v12 = vrot.slane %v623_v11, %v826_v43  ;;  %v692_v6 = vsel %vm280_vm3, %v652_v2, 0.0  ;;  %v695_v11 = vsel %vm280_vm3, %v653_v7, 0.0 }
 0x621   :  { %v835_v13 = vrot.slane %v827_v12, %v826_v43  ;;  %v828_v36 = vcombine.high %v827_v12, %v827_v12 }
 0x623   :  { %960 = vbcast.lane.b32.xlu1 %v958_v4, 256  ;;  %933 = vbcast.lane.b32.xlu0 %v923_v3, 272  ;;  %v843_v14 = vcombine.high %v835_v13, %v835_v13  ;;  %v842_v44 = vrot.slane %v828_v36, %v826_v43  ;;  %v638_v43 = vld [vmem:[%s1900_s7 + $0x70] sm:$0xff]  ;;  %v633_v13 = vld [vmem:[%s1900_s7 + $0x48] sm:$0xff] }
 0x624   :  { %v654_v12 = vmul.f32 %v638_v43, %v638_v43 }
 0x625   :  { %v848_v15 = vrot.slane %v843_v14, %v1523_v21  ;;  %v844_v52 = vcombine.high %v842_v44, %v842_v44  ;;  %v680_v14 = vsel %vm280_vm3, %v648_v10, 0.0 }
 0x627   :  { %964 = vbcast.lane.b32.xlu1 %v958_v4, 264  ;;  %937 = vbcast.lane.b32.xlu0 %v923_v3, 280  ;;  %v855_v24 = vmul.f32 %v848_v15, %v1635_v16  ;;  %v857_v30 = vmul.f32 %v848_v15, %v1644_v27  ;;  %v858_v33 = vmul.f32 %v848_v15, %v1651_v31 }
 0x628   :  { %v859_v38 = vmul.f32 %v848_v15, %v1658_v34  ;;  %v856_v39 = vmul.f32 %v848_v15, %v625_v35  ;;  %v860_v46 = vmul.f32 %v848_v15, %v1668_v40  ;;  %v861_v54 = vmul.f32 %v848_v15, %v1677_v48 }
 0x629   :  { %v871_v29 = vsel %vm280_vm3, %v855_v24, 0.0  ;;  %v877_v32 = vsel %vm280_vm3, %v857_v30, 0.0  ;;  %v880_v37 = vsel %vm280_vm3, %v858_v33, 0.0  ;;  %v1695_v60 = vrot.slane %v844_v52, %v1523_v21 }
 0x62a   :  { %v883_v45 = vsel %vm280_vm3, %v859_v38, 0.0  ;;  %v874_v47 = vsel %vm280_vm3, %v856_v39, 0.0  ;;  %v886_v53 = vsel %vm280_vm3, %v860_v46, 0.0  ;;  %v889_v61 = vsel %vm280_vm3, %v861_v54, 0.0 }
 0x62b   :  { %968 = vbcast.lane.b32.xlu1 %v958_v4, 272  ;;  %941 = vbcast.lane.b32.xlu0 %v923_v3, 288  ;;  %v862_v0 = vmul.f32 %v848_v15, %v1688_v56  ;;  %v649_v15 = vmul.f32 %v633_v13, %v633_v13  ;;  %v865_v30 = vmul.f32 %v1695_v60, %v634_v49 }
 0x62c   :  { %v866_v35 = vmul.f32 %v1695_v60, %v635_v57  ;;  %v867_v38 = vmul.f32 %v1695_v60, %v636_v63  ;;  %v868_v42 = vmul.f32 %v1695_v60, %v637_v5  ;;  %v869_v46 = vmul.f32 %v1695_v60, %v638_v43 }
 0x62d   :  { %v892_v21 = vsel %vm280_vm3, %v862_v0, 0.0  ;;  %v901_v33 = vsel %vm280_vm3, %v865_v30, 0.0 }
 0x62f   :  { %972 = vbcast.lane.b32.xlu1 %v958_v4, 280  ;;  %945 = vbcast.lane.b32.xlu0 %v923_v3, 296 }
 0x633   :  { %976 = vbcast.lane.b32.xlu1 %v958_v4, 288  ;;  %949 = vbcast.lane.b32.xlu0 %v923_v3, 304 }
 0x637   :  { %980 = vbcast.lane.b32.xlu1 %v958_v4, 296  ;;  %953 = vbcast.lane.b32.xlu0 %v923_v3, 312  ;;  %v863_v3 = vmul.f32 %v1695_v60, %v632_v62 }
 0x639   :  { %v895_v8 = vsel %vm280_vm3, %v863_v3, 0.0 }
 0x63b   :  { %984 = vbcast.lane.b32.xlu1 %v958_v4, 304 }
 0x63f   :  { %988 = vbcast.lane.b32.xlu1 %v958_v4, 312  ;;  %v640_v4 = vmul.f32 %v1635_v16, %v1635_v16  ;;  %v639_v16 = vld [vmem:[%s1900_s7 + $0x78] sm:$0xff] }
 0x640   :  { %v870_v49 = vmul.f32 %v1695_v60, %v639_v16 }
 0x641   :  { %v656_v9 = vsel %vm280_vm3, %v640_v4, 0.0 }
 0x650   :  { %v519_v17 = vpop.f32.mrb[4].mxu0 }
 0x651   :  { %v1316_v18 = vpop.f32.mrb[5].mxu0 }
 0x652   :  { %v447_v22 = vpop.f32.mrb[8].mxu1  ;;  %v655_v18 = vmul.f32 %v639_v16, %v639_v16 }
 0x653   :  { %v520_v25 = vadd.f32 %v519_v17, %v447_v22  ;;  %v1297_v26 = vpop.f32.mrb[9].mxu1  ;;  %v698_v17 = vsel %vm280_vm3, %v654_v12, 0.0  ;;  %v683_v22 = vsel %vm280_vm3, %v649_v15, 0.0 }
 0x654   :  { %v701_v24 = vsel %vm280_vm3, %v655_v18, 0.0 }
 0x655   :  { %v530_v28 = vadd.f32 %v1197_v23, %v520_v25  ;;  %v642_v23 = vmul.f32 %v1644_v27, %v1644_v27  ;;  %v864_v25 = vmul.f32 %v1695_v60, %v633_v13  ;;  %v644_v27 = vmul.f32 %v1658_v34, %v1658_v34 }
 0x656   :  { %872 = vadd.xlane.f32.xlu0 %v871_v29  ;;  %v646_v34 = vmul.f32 %v1677_v48, %v1677_v48  ;;  %v913_v48 = vsel %vm280_vm3, %v869_v46, 0.0 }
 0x657   :  { %1389 = vtanh.f32 %v530_v28  ;;  %v662_v26 = vsel %vm280_vm3, %v642_v23, 0.0  ;;  %v643_v28 = vmul.f32 %v1651_v31, %v1651_v31  ;;  %v898_v29 = vsel %vm280_vm3, %v864_v25, 0.0 }
 0x658   :  { %v668_v36 = vsel %vm280_vm3, %v644_v27, 0.0  ;;  %v645_v31 = vmul.f32 %v1668_v40, %v1668_v40  ;;  %v674_v44 = vsel %vm280_vm3, %v646_v34, 0.0  ;;  %v647_v40 = vmul.f32 %v1688_v56, %v1688_v56 }
 0x65a   :  { %878 = vadd.xlane.f32.xlu0 %v877_v32  ;;  %v665_v32 = vsel %vm280_vm3, %v643_v28, 0.0  ;;  %v671_v39 = vsel %vm280_vm3, %v645_v31, 0.0 }
 0x65e   :  { %881 = vadd.xlane.f32.xlu0 %v880_v37  ;;  %v904_v37 = vsel %vm280_vm3, %v866_v35, 0.0 }
 0x661   :  { %v1390_v41 = vpop.eup %1389 }
 0x662   :  { %1326 = vmatmul.mubr.msk.f32.vlgmr.msra.gmra.mrb[10].mxu1 %vm168_vm1, %v1390_v41  ;;  %884 = vadd.xlane.f32.xlu0 %v883_v45  ;;  %v907_v41 = vsel %vm280_vm3, %v867_v38, 0.0  ;;  %v910_v45 = vsel %vm280_vm3, %v868_v42, 0.0 }
 0x663   :  { %875 = vadd.xlane.f32.xlu1 %v874_v47  ;;  %v677_v47 = vsel %vm280_vm3, %v647_v40, 0.0 }
 0x666   :  { %887 = vadd.xlane.f32.xlu0 %v886_v53 }
 0x667   :  { %660 = vadd.xlane.f32.xlu1 %v659_v50  ;;  %v916_v50 = vsel %vm280_vm3, %v870_v49, 0.0 }
 0x66a   :  { %890 = vadd.xlane.f32.xlu0 %v889_v61 }
 0x66b   :  { %687 = vadd.xlane.f32.xlu1 %v686_v58 }
 0x66e   :  { %893 = vadd.xlane.f32.xlu0 %v892_v21 }
 0x66f   :  { %690 = vadd.xlane.f32.xlu1 %v689_v1 }
 0x672   :  { %896 = vadd.xlane.f32.xlu0 %v895_v8 }
 0x673   :  { %693 = vadd.xlane.f32.xlu1 %v692_v6 }
 0x676   :  { %657 = vadd.xlane.f32.xlu0 %v656_v9 }
 0x677   :  { %696 = vadd.xlane.f32.xlu1 %v695_v11 }
 0x67a   :  { %681 = vadd.xlane.f32.xlu0 %v680_v14 }
 0x67b   :  { %699 = vadd.xlane.f32.xlu1 %v698_v17 }
 0x67e   :  { %684 = vadd.xlane.f32.xlu0 %v683_v22 }
 0x67f   :  { %702 = vadd.xlane.f32.xlu1 %v701_v24 }
 0x682   :  { %663 = vadd.xlane.f32.xlu0 %v662_v26  ;;  %v721_v26 = vand.u32 127, %v212_v19 }
 0x683   :  { %899 = vadd.xlane.f32.xlu1 %v898_v29 }
 0x684   :  { %v733_v35 = vadd.s32 4294967280, %v721_v26  ;;  %v1791_v31 = vsub.s32 %v721_v26, %v1520_v20  ;;  %v740_v38 = vadd.s32 4294967272, %v721_v26 }
 0x686   :  { %666 = vadd.xlane.f32.xlu0 %v665_v32  ;;  %v726_v32 = vadd.s32 4294967288, %v721_v26 }
 0x687   :  { %902 = vadd.xlane.f32.xlu1 %v901_v33 }
 0x68a   :  { %669 = vadd.xlane.f32.xlu0 %v668_v36  ;;  %v1788_v36 = vsub.s32 %v726_v32, %v1520_v20 }
 0x68b   :  { %905 = vadd.xlane.f32.xlu1 %v904_v37 }
 0x68e   :  { %672 = vadd.xlane.f32.xlu0 %v671_v39 }
 0x68f   :  { %908 = vadd.xlane.f32.xlu1 %v907_v41  ;;  %v1796_v41 = vsub.s32 %v733_v35, %v1520_v20 }
 0x691   :  { %v926_v51 = vpop.permute.xlu0 %925  ;;  %v930_v52 = vpop.permute.xlu1 %929 }
 0x692   :  { %675 = vadd.xlane.f32.xlu0 %v674_v44  ;;  %v747_v44 = vadd.s32 4294967264, %v721_v26 }
 0x693   :  { %911 = vadd.xlane.f32.xlu1 %v910_v45  ;;  %v1799_v45 = vsub.s32 %v740_v38, %v1520_v20 }
 0x695   :  { %v934_v53 = vpop.permute.xlu0 %933  ;;  %v961_v54 = vpop.permute.xlu1 %960 }
 0x696   :  { %678 = vadd.xlane.f32.xlu0 %v677_v47 }
 0x697   :  { %914 = vadd.xlane.f32.xlu1 %v913_v48 }
 0x699   :  { %v938_v55 = vpop.permute.xlu0 %937  ;;  %v965_v56 = vpop.permute.xlu1 %964 }
 0x69b   :  { %917 = vadd.xlane.f32.xlu1 %v916_v50  ;;  %v754_v50 = vadd.s32 4294967256, %v721_v26 }
 0x69d   :  { %v942_v57 = vpop.permute.xlu0 %941  ;;  %v1762_v58 = vpop.permute.xlu1 %968 }
 0x6a1   :  { %v946_v59 = vpop.permute.xlu0 %945  ;;  %v1764_v61 = vpop.permute.xlu1 %972 }
 0x6a5   :  { %v950_v0 = vpop.permute.xlu0 %949  ;;  %v1766_v62 = vpop.permute.xlu1 %976 }
 0x6a9   :  { %v1768_v60 = vpop.permute.xlu0 %953  ;;  %v1770_v63 = vpop.permute.xlu1 %980 }
 0x6ad   :  { %v1772_v21 = vpop.permute.xlu1 %984 }
 0x6b1   :  { %v1774_v5 = vpop.permute.xlu1 %988 }
 0x6e3   :  { %v873_v1 = vpop.xlane.xlu0 %872 }
 0x6e4   :  { %v1006_v2 = vmul.f32 %v926_v51, %v873_v1  ;;  %v1805_v51 = vsub.s32 %v747_v44, %v1520_v20  ;;  %v768_v1 = vadd.s32 4294967240, %v721_v26 }
 0x6e6   :  { %1039 = vperm.xlu0 %1363, %v1006_v2  }
 0x6e7   :  { %v879_v3 = vpop.xlane.xlu0 %878 }
 0x6e8   :  { %v1008_v43 = vmul.f32 %v934_v53, %v879_v3 }
 0x6eb   :  { %v882_v4 = vpop.xlane.xlu0 %881 }
 0x6ec   :  { %v1009_v13 = vmul.f32 %v938_v55, %v882_v4  ;;  %v761_v55 = vadd.s32 4294967248, %v721_v26 }
 0x6ee   :  { %v1818_v4 = vsub.s32 %v761_v55, %v1520_v20 }
 0x6ef   :  { %v885_v6 = vpop.xlane.xlu0 %884 }
 0x6f0   :  { %v876_v7 = vpop.xlane.xlu1 %875  ;;  %v1010_v16 = vmul.f32 %v942_v57, %v885_v6 }
 0x6f1   :  { %v1007_v8 = vmul.f32 %v930_v52, %v876_v7 }
 0x6f3   :  { %1042 = vperm.xlu1 %1364, %v1007_v8   ;;  %v888_v9 = vpop.xlane.xlu0 %887 }
 0x6f4   :  { %v1776_v10 = vpop.xlane.xlu1 %660  ;;  %v1011_v22 = vmul.f32 %v946_v59, %v888_v9  ;;  %v1811_v59 = vsub.s32 %v754_v50, %v1520_v20 }
 0x6f7   :  { %1045 = vperm.xlu1 %1364, %v1008_v43   ;;  %v891_v11 = vpop.xlane.xlu0 %890  ;;  %v730_v43 = vrot.slane %v1776_v10, %v1788_v36 }
 0x6f8   :  { %v688_v12 = vpop.xlane.xlu1 %687  ;;  %v1012_v25 = vmul.f32 %v950_v0, %v891_v11 }
 0x6f9   :  { %v787_v48 = vrot.slane %v688_v12, %v1796_v41 }
 0x6fb   :  { %1048 = vperm.xlu1 %1364, %v1009_v13   ;;  %v894_v14 = vpop.xlane.xlu0 %893  ;;  %v1830_v13 = vsub.s32 %v768_v1, %v1520_v20 }
 0x6fc   :  { %v691_v15 = vpop.xlane.xlu1 %690 }
 0x6ff   :  { %1051 = vperm.xlu1 %1364, %v1010_v16   ;;  %v897_v17 = vpop.xlane.xlu0 %896 }
 0x700   :  { %v694_v18 = vpop.xlane.xlu1 %693  ;;  %v1014_v30 = vmul.f32 %v961_v54, %v897_v17  ;;  %v792_v54 = vrot.slane %v691_v15, %v1799_v45 }
 0x701   :  { %v797_v0 = vrot.slane %v694_v18, %v1805_v51 }
 0x703   :  { %1054 = vperm.xlu1 %1364, %v1011_v22   ;;  %v1778_v23 = vpop.xlane.xlu0 %657 }
 0x704   :  { %v1780_v24 = vpop.xlane.xlu1 %696  ;;  %v725_v3 = vrot.slane %v1778_v23, %v1791_v31 }
 0x705   :  { %v802_v11 = vrot.slane %v1780_v24, %v1811_v59 }
 0x707   :  { %1057 = vperm.xlu1 %1364, %v1012_v25   ;;  %v682_v28 = vpop.xlane.xlu0 %681 }
 0x708   :  { %v1783_v29 = vpop.xlane.xlu1 %699  ;;  %v778_v19 = vrot.slane %v682_v28, %v1791_v31 }
 0x709   :  { %v807_v17 = vrot.slane %v1783_v29, %v1818_v4 }
 0x70b   :  { %1063 = vperm.xlu1 %1364, %v1014_v30   ;;  %v685_v27 = vpop.xlane.xlu0 %684 }
 0x70c   :  { %v1785_v33 = vpop.xlane.xlu1 %702  ;;  %v782_v39 = vrot.slane %v685_v27, %v1788_v36 }
 0x70d   :  { %v812_v28 = vrot.slane %v1785_v33, %v1830_v13 }
 0x70e   :  { %v783_v46 = vsel %vm731_vm6, %v782_v39, %v778_v19 }
 0x70f   :  { %v664_v37 = vpop.xlane.xlu0 %663  ;;  %v788_v52 = vsel %vm738_vm7, %v787_v48, %v783_v46 }
 0x710   :  { %v900_v34 = vpop.xlane.xlu1 %899  ;;  %v737_v7 = vrot.slane %v664_v37, %v1796_v41 }
 0x711   :  { %v1015_v42 = vmul.f32 %v965_v56, %v900_v34 }
 0x713   :  { %1066 = vperm.xlu1 %1364, %v1015_v42   ;;  %v667_v40 = vpop.xlane.xlu0 %666 }
 0x714   :  { %v903_v47 = vpop.xlane.xlu1 %902  ;;  %v744_v12 = vrot.slane %v667_v40, %v1799_v45 }
 0x715   :  { %v1016_v49 = vmul.f32 %v1762_v58, %v903_v47  ;;  %v793_v58 = vsel %vm745_vm8, %v792_v54, %v788_v52 }
 0x716   :  { %v798_v9 = vsel %vm752_vm9, %v797_v0, %v793_v58 }
 0x717   :  { %1069 = vperm.xlu1 %1364, %v1016_v49   ;;  %v670_v53 = vpop.xlane.xlu0 %669  ;;  %v803_v10 = vsel %vm759_vm10, %v802_v11, %v798_v9 }
 0x718   :  { %v906_v56 = vpop.xlane.xlu1 %905  ;;  %v751_v15 = vrot.slane %v670_v53, %v1805_v51  ;;  %v808_v26 = vsel %vm766_vm11, %v807_v17, %v803_v10 }
 0x719   :  { %v1017_v57 = vmul.f32 %v1764_v61, %v906_v56  ;;  %v1013_v61 = vmul.f32 %v1768_v60, %v894_v14  ;;  %v813_v37 = vsel %vm773_vm12, %v812_v28, %v808_v26 }
 0x71b   :  { %1072 = vperm.xlu1 %1364, %v1017_v57   ;;  %v673_v2 = vpop.xlane.xlu0 %672 }
 0x71c   :  { %v909_v6 = vpop.xlane.xlu1 %908  ;;  %v758_v14 = vrot.slane %v673_v2, %v1811_v59 }
 0x71d   :  { %v1018_v8 = vmul.f32 %v1766_v62, %v909_v6  ;;  %v732_v62 = vsel %vm731_vm6, %v730_v43, %v725_v3 }
 0x71e   :  { %v739_v18 = vsel %vm738_vm7, %v737_v7, %v732_v62 }
 0x71f   :  { %1075 = vperm.xlu0 %1363, %v1018_v8   ;;  %1060 = vperm.xlu1 %1364, %v1013_v61   ;;  %v676_v60 = vpop.xlane.xlu0 %675  ;;  %v746_v23 = vsel %vm745_vm8, %v744_v12, %v739_v18 }
 0x720   :  { %v912_v16 = vpop.xlane.xlu1 %911  ;;  %v765_v20 = vrot.slane %v676_v60, %v1818_v4  ;;  %v753_v24 = vsel %vm752_vm9, %v751_v15, %v746_v23 }
 0x721   :  { %v1019_v22 = vmul.f32 %v1770_v63, %v912_v16  ;;  %v760_v29 = vsel %vm759_vm10, %v758_v14, %v753_v24 }
 0x722   :  { %v767_v63 = vsel %vm766_vm11, %v765_v20, %v760_v29 }
 0x723   :  { %1078 = vperm.xlu0 %1363, %v1019_v22   ;;  %v679_v25 = vpop.xlane.xlu0 %678 }
 0x724   :  { %v772_v30 = vrot.slane %v679_v25, %v1830_v13  ;;  %v915_v32 = vpop.xlane.xlu1 %914 }
 0x725   :  { %v1020_v27 = vmul.f32 %v1772_v21, %v915_v32 }
 0x726   :  { %v774_v35 = vsel %vm773_vm12, %v772_v30, %v767_v63 }
 0x727   :  { %1081 = vperm.xlu0 %1363, %v1020_v27   ;;  %v815_v38 = vsel %vm814_vm13, %v813_v37, %v774_v35 }
 0x728   :  { %v918_v19 = vpop.xlane.xlu1 %917  ;;  %v817_v42 = vsel %vm610_vm5, %v815_v38, 0.0 }
 0x729   :  { %v1021_v33 = vmul.f32 %v1774_v5, %v918_v19 }
 0x72b   :  { %1084 = vperm.xlu0 %1363, %v1021_v33  }
 0x735   :  { %v605_v39 = vpop.f32.mrb[10].mxu1 }
 0x736   :  { %v1327_v34 = vpop.f32.mrb[11].mxu1 }
 0x743   :  { %818 = vadd.xlane.f32.xlu1 %v817_v42 }
 0x765   :  { %v1040_v52 = vpop.permute.xlu0 %1039 }
 0x766   :  { %v1089_v1 = vrot.slane %v1040_v52, %v1791_v31 }
 0x772   :  { %v1043_v44 = vpop.permute.xlu1 %1042 }
 0x773   :  { %v1093_v5 = vrot.slane %v1043_v44, %v1788_v36 }
 0x776   :  { %v1046_v40 = vpop.permute.xlu1 %1045 }
 0x777   :  { %v1098_v58 = vrot.slane %v1046_v40, %v1796_v41 }
 0x77a   :  { %v1049_v46 = vpop.permute.xlu1 %1048 }
 0x77b   :  { %v1103_v2 = vrot.slane %v1049_v46, %v1799_v45 }
 0x77e   :  { %v1052_v21 = vpop.permute.xlu1 %1051 }
 0x77f   :  { %v1108_v61 = vrot.slane %v1052_v21, %v1805_v51 }
 0x782   :  { %v1055_v47 = vpop.permute.xlu1 %1054 }
 0x783   :  { %v1113_v43 = vrot.slane %v1055_v47, %v1811_v59 }
 0x786   :  { %v1058_v48 = vpop.permute.xlu1 %1057 }
 0x78a   :  { %v1064_v49 = vpop.permute.xlu1 %1063 }
 0x78b   :  { %v1128_v3 = vrot.slane %v1064_v49, %v1791_v31  ;;  %v1118_v31 = vrot.slane %v1058_v48, %v1818_v4 }
 0x792   :  { %v1067_v50 = vpop.permute.xlu1 %1066 }
 0x793   :  { %v1132_v57 = vrot.slane %v1067_v50, %v1788_v36  ;;  %v1094_v36 = vsel %vm731_vm6, %v1093_v5, %v1089_v1 }
 0x794   :  { %v1099_v12 = vsel %vm738_vm7, %v1098_v58, %v1094_v36 }
 0x795   :  { %v1104_v60 = vsel %vm745_vm8, %v1103_v2, %v1099_v12 }
 0x796   :  { %v1070_v53 = vpop.permute.xlu1 %1069  ;;  %v1109_v14 = vsel %vm752_vm9, %v1108_v61, %v1104_v60 }
 0x797   :  { %v1137_v0 = vrot.slane %v1070_v53, %v1796_v41  ;;  %v1133_v41 = vsel %vm731_vm6, %v1132_v57, %v1128_v3 }
 0x79a   :  { %v1073_v55 = vpop.permute.xlu1 %1072 }
 0x79b   :  { %v1142_v6 = vrot.slane %v1073_v55, %v1799_v45  ;;  %v1138_v45 = vsel %vm738_vm7, %v1137_v0, %v1133_v41 }
 0x79e   :  { %v1076_v54 = vpop.permute.xlu0 %1075  ;;  %v1061_v7 = vpop.permute.xlu1 %1060 }
 0x79f   :  { %v1147_v8 = vrot.slane %v1076_v54, %v1805_v51  ;;  %v1143_v51 = vsel %vm745_vm8, %v1142_v6, %v1138_v45  ;;  %v1123_v62 = vrot.slane %v1061_v7, %v1830_v13 }
 0x7a1   :  { %v1148_v16 = vsel %vm752_vm9, %v1147_v8, %v1143_v51 }
 0x7a2   :  { %v1079_v56 = vpop.permute.xlu0 %1078 }
 0x7a3   :  { %v1152_v11 = vrot.slane %v1079_v56, %v1811_v59  ;;  %v1114_v59 = vsel %vm759_vm10, %v1113_v43, %v1109_v14 }
 0x7a4   :  { %v1119_v20 = vsel %vm766_vm11, %v1118_v31, %v1114_v59 }
 0x7a5   :  { %v1153_v17 = vsel %vm759_vm10, %v1152_v11, %v1148_v16  ;;  %v1124_v22 = vsel %vm773_vm12, %v1123_v62, %v1119_v20 }
 0x7a6   :  { %v1082_v9 = vpop.permute.xlu0 %1081 }
 0x7a7   :  { %v1157_v15 = vrot.slane %v1082_v9, %v1818_v4 }
 0x7a9   :  { %v1158_v4 = vsel %vm766_vm11, %v1157_v15, %v1153_v17 }
 0x7aa   :  { %v1085_v10 = vpop.permute.xlu0 %1084 }
 0x7ab   :  { %v1162_v18 = vrot.slane %v1085_v10, %v1830_v13 }
 0x7ad   :  { %v1163_v23 = vsel %vm773_vm12, %v1162_v18, %v1158_v4 }
 0x7ae   :  { %v1164_v24 = vsel %vm814_vm13, %v1163_v23, %v1124_v22 }
 0x7af   :  { %v1166_v25 = vsel %vm610_vm5, %v1164_v24, 0.0 }
 0x7b0   :  { %1167 = vadd.xlane.f32.xlu0 %v1166_v25 }
 0x7d0   :  { %v819_v26 = vpop.xlane.xlu1 %818 }
 0x7d1   :  { %v1169_v28 = vadd.f32 1e-24, %v819_v26 }
 0x7d3   :  { %1391 = vrsqrt.f32 %v1169_v28 }
 0x7dd   :  { %v1392_v29 = vpop.eup %1391 }
 0x83d   :  { %v1168_v30 = vpop.xlane.xlu0 %1167 }
 0x83e   :  { %v1171_v32 = vmul.f32 %v1392_v29, %v1168_v30 }
 0x840   :  { %v1172_v13 = vmul.f32 %v1171_v32, %v605_v39 }
 0x842   :  { %1174 = vst.msk [vmem:[%s1902_s12] sm:$0x3] %vm1173_vm14, %v1172_v13 }

</bundles_post_ra>
